<compile_context>
chip_gen: v5e
topology: v5e:2x2
jax: 0.10.0
libtpu: 0.0.40
codegen_flags: <defaults>
</compile_context>

<pallas_src>
import functools

import jax
import jax.numpy as jnp
from jax.experimental import pallas as pl
from jax.experimental.pallas import tpu as pltpu


def _round_up(v, m):
    return (v + m - 1) // m * m


def _pick_tile(total, requested, step=128):
    """Largest multiple of `step` <= requested that divides `total` (total is a multiple of step)."""
    t = min(_round_up(requested, step), total)
    while total % t:
        t -= step
    return t


def _vmem_physical_bytes():
    """Physical VMEM per TensorCore; falls back to the smallest known generation (v7x, 64 MiB)."""
    try:
        info = pltpu.get_tpu_info()
        for attr in ("vmem_capacity_bytes", "vmem_size_bytes", "vmem_bytes"):
            v = getattr(info, attr, None)
            if v:
                return int(v)
    except Exception:
        pass
    return 64 << 20


# --------------------------------------------------------------------------- kernel bodies

def _lora_kernel_resident(x_ref, wbT_ref, bias_ref, aT_ref, bT_ref, o_ref):
    """1-D grid over M; full weight set is VMEM-resident (DMA'd from HBM once)."""
    x = x_ref[...].astype(wbT_ref.dtype)            # in-kernel cast: no extra HBM pass over x
    base = jnp.dot(x, wbT_ref[...], preferred_element_type=jnp.float32)
    a = jnp.dot(x, aT_ref[...], preferred_element_type=jnp.float32)
    lora = jnp.dot(a.astype(bT_ref.dtype), bT_ref[...], preferred_element_type=jnp.float32)
    o_ref[...] = (base + bias_ref[...] + lora).astype(o_ref.dtype)


def _lora_kernel_ntiled(x_ref, wbT_ref, bias_ref, aT_ref, bT_ref, o_ref, a_scr):
    """2-D grid (M x N); LoRA activation computed once per M tile, reused across N stripes.
    Correct only because the N axis is 'arbitrary' (sequential per core, j==0 first)."""
    x = x_ref[...].astype(wbT_ref.dtype)

    @pl.when(pl.program_id(1) == 0)
    def _():
        a_scr[...] = jnp.dot(
            x, aT_ref[...], preferred_element_type=jnp.float32).astype(a_scr.dtype)

    base = jnp.dot(x, wbT_ref[...], preferred_element_type=jnp.float32)
    lora = jnp.dot(a_scr[...], bT_ref[...], preferred_element_type=jnp.float32)
    o_ref[...] = (base + bias_ref[...] + lora).astype(o_ref.dtype)


def _base_kernel(x_ref, wbT_ref, bias_ref, o_ref):
    """Base-linear-only path (used by the merged-weight fast path)."""
    x = x_ref[...].astype(wbT_ref.dtype)
    o_ref[...] = (jnp.dot(x, wbT_ref[...], preferred_element_type=jnp.float32)
                  + bias_ref[...]).astype(o_ref.dtype)


# --------------------------------------------------------------------------- weight prep

def prepare_lora_weights(w_base, b_base, lora_A, lora_B, *, lora_alpha, r,
                         compute_dtype=jnp.bfloat16):
    """One-time weight prep (hoisted out of the per-call forward path): transpose, fold the
    LoRA scaling into B, cast to the MXU compute dtype, pad out_features to a lane (128)
    multiple and the rank only to the bf16 sublane granule (16)."""
    out_features, in_features = w_base.shape
    scaling = float(lora_alpha) / float(r)
    r_pad = _round_up(r, 16)
    n_pad = _round_up(out_features, 128)

    wbT = jnp.zeros((in_features, n_pad), compute_dtype)
    wbT = wbT.at[:, :out_features].set(jnp.transpose(w_base).astype(compute_dtype))

    bias2d = jnp.zeros((1, n_pad), jnp.float32)
    bias2d = bias2d.at[:, :out_features].set(b_base.astype(jnp.float32)[None, :])

    aT = jnp.zeros((in_features, r_pad), compute_dtype)
    aT = aT.at[:, :r].set(jnp.transpose(lora_A).astype(compute_dtype))

    bT = jnp.zeros((r_pad, n_pad), compute_dtype)
    bT = bT.at[:r, :out_features].set(
        (jnp.transpose(lora_B).astype(jnp.float32) * scaling).astype(compute_dtype))

    return wbT, bias2d, aT, bT


def prepare_merged_weights(w_base, b_base, lora_A, lora_B, *, lora_alpha, r,
                           compute_dtype=jnp.bfloat16):
    """Merged-weight fast path for static adapters: Wb + scaling * (B @ A) folded once.
    Use with distributed_lora_forward(..., aT=None, bT=None)."""
    out_features, in_features = w_base.shape
    scaling = float(lora_alpha) / float(r)
    n_pad = _round_up(out_features, 128)

    w_merged = (w_base.astype(jnp.float32)
                + scaling * (lora_B.astype(jnp.float32) @ lora_A.astype(jnp.float32)))
    wbT = jnp.zeros((in_features, n_pad), compute_dtype)
    wbT = wbT.at[:, :out_features].set(jnp.transpose(w_merged).astype(compute_dtype))

    bias2d = jnp.zeros((1, n_pad), jnp.float32)
    bias2d = bias2d.at[:, :out_features].set(b_base.astype(jnp.float32)[None, :])
    return wbT, bias2d


# --------------------------------------------------------------------------- tile selection

def _select_tiles(M, K, N_pad, r_pad, xsz, osz, csz, tile_m, tile_n, vmem_cap, with_lora):
    """Pick (tm, tn, weights_resident, estimated_vmem_bytes)."""
    lr = 1 if with_lora else 0
    resident_weights = (K * N_pad + lr * (r_pad * N_pad + K * r_pad)) * csz + N_pad * 4
    weights_resident = (resident_weights <= vmem_cap // 3
                        and (tile_n is None or tile_n >= N_pad))
    if weights_resident:
        tn = N_pad
        fixed = resident_weights                      # single-buffered, grid-invariant
    else:
        tn = _pick_tile(N_pad, tile_n if tile_n is not None else 512)
        fixed = (2 * K * tn + lr * (2 * r_pad * tn + K * r_pad)) * csz + 2 * tn * 4

    def est(tm):
        per = (2 * tm * K * xsz              # x tile, double-buffered, input dtype
               + 2 * tm * tn * osz           # output tile, double-buffered
               + 2 * tm * tn * 4             # f32 matmul / sum intermediates
               + tm * K * csz                # in-kernel bf16 copy of the x tile
               + lr * tm * r_pad * (csz + 4))  # a_scr + f32 'a' temporary
        return fixed + per

    want = tile_m if tile_m is not None else 1024     # prefer big M tiles (weight-stream intensity)
    want = max(128, min(_round_up(want, 128), _round_up(M, 128)))
    tm = want
    while tm > 128 and est(tm) + (2 << 20) > vmem_cap:
        tm -= 128

    if tile_m is None:
        # Megacore / v7x 2-TC: make sure the (only) parallel axis has >= 2 tiles when M allows.
        m_ceil = _round_up(M, 128)
        if pl.cdiv(M, tm) < 2 and m_ceil >= 256:
            tm = min(tm, max(128, (m_ceil // 2) // 128 * 128))

    return tm, tn, weights_resident, est(tm)


# --------------------------------------------------------------------------- forward

@functools.partial(jax.jit, static_argnames=("out_features", "tile_m", "tile_n",
                                             "out_dtype", "single_buffer_weights"))
def distributed_lora_forward(x, wbT, bias2d, aT=None, bT=None, *, out_features,
                             tile_m=None, tile_n=None, out_dtype=None,
                             single_buffer_weights=True):
    """x: (B, S, in_features). wbT/bias2d/aT/bT: outputs of prepare_lora_weights() (or
    prepare_merged_weights() with aT=bT=None). out_dtype=jnp.bfloat16 halves output writeback."""
    B, S, K = x.shape
    assert wbT.shape[0] == K
    N_pad = wbT.shape[1]
    with_lora = (aT is not None) and (bT is not None)
    r_pad = aT.shape[1] if with_lora else 0
    cdt = wbT.dtype                                   # MXU compute dtype (bf16)
    odt = jnp.dtype(out_dtype) if out_dtype is not None else jnp.dtype(x.dtype)
    xsz = jnp.dtype(x.dtype).itemsize
    osz = odt.itemsize
    csz = jnp.dtype(cdt).itemsize

    M = B * S
    x2d = x.reshape(M, K)     # no cast/pad here; cast happens in-kernel, ragged M is masked

    phys = _vmem_physical_bytes()
    vmem_cap = (phys * 13) // 16      # ~52 MiB on v7x, ~104 MiB on v5e/v6e (compiler headroom)

    tm, tn, resident, est = _select_tiles(M, K, N_pad, r_pad, xsz, osz, csz,
                                          tile_m, tile_n, vmem_cap, with_lora)
    grid0 = pl.cdiv(M, tm)
    grid1 = N_pad // tn
    vmem_limit = int(min(max(est + (4 << 20), 32 << 20), vmem_cap))

    def _inv(shape, index_map):
        # Grid-invariant operand: single-buffer it (no point double-buffering a constant block).
        if single_buffer_weights:
            return pl.BlockSpec(shape, index_map, pipeline_mode=pl.Buffered(1))
        return pl.BlockSpec(shape, index_map)

    # Advisory cost hint for the XLA scheduler around the custom call.
    flops = 2 * M * K * N_pad + 2 * M * r_pad * (K + N_pad)
    if resident:
        weight_stream = (K * N_pad + r_pad * N_pad + K * r_pad) * csz + N_pad * 4
    else:
        weight_stream = grid0 * ((K + r_pad) * N_pad * csz + N_pad * 4) + K * r_pad * csz
    cost = pl.CostEstimate(flops=int(flops), transcendentals=0,
                           bytes_accessed=int(M * K * xsz + weight_stream + M * N_pad * osz))

    if with_lora and resident:
        kernel = _lora_kernel_resident
        grid = (grid0,)
        in_specs = [pl.BlockSpec((tm, K), lambda i: (i, 0)),
                    _inv((K, N_pad), lambda i: (0, 0)),
                    _inv((1, N_pad), lambda i: (0, 0)),
                    _inv((K, r_pad), lambda i: (0, 0)),
                    _inv((r_pad, N_pad), lambda i: (0, 0))]
        out_specs = pl.BlockSpec((tm, N_pad), lambda i: (i, 0))
        scratch = ()
        dims = ("parallel",)
        operands = (x2d, wbT, bias2d, aT, bT)
    elif with_lora:
        kernel = _lora_kernel_ntiled
        grid = (grid0, grid1)
        in_specs = [pl.BlockSpec((tm, K), lambda i, j: (i, 0)),
                    pl.BlockSpec((K, tn), lambda i, j: (0, j)),
                    pl.BlockSpec((1, tn), lambda i, j: (0, j)),
                    _inv((K, r_pad), lambda i, j: (0, 0)),
                    pl.BlockSpec((r_pad, tn), lambda i, j: (0, j))]
        out_specs = pl.BlockSpec((tm, tn), lambda i, j: (i, j))
        scratch = (pltpu.VMEM((tm, r_pad), cdt),)
        dims = ("parallel", "arbitrary")   # N must stay sequential for the a_scr reuse
        operands = (x2d, wbT, bias2d, aT, bT)
    elif resident:
        kernel = _base_kernel
        grid = (grid0,)
        in_specs = [pl.BlockSpec((tm, K), lambda i: (i, 0)),
                    _inv((K, N_pad), lambda i: (0, 0)),
                    _inv((1, N_pad), lambda i: (0, 0))]
        out_specs = pl.BlockSpec((tm, N_pad), lambda i: (i, 0))
        scratch = ()
        dims = ("parallel",)
        operands = (x2d, wbT, bias2d)
    else:
        kernel = _base_kernel
        grid = (grid0, grid1)
        in_specs = [pl.BlockSpec((tm, K), lambda i, j: (i, 0)),
                    pl.BlockSpec((K, tn), lambda i, j: (0, j)),
                    pl.BlockSpec((1, tn), lambda i, j: (0, j))]
        out_specs = pl.BlockSpec((tm, tn), lambda i, j: (i, j))
        scratch = ()
        dims = ("parallel", "parallel")    # no cross-tile state: both axes can shard
        operands = (x2d, wbT, bias2d)

    out2d = pl.pallas_call(
        kernel,
        out_shape=jax.ShapeDtypeStruct((M, N_pad), odt),
        grid_spec=pltpu.PrefetchScalarGridSpec(
            num_scalar_prefetch=0, grid=grid, in_specs=in_specs,
            out_specs=out_specs, scratch_shapes=scratch),
        compiler_params=pltpu.CompilerParams(
            dimension_semantics=dims, vmem_limit_bytes=vmem_limit),
        cost_estimate=cost,
    )(*operands)

    return out2d[:, :out_features].reshape(B, S, out_features)


# --------------------------------------------------------------------------- demo / self-test

if __name__ == "__main__":
    # M = batch*seq = 500 exercises the ragged (masked) last M block and the megacore tm split;
    # out_features=512 keeps the full weight set VMEM-resident on the default path.
    batch, seq = 2, 250
    in_features, out_features = 256, 512
    r, lora_alpha = 16, 32            # scaling = 2.0
    dtype = jnp.float32

    key = jax.random.PRNGKey(0)
    k_x, k_wb, k_bb, k_a, k_b = jax.random.split(key, 5)

    x = jax.random.normal(k_x, (batch, seq, in_features), dtype=dtype)

    # Deterministic parameter init (shapes match the PyTorch module).
    # NOTE: PyTorch zero-inits lora_B; small nonzero values are used so the LoRA path is
    # actually exercised/verified.
    w_base = jax.random.normal(k_wb, (out_features, in_features), dtype=dtype) * 0.05
    b_base = jax.random.normal(k_bb, (out_features,), dtype=dtype) * 0.05
    lora_A = jax.random.uniform(k_a, (r, in_features), dtype=dtype,
                                minval=-0.1, maxval=0.1)   # kaiming-uniform-like
    lora_B = jax.random.normal(k_b, (out_features, r), dtype=dtype) * 0.02

    wbT, bias2d, aT, bT = prepare_lora_weights(
        w_base, b_base, lora_A, lora_B, lora_alpha=lora_alpha, r=r)

    # 1) Auto tiling (weights-resident, 1-D grid). If this JAX build rejects single-buffered
    #    (pl.Buffered(1)) BlockSpecs, fall back to default double-buffered weight specs.
    sb = True
    try:
        out = distributed_lora_forward(x, wbT, bias2d, aT, bT,
                                       out_features=out_features, single_buffer_weights=sb)
        out = jax.block_until_ready(out)
    except Exception:
        sb = False
        out = distributed_lora_forward(x, wbT, bias2d, aT, bT,
                                       out_features=out_features, single_buffer_weights=sb)
        out = jax.block_until_ready(out)

    # Pure-JAX reference mirroring the kernel's bf16 operand quantization (f32 accumulation).
    scaling = lora_alpha / r
    xq = x.astype(jnp.bfloat16).astype(jnp.float32)
    wq = w_base.astype(jnp.bfloat16).astype(jnp.float32)
    aq = lora_A.astype(jnp.bfloat16).astype(jnp.float32)
    bq = lora_B.astype(jnp.bfloat16).astype(jnp.float32)
    base_ref = jnp.einsum("bsi,oi->bso", xq, wq, precision="highest") + b_base
    a_ref = jnp.einsum("bsi,ri->bsr", xq, aq, precision="highest")
    a_ref = a_ref.astype(jnp.bfloat16).astype(jnp.float32)
    lora_ref = jnp.einsum("bsr,or->bso", a_ref, bq, precision="highest")
    ref = base_ref + scaling * lora_ref

    assert out.shape == (batch, seq, out_features)
    assert out.dtype == dtype
    assert jnp.allclose(out, ref, atol=2e-2, rtol=2e-2), "mismatch (weights-resident path)"

    # 2) Forced N-tiled path (exercises the a_scr reuse across N stripes, j > 0).
    out2 = distributed_lora_forward(x, wbT, bias2d, aT, bT, out_features=out_features,
                                    tile_m=256, tile_n=256, single_buffer_weights=sb)
    out2 = jax.block_until_ready(out2)
    assert jnp.allclose(out2, ref, atol=2e-2, rtol=2e-2), "mismatch (N-tiled path)"

    # 3) Merged-weight fast path (static adapter folded into the base weight once).
    wbT_m, bias_m = prepare_merged_weights(w_base, b_base, lora_A, lora_B,
                                           lora_alpha=lora_alpha, r=r)
    out3 = distributed_lora_forward(x, wbT_m, bias_m, out_features=out_features,
                                    single_buffer_weights=sb)
    out3 = jax.block_until_ready(out3)
    w_merged = w_base + scaling * (lora_B @ lora_A)
    wmq = w_merged.astype(jnp.bfloat16).astype(jnp.float32)
    ref_m = jnp.einsum("bsi,oi->bso", xq, wmq, precision="highest") + b_base
    assert jnp.allclose(out3, ref_m, atol=2e-2, rtol=2e-2), "mismatch (merged path)"

    print("KERNEL_OK")
</pallas_src>

<mosaic_0001>
module attributes {stable_mosaic.version = 11 : i64} {
  func.func @_lora_kernel_resident(%arg0: i32, %arg1: memref<256x256xf32, #tpu.memory_space<vmem>>, %arg2: memref<256x512xbf16, #tpu.memory_space<vmem>>, %arg3: memref<1x512xf32, #tpu.memory_space<vmem>>, %arg4: memref<256x16xbf16, #tpu.memory_space<vmem>>, %arg5: memref<16x512xbf16, #tpu.memory_space<vmem>>, %arg6: memref<256x512xf32, #tpu.memory_space<vmem>>) attributes {dimension_semantics = [#tpu.dimension_semantics<parallel>], iteration_bounds = array<i64: 2>, scalar_prefetch = 0 : i64, scratch_operands = 0 : i64, tpu.core_type = #tpu.core_type<tc>, window_params = [{transform_indices = @transform_0, window_bounds = array<i64: 256, 256>}, {pipeline_mode = #tpu.pipeline_mode<synchronous>, transform_indices = @transform_1, window_bounds = array<i64: 256, 512>}, {pipeline_mode = #tpu.pipeline_mode<synchronous>, transform_indices = @transform_2, window_bounds = array<i64: 1, 512>}, {pipeline_mode = #tpu.pipeline_mode<synchronous>, transform_indices = @transform_3, window_bounds = array<i64: 256, 16>}, {pipeline_mode = #tpu.pipeline_mode<synchronous>, transform_indices = @transform_4, window_bounds = array<i64: 16, 512>}, {transform_indices = @transform_5, window_bounds = array<i64: 256, 512>}]} {
    %c0 = arith.constant 0 : index
    %c0_0 = arith.constant 0 : index
    %0 = vector.load %arg1[%c0, %c0_0] : memref<256x256xf32, #tpu.memory_space<vmem>>, vector<256x256xf32>
    %1 = arith.truncf %0 : vector<256x256xf32> to vector<256x256xbf16>
    %c0_1 = arith.constant 0 : index
    %c0_2 = arith.constant 0 : index
    %2 = vector.load %arg2[%c0_1, %c0_2] : memref<256x512xbf16, #tpu.memory_space<vmem>>, vector<256x512xbf16>
    %cst = arith.constant dense<0.000000e+00> : vector<256x512xf32>
    %3 = tpu.matmul %1, %2, %cst {dimension_numbers = #tpu.dot_dimension_numbers<[1], [0], [0], [1], [0, 0, 1, 1], [], []>} : vector<256x256xbf16>, vector<256x512xbf16>, vector<256x512xf32> -> vector<256x512xf32>
    %c0_3 = arith.constant 0 : index
    %c0_4 = arith.constant 0 : index
    %4 = vector.load %arg4[%c0_3, %c0_4] : memref<256x16xbf16, #tpu.memory_space<vmem>>, vector<256x16xbf16>
    %cst_5 = arith.constant dense<0.000000e+00> : vector<256x16xf32>
    %5 = tpu.matmul %1, %4, %cst_5 {dimension_numbers = #tpu.dot_dimension_numbers<[1], [0], [0], [1], [0, 0, 1, 1], [], []>} : vector<256x256xbf16>, vector<256x16xbf16>, vector<256x16xf32> -> vector<256x16xf32>
    %6 = arith.truncf %5 : vector<256x16xf32> to vector<256x16xbf16>
    %c0_6 = arith.constant 0 : index
    %c0_7 = arith.constant 0 : index
    %7 = vector.load %arg5[%c0_6, %c0_7] : memref<16x512xbf16, #tpu.memory_space<vmem>>, vector<16x512xbf16>
    %cst_8 = arith.constant dense<0.000000e+00> : vector<256x512xf32>
    %8 = tpu.matmul %6, %7, %cst_8 {dimension_numbers = #tpu.dot_dimension_numbers<[1], [0], [0], [1], [0, 0, 1, 1], [], []>} : vector<256x16xbf16>, vector<16x512xbf16>, vector<256x512xf32> -> vector<256x512xf32>
    %c0_9 = arith.constant 0 : index
    %c0_10 = arith.constant 0 : index
    %9 = vector.load %arg3[%c0_9, %c0_10] : memref<1x512xf32, #tpu.memory_space<vmem>>, vector<1x512xf32>
    %10 = vector.broadcast %9 : vector<1x512xf32> to vector<256x512xf32>
    %11 = arith.addf %3, %10 : vector<256x512xf32>
    %12 = arith.addf %11, %8 : vector<256x512xf32>
    %c0_11 = arith.constant 0 : index
    %c0_12 = arith.constant 0 : index
    %13 = vector.load %arg6[%c0_11, %c0_12] : memref<256x512xf32, #tpu.memory_space<vmem>>, vector<256x512xf32>
    tpu.vector_store %arg6[%c0_11, %c0_12], %12 {strides = array<i32>} : memref<256x512xf32, #tpu.memory_space<vmem>>, vector<256x512xf32>,
    return
  }
  func.func @transform_0(%arg0: i32) -> (i32, i32) {
    %c0_i32 = arith.constant 0 : i32
    %c0_i32_0 = arith.constant 0 : i32
    return %arg0, %c0_i32 : i32, i32
  }
  func.func @transform_1(%arg0: i32) -> (i32, i32) {
    %c0_i32 = arith.constant 0 : i32
    %c0_i32_0 = arith.constant 0 : i32
    %c0_i32_1 = arith.constant 0 : i32
    return %c0_i32, %c0_i32_0 : i32, i32
  }
  func.func @transform_2(%arg0: i32) -> (i32, i32) {
    %c0_i32 = arith.constant 0 : i32
    %c0_i32_0 = arith.constant 0 : i32
    %c0_i32_1 = arith.constant 0 : i32
    return %c0_i32, %c0_i32_0 : i32, i32
  }
  func.func @transform_3(%arg0: i32) -> (i32, i32) {
    %c0_i32 = arith.constant 0 : i32
    %c0_i32_0 = arith.constant 0 : i32
    %c0_i32_1 = arith.constant 0 : i32
    return %c0_i32, %c0_i32_0 : i32, i32
  }
  func.func @transform_4(%arg0: i32) -> (i32, i32) {
    %c0_i32 = arith.constant 0 : i32
    %c0_i32_0 = arith.constant 0 : i32
    %c0_i32_1 = arith.constant 0 : i32
    return %c0_i32, %c0_i32_0 : i32, i32
  }
  func.func @transform_5(%arg0: i32) -> (i32, i32) {
    %c0_i32 = arith.constant 0 : i32
    %c0_i32_0 = arith.constant 0 : i32
    return %arg0, %c0_i32 : i32, i32
  }
}

module attributes {stable_mosaic.version = 11 : i64} {
  func.func @_lora_kernel_resident(%arg0: i32, %arg1: memref<256x256xf32, #tpu.memory_space<vmem>>, %arg2: memref<256x512xbf16, #tpu.memory_space<vmem>>, %arg3: memref<1x512xf32, #tpu.memory_space<vmem>>, %arg4: memref<256x16xbf16, #tpu.memory_space<vmem>>, %arg5: memref<16x512xbf16, #tpu.memory_space<vmem>>, %arg6: memref<256x512xf32, #tpu.memory_space<vmem>>) attributes {dimension_semantics = [#tpu.dimension_semantics<parallel>], iteration_bounds = array<i64: 2>, scalar_prefetch = 0 : i64, scratch_operands = 0 : i64, tpu.core_type = #tpu.core_type<tc>, window_params = [{transform_indices = @transform_0, window_bounds = array<i64: 256, 256>}, {pipeline_mode = #tpu.pipeline_mode<synchronous>, transform_indices = @transform_1, window_bounds = array<i64: 256, 512>}, {pipeline_mode = #tpu.pipeline_mode<synchronous>, transform_indices = @transform_2, window_bounds = array<i64: 1, 512>}, {pipeline_mode = #tpu.pipeline_mode<synchronous>, transform_indices = @transform_3, window_bounds = array<i64: 256, 16>}, {pipeline_mode = #tpu.pipeline_mode<synchronous>, transform_indices = @transform_4, window_bounds = array<i64: 16, 512>}, {transform_indices = @transform_5, window_bounds = array<i64: 256, 512>}]} {
    %c0 = arith.constant 0 : index
    %c0_0 = arith.constant 0 : index
    %0 = vector.load %arg1[%c0, %c0_0] : memref<256x256xf32, #tpu.memory_space<vmem>>, vector<256x256xf32>
    %1 = arith.truncf %0 : vector<256x256xf32> to vector<256x256xbf16>
    %c0_1 = arith.constant 0 : index
    %c0_2 = arith.constant 0 : index
    %2 = vector.load %arg2[%c0_1, %c0_2] : memref<256x512xbf16, #tpu.memory_space<vmem>>, vector<256x512xbf16>
    %cst = arith.constant dense<0.000000e+00> : vector<256x512xf32>
    %3 = tpu.matmul %1, %2, %cst {dimension_numbers = #tpu.dot_dimension_numbers<[1], [0], [0], [1], [0, 0, 1, 1], [], []>} : vector<256x256xbf16>, vector<256x512xbf16>, vector<256x512xf32> -> vector<256x512xf32>
    %c0_3 = arith.constant 0 : index
    %c0_4 = arith.constant 0 : index
    %4 = vector.load %arg4[%c0_3, %c0_4] : memref<256x16xbf16, #tpu.memory_space<vmem>>, vector<256x16xbf16>
    %cst_5 = arith.constant dense<0.000000e+00> : vector<256x16xf32>
    %5 = tpu.matmul %1, %4, %cst_5 {dimension_numbers = #tpu.dot_dimension_numbers<[1], [0], [0], [1], [0, 0, 1, 1], [], []>} : vector<256x256xbf16>, vector<256x16xbf16>, vector<256x16xf32> -> vector<256x16xf32>
    %6 = arith.truncf %5 : vector<256x16xf32> to vector<256x16xbf16>
    %c0_6 = arith.constant 0 : index
    %c0_7 = arith.constant 0 : index
    %7 = vector.load %arg5[%c0_6, %c0_7] : memref<16x512xbf16, #tpu.memory_space<vmem>>, vector<16x512xbf16>
    %cst_8 = arith.constant dense<0.000000e+00> : vector<256x512xf32>
    %8 = tpu.matmul %6, %7, %cst_8 {dimension_numbers = #tpu.dot_dimension_numbers<[1], [0], [0], [1], [0, 0, 1, 1], [], []>} : vector<256x16xbf16>, vector<16x512xbf16>, vector<256x512xf32> -> vector<256x512xf32>
    %c0_9 = arith.constant 0 : index
    %c0_10 = arith.constant 0 : index
    %9 = vector.load %arg3[%c0_9, %c0_10] : memref<1x512xf32, #tpu.memory_space<vmem>>, vector<1x512xf32>
    %10 = vector.broadcast %9 : vector<1x512xf32> to vector<256x512xf32>
    %11 = arith.addf %3, %10 : vector<256x512xf32>
    %12 = arith.addf %11, %8 : vector<256x512xf32>
    %c0_11 = arith.constant 0 : index
    %c0_12 = arith.constant 0 : index
    %13 = vector.load %arg6[%c0_11, %c0_12] : memref<256x512xf32, #tpu.memory_space<vmem>>, vector<256x512xf32>
    tpu.vector_store %arg6[%c0_11, %c0_12], %12 {strides = array<i32>} : memref<256x512xf32, #tpu.memory_space<vmem>>, vector<256x512xf32>,
    return
  }
  func.func @transform_0(%arg0: i32) -> (i32, i32) {
    %c0_i32 = arith.constant 0 : i32
    %c0_i32_0 = arith.constant 0 : i32
    return %arg0, %c0_i32 : i32, i32
  }
  func.func @transform_1(%arg0: i32) -> (i32, i32) {
    %c0_i32 = arith.constant 0 : i32
    %c0_i32_0 = arith.constant 0 : i32
    %c0_i32_1 = arith.constant 0 : i32
    return %c0_i32, %c0_i32_0 : i32, i32
  }
  func.func @transform_2(%arg0: i32) -> (i32, i32) {
    %c0_i32 = arith.constant 0 : i32
    %c0_i32_0 = arith.constant 0 : i32
    %c0_i32_1 = arith.constant 0 : i32
    return %c0_i32, %c0_i32_0 : i32, i32
  }
  func.func @transform_3(%arg0: i32) -> (i32, i32) {
    %c0_i32 = arith.constant 0 : i32
    %c0_i32_0 = arith.constant 0 : i32
    %c0_i32_1 = arith.constant 0 : i32
    return %c0_i32, %c0_i32_0 : i32, i32
  }
  func.func @transform_4(%arg0: i32) -> (i32, i32) {
    %c0_i32 = arith.constant 0 : i32
    %c0_i32_0 = arith.constant 0 : i32
    %c0_i32_1 = arith.constant 0 : i32
    return %c0_i32, %c0_i32_0 : i32, i32
  }
  func.func @transform_5(%arg0: i32) -> (i32, i32) {
    %c0_i32 = arith.constant 0 : i32
    %c0_i32_0 = arith.constant 0 : i32
    return %arg0, %c0_i32 : i32, i32
  }
}

</mosaic_0001>

<bundles_post_ra>
// kernel: distributed_lora_forward.1
= control target key start
LH: loop header
LB: loop body
LE: loop exit
PB: predicated region body
PF: predicated region fallthrough
CT: control target
= control target key end

     0   :  { %s3415_s18 = smov 0   ;;  %s3417_s19 = smov 0   ;;  %s5180_s0 = inlined_call_operand.vmem [shape: f32[500,256], index: 0, kind: input, shape index: {}]   ;;  %s5181_s1 = inlined_call_operand.vmem [shape: bf16[256,512], index: 1, kind: input, shape index: {}]   ;;  %s5182_s2 = inlined_call_operand.vmem [shape: f32[1,512], index: 2, kind: input, shape index: {}]   ;;  %s5183_s3 = inlined_call_operand.vmem [shape: bf16[256,16], index: 3, kind: input, shape index: {}]   ;;  %s5184_s4 = inlined_call_operand.vmem [shape: bf16[16,512], index: 4, kind: input, shape index: {}]   ;;  %s5185_s5 = inlined_call_operand.vmem [shape: f32[500,512], index: 5, kind: output, shape index: {}]  }
   0x1   :  { %s3419_s20 = smov 0  }
   0x2 LB: > { %s3428_s21 = sadd.s32 4294967295, %s3351_s20   ;;  %s3430_s22 = sadd.s32 1, %s3351_s20   ;;  %s3351_s20 = sphi %s3419_s20, %s5415_s20   ;;  %s3347_s19 = sphi %s3417_s19, %s5414_s19   ;;  %s3343_s18 = sphi %s3415_s18, %s5413_s18  }
   0x3   : > { %s129_s23 = ssub.s32 %s3351_s20, %s3430_s22  ;;  %s132_s24 = sadd.s32 1, %s3347_s19 }
   0x4   : > { %p130_p0 = scmp.eq.s32.totalorder %s129_s23, 0  ;;  %p142_p1 = scmp.ne.s32.totalorder %s3347_s19, %s3343_s18 }
   0x5   : > { %p143_p2 = scmp.eq.s32.totalorder %s3428_s21, 1  ;;  %p2692_p3 = scmp.ge.s32.totalorder %s3351_s20, 1 }
   0x6   : > { %s3438_s25 = scalar_select %p130_p0, %s3347_s19, %s132_s24  }
   0x7   : > { %p3440_p4 = por %p143_p2, %p142_p1  ;;  %p199_p5 = scmp.lt.s32.totalorder %s3351_s20, 3 }
   0x9   : > { %p200_p6 = pnand %p2692_p3, %p199_p5 }
   0xb   : > { %203 = sbr.rel (%p200_p6) target bundleno = 1406 (0x57e), region = 40 }
  0x10   : > { %v3188_v0 = vld [vmem:[%s5183_s3 + $0x38] sm:$0xff]  ;;  %v3187_v2 = vld [vmem:[%s5183_s3 + $0x30] sm:$0xff]  ;;  %v3186_v4 = vld [vmem:[%s5183_s3 + $0x28] sm:$0xff]  ;;  %s3463_s14 = sshll.u32 %s3428_s21, 5  ;;  %vm762_vm0 = vcmask 130048   ;;  %s3203_s12 = sshll.u32 (%p3440_p4), %s3428_s21, 10 }
  0x11   : > { %v3196_v1 = vld [vmem:[%s5183_s3 + $0x78] sm:$0xff]  ;;  %544 = vmatpush.bf16.msra.mxu0 %v3188_v0  ;;  %v3195_v3 = vld [vmem:[%s5183_s3 + $0x70] sm:$0xff]  ;;  %v3194_v5 = vld [vmem:[%s5183_s3 + $0x68] sm:$0xff]  ;;  %p238_p7 = scmp.lt.s32.totalorder %s3463_s14, 62  ;;  %s2473_s11 = ssub.s32 (%p3440_p4), 63, %s3463_s14 }
  0x12   : > { %633 = vmatpush.bf16.msra.mxu1 %v3196_v1  ;;  %v3185_v6 = vld [vmem:[%s5183_s3 + $0x20] sm:$0xff]  ;;  %v3184_v8 = vld [vmem:[%s5183_s3 + $0x18] sm:$0xff]  ;;  %v3183_v10 = vld [vmem:[%s5183_s3 + $0x10] sm:$0xff]  ;;  %p2474_p8 = scmp.lt.s32.totalorder (%p3440_p4), %s2473_s11, 32  ;;  %s5027_s16 = scalar_lea.vmem (%p3440_p4), %s5185_s5, %s3203_s12  }
  0x13   : > { %v3193_v7 = vld [vmem:[%s5183_s3 + $0x60] sm:$0xff]  ;;  %v3192_v9 = vld [vmem:[%s5183_s3 + $0x58] sm:$0xff]  ;;  %s239_s29 = scalar_select %p238_p7, %s3463_s14, 62  ;;  %v3191_v11 = vld [vmem:[%s5183_s3 + $0x50] sm:$0xff] }
  0x14   : > { %v3182_v12 = vld [vmem:[%s5183_s3 + $0x8] sm:$0xff]  ;;  %v3181_v14 = vld [vmem:[%s5183_s3] sm:$0xff] }
  0x15   : > { %545 = vmatpush.bf16.msra.mxu0 %v3187_v2  ;;  %s3116_s9 = sshll.u32 %s239_s29, 4  ;;  %v3190_v13 = vld [vmem:[%s5183_s3 + $0x48] sm:$0xff]  ;;  %v3189_v15 = vld [vmem:[%s5183_s3 + $0x40] sm:$0xff] }
  0x16   : > { %634 = vmatpush.bf16.msra.mxu1 %v3195_v3  ;;  %s3494_s17 = scalar_lea.vmem %s5180_s0, %s3116_s9  ;;  %s229_s9 = sand.u32 1, %s3343_s18  }
  0x17   : > { %v256_v16 = vld [vmem:[%s3494_s17] sm:$0xff]  ;;  %v258_v17 = vld [vmem:[%s3494_s17 + $0x10] sm:$0xff]  ;;  %v257_v18 = vld [vmem:[%s3494_s17 + $0x8] sm:$0xff]  ;;  %s2693_s18 = sshll.u32 %s229_s9, 10 }
  0x18   : > { %v259_v19 = vld [vmem:[%s3494_s17 + $0x18] sm:$0xff]  ;;  %v3506_v20 = vpack.c.bf16 %v258_v17, %v256_v16  ;;  %v260_v22 = vld [vmem:[%s3494_s17 + $0x20] sm:$0xff]  ;;  %v262_v23 = vld [vmem:[%s3494_s17 + $0x30] sm:$0xff]  ;;  %s4111_s24 = scalar_lea.vmem [#allocation2], %s2693_s18  }
  0x19   : > { %546 = vmatpush.bf16.msra.mxu0 %v3186_v4  ;;  %v3508_v21 = vpack.c.bf16 %v259_v19, %v257_v18  ;;  %v261_v24 = vld [vmem:[%s3494_s17 + $0x28] sm:$0xff]  ;;  %v263_v25 = vld [vmem:[%s3494_s17 + $0x38] sm:$0xff]  ;;  %v3516_v26 = vpack.c.bf16 %v262_v23, %v260_v22  ;;  %v264_v28 = vld [vmem:[%s3494_s17 + $0x40] sm:$0xff] }
  0x1a   : > { %635 = vmatpush.bf16.msra.mxu1 %v3194_v5  ;;  %v3518_v27 = vpack.c.bf16 %v263_v25, %v261_v24  ;;  %v266_v29 = vld [vmem:[%s3494_s17 + $0x50] sm:$0xff]  ;;  %v265_v30 = vld [vmem:[%s3494_s17 + $0x48] sm:$0xff]  ;;  %v267_v31 = vld [vmem:[%s3494_s17 + $0x58] sm:$0xff] }
  0x1b   : > { %v3526_v32 = vpack.c.bf16 %v266_v29, %v264_v28  ;;  %v3528_v33 = vpack.c.bf16 %v267_v31, %v265_v30  ;;  %v268_v34 = vld [vmem:[%s3494_s17 + $0x60] sm:$0xff]  ;;  %v270_v35 = vld [vmem:[%s3494_s17 + $0x70] sm:$0xff]  ;;  %v269_v36 = vld [vmem:[%s3494_s17 + $0x68] sm:$0xff] }
  0x1c   : > { %v271_v37 = vld [vmem:[%s3494_s17 + $0x78] sm:$0xff]  ;;  %v3536_v38 = vpack.c.bf16 %v270_v35, %v268_v34  ;;  %v272_v40 = vld [vmem:[%s3494_s17 + $0x80] sm:$0xff]  ;;  %v274_v41 = vld [vmem:[%s3494_s17 + $0x90] sm:$0xff] }
  0x1d   : > { %547 = vmatpush.bf16.msra.mxu0 %v3185_v6  ;;  %5223 = vst [vmem:[#allocation3_spill] sm:$0xff] %v3526_v32  ;;  %v3538_v39 = vpack.c.bf16 %v271_v37, %v269_v36  ;;  %v273_v42 = vld [vmem:[%s3494_s17 + $0x88] sm:$0xff]  ;;  %v275_v43 = vld [vmem:[%s3494_s17 + $0x98] sm:$0xff]  ;;  %v3546_v44 = vpack.c.bf16 %v274_v41, %v272_v40  ;;  %v276_v46 = vld [vmem:[%s3494_s17 + $0xa0] sm:$0xff] }
  0x1e   : > { %636 = vmatpush.bf16.msra.mxu1 %v3193_v7  ;;  %5224 = vst [vmem:[#allocation4_spill] sm:$0xff] %v3528_v33  ;;  %v3548_v45 = vpack.c.bf16 %v275_v43, %v273_v42  ;;  %v278_v47 = vld [vmem:[%s3494_s17 + $0xb0] sm:$0xff]  ;;  %v277_v48 = vld [vmem:[%s3494_s17 + $0xa8] sm:$0xff]  ;;  %v279_v49 = vld [vmem:[%s3494_s17 + $0xb8] sm:$0xff] }
  0x1f   : > { %5225 = vst [vmem:[#allocation5_spill] sm:$0xff] %v3536_v38  ;;  %v3556_v50 = vpack.c.bf16 %v278_v47, %v276_v46  ;;  %v3558_v51 = vpack.c.bf16 %v279_v49, %v277_v48  ;;  %v280_v52 = vld [vmem:[%s3494_s17 + $0xc0] sm:$0xff]  ;;  %v282_v53 = vld [vmem:[%s3494_s17 + $0xd0] sm:$0xff]  ;;  %v281_v54 = vld [vmem:[%s3494_s17 + $0xc8] sm:$0xff] }
  0x20   : > { %5226 = vst [vmem:[#allocation6_spill] sm:$0xff] %v3538_v39  ;;  %v283_v55 = vld [vmem:[%s3494_s17 + $0xd8] sm:$0xff]  ;;  %v3566_v56 = vpack.c.bf16 %v282_v53, %v280_v52  ;;  %v284_v58 = vld [vmem:[%s3494_s17 + $0xe0] sm:$0xff]  ;;  %v286_v59 = vld [vmem:[%s3494_s17 + $0xf0] sm:$0xff] }
  0x21   : > { %548 = vmatpush.bf16.msra.mxu0 %v3184_v8  ;;  %5227 = vst [vmem:[#allocation7_spill] sm:$0xff] %v3546_v44  ;;  %v3568_v57 = vpack.c.bf16 %v283_v55, %v281_v54  ;;  %v285_v60 = vld [vmem:[%s3494_s17 + $0xe8] sm:$0xff]  ;;  %v287_v61 = vld [vmem:[%s3494_s17 + $0xf8] sm:$0xff]  ;;  %v3576_v62 = vpack.c.bf16 %v286_v59, %v284_v58  ;;  %v288_v0 = vld [vmem:[%s3494_s17 + $0x100] sm:$0xff] }
  0x22   : > { %637 = vmatpush.bf16.msra.mxu1 %v3192_v9  ;;  %5228 = vst [vmem:[#allocation8_spill] sm:$0xff] %v3548_v45  ;;  %v3578_v63 = vpack.c.bf16 %v287_v61, %v285_v60  ;;  %v290_v1 = vld [vmem:[%s3494_s17 + $0x110] sm:$0xff]  ;;  %v289_v2 = vld [vmem:[%s3494_s17 + $0x108] sm:$0xff]  ;;  %v291_v3 = vld [vmem:[%s3494_s17 + $0x118] sm:$0xff] }
  0x23   : > { %5229 = vst [vmem:[#allocation9_spill] sm:$0xff] %v3556_v50  ;;  %v3586_v4 = vpack.c.bf16 %v290_v1, %v288_v0  ;;  %v3588_v5 = vpack.c.bf16 %v291_v3, %v289_v2  ;;  %v295_v16 = vld [vmem:[%s3494_s17 + $0x138] sm:$0xff]  ;;  %v296_v30 = vld [vmem:[%s3494_s17 + $0x140] sm:$0xff]  ;;  %v298_v31 = vld [vmem:[%s3494_s17 + $0x150] sm:$0xff] }
  0x24   : > { %5230 = vst [vmem:[#allocation10_spill] sm:$0xff] %v3558_v51  ;;  %v297_v34 = vld [vmem:[%s3494_s17 + $0x148] sm:$0xff]  ;;  %v299_v35 = vld [vmem:[%s3494_s17 + $0x158] sm:$0xff]  ;;  %v3610_v36 = vpack.c.bf16 %v298_v31, %v296_v30  ;;  %v300_v49 = vld [vmem:[%s3494_s17 + $0x160] sm:$0xff] }
  0x25   : > { %549 = vmatpush.bf16.msra.mxu0 %v3183_v10  ;;  %5231 = vst [vmem:[#allocation11_spill] sm:$0xff] %v3566_v56  ;;  %v3612_v37 = vpack.c.bf16 %v299_v35, %v297_v34  ;;  %v302_v52 = vld [vmem:[%s3494_s17 + $0x170] sm:$0xff]  ;;  %v301_v53 = vld [vmem:[%s3494_s17 + $0x168] sm:$0xff]  ;;  %v303_v54 = vld [vmem:[%s3494_s17 + $0x178] sm:$0xff] }
  0x26   : > { %638 = vmatpush.bf16.msra.mxu1 %v3191_v11  ;;  %5232 = vst [vmem:[#allocation12_spill] sm:$0xff] %v3568_v57  ;;  %v3622_v55 = vpack.c.bf16 %v302_v52, %v300_v49  ;;  %v3624_v58 = vpack.c.bf16 %v303_v54, %v301_v53  ;;  %v311_v30 = vld [vmem:[%s3494_s17 + $0x1b8] sm:$0xff]  ;;  %v2765_v53 = vld [vmem:[%s5184_s4 + $0x10] sm:$0xf0] }
  0x27   : > { %5233 = vst [vmem:[#allocation13_spill] sm:$0xff] %v3576_v62 }
  0x28   : > { %5234 = vst [vmem:[#allocation14_spill] sm:$0xff] %v3578_v63 }
  0x29   : > { %550 = vmatpush.bf16.msra.mxu0 %v3182_v12  ;;  %5235 = vst [vmem:[#allocation15_spill] sm:$0xff] %v3588_v5 }
  0x2a   : > { %639 = vmatpush.bf16.msra.mxu1 %v3190_v13  ;;  %v292_v13 = vld [vmem:[%s3494_s17 + $0x120] sm:$0xff] }
  0x2d   : > { %551 = vmatpush.bf16.msra.mxu0 %v3181_v14  ;;  %v294_v14 = vld [vmem:[%s3494_s17 + $0x130] sm:$0xff] }
  0x2e   : > { %640 = vmatpush.bf16.msra.mxu1 %v3189_v15  ;;  %v293_v15 = vld [vmem:[%s3494_s17 + $0x128] sm:$0xff]  ;;  %v3598_v17 = vpack.c.bf16 %v294_v14, %v292_v13 }
  0x2f   : > { %v3600_v18 = vpack.c.bf16 %v295_v16, %v293_v15 }
  0x30   : > { %552 = vmatmul.bf16.vlgmr.msra.gmra.mxu0 %v3506_v20 }
  0x31   : > { %641 = vmatmul.bf16.vlgmr.msra.gmra.mxu1 %v3508_v21 }
  0x40   : > { %557 = vmatmul.bf16.gmra.mxu0 %v3516_v26 }
  0x41   : > { %646 = vmatmul.bf16.gmra.mxu1 %v3518_v27 }
  0x50   : > { %562 = vmatmul.bf16.gmra.mxu0 %v3526_v32 }
  0x51   : > { %651 = vmatmul.bf16.gmra.mxu1 %v3528_v33 }
  0x60   : > { %567 = vmatmul.bf16.gmra.mxu0 %v3536_v38 }
  0x61   : > { %656 = vmatmul.bf16.gmra.mxu1 %v3538_v39 }
  0x70   : > { %572 = vmatmul.bf16.gmra.mxu0 %v3546_v44 }
  0x71   : > { %661 = vmatmul.bf16.gmra.mxu1 %v3548_v45 }
  0x80   : > { %577 = vmatmul.bf16.gmra.mxu0 %v3556_v50 }
  0x81   : > { %666 = vmatmul.bf16.gmra.mxu1 %v3558_v51 }
  0x90   : > { %582 = vmatmul.bf16.gmra.mxu0 %v3566_v56 }
  0x91   : > { %671 = vmatmul.bf16.gmra.mxu1 %v3568_v57 }
  0xa0   : > { %587 = vmatmul.bf16.gmra.mxu0 %v3576_v62 }
  0xa1   : > { %676 = vmatmul.bf16.gmra.mxu1 %v3578_v63 }
  0xad   : > { %v553_v6 = vpop.f32.mrf.mxu0 }
  0xae   : > { %v642_v7 = vpop.f32.mrf.mxu1 }
  0xaf   : > { %v643_v8 = vadd.f32 %v642_v7, %v553_v6  ;;  %v304_v6 = vld [vmem:[%s3494_s17 + $0x180] sm:$0xff]  ;;  %v306_v7 = vld [vmem:[%s3494_s17 + $0x190] sm:$0xff] }
  0xb0   : > { %592 = vmatmul.bf16.gmra.mxu0 %v3586_v4 }
  0xb1   : > { %681 = vmatmul.bf16.gmra.mxu1 %v3588_v5 }
  0xb5   : > { %v555_v9 = vpop.f32.mrf.mxu0 }
  0xb6   : > { %v644_v10 = vpop.f32.mrf.mxu1 }
  0xb7   : > { %v645_v11 = vadd.f32 %v644_v10, %v555_v9  ;;  %v307_v9 = vld [vmem:[%s3494_s17 + $0x198] sm:$0xff]  ;;  %v3634_v10 = vpack.c.bf16 %v306_v7, %v304_v6  ;;  %v2771_v6 = vld [vmem:[%s5184_s4 + $0x8] sm:$0xf] }
  0xb8   : > { %v3200_v7 = vld [vmem:[%s5184_s4 + $0x14] sm:$0xf0] }
  0xb9   : > { %v3592_v12 = vpack.c.bf16 %v645_v11, %v643_v8  ;;  %v305_v8 = vld [vmem:[%s3494_s17 + $0x188] sm:$0xff] }
  0xba   : > { %v3636_v11 = vpack.c.bf16 %v307_v9, %v305_v8  ;;  %v3198_v8 = vld [vmem:[%s5184_s4 + $0xc] sm:$0xf]  ;;  %v2772_v9 = vor.u32 %v3200_v7, %v2771_v6 }
  0xbd   : > { %v558_v19 = vpop.f32.mrf.mxu0 }
  0xbe   : > { %v647_v22 = vpop.f32.mrf.mxu1 }
  0xbf   : > { %v648_v23 = vadd.f32 %v647_v22, %v558_v19 }
  0xc0   : > { %597 = vmatmul.bf16.gmra.mxu0 %v3598_v17 }
  0xc1   : > { %686 = vmatmul.bf16.gmra.mxu1 %v3600_v18 }
  0xc5   : > { %v560_v24 = vpop.f32.mrf.mxu0 }
  0xc6   : > { %v649_v25 = vpop.f32.mrf.mxu1 }
  0xc7   : > { %v650_v28 = vadd.f32 %v649_v25, %v560_v24  ;;  %v308_v24 = vld [vmem:[%s3494_s17 + $0x1a0] sm:$0xff]  ;;  %v310_v25 = vld [vmem:[%s3494_s17 + $0x1b0] sm:$0xff] }
  0xc8   : > { %v3646_v31 = vpack.c.bf16 %v310_v25, %v308_v24 }
  0xc9   : > { %v3604_v29 = vpack.c.bf16 %v650_v28, %v648_v23  ;;  %v309_v28 = vld [vmem:[%s3494_s17 + $0x1a8] sm:$0xff] }
  0xca   : > { %v3648_v34 = vpack.c.bf16 %v311_v30, %v309_v28 }
  0xcd   : > { %v563_v40 = vpop.f32.mrf.mxu0 }
  0xce   : > { %v652_v41 = vpop.f32.mrf.mxu1 }
  0xcf   : > { %v653_v42 = vadd.f32 %v652_v41, %v563_v40 }
  0xd0   : > { %602 = vmatmul.bf16.gmra.mxu0 %v3610_v36 }
  0xd1   : > { %691 = vmatmul.bf16.gmra.mxu1 %v3612_v37 }
  0xd5   : > { %v565_v43 = vpop.f32.mrf.mxu0 }
  0xd6   : > { %v654_v46 = vpop.f32.mrf.mxu1 }
  0xd7   : > { %v655_v47 = vadd.f32 %v654_v46, %v565_v43  ;;  %v3199_v43 = vld [vmem:[%s5184_s4 + $0xc] sm:$0xf0]  ;;  %v3197_v46 = vld [vmem:[%s5184_s4 + $0x4] sm:$0xf] }
  0xd9   : > { %v3616_v48 = vpack.c.bf16 %v655_v47, %v653_v42  ;;  %v2763_v42 = vld [vmem:[%s5184_s4] sm:$0xf] }
  0xda   : > { %v2764_v52 = vor.u32 %v3199_v43, %v2763_v42  ;;  %v317_v42 = vld [vmem:[%s3494_s17 + $0x1e8] sm:$0xff]  ;;  %v319_v43 = vld [vmem:[%s3494_s17 + $0x1f8] sm:$0xff] }
  0xdc   : > { %3206 = vmatpush.bf16.msra.mxu2 %v2764_v52  ;;  %818 = vmatpush.bf16.msrb.mxu0 %v2764_v52 }
  0xdd   : > { %v568_v59 = vpop.f32.mrf.mxu0 }
  0xde   : > { %v657_v60 = vpop.f32.mrf.mxu1 }
  0xdf   : > { %v658_v61 = vadd.f32 %v657_v60, %v568_v59  ;;  %v2768_v59 = vor.u32 %v3197_v46, %v2765_v53 }
  0xe0   : > { %607 = vmatmul.bf16.gmra.mxu0 %v3622_v55  ;;  %996 = vmatpush.bf16.msrb.mxu2 %v2772_v9 }
  0xe1   : > { %696 = vmatmul.bf16.gmra.mxu1 %v3624_v58  ;;  %3207 = vmatpush.bf16.msra.mxu3 %v2768_v59 }
  0xe2   : > { %907 = vmatpush.bf16.msrb.mxu1 %v2768_v59 }
  0xe5   : > { %v570_v0 = vpop.f32.mrf.mxu0 }
  0xe6   : > { %v659_v1 = vpop.f32.mrf.mxu1 }
  0xe7   : > { %v660_v2 = vadd.f32 %v659_v1, %v570_v0  ;;  %v314_v0 = vld [vmem:[%s3494_s17 + $0x1d0] sm:$0xff]  ;;  %v313_v1 = vld [vmem:[%s3494_s17 + $0x1c8] sm:$0xff] }
  0xe9   : > { %v3628_v3 = vpack.c.bf16 %v660_v2, %v658_v61  ;;  %v312_v61 = vld [vmem:[%s3494_s17 + $0x1c0] sm:$0xff]  ;;  %v315_v2 = vld [vmem:[%s3494_s17 + $0x1d8] sm:$0xff] }
  0xed   : > { %v573_v13 = vpop.f32.mrf.mxu0 }
  0xee   : > { %v662_v14 = vpop.f32.mrf.mxu1 }
  0xef   : > { %v663_v15 = vadd.f32 %v662_v14, %v573_v13  ;;  %v2773_v13 = vld [vmem:[%s5184_s4 + $0x18] sm:$0xf0]  ;;  %v3682_v14 = vpack.c.bf16 %v314_v0, %v312_v61 }
  0xf0   : > { %612 = vmatmul.bf16.gmra.mxu0 %v3634_v10 }
  0xf1   : > { %701 = vmatmul.bf16.gmra.mxu1 %v3636_v11 }
  0xf5   : > { %v575_v16 = vpop.f32.mrf.mxu0 }
  0xf6   : > { %v664_v19 = vpop.f32.mrf.mxu1 }
  0xf7   : > { %v665_v22 = vadd.f32 %v664_v19, %v575_v16  ;;  %v2776_v16 = vor.u32 %v3198_v8, %v2773_v13 }
  0xf9   : > { %v3640_v23 = vpack.c.bf16 %v665_v22, %v663_v15  ;;  %v3684_v15 = vpack.c.bf16 %v315_v2, %v313_v1  ;;  %1085 = vmatpush.bf16.msrb.mxu3 %v2776_v16 }
  0xfd   : > { %v578_v35 = vpop.f32.mrf.mxu0 }
  0xfe   : > { %v667_v40 = vpop.f32.mrf.mxu1 }
  0xff   : > { %v668_v41 = vadd.f32 %v667_v40, %v578_v35  ;;  %v316_v40 = vld [vmem:[%s3494_s17 + $0x1e0] sm:$0xff] }
 0x100   : > { %617 = vmatmul.bf16.gmra.mxu0 %v3646_v31 }
 0x101   : > { %706 = vmatmul.bf16.gmra.mxu1 %v3648_v34 }
 0x105   : > { %v580_v47 = vpop.f32.mrf.mxu0 }
 0x106   : > { %v669_v49 = vpop.f32.mrf.mxu1 }
 0x107   : > { %v670_v54 = vadd.f32 %v669_v49, %v580_v47  ;;  %v3696_v47 = vpack.c.bf16 %v319_v43, %v317_v42 }
 0x109   : > { %v3664_v60 = vpack.c.bf16 %v670_v54, %v668_v41  ;;  %v318_v41 = vld [vmem:[%s3494_s17 + $0x1f0] sm:$0xff] }
 0x10a   : > { %v3694_v46 = vpack.c.bf16 %v318_v41, %v316_v40 }
 0x10d   : > { %v583_v19 = vpop.f32.mrf.mxu0 }
 0x10e   : > { %v672_v22 = vpop.f32.mrf.mxu1 }
 0x10f   : > { %v673_v24 = vadd.f32 %v672_v22, %v583_v19 }
 0x110   : > { %622 = vmatmul.bf16.gmra.mxu0 %v3682_v14 }
 0x111   : > { %711 = vmatmul.bf16.gmra.mxu1 %v3684_v15 }
 0x115   : > { %v585_v25 = vpop.f32.mrf.mxu0 }
 0x116   : > { %v674_v28 = vpop.f32.mrf.mxu1 }
 0x117   : > { %v675_v30 = vadd.f32 %v674_v28, %v585_v25 }
 0x119   : > { %v3688_v35 = vpack.c.bf16 %v675_v30, %v673_v24 }
 0x11d   : > { %v588_v49 = vpop.f32.mrf.mxu0 }
 0x11e   : > { %v677_v52 = vpop.f32.mrf.mxu1 }
 0x11f   : > { %v678_v59 = vadd.f32 %v677_v52, %v588_v49 }
 0x120   : > { %627 = vmatmul.bf16.gmra.mxu0 %v3694_v46 }
 0x121   : > { %716 = vmatmul.bf16.gmra.mxu1 %v3696_v47 }
 0x125   : > { %v590_v53 = vpop.f32.mrf.mxu0 }
 0x126   : > { %v679_v54 = vpop.f32.mrf.mxu1 }
 0x127   : > { %v680_v61 = vadd.f32 %v679_v54, %v590_v53 }
 0x129   : > { %v3700_v0 = vpack.c.bf16 %v680_v61, %v678_v59  ;;  %v2955_v61 = vld [vmem:[%s5181_s1 + $0xe0] sm:$0xf] }
 0x12b   : > { %2784 = vmatmul.msk.bf16.vlgmr.msra.gmra.mxu2 %vm762_vm0, %v3700_v0  ;;  %2800 = vmatmul.msk.bf16.vlgmr.msra.gmra.mxu3 %vm762_vm0, %v3700_v0 }
 0x12d   : > { %v593_v1 = vpop.f32.mrf.mxu0 }
 0x12e   : > { %v682_v2 = vpop.f32.mrf.mxu1 }
 0x12f   : > { %v683_v8 = vadd.f32 %v682_v2, %v593_v1  ;;  %v3147_v1 = vld [vmem:[%s5181_s1 + $0xec] sm:$0xf0] }
 0x130   : > { %2777 = vmatmul.msk.bf16.vlgmr.msrb.gmra.mxu0 %vm762_vm0, %v3592_v12  ;;  %v2956_v2 = vor.u32 %v3147_v1, %v2955_v61  ;;  %v3051_v1 = vld [vmem:[%s5181_s1 + $0x1a0] sm:$0xf] }
 0x131   : > { %2793 = vmatmul.msk.bf16.vlgmr.msrb.gmra.mxu1 %vm762_vm0, %v3592_v12 }
 0x132   : > { %1497 = vmatpush.bf16.msra.mxu0 %v2956_v2  ;;  %v2907_v2 = vld [vmem:[%s5181_s1 + $0x80] sm:$0xf] }
 0x135   : > { %v595_v6 = vpop.f32.mrf.mxu0 }
 0x136   : > { %v684_v7 = vpop.f32.mrf.mxu1 }
 0x137   : > { %v685_v9 = vadd.f32 %v684_v7, %v595_v6  ;;  %v3083_v6 = vld [vmem:[%s5181_s1 + $0x1e0] sm:$0xf]  ;;  %v3179_v7 = vld [vmem:[%s5181_s1 + $0x1ec] sm:$0xf0] }
 0x139   : > { %v3710_v13 = vpack.c.bf16 %v685_v9, %v683_v8  ;;  %v3084_v8 = vor.u32 %v3179_v7, %v3083_v6  ;;  %v2939_v9 = vld [vmem:[%s5181_s1 + $0xc0] sm:$0xf]  ;;  %v3135_v6 = vld [vmem:[%s5181_s1 + $0x8c] sm:$0xf0] }
 0x13a   : > { %v2908_v7 = vor.u32 %v3135_v6, %v2907_v2 }
 0x13b   : > { %2785 = vmatmul.msk.bf16.gmra.mxu2 %vm762_vm0, %v3710_v13  ;;  %2801 = vmatmul.msk.bf16.gmra.mxu3 %vm762_vm0, %v3710_v13 }
 0x13c   : > { %1586 = vmatpush.bf16.msra.mxu1 %v3084_v8  ;;  %v3035_v8 = vld [vmem:[%s5181_s1 + $0x180] sm:$0xf] }
 0x13d   : > { %v598_v16 = vpop.f32.mrf.mxu0 }
 0x13e   : > { %v687_v19 = vpop.f32.mrf.mxu1 }
 0x13f   : > { %v688_v25 = vadd.f32 %v687_v19, %v598_v16  ;;  %v3143_v16 = vld [vmem:[%s5181_s1 + $0xcc] sm:$0xf0] }
 0x140   : > { %2778 = vmatmul.msk.bf16.gmra.mxu0 %vm762_vm0, %v3604_v29  ;;  %v2940_v19 = vor.u32 %v3143_v16, %v2939_v9  ;;  %v3167_v9 = vld [vmem:[%s5181_s1 + $0x18c] sm:$0xf0] }
 0x141   : > { %2794 = vmatmul.msk.bf16.gmra.mxu1 %vm762_vm0, %v3604_v29 }
 0x142   : > { %1498 = vmatpush.bf16.msra.mxu0 %v2940_v19 }
 0x145   : > { %v600_v22 = vpop.f32.mrf.mxu0 }
 0x146   : > { %v689_v24 = vpop.f32.mrf.mxu1 }
 0x147   : > { %v690_v28 = vadd.f32 %v689_v24, %v600_v22  ;;  %v3067_v22 = vld [vmem:[%s5181_s1 + $0x1c0] sm:$0xf]  ;;  %v3175_v24 = vld [vmem:[%s5181_s1 + $0x1cc] sm:$0xf0] }
 0x149   : > { %v3720_v30 = vpack.c.bf16 %v690_v28, %v688_v25 }
 0x14b   : > { %2786 = vmatmul.msk.bf16.gmra.mxu2 %vm762_vm0, %v3720_v30  ;;  %2802 = vmatmul.msk.bf16.gmra.mxu3 %vm762_vm0, %v3720_v30 }
 0x14d   : > { %v603_v40 = vpop.f32.mrf.mxu0 }
 0x14e   : > { %v692_v41 = vpop.f32.mrf.mxu1 }
 0x14f   : > { %v693_v49 = vadd.f32 %v692_v41, %v603_v40  ;;  %v3068_v40 = vor.u32 %v3175_v24, %v3067_v22  ;;  %v3036_v22 = vor.u32 %v3167_v9, %v3035_v8  ;;  %v2891_v24 = vld [vmem:[%s5181_s1 + $0x60] sm:$0xf] }
 0x150   : > { %2779 = vmatmul.msk.bf16.gmra.mxu0 %vm762_vm0, %v3616_v48  ;;  %v2859_v9 = vld [vmem:[%s5181_s1 + $0x20] sm:$0xf] }
 0x151   : > { %2795 = vmatmul.msk.bf16.gmra.mxu1 %vm762_vm0, %v3616_v48 }
 0x152   : > { %1587 = vmatpush.bf16.msra.mxu1 %v3068_v40  ;;  %v3019_v40 = vld [vmem:[%s5181_s1 + $0x160] sm:$0xf] }
 0x155   : > { %v605_v42 = vpop.f32.mrf.mxu0 }
 0x156   : > { %v694_v43 = vpop.f32.mrf.mxu1 }
 0x157   : > { %v695_v52 = vadd.f32 %v694_v43, %v605_v42  ;;  %v2923_v43 = vld [vmem:[%s5181_s1 + $0xa0] sm:$0xf] }
 0x159   : > { %v3730_v53 = vpack.c.bf16 %v695_v52, %v693_v49  ;;  %v3139_v49 = vld [vmem:[%s5181_s1 + $0xac] sm:$0xf0] }
 0x15a   : > { %v2924_v52 = vor.u32 %v3139_v49, %v2923_v43  ;;  %v2875_v43 = vld [vmem:[%s5181_s1 + $0x40] sm:$0xf]  ;;  %v3127_v49 = vld [vmem:[%s5181_s1 + $0x4c] sm:$0xf0] }
 0x15b   : > { %2787 = vmatmul.msk.bf16.gmra.mxu2 %vm762_vm0, %v3730_v53  ;;  %2803 = vmatmul.msk.bf16.gmra.mxu3 %vm762_vm0, %v3730_v53 }
 0x15c   : > { %1499 = vmatpush.bf16.msra.mxu0 %v2924_v52  ;;  %v2876_v52 = vor.u32 %v3127_v49, %v2875_v43  ;;  %v2971_v43 = vld [vmem:[%s5181_s1 + $0x100] sm:$0xf]  ;;  %v3151_v49 = vld [vmem:[%s5181_s1 + $0x10c] sm:$0xf0] }
 0x15d   : > { %v608_v54 = vpop.f32.mrf.mxu0 }
 0x15e   : > { %v697_v59 = vpop.f32.mrf.mxu1 }
 0x15f   : > { %v698_v41 = vadd.f32 %v697_v59, %v608_v54  ;;  %v3171_v54 = vld [vmem:[%s5181_s1 + $0x1ac] sm:$0xf0] }
 0x160   : > { %2780 = vmatmul.msk.bf16.gmra.mxu0 %vm762_vm0, %v3628_v3  ;;  %v3052_v59 = vor.u32 %v3171_v54, %v3051_v1  ;;  %v3003_v1 = vld [vmem:[%s5181_s1 + $0x140] sm:$0xf]  ;;  %v3159_v54 = vld [vmem:[%s5181_s1 + $0x14c] sm:$0xf0] }
 0x161   : > { %2796 = vmatmul.msk.bf16.gmra.mxu1 %vm762_vm0, %v3628_v3  ;;  %1500 = vmatpush.bf16.msra.mxu0 %v2908_v7  ;;  %v3004_v6 = vor.u32 %v3159_v54, %v3003_v1  ;;  %v2972_v54 = vor.u32 %v3151_v49, %v2971_v43  ;;  %v3177_v43 = vld [vmem:[%s5181_s1 + $0x1e4] sm:$0xf] }
 0x162   : > { %1588 = vmatpush.bf16.msra.mxu1 %v3052_v59 }
 0x165   : > { %v610_v25 = vpop.f32.mrf.mxu0 }
 0x166   : > { %v699_v28 = vpop.f32.mrf.mxu1  ;;  %1589 = vmatpush.bf16.msra.mxu1 %v3036_v22  ;;  %v3123_v22 = vld [vmem:[%s5181_s1 + $0x2c] sm:$0xf0] }
 0x167   : > { %v700_v42 = vadd.f32 %v699_v28, %v610_v25  ;;  %v3131_v25 = vld [vmem:[%s5181_s1 + $0x6c] sm:$0xf0] }
 0x168   : > { %v2892_v28 = vor.u32 %v3131_v25, %v2891_v24  ;;  %v2860_v24 = vor.u32 %v3123_v22, %v2859_v9 }
 0x169   : > { %v3770_v61 = vpack.c.bf16 %v700_v42, %v698_v41  ;;  %v3163_v41 = vld [vmem:[%s5181_s1 + $0x16c] sm:$0xf0] }
 0x16a   : > { %1501 = vmatpush.bf16.msra.mxu0 %v2892_v28  ;;  %v3020_v42 = vor.u32 %v3163_v41, %v3019_v40  ;;  %v2987_v28 = vld [vmem:[%s5181_s1 + $0x120] sm:$0xf]  ;;  %v3119_v41 = vld [vmem:[%s5181_s1 + $0xc] sm:$0xf0] }
 0x16b   : > { %2788 = vmatmul.msk.bf16.gmra.mxu2 %vm762_vm0, %v3770_v61  ;;  %2804 = vmatmul.msk.bf16.gmra.mxu3 %vm762_vm0, %v3770_v61  ;;  %v2843_v40 = vld [vmem:[%s5181_s1] sm:$0xf] }
 0x16c   : > { %1590 = vmatpush.bf16.msra.mxu1 %v3020_v42  ;;  %v2844_v42 = vor.u32 %v3119_v41, %v2843_v40  ;;  %v3145_v41 = vld [vmem:[%s5181_s1 + $0xe4] sm:$0xf] }
 0x16d   : > { %v613_v16 = vpop.f32.mrf.mxu0 }
 0x16e   : > { %v702_v19 = vpop.f32.mrf.mxu1  ;;  %1502 = vmatpush.bf16.msra.mxu0 %v2876_v52 }
 0x16f   : > { %v703_v7 = vadd.f32 %v702_v19, %v613_v16  ;;  %v3155_v16 = vld [vmem:[%s5181_s1 + $0x12c] sm:$0xf0] }
 0x170   : > { %2781 = vmatmul.msk.bf16.gmra.mxu0 %vm762_vm0, %v3640_v23  ;;  %1591 = vmatpush.bf16.msra.mxu1 %v3004_v6  ;;  %v2988_v19 = vor.u32 %v3155_v16, %v2987_v28 }
 0x171   : > { %2797 = vmatmul.msk.bf16.gmra.mxu1 %vm762_vm0, %v3640_v23 }
 0x172   : > { %1503 = vmatpush.bf16.msra.mxu0 %v2860_v24 }
 0x174   : > { %1592 = vmatpush.bf16.msra.mxu1 %v2988_v19 }
 0x175   : > { %v615_v59 = vpop.f32.mrf.mxu0 }
 0x176   : > { %v704_v2 = vpop.f32.mrf.mxu1  ;;  %1504 = vmatpush.bf16.msra.mxu0 %v2844_v42  ;;  %v2957_v42 = vld [vmem:[%s5181_s1 + $0xf0] sm:$0xf0] }
 0x177   : > { %v705_v8 = vadd.f32 %v704_v2, %v615_v59  ;;  %v2960_v49 = vor.u32 %v3145_v41, %v2957_v42 }
 0x178   : > { %1593 = vmatpush.bf16.msra.mxu1 %v2972_v54 }
 0x179   : > { %v3828_v25 = vpack.c.bf16 %v705_v8, %v703_v7  ;;  %1675 = vmatpush.bf16.msra.mxu2 %v2960_v49 }
 0x17b   : > { %2789 = vmatmul.msk.bf16.gmra.mxu2 %vm762_vm0, %v3828_v25  ;;  %2805 = vmatmul.msk.bf16.gmra.mxu3 %vm762_vm0, %v3828_v25 }
 0x17d   : > { %v618_v52 = vpop.f32.mrf.mxu0 }
 0x17e   : > { %v707_v1 = vpop.f32.mrf.mxu1 }
 0x17f   : > { %v708_v6 = vadd.f32 %v707_v1, %v618_v52  ;;  %v3085_v52 = vld [vmem:[%s5181_s1 + $0x1f0] sm:$0xf0] }
 0x180   : > { %2782 = vmatmul.msk.bf16.gmra.mxu0 %vm762_vm0, %v3664_v60  ;;  %v3088_v1 = vor.u32 %v3177_v43, %v3085_v52  ;;  %v3141_v52 = vld [vmem:[%s5181_s1 + $0xc4] sm:$0xf] }
 0x181   : > { %2798 = vmatmul.msk.bf16.gmra.mxu1 %vm762_vm0, %v3664_v60 }
 0x182   : > { %1764 = vmatpush.bf16.msra.mxu3 %v3088_v1  ;;  %v2941_v1 = vld [vmem:[%s5181_s1 + $0xd0] sm:$0xf0] }
 0x185   : > { %v620_v59 = vpop.f32.mrf.mxu0 }
 0x186   : > { %v709_v2 = vpop.f32.mrf.mxu1 }
 0x187   : > { %v710_v7 = vadd.f32 %v709_v2, %v620_v59 }
 0x189   : > { %v3856_v8 = vpack.c.bf16 %v710_v7, %v708_v6 }
 0x18b   : > { %2790 = vmatmul.msk.bf16.gmra.mxu2 %vm762_vm0, %v3856_v8  ;;  %2806 = vmatmul.msk.bf16.gmra.mxu3 %vm762_vm0, %v3856_v8 }
 0x18d   : > { %v623_v9 = vpop.f32.mrf.mxu0 }
 0x18e   : > { %v712_v22 = vpop.f32.mrf.mxu1 }
 0x18f   : > { %v713_v16 = vadd.f32 %v712_v22, %v623_v9 }
 0x190   : > { %2783 = vmatmul.msk.bf16.gmra.mxu0 %vm762_vm0, %v3688_v35 }
 0x191   : > { %2799 = vmatmul.msk.bf16.gmra.mxu1 %vm762_vm0, %v3688_v35 }
 0x195   : > { %v625_v24 = vpop.f32.mrf.mxu0 }
 0x196   : > { %v714_v28 = vpop.f32.mrf.mxu1 }
 0x197   : > { %v715_v19 = vadd.f32 %v714_v28, %v625_v24 }
 0x199   : > { %v3866_v40 = vpack.c.bf16 %v715_v19, %v713_v16 }
 0x19b   : > { %2791 = vmatmul.msk.bf16.gmra.mxu2 %vm762_vm0, %v3866_v40  ;;  %2807 = vmatmul.msk.bf16.gmra.mxu3 %vm762_vm0, %v3866_v40 }
 0x19d   : > { %v628_v54 = vpop.f32.mrf.mxu0 }
 0x19e   : > { %v717_v59 = vpop.f32.mrf.mxu1 }
 0x19f   : > { %v718_v7 = vadd.f32 %v717_v59, %v628_v54  ;;  %v3173_v54 = vld [vmem:[%s5181_s1 + $0x1c4] sm:$0xf]  ;;  %v2944_v59 = vor.u32 %v3141_v52, %v2941_v1 }
 0x1a0   : > { %1505 = vmatmul.bf16.vlgmr.msra.gmra.mxu0 %v3506_v20 }
 0x1a1   : > { %1594 = vmatmul.bf16.vlgmr.msra.gmra.mxu1 %v3508_v21  ;;  %1676 = vmatpush.bf16.msra.mxu2 %v2944_v59 }
 0x1a5   : > { %v630_v2 = vpop.f32.mrf.mxu0 }
 0x1a6   : > { %v719_v6 = vpop.f32.mrf.mxu1 }
 0x1a7   : > { %v720_v9 = vadd.f32 %v719_v6, %v630_v2  ;;  %v3069_v2 = vld [vmem:[%s5181_s1 + $0x1d0] sm:$0xf0] }
 0x1a8   : > { %v3072_v6 = vor.u32 %v3173_v54, %v3069_v2 }
 0x1a9   : > { %v3886_v22 = vpack.c.bf16 %v720_v9, %v718_v7 }
 0x1aa   : > { %1765 = vmatpush.bf16.msra.mxu3 %v3072_v6 }
 0x1ab   : > { %2792 = vmatmul.msk.bf16.gmra.mxu2 %vm762_vm0, %v3886_v22  ;;  %2808 = vmatmul.msk.bf16.gmra.mxu3 %vm762_vm0, %v3886_v22 }
 0x1ad   : > { %v3892_v24 = vpop.f32.mrf.mxu0 }
 0x1ae   : > { %v3894_v28 = vpop.f32.mrf.mxu2  ;;  %v3896_v16 = vpop.f32.mrf.mxu1 }
 0x1af   : > { %5236 = vst [vmem:[#allocation16_spill] sm:$0xff] %v3896_v16  ;;  %v3898_v19 = vpop.f32.mrf.mxu3 }
 0x1b0   : > { %5237 = vst [vmem:[#allocation17_spill] sm:$0xff] %v3898_v19  ;;  %1510 = vmatmul.bf16.gmra.mxu0 %v3516_v26 }
 0x1b1   : > { %1599 = vmatmul.bf16.gmra.mxu1 %v3518_v27 }
 0x1b5   : > { %v3902_v41 = vpop.f32.mrf.mxu0 }
 0x1b6   : > { %v3904_v42 = vpop.f32.mrf.mxu2  ;;  %v3906_v43 = vpop.f32.mrf.mxu1 }
 0x1b7   : > { %5238 = vst [vmem:[#allocation18_spill] sm:$0xff] %v3906_v43  ;;  %v3908_v49 = vpop.f32.mrf.mxu3 }
 0x1b8   : > { %5239 = vst [vmem:[#allocation19_spill] sm:$0xff] %v3908_v49 }
 0x1bb   : > { %2809 = vmatmul.msk.bf16.vlgmr.msrb.gmra.mxu2 %vm762_vm0, %v3592_v12  ;;  %2825 = vmatmul.msk.bf16.vlgmr.msrb.gmra.mxu3 %vm762_vm0, %v3592_v12 }
 0x1bd   : > { %v3926_v7 = vpop.f32.mrf.mxu0 }
 0x1be   : > { %v3928_v12 = vpop.f32.mrf.mxu2  ;;  %v3930_v9 = vpop.f32.mrf.mxu1 }
 0x1bf   : > { %5240 = vst [vmem:[#allocation20_spill] sm:$0xff] %v3930_v9  ;;  %v3932_v49 = vpop.f32.mrf.mxu3 }
 0x1c0   : > { %5241 = vst [vmem:[#allocation21_spill] sm:$0xff] %v3932_v49  ;;  %1515 = vmatmul.bf16.gmra.mxu0 %v3526_v32 }
 0x1c1   : > { %1604 = vmatmul.bf16.gmra.mxu1 %v3528_v33 }
 0x1c5   : > { %v3936_v52 = vpop.f32.mrf.mxu0 }
 0x1c6   : > { %v3938_v1 = vpop.f32.mrf.mxu2  ;;  %v3940_v19 = vpop.f32.mrf.mxu1 }
 0x1c7   : > { %5242 = vst [vmem:[#allocation22_spill] sm:$0xff] %v3940_v19  ;;  %v3942_v54 = vpop.f32.mrf.mxu3 }
 0x1c8   : > { %5243 = vst [vmem:[#allocation23_spill] sm:$0xff] %v3942_v54 }
 0x1cb   : > { %2810 = vmatmul.msk.bf16.gmra.mxu2 %vm762_vm0, %v3604_v29  ;;  %2826 = vmatmul.msk.bf16.gmra.mxu3 %vm762_vm0, %v3604_v29  ;;  %v3137_v29 = vld [vmem:[%s5181_s1 + $0xa4] sm:$0xf] }
 0x1cd   : > { %v3948_v59 = vpop.f32.mrf.mxu0 }
 0x1ce   : > { %v3950_v2 = vpop.f32.mrf.mxu2  ;;  %v3952_v6 = vpop.f32.mrf.mxu1 }
 0x1cf   : > { %5244 = vst [vmem:[#allocation24_spill] sm:$0xff] %v3952_v6  ;;  %v3954_v49 = vpop.f32.mrf.mxu3 }
 0x1d0   : > { %5245 = vst [vmem:[#allocation25_spill] sm:$0xff] %v3954_v49  ;;  %1520 = vmatmul.bf16.gmra.mxu0 %v3536_v38  ;;  %v2925_v49 = vld [vmem:[%s5181_s1 + $0xb0] sm:$0xf0] }
 0x1d1   : > { %1609 = vmatmul.bf16.gmra.mxu1 %v3538_v39  ;;  %v2928_v6 = vor.u32 %v3137_v29, %v2925_v49 }
 0x1d3   : > { %1677 = vmatpush.bf16.msra.mxu2 %v2928_v6 }
 0x1d5   : > { %v3958_v19 = vpop.f32.mrf.mxu0 }
 0x1d6   : > { %v3960_v54 = vpop.f32.mrf.mxu2  ;;  %v3962_v9 = vpop.f32.mrf.mxu1 }
 0x1d7   : > { %5246 = vst [vmem:[#allocation26_spill] sm:$0xff] %v3962_v9  ;;  %v3964_v43 = vpop.f32.mrf.mxu3  ;;  %v3169_v9 = vld [vmem:[%s5181_s1 + $0x1a4] sm:$0xf] }
 0x1d8   : > { %5247 = vst [vmem:[#allocation27_spill] sm:$0xff] %v3964_v43  ;;  %v3053_v43 = vld [vmem:[%s5181_s1 + $0x1b0] sm:$0xf0] }
 0x1d9   : > { %v3056_v16 = vor.u32 %v3169_v9, %v3053_v43 }
 0x1db   : > { %2811 = vmatmul.msk.bf16.gmra.mxu2 %vm762_vm0, %v3616_v48  ;;  %2827 = vmatmul.msk.bf16.gmra.mxu3 %vm762_vm0, %v3616_v48 }
 0x1dc   : > { %1766 = vmatpush.bf16.msra.mxu3 %v3056_v16 }
 0x1dd   : > { %v3982_v39 = vpop.f32.mrf.mxu0 }
 0x1de   : > { %v3984_v48 = vpop.f32.mrf.mxu2  ;;  %v3986_v38 = vpop.f32.mrf.mxu1 }
 0x1df   : > { %5248 = vst [vmem:[#allocation28_spill] sm:$0xff] %v3986_v38  ;;  %v3988_v33 = vpop.f32.mrf.mxu3 }
 0x1e0   : > { %5249 = vst [vmem:[#allocation29_spill] sm:$0xff] %v3988_v33  ;;  %1525 = vmatmul.bf16.gmra.mxu0 %v3546_v44 }
 0x1e1   : > { %1614 = vmatmul.bf16.gmra.mxu1 %v3548_v45 }
 0x1e5   : > { %v3992_v49 = vpop.f32.mrf.mxu0 }
 0x1e6   : > { %v3994_v29 = vpop.f32.mrf.mxu2  ;;  %v3996_v32 = vpop.f32.mrf.mxu1 }
 0x1e7   : > { %5250 = vst [vmem:[#allocation30_spill] sm:$0xff] %v3996_v32  ;;  %v3998_v43 = vpop.f32.mrf.mxu3 }
 0x1e8   : > { %5251 = vst [vmem:[#allocation31_spill] sm:$0xff] %v3998_v43 }
 0x1eb   : > { %2812 = vmatmul.msk.bf16.gmra.mxu2 %vm762_vm0, %v3628_v3  ;;  %2828 = vmatmul.msk.bf16.gmra.mxu3 %vm762_vm0, %v3628_v3  ;;  %v3133_v3 = vld [vmem:[%s5181_s1 + $0x84] sm:$0xf] }
 0x1ed   : > { %v4004_v9 = vpop.f32.mrf.mxu0 }
 0x1ee   : > { %v4006_v16 = vpop.f32.mrf.mxu2  ;;  %v4008_v6 = vpop.f32.mrf.mxu1 }
 0x1ef   : > { %5252 = vst [vmem:[#allocation32_spill] sm:$0xff] %v4006_v16  ;;  %v4010_v33 = vpop.f32.mrf.mxu3 }
 0x1f0   : > { %5253 = vst [vmem:[#allocation33_spill] sm:$0xff] %v4008_v6  ;;  %1530 = vmatmul.bf16.gmra.mxu0 %v3556_v50 }
 0x1f1   : > { %5254 = vst [vmem:[#allocation34_spill] sm:$0xff] %v4010_v33  ;;  %1619 = vmatmul.bf16.gmra.mxu1 %v3558_v51  ;;  %v2909_v33 = vld [vmem:[%s5181_s1 + $0x90] sm:$0xf0] }
 0x1f2   : > { %v2912_v6 = vor.u32 %v3133_v3, %v2909_v33 }
 0x1f4   : > { %1678 = vmatpush.bf16.msra.mxu2 %v2912_v6 }
 0x1f5   : > { %v4014_v32 = vpop.f32.mrf.mxu0 }
 0x1f6   : > { %v4016_v43 = vpop.f32.mrf.mxu2  ;;  %v4018_v38 = vpop.f32.mrf.mxu1 }
 0x1f7   : > { %5255 = vst [vmem:[#allocation35_spill] sm:$0xff] %v4016_v43  ;;  %v4020_v45 = vpop.f32.mrf.mxu3 }
 0x1f8   : > { %5256 = vst [vmem:[#allocation36_spill] sm:$0xff] %v4018_v38  ;;  %v3165_v38 = vld [vmem:[%s5181_s1 + $0x184] sm:$0xf] }
 0x1f9   : > { %5257 = vst [vmem:[#allocation37_spill] sm:$0xff] %v4020_v45  ;;  %v3037_v45 = vld [vmem:[%s5181_s1 + $0x190] sm:$0xf0] }
 0x1fa   : > { %v3040_v51 = vor.u32 %v3165_v38, %v3037_v45 }
 0x1fb   : > { %2813 = vmatmul.msk.bf16.gmra.mxu2 %vm762_vm0, %v3640_v23  ;;  %2829 = vmatmul.msk.bf16.gmra.mxu3 %vm762_vm0, %v3640_v23 }
 0x1fc   : > { %1767 = vmatpush.bf16.msra.mxu3 %v3040_v51 }
 0x1fd   : > { %v4038_v50 = vpop.f32.mrf.mxu0 }
 0x1fe   : > { %v4040_v23 = vpop.f32.mrf.mxu2  ;;  %v4042_v44 = vpop.f32.mrf.mxu1 }
 0x1ff   : > { %5258 = vst [vmem:[#allocation38_spill] sm:$0xff] %v4040_v23  ;;  %v4044_v43 = vpop.f32.mrf.mxu3 }
 0x200   : > { %5259 = vst [vmem:[#allocation39_spill] sm:$0xff] %v4042_v44  ;;  %1535 = vmatmul.bf16.gmra.mxu0 %v3566_v56 }
 0x201   : > { %5260 = vst [vmem:[#allocation40_spill] sm:$0xff] %v4044_v43  ;;  %1624 = vmatmul.bf16.gmra.mxu1 %v3568_v57 }
 0x205   : > { %v4048_v33 = vpop.f32.mrf.mxu0 }
 0x206   : > { %v4050_v3 = vpop.f32.mrf.mxu2  ;;  %v4052_v16 = vpop.f32.mrf.mxu1 }
 0x207   : > { %5261 = vst [vmem:[#allocation41_spill] sm:$0xff] %v4050_v3  ;;  %v4054_v38 = vpop.f32.mrf.mxu3 }
 0x208   : > { %5262 = vst [vmem:[#allocation42_spill] sm:$0xff] %v4052_v16 }
 0x209   : > { %5263 = vst [vmem:[#allocation43_spill] sm:$0xff] %v4054_v38 }
 0x20b   : > { %2814 = vmatmul.msk.bf16.gmra.mxu2 %vm762_vm0, %v3664_v60  ;;  %2830 = vmatmul.msk.bf16.gmra.mxu3 %vm762_vm0, %v3664_v60  ;;  %v4081_v60 = vld [vmem:[%s5182_s2] sm:$0xf] }
 0x20c   : > { %5270 = vst [vmem:[#allocation50_spill] sm:$0xff] %v4081_v60 }
 0x20d   : > { %v4060_v45 = vpop.f32.mrf.mxu0 }
 0x20e   : > { %v4062_v51 = vpop.f32.mrf.mxu2  ;;  %v4064_v6 = vpop.f32.mrf.mxu1 }
 0x20f   : > { %5264 = vst [vmem:[#allocation44_spill] sm:$0xff] %v4062_v51  ;;  %v4066_v43 = vpop.f32.mrf.mxu3 }
 0x210   : > { %5265 = vst [vmem:[#allocation45_spill] sm:$0xff] %v4064_v6  ;;  %1540 = vmatmul.bf16.gmra.mxu0 %v3576_v62  ;;  %v3161_v6 = vld [vmem:[%s5181_s1 + $0x164] sm:$0xf] }
 0x211   : > { %5266 = vst [vmem:[#allocation46_spill] sm:$0xff] %v4066_v43  ;;  %1629 = vmatmul.bf16.gmra.mxu1 %v3578_v63  ;;  %v4088_v43 = vperm.slane %v4081_v60, 0  ;;  %v3021_v60 = vld [vmem:[%s5181_s1 + $0x170] sm:$0xf0] }
 0x212   : > { %v3024_v3 = vor.u32 %v3161_v6, %v3021_v60 }
 0x214   : > { %1768 = vmatpush.bf16.msra.mxu3 %v3024_v3 }
 0x215   : > { %v4070_v38 = vpop.f32.mrf.mxu0 }
 0x216   : > { %v4072_v16 = vpop.f32.mrf.mxu2  ;;  %v4074_v44 = vpop.f32.mrf.mxu1 }
 0x217   : > { %5267 = vst [vmem:[#allocation47_spill] sm:$0xff] %v4072_v16  ;;  %v4076_v57 = vpop.f32.mrf.mxu3 }
 0x218   : > { %5268 = vst [vmem:[#allocation48_spill] sm:$0xff] %v4074_v44  ;;  %v3129_v44 = vld [vmem:[%s5181_s1 + $0x64] sm:$0xf] }
 0x219   : > { %5269 = vst [vmem:[#allocation49_spill] sm:$0xff] %v4076_v57  ;;  %v2893_v57 = vld [vmem:[%s5181_s1 + $0x70] sm:$0xf0] }
 0x21b   : > { %2815 = vmatmul.msk.bf16.gmra.mxu2 %vm762_vm0, %v3688_v35  ;;  %2831 = vmatmul.msk.bf16.gmra.mxu3 %vm762_vm0, %v3688_v35  ;;  %v2896_v35 = vor.u32 %v3129_v44, %v2893_v57 }
 0x21d   : > { %v1506_v62 = vpop.f32.mrf.mxu0  ;;  %1679 = vmatpush.bf16.msra.mxu2 %v2896_v35 }
 0x21e   : > { %v4100_v63 = vpop.f32.mrf.mxu2  ;;  %v1507_v16 = vadd.f32 %v1506_v62, %v4088_v43  ;;  %v1595_v51 = vpop.f32.mrf.mxu1 }
 0x21f   : > { %v4105_v56 = vpop.f32.mrf.mxu3 }
 0x220   : > { %5271 = vst [vmem:[#allocation51_spill] sm:$0xff] %v4105_v56  ;;  %v1596_v23 = vadd.f32 %v1595_v51, %v1507_v16  ;;  %1545 = vmatmul.bf16.gmra.mxu0 %v3586_v4 }
 0x221   : > { %1634 = vmatmul.bf16.gmra.mxu1 %v3588_v5 }
 0x222   : > { %v2209_v44 = vadd.f32 %v1596_v23, %v3892_v24 }
 0x224   : > { %2337 = vst [vmem:[%s4111_s24] sm:$0xff] %v2209_v44 }
 0x225   : > { %v1508_v62 = vpop.f32.mrf.mxu0 }
 0x226   : > { %v4114_v57 = vpop.f32.mrf.mxu2  ;;  %v1509_v6 = vadd.f32 %v1508_v62, %v4088_v43  ;;  %v1597_v16 = vpop.f32.mrf.mxu1 }
 0x227   : > { %v4116_v56 = vpop.f32.mrf.mxu3 }
 0x228   : > { %5272 = vst [vmem:[#allocation52_spill] sm:$0xff] %v4116_v56  ;;  %v1598_v51 = vadd.f32 %v1597_v16, %v1509_v6 }
 0x22a   : > { %v2213_v60 = vadd.f32 %v1598_v51, %v3902_v41 }
 0x22b   : > { %2816 = vmatmul.msk.bf16.gmra.mxu2 %vm762_vm0, %v3700_v0  ;;  %2832 = vmatmul.msk.bf16.gmra.mxu3 %vm762_vm0, %v3700_v0 }
 0x22c   : > { %2341 = vst [vmem:[%s4111_s24 + $0x20] sm:$0xff] %v2213_v60 }
 0x22d   : > { %v1511_v23 = vpop.f32.mrf.mxu0 }
 0x22e   : > { %v4125_v24 = vpop.f32.mrf.mxu2  ;;  %v1512_v35 = vadd.f32 %v1511_v23, %v4088_v43  ;;  %v1600_v44 = vpop.f32.mrf.mxu1 }
 0x22f   : > { %v4127_v3 = vpop.f32.mrf.mxu3 }
 0x230   : > { %5273 = vst [vmem:[#allocation53_spill] sm:$0xff] %v4127_v3  ;;  %v1601_v62 = vadd.f32 %v1600_v44, %v1512_v35  ;;  %1550 = vmatmul.bf16.gmra.mxu0 %v3598_v17  ;;  %v2877_v35 = vld [vmem:[%s5181_s1 + $0x50] sm:$0xf0] }
 0x231   : > { %1639 = vmatmul.bf16.gmra.mxu1 %v3600_v18 }
 0x232   : > { %v2217_v41 = vadd.f32 %v1601_v62, %v3926_v7  ;;  %v3125_v7 = vld [vmem:[%s5181_s1 + $0x44] sm:$0xf] }
 0x234   : > { %2345 = vst [vmem:[%s4111_s24 + $0x40] sm:$0xff] %v2217_v41 }
 0x235   : > { %v1513_v0 = vpop.f32.mrf.mxu0 }
 0x236   : > { %v4134_v6 = vpop.f32.mrf.mxu2  ;;  %v1514_v51 = vadd.f32 %v1513_v0, %v4088_v43  ;;  %v1602_v60 = vpop.f32.mrf.mxu1 }
 0x237   : > { %v4136_v16 = vpop.f32.mrf.mxu3 }
 0x238   : > { %5274 = vst [vmem:[#allocation54_spill] sm:$0xff] %v4136_v16  ;;  %v1603_v3 = vadd.f32 %v1602_v60, %v1514_v51 }
 0x23a   : > { %v2221_v23 = vadd.f32 %v1603_v3, %v3936_v52  ;;  %v2880_v52 = vor.u32 %v3125_v7, %v2877_v35  ;;  %v3157_v3 = vld [vmem:[%s5181_s1 + $0x144] sm:$0xf] }
 0x23b   : > { %2817 = vmatmul.msk.bf16.gmra.mxu2 %vm762_vm0, %v3710_v13  ;;  %2833 = vmatmul.msk.bf16.gmra.mxu3 %vm762_vm0, %v3710_v13  ;;  %v3005_v13 = vld [vmem:[%s5181_s1 + $0x150] sm:$0xf0] }
 0x23c   : > { %2349 = vst [vmem:[%s4111_s24 + $0x60] sm:$0xff] %v2221_v23  ;;  %v3008_v60 = vor.u32 %v3157_v3, %v3005_v13  ;;  %1680 = vmatpush.bf16.msra.mxu2 %v2880_v52 }
 0x23d   : > { %v1516_v62 = vpop.f32.mrf.mxu0 }
 0x23e   : > { %v4151_v44 = vpop.f32.mrf.mxu2  ;;  %v1517_v0 = vadd.f32 %v1516_v62, %v4088_v43  ;;  %v1605_v51 = vpop.f32.mrf.mxu1  ;;  %1769 = vmatpush.bf16.msra.mxu3 %v3008_v60 }
 0x23f   : > { %v4159_v41 = vpop.f32.mrf.mxu3 }
 0x240   : > { %5275 = vst [vmem:[#allocation55_spill] sm:$0xff] %v4159_v41  ;;  %v1606_v23 = vadd.f32 %v1605_v51, %v1517_v0  ;;  %1555 = vmatmul.bf16.gmra.mxu0 %v3610_v36 }
 0x241   : > { %1644 = vmatmul.bf16.gmra.mxu1 %v3612_v37 }
 0x242   : > { %v2225_v7 = vadd.f32 %v1606_v23, %v3948_v59 }
 0x244   : > { %2353 = vst [vmem:[%s4111_s24 + $0x80] sm:$0xff] %v2225_v7 }
 0x245   : > { %v1518_v16 = vpop.f32.mrf.mxu0 }
 0x246   : > { %v4166_v35 = vpop.f32.mrf.mxu2  ;;  %v1519_v62 = vadd.f32 %v1518_v16, %v4088_v43  ;;  %v1607_v3 = vpop.f32.mrf.mxu1 }
 0x247   : > { %v4168_v56 = vpop.f32.mrf.mxu3 }
 0x248   : > { %5276 = vst [vmem:[#allocation56_spill] sm:$0xff] %v4168_v56  ;;  %v1608_v52 = vadd.f32 %v1607_v3, %v1519_v62 }
 0x24a   : > { %v2229_v13 = vadd.f32 %v1608_v52, %v3958_v19 }
 0x24b   : > { %2818 = vmatmul.msk.bf16.gmra.mxu2 %vm762_vm0, %v3720_v30  ;;  %2834 = vmatmul.msk.bf16.gmra.mxu3 %vm762_vm0, %v3720_v30 }
 0x24c   : > { %2357 = vst [vmem:[%s4111_s24 + $0xa0] sm:$0xff] %v2229_v13 }
 0x24d   : > { %v1521_v0 = vpop.f32.mrf.mxu0 }
 0x24e   : > { %v4177_v59 = vpop.f32.mrf.mxu2  ;;  %v1522_v60 = vadd.f32 %v1521_v0, %v4088_v43  ;;  %v1610_v16 = vpop.f32.mrf.mxu1 }
 0x24f   : > { %v4179_v51 = vpop.f32.mrf.mxu3 }
 0x250   : > { %5277 = vst [vmem:[#allocation57_spill] sm:$0xff] %v4179_v51  ;;  %v1611_v23 = vadd.f32 %v1610_v16, %v1522_v60  ;;  %1560 = vmatmul.bf16.gmra.mxu0 %v3622_v55  ;;  %v2861_v60 = vld [vmem:[%s5181_s1 + $0x30] sm:$0xf0]  ;;  %v5302_v51 = vld [vmem:[#allocation7_spill] sm:$0xff] }
 0x251   : > { %1649 = vmatmul.bf16.gmra.mxu1 %v3624_v58 }
 0x252   : > { %v2233_v19 = vadd.f32 %v1611_v23, %v3982_v39  ;;  %v3121_v39 = vld [vmem:[%s5181_s1 + $0x24] sm:$0xf] }
 0x254   : > { %2361 = vst [vmem:[%s4111_s24 + $0xc0] sm:$0xff] %v2233_v19  ;;  %v2864_v19 = vor.u32 %v3121_v39, %v2861_v60  ;;  %v3148_v39 = vld [vmem:[%s5181_s1 + $0xf4] sm:$0xf0] }
 0x255   : > { %v1523_v30 = vpop.f32.mrf.mxu0 }
 0x256   : > { %v4186_v7 = vpop.f32.mrf.mxu2  ;;  %v1524_v3 = vadd.f32 %v1523_v30, %v4088_v43  ;;  %v1612_v52 = vpop.f32.mrf.mxu1  ;;  %1681 = vmatpush.bf16.msra.mxu2 %v2864_v19  ;;  %v3180_v19 = vld [vmem:[%s5181_s1 + $0x1f4] sm:$0xf0] }
 0x257   : > { %v4188_v62 = vpop.f32.mrf.mxu3 }
 0x258   : > { %5278 = vst [vmem:[#allocation58_spill] sm:$0xff] %v4188_v62  ;;  %v1613_v13 = vadd.f32 %v1612_v52, %v1524_v3 }
 0x25a   : > { %v2237_v0 = vadd.f32 %v1613_v13, %v3992_v49  ;;  %v3153_v49 = vld [vmem:[%s5181_s1 + $0x124] sm:$0xf] }
 0x25b   : > { %2819 = vmatmul.msk.bf16.gmra.mxu2 %vm762_vm0, %v3730_v53  ;;  %2835 = vmatmul.msk.bf16.gmra.mxu3 %vm762_vm0, %v3730_v53  ;;  %v2989_v53 = vld [vmem:[%s5181_s1 + $0x130] sm:$0xf0] }
 0x25c   : > { %2365 = vst [vmem:[%s4111_s24 + $0xe0] sm:$0xff] %v2237_v0  ;;  %v2992_v13 = vor.u32 %v3153_v49, %v2989_v53  ;;  %v2963_v0 = vld [vmem:[%s5181_s1 + $0xe8] sm:$0xf] }
 0x25d   : > { %v1526_v23 = vpop.f32.mrf.mxu0 }
 0x25e   : > { %v4203_v16 = vpop.f32.mrf.mxu2  ;;  %v1527_v3 = vadd.f32 %v1526_v23, %v4088_v43  ;;  %v1615_v52 = vpop.f32.mrf.mxu1  ;;  %1770 = vmatpush.bf16.msra.mxu3 %v2992_v13  ;;  %v3091_v23 = vld [vmem:[%s5181_s1 + $0x1e8] sm:$0xf] }
 0x25f   : > { %v4211_v30 = vpop.f32.mrf.mxu3  ;;  %v3092_v53 = vor.u32 %v3180_v19, %v3091_v23 }
 0x260   : > { %5279 = vst [vmem:[#allocation59_spill] sm:$0xff] %v4211_v30  ;;  %v1616_v60 = vadd.f32 %v1615_v52, %v1527_v3  ;;  %1565 = vmatmul.bf16.gmra.mxu0 %v3634_v10  ;;  %v2964_v30 = vor.u32 %v3148_v39, %v2963_v0  ;;  %v2947_v3 = vld [vmem:[%s5181_s1 + $0xc8] sm:$0xf]  ;;  %v3144_v52 = vld [vmem:[%s5181_s1 + $0xd4] sm:$0xf0] }
 0x261   : > { %1654 = vmatmul.bf16.gmra.mxu1 %v3636_v11  ;;  %v2948_v13 = vor.u32 %v3144_v52, %v2947_v3  ;;  %v3140_v3 = vld [vmem:[%s5181_s1 + $0xb4] sm:$0xf0] }
 0x262   : > { %v2241_v49 = vadd.f32 %v1616_v60, %v4004_v9  ;;  %1853 = vmatpush.bf16.msrb.mxu0 %v2964_v30  ;;  %1942 = vmatpush.bf16.msrb.mxu1 %v3092_v53  ;;  %v3075_v9 = vld [vmem:[%s5181_s1 + $0x1c8] sm:$0xf]  ;;  %v3176_v30 = vld [vmem:[%s5181_s1 + $0x1d4] sm:$0xf0] }
 0x263   : > { %v2931_v53 = vld [vmem:[%s5181_s1 + $0xa8] sm:$0xf] }
 0x264   : > { %2369 = vst [vmem:[%s4111_s24 + $0x100] sm:$0xff] %v2241_v49  ;;  %v3076_v49 = vor.u32 %v3176_v30, %v3075_v9  ;;  %v2932_v62 = vor.u32 %v3140_v3, %v2931_v53  ;;  %v2915_v30 = vld [vmem:[%s5181_s1 + $0x88] sm:$0xf] }
 0x265   : > { %v1528_v39 = vpop.f32.mrf.mxu0 }
 0x266   : > { %v4236_v0 = vpop.f32.mrf.mxu2  ;;  %v1529_v23 = vadd.f32 %v1528_v39, %v4088_v43  ;;  %v1617_v19 = vpop.f32.mrf.mxu1  ;;  %1854 = vmatpush.bf16.msrb.mxu0 %v2948_v13  ;;  %1943 = vmatpush.bf16.msrb.mxu1 %v3076_v49  ;;  %v3172_v13 = vld [vmem:[%s5181_s1 + $0x1b4] sm:$0xf0] }
 0x267   : > { %v4244_v60 = vpop.f32.mrf.mxu3 }
 0x268   : > { %5280 = vst [vmem:[#allocation60_spill] sm:$0xff] %v4244_v60  ;;  %v1618_v52 = vadd.f32 %v1617_v19, %v1529_v23  ;;  %v3059_v60 = vld [vmem:[%s5181_s1 + $0x1a8] sm:$0xf]  ;;  %v3136_v23 = vld [vmem:[%s5181_s1 + $0x94] sm:$0xf0] }
 0x269   : > { %v3060_v9 = vor.u32 %v3172_v13, %v3059_v60  ;;  %v2916_v19 = vor.u32 %v3136_v23, %v2915_v30  ;;  %v2899_v13 = vld [vmem:[%s5181_s1 + $0x68] sm:$0xf] }
 0x26a   : > { %v2245_v39 = vadd.f32 %v1618_v52, %v4014_v32  ;;  %1855 = vmatpush.bf16.msrb.mxu0 %v2932_v62  ;;  %v3168_v62 = vld [vmem:[%s5181_s1 + $0x194] sm:$0xf0]  ;;  %v3027_v23 = vld [vmem:[%s5181_s1 + $0x168] sm:$0xf] }
 0x26b   : > { %2820 = vmatmul.msk.bf16.gmra.mxu2 %vm762_vm0, %v3770_v61  ;;  %2836 = vmatmul.msk.bf16.gmra.mxu3 %vm762_vm0, %v3770_v61  ;;  %v3043_v61 = vld [vmem:[%s5181_s1 + $0x188] sm:$0xf] }
 0x26c   : > { %2373 = vst [vmem:[%s4111_s24 + $0x120] sm:$0xff] %v2245_v39  ;;  %1944 = vmatpush.bf16.msrb.mxu1 %v3060_v9  ;;  %v3044_v52 = vor.u32 %v3168_v62, %v3043_v61  ;;  %v3132_v39 = vld [vmem:[%s5181_s1 + $0x74] sm:$0xf0]  ;;  %v2883_v62 = vld [vmem:[%s5181_s1 + $0x48] sm:$0xf] }
 0x26d   : > { %v1531_v49 = vpop.f32.mrf.mxu0  ;;  %v2900_v30 = vor.u32 %v3132_v39, %v2899_v13  ;;  %v3160_v39 = vld [vmem:[%s5181_s1 + $0x154] sm:$0xf0] }
 0x26e   : > { %v4271_v32 = vpop.f32.mrf.mxu2  ;;  %v1532_v53 = vadd.f32 %v1531_v49, %v4088_v43  ;;  %v1620_v3 = vpop.f32.mrf.mxu1  ;;  %1856 = vmatpush.bf16.msrb.mxu0 %v2916_v19  ;;  %v3164_v19 = vld [vmem:[%s5181_s1 + $0x174] sm:$0xf0] }
 0x26f   : > { %v4279_v60 = vpop.f32.mrf.mxu3  ;;  %v3028_v61 = vor.u32 %v3164_v19, %v3027_v23 }
 0x270   : > { %5281 = vst [vmem:[#allocation61_spill] sm:$0xff] %v4279_v60  ;;  %v1621_v9 = vadd.f32 %v1620_v3, %v1532_v53  ;;  %1570 = vmatmul.bf16.gmra.mxu0 %v3646_v31  ;;  %1945 = vmatpush.bf16.msrb.mxu1 %v3044_v52  ;;  %v3128_v53 = vld [vmem:[%s5181_s1 + $0x54] sm:$0xf0] }
 0x271   : > { %1659 = vmatmul.bf16.gmra.mxu1 %v3648_v34  ;;  %v2884_v3 = vor.u32 %v3128_v53, %v2883_v62 }
 0x272   : > { %v2249_v49 = vadd.f32 %v1621_v9, %v4038_v50  ;;  %1857 = vmatpush.bf16.msrb.mxu0 %v2900_v30  ;;  %v3011_v50 = vld [vmem:[%s5181_s1 + $0x148] sm:$0xf] }
 0x273   : > { %v3012_v19 = vor.u32 %v3160_v39, %v3011_v50  ;;  %v2851_v39 = vld [vmem:[%s5181_s1 + $0x8] sm:$0xf] }
 0x274   : > { %2377 = vst [vmem:[%s4111_s24 + $0x140] sm:$0xff] %v2249_v49  ;;  %1946 = vmatpush.bf16.msrb.mxu1 %v3028_v61  ;;  %v2867_v49 = vld [vmem:[%s5181_s1 + $0x28] sm:$0xf]  ;;  %v3124_v61 = vld [vmem:[%s5181_s1 + $0x34] sm:$0xf0] }
 0x275   : > { %v1533_v13 = vpop.f32.mrf.mxu0  ;;  %v2868_v53 = vor.u32 %v3124_v61, %v2867_v49  ;;  %v3149_v61 = vld [vmem:[%s5181_s1 + $0x104] sm:$0xf] }
 0x276   : > { %v4304_v52 = vpop.f32.mrf.mxu2  ;;  %v1534_v30 = vadd.f32 %v1533_v13, %v4088_v43  ;;  %v1622_v23 = vpop.f32.mrf.mxu1  ;;  %1858 = vmatpush.bf16.msrb.mxu0 %v2884_v3  ;;  %v3156_v13 = vld [vmem:[%s5181_s1 + $0x134] sm:$0xf0] }
 0x277   : > { %v4312_v9 = vpop.f32.mrf.mxu3 }
 0x278   : > { %5282 = vst [vmem:[#allocation62_spill] sm:$0xff] %v4312_v9  ;;  %v1623_v62 = vadd.f32 %v1622_v23, %v1534_v30  ;;  %1947 = vmatpush.bf16.msrb.mxu1 %v3012_v19  ;;  %v2995_v9 = vld [vmem:[%s5181_s1 + $0x128] sm:$0xf]  ;;  %v3120_v30 = vld [vmem:[%s5181_s1 + $0x14] sm:$0xf0] }
 0x279   : > { %v2996_v50 = vor.u32 %v3156_v13, %v2995_v9  ;;  %v2845_v23 = vld [vmem:[%s5181_s1 + $0x10] sm:$0xf0] }
 0x27a   : > { %v2253_v3 = vadd.f32 %v1623_v62, %v4048_v33  ;;  %1859 = vmatpush.bf16.msrb.mxu0 %v2868_v53  ;;  %v3117_v33 = vld [vmem:[%s5181_s1 + $0x4] sm:$0xf]  ;;  %v2973_v62 = vld [vmem:[%s5181_s1 + $0x110] sm:$0xf0]  ;;  %v2979_v53 = vld [vmem:[%s5181_s1 + $0x108] sm:$0xf] }
 0x27b   : > { %2821 = vmatmul.msk.bf16.gmra.mxu2 %vm762_vm0, %v3828_v25  ;;  %2837 = vmatmul.msk.bf16.gmra.mxu3 %vm762_vm0, %v3828_v25  ;;  %v2852_v25 = vor.u32 %v3120_v30, %v2851_v39  ;;  %v2848_v49 = vor.u32 %v3117_v33, %v2845_v23  ;;  %v2976_v30 = vor.u32 %v3149_v61, %v2973_v62 }
 0x27c   : > { %2381 = vst [vmem:[%s4111_s24 + $0x160] sm:$0xff] %v2253_v3  ;;  %1948 = vmatpush.bf16.msrb.mxu1 %v2996_v50  ;;  %v3152_v50 = vld [vmem:[%s5181_s1 + $0x114] sm:$0xf0] }
 0x27d   : > { %v1536_v19 = vpop.f32.mrf.mxu0  ;;  %1682 = vmatpush.bf16.msra.mxu2 %v2848_v49  ;;  %v2980_v33 = vor.u32 %v3152_v50, %v2979_v53  ;;  %1771 = vmatpush.bf16.msra.mxu3 %v2976_v30 }
 0x27e   : > { %v4345_v9 = vpop.f32.mrf.mxu2  ;;  %v1537_v3 = vadd.f32 %v1536_v19, %v4088_v43  ;;  %v1625_v39 = vpop.f32.mrf.mxu1  ;;  %1860 = vmatpush.bf16.msrb.mxu0 %v2852_v25 }
 0x27f   : > { %v4356_v13 = vpop.f32.mrf.mxu3 }
 0x280   : > { %5283 = vst [vmem:[#allocation63_spill] sm:$0xff] %v4356_v13  ;;  %v1626_v23 = vadd.f32 %v1625_v39, %v1537_v3  ;;  %1575 = vmatmul.bf16.gmra.mxu0 %v3682_v14  ;;  %1949 = vmatpush.bf16.msrb.mxu1 %v2980_v33 }
 0x281   : > { %1664 = vmatmul.bf16.gmra.mxu1 %v3684_v15 }
 0x282   : > { %v2257_v13 = vadd.f32 %v1626_v23, %v4060_v45 }
 0x284   : > { %2385 = vst [vmem:[%s4111_s24 + $0x180] sm:$0xff] %v2257_v13 }
 0x285   : > { %v1538_v61 = vpop.f32.mrf.mxu0 }
 0x286   : > { %v4366_v19 = vpop.f32.mrf.mxu2  ;;  %v1539_v49 = vadd.f32 %v1538_v61, %v4088_v43  ;;  %v1627_v25 = vpop.f32.mrf.mxu1 }
 0x287   : > { %v4368_v62 = vpop.f32.mrf.mxu3 }
 0x288   : > { %5284 = vst [vmem:[#allocation64_spill] sm:$0xff] %v4368_v62  ;;  %v1628_v53 = vadd.f32 %v1627_v25, %v1539_v49 }
 0x28a   : > { %v2261_v3 = vadd.f32 %v1628_v53, %v4070_v38 }
 0x28b   : > { %2822 = vmatmul.msk.bf16.gmra.mxu2 %vm762_vm0, %v3856_v8  ;;  %2838 = vmatmul.msk.bf16.gmra.mxu3 %vm762_vm0, %v3856_v8 }
 0x28c   : > { %2389 = vst [vmem:[%s4111_s24 + $0x1a0] sm:$0xff] %v2261_v3 }
 0x28d   : > { %v1541_v13 = vpop.f32.mrf.mxu0 }
 0x28e   : > { %v4377_v45 = vpop.f32.mrf.mxu2  ;;  %v1542_v30 = vadd.f32 %v1541_v13, %v4088_v43  ;;  %v1630_v50 = vpop.f32.mrf.mxu1  ;;  %v2965_v13 = vld [vmem:[%s5181_s1 + $0xf8] sm:$0xf0] }
 0x28f   : > { %v4379_v39 = vpop.f32.mrf.mxu3 }
 0x290   : > { %5285 = vst [vmem:[#allocation65_spill] sm:$0xff] %v4379_v39  ;;  %v1631_v33 = vadd.f32 %v1630_v50, %v1542_v30  ;;  %1580 = vmatmul.bf16.gmra.mxu0 %v3694_v46 }
 0x291   : > { %1669 = vmatmul.bf16.gmra.mxu1 %v3696_v47 }
 0x292   : > { %v2265_v38 = vadd.f32 %v1631_v33, %v3894_v28  ;;  %v3146_v28 = vld [vmem:[%s5181_s1 + $0xec] sm:$0xf] }
 0x293   : > { %v3178_v33 = vld [vmem:[%s5181_s1 + $0x1ec] sm:$0xf] }
 0x294   : > { %2393 = vst [vmem:[%s4111_s24 + $0x1c0] sm:$0xff] %v2265_v38 }
 0x295   : > { %v1543_v8 = vpop.f32.mrf.mxu0 }
 0x296   : > { %v4386_v23 = vpop.f32.mrf.mxu2  ;;  %v1544_v49 = vadd.f32 %v1543_v8, %v4088_v43  ;;  %v1632_v25 = vpop.f32.mrf.mxu1 }
 0x297   : > { %v4388_v61 = vpop.f32.mrf.mxu3 }
 0x298   : > { %5286 = vst [vmem:[#allocation66_spill] sm:$0xff] %v4388_v61  ;;  %v1633_v53 = vadd.f32 %v1632_v25, %v1544_v49 }
 0x29a   : > { %v2269_v3 = vadd.f32 %v1633_v53, %v3904_v42  ;;  %v2968_v42 = vor.u32 %v3146_v28, %v2965_v13 }
 0x29b   : > { %2823 = vmatmul.msk.bf16.gmra.mxu2 %vm762_vm0, %v3866_v40  ;;  %2839 = vmatmul.msk.bf16.gmra.mxu3 %vm762_vm0, %v3866_v40  ;;  %v3093_v40 = vld [vmem:[%s5181_s1 + $0x1f8] sm:$0xf0] }
 0x29c   : > { %2397 = vst [vmem:[%s4111_s24 + $0x1e0] sm:$0xff] %v2269_v3  ;;  %v3096_v25 = vor.u32 %v3178_v33, %v3093_v40  ;;  %2031 = vmatpush.bf16.msrb.mxu2 %v2968_v42 }
 0x29d   : > { %v1546_v50 = vpop.f32.mrf.mxu0 }
 0x29e   : > { %v4403_v30 = vpop.f32.mrf.mxu2  ;;  %v1547_v8 = vadd.f32 %v1546_v50, %v4088_v43  ;;  %v1635_v49 = vpop.f32.mrf.mxu1  ;;  %2120 = vmatpush.bf16.msrb.mxu3 %v3096_v25 }
 0x29f   : > { %v4411_v38 = vpop.f32.mrf.mxu3 }
 0x2a0   : > { %5287 = vst [vmem:[#allocation67_spill] sm:$0xff] %v4411_v38  ;;  %v1636_v53 = vadd.f32 %v1635_v49, %v1547_v8  ;;  %1861 = vmatmul.bf16.vlgmr.msrb.gmra.mxu0 %v3506_v20 }
 0x2a1   : > { %1950 = vmatmul.bf16.vlgmr.msrb.gmra.mxu1 %v3508_v21 }
 0x2a2   : > { %v2273_v3 = vadd.f32 %v1636_v53, %v3928_v12 }
 0x2a4   : > { %2401 = vst [vmem:[%s4111_s24 + $0x200] sm:$0xff] %v2273_v3 }
 0x2a5   : > { %v1548_v13 = vpop.f32.mrf.mxu0 }
 0x2a6   : > { %v4418_v28 = vpop.f32.mrf.mxu2  ;;  %v1549_v50 = vadd.f32 %v1548_v13, %v4088_v43  ;;  %v1637_v33 = vpop.f32.mrf.mxu1 }
 0x2a7   : > { %v4420_v61 = vpop.f32.mrf.mxu3 }
 0x2a8   : > { %5288 = vst [vmem:[#allocation68_spill] sm:$0xff] %v4420_v61  ;;  %v1638_v42 = vadd.f32 %v1637_v33, %v1549_v50 }
 0x2aa   : > { %v2277_v40 = vadd.f32 %v1638_v42, %v3938_v1 }
 0x2ab   : > { %2824 = vmatmul.msk.bf16.gmra.mxu2 %vm762_vm0, %v3886_v22  ;;  %2840 = vmatmul.msk.bf16.gmra.mxu3 %vm762_vm0, %v3886_v22 }
 0x2ac   : > { %2405 = vst [vmem:[%s4111_s24 + $0x220] sm:$0xff] %v2277_v40 }
 0x2ad   : > { %v1551_v8 = vpop.f32.mrf.mxu0 }
 0x2ae   : > { %v4429_v12 = vpop.f32.mrf.mxu2  ;;  %v1552_v25 = vadd.f32 %v1551_v8, %v4088_v43  ;;  %v1640_v53 = vpop.f32.mrf.mxu1 }
 0x2af   : > { %v4431_v49 = vpop.f32.mrf.mxu3 }
 0x2b0   : > { %5289 = vst [vmem:[#allocation69_spill] sm:$0xff] %v4431_v49  ;;  %v1641_v3 = vadd.f32 %v1640_v53, %v1552_v25  ;;  %1866 = vmatmul.bf16.gmra.mxu0 %v3516_v26  ;;  %v2949_v25 = vld [vmem:[%s5181_s1 + $0xd8] sm:$0xf0]  ;;  %v5292_v49 = vld [vmem:[#allocation3_spill] sm:$0xff] }
 0x2b1   : > { %1955 = vmatmul.bf16.gmra.mxu1 %v3518_v27 }
 0x2b2   : > { %v2281_v1 = vadd.f32 %v1641_v3, %v3950_v2  ;;  %v3142_v2 = vld [vmem:[%s5181_s1 + $0xcc] sm:$0xf] }
 0x2b4   : > { %2409 = vst [vmem:[%s4111_s24 + $0x240] sm:$0xff] %v2281_v1  ;;  %v2952_v1 = vor.u32 %v3142_v2, %v2949_v25  ;;  %v5293_v2 = vld [vmem:[#allocation4_spill] sm:$0xff] }
 0x2b5   : > { %v1553_v22 = vpop.f32.mrf.mxu0 }
 0x2b6   : > { %v4438_v13 = vpop.f32.mrf.mxu2  ;;  %v1554_v33 = vadd.f32 %v1553_v22, %v4088_v43  ;;  %v1642_v42 = vpop.f32.mrf.mxu1  ;;  %v3077_v22 = vld [vmem:[%s5181_s1 + $0x1d8] sm:$0xf0]  ;;  %2032 = vmatpush.bf16.msrb.mxu2 %v2952_v1 }
 0x2b7   : > { %v4440_v50 = vpop.f32.mrf.mxu3 }
 0x2b8   : > { %5290 = vst [vmem:[#allocation70_spill] sm:$0xff] %v4440_v50  ;;  %v1643_v40 = vadd.f32 %v1642_v42, %v1554_v33 }
 0x2ba   : > { %v2285_v8 = vadd.f32 %v1643_v40, %v3960_v54  ;;  %v3174_v54 = vld [vmem:[%s5181_s1 + $0x1cc] sm:$0xf] }
 0x2bb   : > { %1683 = vmatmul.bf16.vlgmr.msra.gmra.mxu2 %v3506_v20  ;;  %1772 = vmatmul.bf16.vlgmr.msra.gmra.mxu3 %v3508_v21 }
 0x2bc   : > { %2413 = vst [vmem:[%s4111_s24 + $0x260] sm:$0xff] %v2285_v8  ;;  %v3080_v8 = vor.u32 %v3174_v54, %v3077_v22 }
 0x2bd   : > { %v1556_v3 = vpop.f32.mrf.mxu0 }
 0x2be   : > { %v4453_v53 = vpop.f32.mrf.mxu2  ;;  %v1557_v42 = vadd.f32 %v1556_v3, %v4088_v43  ;;  %v1645_v40 = vpop.f32.mrf.mxu1  ;;  %2121 = vmatpush.bf16.msrb.mxu3 %v3080_v8 }
 0x2bf   : > { %v4461_v33 = vpop.f32.mrf.mxu3 }
 0x2c0   : > { %5291 = vst [vmem:[#allocation71_spill] sm:$0xff] %v4461_v33  ;;  %v1646_v50 = vadd.f32 %v1645_v40, %v1557_v42  ;;  %1871 = vmatmul.bf16.gmra.mxu0 %v5292_v49 }
 0x2c1   : > { %1960 = vmatmul.bf16.gmra.mxu1 %v5293_v2 }
 0x2c2   : > { %v2289_v25 = vadd.f32 %v1646_v50, %v3984_v48 }
 0x2c4   : > { %2417 = vst [vmem:[%s4111_s24 + $0x280] sm:$0xff] %v2289_v25  ;;  %v5296_v25 = vld [vmem:[#allocation5_spill] sm:$0xff] }
 0x2c5   : > { %v1558_v38 = vpop.f32.mrf.mxu0 }
 0x2c6   : > { %v4468_v61 = vpop.f32.mrf.mxu2  ;;  %v1559_v3 = vadd.f32 %v1558_v38, %v4088_v43  ;;  %v1647_v54 = vpop.f32.mrf.mxu1 }
 0x2c7   : > { %v4470_v39 = vpop.f32.mrf.mxu3 }
 0x2c8   : > { %5294 = vst [vmem:[#allocation72_spill] sm:$0xff] %v4470_v39  ;;  %v1648_v1 = vadd.f32 %v1647_v54, %v1559_v3  ;;  %v5297_v3 = vld [vmem:[#allocation6_spill] sm:$0xff] }
 0x2ca   : > { %v2293_v22 = vadd.f32 %v1648_v1, %v3994_v29  ;;  %v5298_v29 = vld [vmem:[#allocation32_spill] sm:$0xff] }
 0x2cb   : > { %1688 = vmatmul.bf16.gmra.mxu2 %v3516_v26  ;;  %1777 = vmatmul.bf16.gmra.mxu3 %v3518_v27 }
 0x2cc   : > { %2421 = vst [vmem:[%s4111_s24 + $0x2a0] sm:$0xff] %v2293_v22 }
 0x2cd   : > { %v1561_v48 = vpop.f32.mrf.mxu0 }
 0x2ce   : > { %v4477_v42 = vpop.f32.mrf.mxu2  ;;  %v1562_v40 = vadd.f32 %v1561_v48, %v4088_v43  ;;  %v1650_v8 = vpop.f32.mrf.mxu1  ;;  %v5300_v48 = vld [vmem:[#allocation35_spill] sm:$0xff] }
 0x2cf   : > { %v4479_v50 = vpop.f32.mrf.mxu3 }
 0x2d0   : > { %5295 = vst [vmem:[#allocation73_spill] sm:$0xff] %v4479_v50  ;;  %v1651_v38 = vadd.f32 %v1650_v8, %v1562_v40  ;;  %1876 = vmatmul.bf16.gmra.mxu0 %v5296_v25  ;;  %v3138_v40 = vld [vmem:[%s5181_s1 + $0xac] sm:$0xf]  ;;  %v2933_v8 = vld [vmem:[%s5181_s1 + $0xb8] sm:$0xf0] }
 0x2d1   : > { %1965 = vmatmul.bf16.gmra.mxu1 %v5297_v3 }
 0x2d2   : > { %v2297_v54 = vadd.f32 %v1651_v38, %v5298_v29 }
 0x2d4   : > { %2425 = vst [vmem:[%s4111_s24 + $0x2c0] sm:$0xff] %v2297_v54 }
 0x2d5   : > { %v1563_v22 = vpop.f32.mrf.mxu0 }
 0x2d6   : > { %v4486_v1 = vpop.f32.mrf.mxu2  ;;  %v1564_v33 = vadd.f32 %v1563_v22, %v4088_v43  ;;  %v1652_v50 = vpop.f32.mrf.mxu1 }
 0x2d7   : > { %v4488_v39 = vpop.f32.mrf.mxu3 }
 0x2d8   : > { %5299 = vst [vmem:[#allocation32_spill] sm:$0xff] %v4488_v39  ;;  %v1653_v62 = vadd.f32 %v1652_v50, %v1564_v33  ;;  %v2936_v33 = vor.u32 %v3138_v40, %v2933_v8  ;;  %v5303_v40 = vld [vmem:[#allocation8_spill] sm:$0xff]  ;;  %v5304_v8 = vld [vmem:[#allocation38_spill] sm:$0xff] }
 0x2da   : > { %v2301_v60 = vadd.f32 %v1653_v62, %v5300_v48  ;;  %v3170_v62 = vld [vmem:[%s5181_s1 + $0x1ac] sm:$0xf]  ;;  %2033 = vmatpush.bf16.msrb.mxu2 %v2936_v33 }
 0x2db   : > { %1693 = vmatmul.bf16.gmra.mxu2 %v5292_v49  ;;  %1782 = vmatmul.bf16.gmra.mxu3 %v5293_v2 }
 0x2dc   : > { %2429 = vst [vmem:[%s4111_s24 + $0x2e0] sm:$0xff] %v2301_v60  ;;  %v3061_v60 = vld [vmem:[%s5181_s1 + $0x1b8] sm:$0xf0] }
 0x2dd   : > { %v1566_v29 = vpop.f32.mrf.mxu0  ;;  %v3064_v48 = vor.u32 %v3170_v62, %v3061_v60  ;;  %v5306_v60 = vld [vmem:[#allocation41_spill] sm:$0xff] }
 0x2de   : > { %v4501_v38 = vpop.f32.mrf.mxu2  ;;  %v1567_v54 = vadd.f32 %v1566_v29, %v4088_v43  ;;  %v1655_v22 = vpop.f32.mrf.mxu1 }
 0x2df   : > { %v4509_v50 = vpop.f32.mrf.mxu3  ;;  %2122 = vmatpush.bf16.msrb.mxu3 %v3064_v48 }
 0x2e0   : > { %5301 = vst [vmem:[#allocation35_spill] sm:$0xff] %v4509_v50  ;;  %v1656_v39 = vadd.f32 %v1655_v22, %v1567_v54  ;;  %1881 = vmatmul.bf16.gmra.mxu0 %v5302_v51 }
 0x2e1   : > { %1970 = vmatmul.bf16.gmra.mxu1 %v5303_v40 }
 0x2e2   : > { %v2305_v56 = vadd.f32 %v1656_v39, %v5304_v8 }
 0x2e4   : > { %2433 = vst [vmem:[%s4111_s24 + $0x300] sm:$0xff] %v2305_v56 }
 0x2e5   : > { %v1568_v2 = vpop.f32.mrf.mxu0 }
 0x2e6   : > { %v4516_v41 = vpop.f32.mrf.mxu2  ;;  %v1569_v29 = vadd.f32 %v1568_v2, %v4088_v43  ;;  %v1657_v62 = vpop.f32.mrf.mxu1 }
 0x2e7   : > { %v4518_v49 = vpop.f32.mrf.mxu3 }
 0x2e8   : > { %5305 = vst [vmem:[#allocation38_spill] sm:$0xff] %v4518_v49  ;;  %v1658_v33 = vadd.f32 %v1657_v62, %v1569_v29  ;;  %v5309_v49 = vld [vmem:[#allocation9_spill] sm:$0xff]  ;;  %v5310_v29 = vld [vmem:[#allocation10_spill] sm:$0xff]  ;;  %v5311_v62 = vld [vmem:[#allocation44_spill] sm:$0xff] }
 0x2ea   : > { %v2309_v54 = vadd.f32 %v1658_v33, %v5306_v60 }
 0x2eb   : > { %1698 = vmatmul.bf16.gmra.mxu2 %v5296_v25  ;;  %1787 = vmatmul.bf16.gmra.mxu3 %v5297_v3 }
 0x2ec   : > { %2437 = vst [vmem:[%s4111_s24 + $0x320] sm:$0xff] %v2309_v54 }
 0x2ed   : > { %v1571_v56 = vpop.f32.mrf.mxu0 }
 0x2ee   : > { %v4525_v22 = vpop.f32.mrf.mxu2  ;;  %v1572_v48 = vadd.f32 %v1571_v56, %v4088_v43  ;;  %v1660_v8 = vpop.f32.mrf.mxu1  ;;  %v5314_v56 = vld [vmem:[#allocation47_spill] sm:$0xff] }
 0x2ef   : > { %5307 = vst [vmem:[#allocation41_spill] sm:$0xff] %v4525_v22  ;;  %v4527_v39 = vpop.f32.mrf.mxu3 }
 0x2f0   : > { %5308 = vst [vmem:[#allocation74_spill] sm:$0xff] %v4527_v39  ;;  %v1661_v2 = vadd.f32 %v1660_v8, %v1572_v48  ;;  %1886 = vmatmul.bf16.gmra.mxu0 %v5309_v49  ;;  %v3134_v48 = vld [vmem:[%s5181_s1 + $0x8c] sm:$0xf]  ;;  %v2917_v8 = vld [vmem:[%s5181_s1 + $0x98] sm:$0xf0] }
 0x2f1   : > { %1975 = vmatmul.bf16.gmra.mxu1 %v5310_v29 }
 0x2f2   : > { %v2313_v33 = vadd.f32 %v1661_v2, %v5311_v62 }
 0x2f4   : > { %2441 = vst [vmem:[%s4111_s24 + $0x340] sm:$0xff] %v2313_v33 }
 0x2f5   : > { %v1573_v54 = vpop.f32.mrf.mxu0 }
 0x2f6   : > { %v4534_v60 = vpop.f32.mrf.mxu2  ;;  %v1574_v3 = vadd.f32 %v1573_v54, %v4088_v43  ;;  %v1662_v39 = vpop.f32.mrf.mxu1 }
 0x2f7   : > { %5312 = vst [vmem:[#allocation9_spill] sm:$0xff] %v4534_v60  ;;  %v4536_v50 = vpop.f32.mrf.mxu3 }
 0x2f8   : > { %5313 = vst [vmem:[#allocation44_spill] sm:$0xff] %v4536_v50  ;;  %v1663_v25 = vadd.f32 %v1662_v39, %v1574_v3  ;;  %v2920_v3 = vor.u32 %v3134_v48, %v2917_v8  ;;  %v5318_v48 = vld [vmem:[#allocation12_spill] sm:$0xff] }
 0x2fa   : > { %v2317_v22 = vadd.f32 %v1663_v25, %v5314_v56  ;;  %v3166_v25 = vld [vmem:[%s5181_s1 + $0x18c] sm:$0xf]  ;;  %2034 = vmatpush.bf16.msrb.mxu2 %v2920_v3 }
 0x2fb   : > { %1703 = vmatmul.bf16.gmra.mxu2 %v5302_v51  ;;  %1792 = vmatmul.bf16.gmra.mxu3 %v5303_v40  ;;  %v5317_v40 = vld [vmem:[#allocation11_spill] sm:$0xff] }
 0x2fc   : > { %2445 = vst [vmem:[%s4111_s24 + $0x360] sm:$0xff] %v2317_v22  ;;  %v3045_v22 = vld [vmem:[%s5181_s1 + $0x198] sm:$0xf0] }
 0x2fd   : > { %v1576_v62 = vpop.f32.mrf.mxu0  ;;  %v3048_v56 = vor.u32 %v3166_v25, %v3045_v22 }
 0x2fe   : > { %v4549_v2 = vpop.f32.mrf.mxu2  ;;  %v1577_v33 = vadd.f32 %v1576_v62, %v4088_v43  ;;  %v1665_v54 = vpop.f32.mrf.mxu1 }
 0x2ff   : > { %5315 = vst [vmem:[#allocation47_spill] sm:$0xff] %v4549_v2  ;;  %v4557_v39 = vpop.f32.mrf.mxu3  ;;  %2123 = vmatpush.bf16.msrb.mxu3 %v3048_v56 }
 0x300   : > { %5316 = vst [vmem:[#allocation75_spill] sm:$0xff] %v4557_v39  ;;  %v1666_v50 = vadd.f32 %v1665_v54, %v1577_v33  ;;  %1891 = vmatmul.bf16.gmra.mxu0 %v5317_v40 }
 0x301   : > { %1980 = vmatmul.bf16.gmra.mxu1 %v5318_v48 }
 0x302   : > { %v2321_v8 = vadd.f32 %v1666_v50, %v4100_v63 }
 0x304   : > { %2449 = vst [vmem:[%s4111_s24 + $0x380] sm:$0xff] %v2321_v8  ;;  %v5321_v8 = vld [vmem:[#allocation13_spill] sm:$0xff] }
 0x305   : > { %v1578_v2 = vpop.f32.mrf.mxu0 }
 0x306   : > { %v4564_v51 = vpop.f32.mrf.mxu2  ;;  %v1579_v62 = vadd.f32 %v1578_v2, %v4088_v43  ;;  %v1667_v25 = vpop.f32.mrf.mxu1 }
 0x307   : > { %v4566_v60 = vpop.f32.mrf.mxu3 }
 0x308   : > { %5319 = vst [vmem:[#allocation76_spill] sm:$0xff] %v4566_v60  ;;  %v1668_v3 = vadd.f32 %v1667_v25, %v1579_v62  ;;  %v5322_v62 = vld [vmem:[#allocation14_spill] sm:$0xff] }
 0x30a   : > { %v2325_v22 = vadd.f32 %v1668_v3, %v4114_v57 }
 0x30b   : > { %1708 = vmatmul.bf16.gmra.mxu2 %v5309_v49  ;;  %1797 = vmatmul.bf16.gmra.mxu3 %v5310_v29 }
 0x30c   : > { %2453 = vst [vmem:[%s4111_s24 + $0x3a0] sm:$0xff] %v2325_v22 }
 0x30d   : > { %v1581_v63 = vpop.f32.mrf.mxu0 }
 0x30e   : > { %v4573_v33 = vpop.f32.mrf.mxu2  ;;  %v1582_v54 = vadd.f32 %v1581_v63, %v4088_v43  ;;  %v1670_v56 = vpop.f32.mrf.mxu1 }
 0x30f   : > { %v4575_v50 = vpop.f32.mrf.mxu3 }
 0x310   : > { %5320 = vst [vmem:[#allocation77_spill] sm:$0xff] %v4575_v50  ;;  %v1671_v2 = vadd.f32 %v1670_v56, %v1582_v54  ;;  %1896 = vmatmul.bf16.gmra.mxu0 %v5321_v8  ;;  %v5324_v54 = vld [vmem:[#allocation50_spill] sm:$0xff] }
 0x311   : > { %1985 = vmatmul.bf16.gmra.mxu1 %v5322_v62  ;;  %v4591_v56 = vperm.slane %v5324_v54, 2 }
 0x312   : > { %v2329_v57 = vadd.f32 %v1671_v2, %v4125_v24  ;;  %v3130_v24 = vld [vmem:[%s5181_s1 + $0x6c] sm:$0xf]  ;;  %v3029_v2 = vld [vmem:[%s5181_s1 + $0x178] sm:$0xf0] }
 0x314   : > { %2457 = vst [vmem:[%s4111_s24 + $0x3c0] sm:$0xff] %v2329_v57 }
 0x315   : > { %v1583_v3 = vpop.f32.mrf.mxu0 }
 0x316   : > { %v4582_v25 = vpop.f32.mrf.mxu2  ;;  %v1584_v60 = vadd.f32 %v1583_v3, %v4088_v43  ;;  %v1672_v50 = vpop.f32.mrf.mxu1  ;;  %v2901_v43 = vld [vmem:[%s5181_s1 + $0x78] sm:$0xf0] }
 0x317   : > { %v4584_v22 = vpop.f32.mrf.mxu3 }
 0x318   : > { %5323 = vst [vmem:[#allocation13_spill] sm:$0xff] %v4584_v22  ;;  %v1673_v39 = vadd.f32 %v1672_v50, %v1584_v60  ;;  %v3162_v50 = vld [vmem:[%s5181_s1 + $0x16c] sm:$0xf] }
 0x319   : > { %v3032_v22 = vor.u32 %v3162_v50, %v3029_v2 }
 0x31a   : > { %v2333_v63 = vadd.f32 %v1673_v39, %v4134_v6  ;;  %v2904_v39 = vor.u32 %v3130_v24, %v2901_v43 }
 0x31b   : > { %1713 = vmatmul.bf16.gmra.mxu2 %v5317_v40  ;;  %1802 = vmatmul.bf16.gmra.mxu3 %v5318_v48 }
 0x31c   : > { %2461 = vst [vmem:[%s4111_s24 + $0x3e0] sm:$0xff] %v2333_v63  ;;  %2035 = vmatpush.bf16.msrb.mxu2 %v2904_v39  ;;  %2124 = vmatpush.bf16.msrb.mxu3 %v3032_v22 }
 0x31d   : > { %v1862_v6 = vpop.f32.mrf.mxu0 }
 0x31e   : > { %v4600_v60 = vpop.f32.mrf.mxu2  ;;  %v1863_v3 = vadd.f32 %v1862_v6, %v4591_v56  ;;  %v1951_v63 = vpop.f32.mrf.mxu1 }
 0x31f   : > { %v4608_v57 = vpop.f32.mrf.mxu3 }
 0x320   : > { %5325 = vst [vmem:[#allocation14_spill] sm:$0xff] %v4608_v57  ;;  %v1952_v48 = vadd.f32 %v1951_v63, %v1863_v3  ;;  %1901 = vmatmul.bf16.gmra.mxu0 %v3586_v4 }
 0x321   : > { %1990 = vmatmul.bf16.gmra.mxu1 %v3588_v5 }
 0x322   : > { %v2211_v24 = vadd.f32 %v1952_v48, %v4151_v44 }
 0x324   : > { %2339 = vst [vmem:[%s4111_s24 + $0x10] sm:$0xff] %v2211_v24 }
 0x325   : > { %v1864_v40 = vpop.f32.mrf.mxu0 }
 0x326   : > { %v4615_v43 = vpop.f32.mrf.mxu2  ;;  %v1865_v6 = vadd.f32 %v1864_v40, %v4591_v56  ;;  %v1953_v50 = vpop.f32.mrf.mxu1 }
 0x327   : > { %v4617_v29 = vpop.f32.mrf.mxu3 }
 0x328   : > { %5326 = vst [vmem:[#allocation50_spill] sm:$0xff] %v4617_v29  ;;  %v1954_v39 = vadd.f32 %v1953_v50, %v1865_v6 }
 0x32a   : > { %v2215_v2 = vadd.f32 %v1954_v39, %v4166_v35 }
 0x32b   : > { %1718 = vmatmul.bf16.gmra.mxu2 %v5321_v8  ;;  %1807 = vmatmul.bf16.gmra.mxu3 %v5322_v62 }
 0x32c   : > { %2343 = vst [vmem:[%s4111_s24 + $0x30] sm:$0xff] %v2215_v2 }
 0x32d   : > { %v1867_v44 = vpop.f32.mrf.mxu0 }
 0x32e   : > { %v4624_v22 = vpop.f32.mrf.mxu2  ;;  %v1868_v3 = vadd.f32 %v1867_v44, %v4591_v56  ;;  %v1956_v63 = vpop.f32.mrf.mxu1 }
 0x32f   : > { %v4626_v48 = vpop.f32.mrf.mxu3 }
 0x330   : > { %5327 = vst [vmem:[#allocation78_spill] sm:$0xff] %v4626_v48  ;;  %v1957_v40 = vadd.f32 %v1956_v63, %v1868_v3  ;;  %1906 = vmatmul.bf16.gmra.mxu0 %v3598_v17  ;;  %v4642_v3 = vperm.slane %v5324_v54, 1 }
 0x331   : > { %1995 = vmatmul.bf16.gmra.mxu1 %v3600_v18 }
 0x332   : > { %v2219_v35 = vadd.f32 %v1957_v40, %v4177_v59  ;;  %v3126_v40 = vld [vmem:[%s5181_s1 + $0x4c] sm:$0xf] }
 0x334   : > { %2347 = vst [vmem:[%s4111_s24 + $0x50] sm:$0xff] %v2219_v35  ;;  %v2885_v35 = vld [vmem:[%s5181_s1 + $0x58] sm:$0xf0] }
 0x335   : > { %v1869_v6 = vpop.f32.mrf.mxu0 }
 0x336   : > { %v4633_v24 = vpop.f32.mrf.mxu2  ;;  %v1870_v39 = vadd.f32 %v1869_v6, %v4591_v56  ;;  %v1958_v2 = vpop.f32.mrf.mxu1 }
 0x337   : > { %v4635_v50 = vpop.f32.mrf.mxu3 }
 0x338   : > { %5328 = vst [vmem:[#allocation79_spill] sm:$0xff] %v4635_v50  ;;  %v1959_v48 = vadd.f32 %v1958_v2, %v1870_v39  ;;  %v2888_v2 = vor.u32 %v3126_v40, %v2885_v35 }
 0x33a   : > { %v2223_v44 = vadd.f32 %v1959_v48, %v4186_v7  ;;  %v3158_v7 = vld [vmem:[%s5181_s1 + $0x14c] sm:$0xf]  ;;  %2036 = vmatpush.bf16.msrb.mxu2 %v2888_v2  ;;  %v5330_v2 = vld [vmem:[#allocation18_spill] sm:$0xff] }
 0x33b   : > { %1723 = vmatmul.bf16.gmra.mxu2 %v3586_v4  ;;  %1812 = vmatmul.bf16.gmra.mxu3 %v3588_v5 }
 0x33c   : > { %2351 = vst [vmem:[%s4111_s24 + $0x70] sm:$0xff] %v2223_v44  ;;  %v3013_v44 = vld [vmem:[%s5181_s1 + $0x158] sm:$0xf0] }
 0x33d   : > { %v1872_v63 = vpop.f32.mrf.mxu0  ;;  %v3016_v50 = vor.u32 %v3158_v7, %v3013_v44 }
 0x33e   : > { %v1684_v59 = vpop.f32.mrf.mxu2  ;;  %v1873_v6 = vadd.f32 %v1872_v63, %v4591_v56  ;;  %v1961_v39 = vpop.f32.mrf.mxu1 }
 0x33f   : > { %v1685_v48 = vadd.f32 %v1684_v59, %v4642_v3  ;;  %v1773_v54 = vpop.f32.mrf.mxu3  ;;  %2125 = vmatpush.bf16.msrb.mxu3 %v3016_v50  ;;  %v5329_v59 = vld [vmem:[#allocation16_spill] sm:$0xff] }
 0x340   : > { %v1962_v57 = vadd.f32 %v1961_v39, %v1873_v6  ;;  %1911 = vmatmul.bf16.gmra.mxu0 %v3610_v36 }
 0x341   : > { %v1774_v29 = vadd.f32 %v1773_v54, %v1685_v48  ;;  %2000 = vmatmul.bf16.gmra.mxu1 %v3612_v37 }
 0x342   : > { %v2227_v63 = vadd.f32 %v1962_v57, %v4203_v16 }
 0x343   : > { %v2210_v5 = vadd.f32 %v1774_v29, %v5329_v59 }
 0x344   : > { %2355 = vst [vmem:[%s4111_s24 + $0x90] sm:$0xff] %v2227_v63 }
 0x345   : > { %2338 = vst [vmem:[%s4111_s24 + $0x8] sm:$0xff] %v2210_v5  ;;  %v1874_v35 = vpop.f32.mrf.mxu0 }
 0x346   : > { %v1686_v40 = vpop.f32.mrf.mxu2  ;;  %v1875_v54 = vadd.f32 %v1874_v35, %v4591_v56  ;;  %v1963_v6 = vpop.f32.mrf.mxu1 }
 0x347   : > { %v1687_v7 = vadd.f32 %v1686_v40, %v4642_v3  ;;  %v1775_v48 = vpop.f32.mrf.mxu3 }
 0x348   : > { %v1964_v44 = vadd.f32 %v1963_v6, %v1875_v54 }
 0x349   : > { %v1776_v39 = vadd.f32 %v1775_v48, %v1687_v7 }
 0x34a   : > { %v2231_v29 = vadd.f32 %v1964_v44, %v4236_v0  ;;  %v5331_v0 = vld [vmem:[#allocation20_spill] sm:$0xff] }
 0x34b   : > { %v2214_v50 = vadd.f32 %v1776_v39, %v5330_v2  ;;  %1728 = vmatmul.bf16.gmra.mxu2 %v3598_v17  ;;  %1817 = vmatmul.bf16.gmra.mxu3 %v3600_v18 }
 0x34c   : > { %2359 = vst [vmem:[%s4111_s24 + $0xb0] sm:$0xff] %v2231_v29 }
 0x34d   : > { %2342 = vst [vmem:[%s4111_s24 + $0x28] sm:$0xff] %v2214_v50  ;;  %v1877_v16 = vpop.f32.mrf.mxu0 }
 0x34e   : > { %v1689_v5 = vpop.f32.mrf.mxu2  ;;  %v1878_v63 = vadd.f32 %v1877_v16, %v4591_v56  ;;  %v1966_v40 = vpop.f32.mrf.mxu1 }
 0x34f   : > { %v1690_v57 = vadd.f32 %v1689_v5, %v4642_v3  ;;  %v1778_v59 = vpop.f32.mrf.mxu3 }
 0x350   : > { %v1967_v7 = vadd.f32 %v1966_v40, %v1878_v63  ;;  %1916 = vmatmul.bf16.gmra.mxu0 %v3622_v55 }
 0x351   : > { %v1779_v35 = vadd.f32 %v1778_v59, %v1690_v57  ;;  %2005 = vmatmul.bf16.gmra.mxu1 %v3624_v58  ;;  %v5332_v57 = vld [vmem:[#allocation22_spill] sm:$0xff] }
 0x352   : > { %v2235_v54 = vadd.f32 %v1967_v7, %v4271_v32  ;;  %v2869_v7 = vld [vmem:[%s5181_s1 + $0x38] sm:$0xf0] }
 0x353   : > { %v2218_v48 = vadd.f32 %v1779_v35, %v5331_v0  ;;  %v3122_v35 = vld [vmem:[%s5181_s1 + $0x2c] sm:$0xf] }
 0x354   : > { %2363 = vst [vmem:[%s4111_s24 + $0xd0] sm:$0xff] %v2235_v54 }
 0x355   : > { %2346 = vst [vmem:[%s4111_s24 + $0x48] sm:$0xff] %v2218_v48  ;;  %v1879_v39 = vpop.f32.mrf.mxu0 }
 0x356   : > { %v1691_v6 = vpop.f32.mrf.mxu2  ;;  %v1880_v50 = vadd.f32 %v1879_v39, %v4591_v56  ;;  %v1968_v29 = vpop.f32.mrf.mxu1  ;;  %v3154_v39 = vld [vmem:[%s5181_s1 + $0x12c] sm:$0xf] }
 0x357   : > { %v1692_v44 = vadd.f32 %v1691_v6, %v4642_v3  ;;  %v1780_v2 = vpop.f32.mrf.mxu3  ;;  %v2872_v6 = vor.u32 %v3122_v35, %v2869_v7 }
 0x358   : > { %v1969_v16 = vadd.f32 %v1968_v29, %v1880_v50 }
 0x359   : > { %v1781_v5 = vadd.f32 %v1780_v2, %v1692_v44  ;;  %v2997_v44 = vld [vmem:[%s5181_s1 + $0x138] sm:$0xf0]  ;;  %2037 = vmatpush.bf16.msrb.mxu2 %v2872_v6 }
 0x35a   : > { %v2239_v63 = vadd.f32 %v1969_v16, %v4304_v52  ;;  %v3000_v2 = vor.u32 %v3154_v39, %v2997_v44 }
 0x35b   : > { %v2222_v59 = vadd.f32 %v1781_v5, %v5332_v57  ;;  %1733 = vmatmul.bf16.gmra.mxu2 %v3610_v36  ;;  %1822 = vmatmul.bf16.gmra.mxu3 %v3612_v37  ;;  %v5333_v5 = vld [vmem:[#allocation24_spill] sm:$0xff] }
 0x35c   : > { %2367 = vst [vmem:[%s4111_s24 + $0xf0] sm:$0xff] %v2239_v63  ;;  %2126 = vmatpush.bf16.msrb.mxu3 %v3000_v2 }
 0x35d   : > { %2350 = vst [vmem:[%s4111_s24 + $0x68] sm:$0xff] %v2222_v59  ;;  %v1882_v40 = vpop.f32.mrf.mxu0 }
 0x35e   : > { %v1694_v32 = vpop.f32.mrf.mxu2  ;;  %v1883_v48 = vadd.f32 %v1882_v40, %v4591_v56  ;;  %v1971_v54 = vpop.f32.mrf.mxu1 }
 0x35f   : > { %v1695_v0 = vadd.f32 %v1694_v32, %v4642_v3  ;;  %v1783_v52 = vpop.f32.mrf.mxu3 }
 0x360   : > { %v1972_v29 = vadd.f32 %v1971_v54, %v1883_v48  ;;  %1921 = vmatmul.bf16.gmra.mxu0 %v3634_v10  ;;  %v5334_v48 = vld [vmem:[#allocation26_spill] sm:$0xff] }
 0x361   : > { %v1784_v50 = vadd.f32 %v1783_v52, %v1695_v0  ;;  %2010 = vmatmul.bf16.gmra.mxu1 %v3636_v11 }
 0x362   : > { %v2243_v57 = vadd.f32 %v1972_v29, %v4345_v9 }
 0x363   : > { %v2226_v16 = vadd.f32 %v1784_v50, %v5333_v5 }
 0x364   : > { %2371 = vst [vmem:[%s4111_s24 + $0x110] sm:$0xff] %v2243_v57 }
 0x365   : > { %2354 = vst [vmem:[%s4111_s24 + $0x88] sm:$0xff] %v2226_v16  ;;  %v1884_v63 = vpop.f32.mrf.mxu0 }
 0x366   : > { %v1696_v59 = vpop.f32.mrf.mxu2  ;;  %v1885_v35 = vadd.f32 %v1884_v63, %v4591_v56  ;;  %v1973_v7 = vpop.f32.mrf.mxu1 }
 0x367   : > { %v1697_v32 = vadd.f32 %v1696_v59, %v4642_v3  ;;  %v1785_v40 = vpop.f32.mrf.mxu3 }
 0x368   : > { %v1974_v52 = vadd.f32 %v1973_v7, %v1885_v35 }
 0x369   : > { %v1786_v0 = vadd.f32 %v1785_v40, %v1697_v32 }
 0x36a   : > { %v2247_v6 = vadd.f32 %v1974_v52, %v4366_v19  ;;  %v5335_v19 = vld [vmem:[#allocation28_spill] sm:$0xff] }
 0x36b   : > { %v2230_v54 = vadd.f32 %v1786_v0, %v5334_v48  ;;  %1738 = vmatmul.bf16.gmra.mxu2 %v3622_v55  ;;  %1827 = vmatmul.bf16.gmra.mxu3 %v3624_v58 }
 0x36c   : > { %2375 = vst [vmem:[%s4111_s24 + $0x130] sm:$0xff] %v2247_v6 }
 0x36d   : > { %2358 = vst [vmem:[%s4111_s24 + $0xa8] sm:$0xff] %v2230_v54  ;;  %v1887_v39 = vpop.f32.mrf.mxu0  ;;  %v5336_v54 = vld [vmem:[#allocation30_spill] sm:$0xff] }
 0x36e   : > { %v1699_v9 = vpop.f32.mrf.mxu2  ;;  %v1888_v50 = vadd.f32 %v1887_v39, %v4591_v56  ;;  %v1976_v29 = vpop.f32.mrf.mxu1 }
 0x36f   : > { %v1700_v44 = vadd.f32 %v1699_v9, %v4642_v3  ;;  %v1788_v2 = vpop.f32.mrf.mxu3 }
 0x370   : > { %v1977_v16 = vadd.f32 %v1976_v29, %v1888_v50  ;;  %1926 = vmatmul.bf16.gmra.mxu0 %v3646_v31 }
 0x371   : > { %v1789_v5 = vadd.f32 %v1788_v2, %v1700_v44  ;;  %2015 = vmatmul.bf16.gmra.mxu1 %v3648_v34  ;;  %v3118_v44 = vld [vmem:[%s5181_s1 + $0xc] sm:$0xf]  ;;  %v2853_v2 = vld [vmem:[%s5181_s1 + $0x18] sm:$0xf0] }
 0x372   : > { %v2251_v59 = vadd.f32 %v1977_v16, %v4377_v45  ;;  %v2856_v16 = vor.u32 %v3118_v44, %v2853_v2  ;;  %v5338_v44 = vld [vmem:[#allocation36_spill] sm:$0xff] }
 0x373   : > { %v2234_v57 = vadd.f32 %v1789_v5, %v5335_v19  ;;  %v3150_v19 = vld [vmem:[%s5181_s1 + $0x10c] sm:$0xf] }
 0x374   : > { %2379 = vst [vmem:[%s4111_s24 + $0x150] sm:$0xff] %v2251_v59  ;;  %2038 = vmatpush.bf16.msrb.mxu2 %v2856_v16 }
 0x375   : > { %2362 = vst [vmem:[%s4111_s24 + $0xc8] sm:$0xff] %v2234_v57  ;;  %v1889_v32 = vpop.f32.mrf.mxu0  ;;  %v2981_v57 = vld [vmem:[%s5181_s1 + $0x118] sm:$0xf0] }
 0x376   : > { %v1701_v63 = vpop.f32.mrf.mxu2  ;;  %v1890_v7 = vadd.f32 %v1889_v32, %v4591_v56  ;;  %v1978_v0 = vpop.f32.mrf.mxu1  ;;  %v2984_v59 = vor.u32 %v3150_v19, %v2981_v57 }
 0x377   : > { %v1702_v40 = vadd.f32 %v1701_v63, %v4642_v3  ;;  %v1790_v35 = vpop.f32.mrf.mxu3 }
 0x378   : > { %v1979_v48 = vadd.f32 %v1978_v0, %v1890_v7  ;;  %2127 = vmatpush.bf16.msrb.mxu3 %v2984_v59 }
 0x379   : > { %v1791_v52 = vadd.f32 %v1790_v35, %v1702_v40  ;;  %v5337_v40 = vld [vmem:[#allocation33_spill] sm:$0xff] }
 0x37a   : > { %v2255_v9 = vadd.f32 %v1979_v48, %v4386_v23 }
 0x37b   : > { %v2238_v6 = vadd.f32 %v1791_v52, %v5336_v54  ;;  %1743 = vmatmul.bf16.gmra.mxu2 %v3634_v10  ;;  %1832 = vmatmul.bf16.gmra.mxu3 %v3636_v11 }
 0x37c   : > { %2383 = vst [vmem:[%s4111_s24 + $0x170] sm:$0xff] %v2255_v9 }
 0x37d   : > { %2366 = vst [vmem:[%s4111_s24 + $0xe8] sm:$0xff] %v2238_v6  ;;  %v1892_v39 = vpop.f32.mrf.mxu0 }
 0x37e   : > { %v1704_v45 = vpop.f32.mrf.mxu2  ;;  %v1893_v29 = vadd.f32 %v1892_v39, %v4591_v56  ;;  %v1981_v5 = vpop.f32.mrf.mxu1 }
 0x37f   : > { %v1705_v50 = vadd.f32 %v1704_v45, %v4642_v3  ;;  %v1793_v23 = vpop.f32.mrf.mxu3 }
 0x380   : > { %v1982_v32 = vadd.f32 %v1981_v5, %v1893_v29  ;;  %1931 = vmatmul.bf16.gmra.mxu0 %v3682_v14 }
 0x381   : > { %v1794_v63 = vadd.f32 %v1793_v23, %v1705_v50  ;;  %2020 = vmatmul.bf16.gmra.mxu1 %v3684_v15 }
 0x382   : > { %v2259_v7 = vadd.f32 %v1982_v32, %v4403_v30 }
 0x383   : > { %v2242_v35 = vadd.f32 %v1794_v63, %v5337_v40 }
 0x384   : > { %2387 = vst [vmem:[%s4111_s24 + $0x190] sm:$0xff] %v2259_v7 }
 0x385   : > { %2370 = vst [vmem:[%s4111_s24 + $0x108] sm:$0xff] %v2242_v35  ;;  %v1894_v52 = vpop.f32.mrf.mxu0 }
 0x386   : > { %v1706_v0 = vpop.f32.mrf.mxu2  ;;  %v1895_v6 = vadd.f32 %v1894_v52, %v4591_v56  ;;  %v1983_v9 = vpop.f32.mrf.mxu1 }
 0x387   : > { %v1707_v48 = vadd.f32 %v1706_v0, %v4642_v3  ;;  %v1795_v54 = vpop.f32.mrf.mxu3 }
 0x388   : > { %v1984_v39 = vadd.f32 %v1983_v9, %v1895_v6  ;;  %v5340_v9 = vld [vmem:[#allocation42_spill] sm:$0xff] }
 0x389   : > { %v1796_v45 = vadd.f32 %v1795_v54, %v1707_v48 }
 0x38a   : > { %v2263_v50 = vadd.f32 %v1984_v39, %v4418_v28  ;;  %v5339_v28 = vld [vmem:[#allocation39_spill] sm:$0xff] }
 0x38b   : > { %v2246_v2 = vadd.f32 %v1796_v45, %v5338_v44  ;;  %1748 = vmatmul.bf16.gmra.mxu2 %v3646_v31  ;;  %1837 = vmatmul.bf16.gmra.mxu3 %v3648_v34 }
 0x38c   : > { %2391 = vst [vmem:[%s4111_s24 + $0x1b0] sm:$0xff] %v2263_v50 }
 0x38d   : > { %2374 = vst [vmem:[%s4111_s24 + $0x128] sm:$0xff] %v2246_v2  ;;  %v1897_v23 = vpop.f32.mrf.mxu0 }
 0x38e   : > { %v1709_v30 = vpop.f32.mrf.mxu2  ;;  %v1898_v16 = vadd.f32 %v1897_v23, %v4591_v56  ;;  %v1986_v19 = vpop.f32.mrf.mxu1 }
 0x38f   : > { %v1710_v29 = vadd.f32 %v1709_v30, %v4642_v3  ;;  %v1798_v5 = vpop.f32.mrf.mxu3 }
 0x390   : > { %v1987_v59 = vadd.f32 %v1986_v19, %v1898_v16  ;;  %1936 = vmatmul.bf16.gmra.mxu0 %v3694_v46  ;;  %v5341_v16 = vld [vmem:[#allocation45_spill] sm:$0xff] }
 0x391   : > { %v1799_v57 = vadd.f32 %v1798_v5, %v1710_v29  ;;  %2025 = vmatmul.bf16.gmra.mxu1 %v3696_v47 }
 0x392   : > { %v2267_v32 = vadd.f32 %v1987_v59, %v4429_v12 }
 0x393   : > { %v2250_v63 = vadd.f32 %v1799_v57, %v5339_v28 }
 0x394   : > { %2395 = vst [vmem:[%s4111_s24 + $0x1d0] sm:$0xff] %v2267_v32 }
 0x395   : > { %2378 = vst [vmem:[%s4111_s24 + $0x148] sm:$0xff] %v2250_v63  ;;  %v1899_v35 = vpop.f32.mrf.mxu0 }
 0x396   : > { %v1711_v40 = vpop.f32.mrf.mxu2  ;;  %v1900_v52 = vadd.f32 %v1899_v35, %v4591_v56  ;;  %v1988_v48 = vpop.f32.mrf.mxu1 }
 0x397   : > { %v1712_v7 = vadd.f32 %v1711_v40, %v4642_v3  ;;  %v1800_v0 = vpop.f32.mrf.mxu3 }
 0x398   : > { %v1989_v6 = vadd.f32 %v1988_v48, %v1900_v52 }
 0x399   : > { %v1801_v54 = vadd.f32 %v1800_v0, %v1712_v7  ;;  %v5342_v0 = vld [vmem:[#allocation48_spill] sm:$0xff] }
 0x39a   : > { %v2271_v39 = vadd.f32 %v1989_v6, %v4438_v13 }
 0x39b   : > { %v2254_v45 = vadd.f32 %v1801_v54, %v5340_v9  ;;  %1753 = vmatmul.bf16.gmra.mxu2 %v3682_v14  ;;  %1842 = vmatmul.bf16.gmra.mxu3 %v3684_v15 }
 0x39c   : > { %2399 = vst [vmem:[%s4111_s24 + $0x1f0] sm:$0xff] %v2271_v39 }
 0x39d   : > { %2382 = vst [vmem:[%s4111_s24 + $0x168] sm:$0xff] %v2254_v45  ;;  %v1902_v44 = vpop.f32.mrf.mxu0 }
 0x39e   : > { %v1714_v12 = vpop.f32.mrf.mxu2  ;;  %v1903_v30 = vadd.f32 %v1902_v44, %v4591_v56  ;;  %v1991_v23 = vpop.f32.mrf.mxu1 }
 0x39f   : > { %v1715_v2 = vadd.f32 %v1714_v12, %v4642_v3  ;;  %v1803_v50 = vpop.f32.mrf.mxu3 }
 0x3a0   : > { %v1992_v5 = vadd.f32 %v1991_v23, %v1903_v30 }
 0x3a1   : > { %v1804_v29 = vadd.f32 %v1803_v50, %v1715_v2  ;;  %v5343_v2 = vld [vmem:[#allocation17_spill] sm:$0xff] }
 0x3a2   : > { %v2275_v13 = vadd.f32 %v1992_v5, %v4453_v53 }
 0x3a3   : > { %v2258_v19 = vadd.f32 %v1804_v29, %v5341_v16 }
 0x3a4   : > { %2403 = vst [vmem:[%s4111_s24 + $0x210] sm:$0xff] %v2275_v13 }
 0x3a5   : > { %2386 = vst [vmem:[%s4111_s24 + $0x188] sm:$0xff] %v2258_v19  ;;  %v1904_v59 = vpop.f32.mrf.mxu0 }
 0x3a6   : > { %v1716_v57 = vpop.f32.mrf.mxu2  ;;  %v1905_v32 = vadd.f32 %v1904_v59, %v4591_v56  ;;  %v1993_v40 = vpop.f32.mrf.mxu1  ;;  %v5344_v59 = vld [vmem:[#allocation19_spill] sm:$0xff] }
 0x3a7   : > { %v1717_v28 = vadd.f32 %v1716_v57, %v4642_v3  ;;  %v1805_v63 = vpop.f32.mrf.mxu3 }
 0x3a8   : > { %v1994_v7 = vadd.f32 %v1993_v40, %v1905_v32 }
 0x3a9   : > { %v1806_v35 = vadd.f32 %v1805_v63, %v1717_v28 }
 0x3aa   : > { %v2279_v48 = vadd.f32 %v1994_v7, %v4468_v61 }
 0x3ab   : > { %v2262_v52 = vadd.f32 %v1806_v35, %v5342_v0  ;;  %1758 = vmatmul.bf16.gmra.mxu2 %v3694_v46  ;;  %1847 = vmatmul.bf16.gmra.mxu3 %v3696_v47 }
 0x3ac   : > { %2407 = vst [vmem:[%s4111_s24 + $0x230] sm:$0xff] %v2279_v48 }
 0x3ad   : > { %2390 = vst [vmem:[%s4111_s24 + $0x1a8] sm:$0xff] %v2262_v52  ;;  %v1907_v54 = vpop.f32.mrf.mxu0 }
 0x3ae   : > { %v1719_v53 = vpop.f32.mrf.mxu2  ;;  %v1908_v45 = vadd.f32 %v1907_v54, %v4591_v56  ;;  %v1996_v39 = vpop.f32.mrf.mxu1 }
 0x3af   : > { %v1720_v6 = vadd.f32 %v1719_v53, %v4642_v3  ;;  %v1808_v9 = vpop.f32.mrf.mxu3  ;;  %v5345_v53 = vld [vmem:[#allocation21_spill] sm:$0xff] }
 0x3b0   : > { %v1997_v44 = vadd.f32 %v1996_v39, %v1908_v45 }
 0x3b1   : > { %v1809_v12 = vadd.f32 %v1808_v9, %v1720_v6 }
 0x3b2   : > { %v2283_v61 = vadd.f32 %v1997_v44, %v4477_v42 }
 0x3b3   : > { %v2266_v50 = vadd.f32 %v1809_v12, %v5343_v2  ;;  %v5346_v2 = vld [vmem:[#allocation23_spill] sm:$0xff] }
 0x3b4   : > { %2411 = vst [vmem:[%s4111_s24 + $0x250] sm:$0xff] %v2283_v61 }
 0x3b5   : > { %2394 = vst [vmem:[%s4111_s24 + $0x1c8] sm:$0xff] %v2266_v50  ;;  %v1909_v23 = vpop.f32.mrf.mxu0 }
 0x3b6   : > { %v1721_v30 = vpop.f32.mrf.mxu2  ;;  %v1910_v16 = vadd.f32 %v1909_v23, %v4591_v56  ;;  %v1998_v19 = vpop.f32.mrf.mxu1 }
 0x3b7   : > { %v1722_v29 = vadd.f32 %v1721_v30, %v4642_v3  ;;  %v1810_v5 = vpop.f32.mrf.mxu3 }
 0x3b8   : > { %v1999_v57 = vadd.f32 %v1998_v19, %v1910_v16 }
 0x3b9   : > { %v1811_v13 = vadd.f32 %v1810_v5, %v1722_v29 }
 0x3ba   : > { %v2287_v63 = vadd.f32 %v1999_v57, %v4486_v1  ;;  %v5347_v57 = vld [vmem:[#allocation25_spill] sm:$0xff] }
 0x3bb   : > { %v2270_v28 = vadd.f32 %v1811_v13, %v5344_v59  ;;  %2039 = vmatmul.bf16.vlgmr.msrb.gmra.mxu2 %v3506_v20  ;;  %2128 = vmatmul.bf16.vlgmr.msrb.gmra.mxu3 %v3508_v21 }
 0x3bc   : > { %2415 = vst [vmem:[%s4111_s24 + $0x270] sm:$0xff] %v2287_v63 }
 0x3bd   : > { %2398 = vst [vmem:[%s4111_s24 + $0x1e8] sm:$0xff] %v2270_v28  ;;  %v1912_v32 = vpop.f32.mrf.mxu0 }
 0x3be   : > { %v1724_v42 = vpop.f32.mrf.mxu2  ;;  %v1913_v7 = vadd.f32 %v1912_v32, %v4591_v56  ;;  %v2001_v0 = vpop.f32.mrf.mxu1 }
 0x3bf   : > { %v1725_v40 = vadd.f32 %v1724_v42, %v4642_v3  ;;  %v1813_v35 = vpop.f32.mrf.mxu3 }
 0x3c0   : > { %v2002_v48 = vadd.f32 %v2001_v0, %v1913_v7  ;;  %v5349_v0 = vld [vmem:[#allocation27_spill] sm:$0xff] }
 0x3c1   : > { %v1814_v52 = vadd.f32 %v1813_v35, %v1725_v40 }
 0x3c2   : > { %v2291_v1 = vadd.f32 %v2002_v48, %v4501_v38  ;;  %v5350_v48 = vld [vmem:[#allocation9_spill] sm:$0xff] }
 0x3c3   : > { %v2274_v54 = vadd.f32 %v1814_v52, %v5345_v53 }
 0x3c4   : > { %2419 = vst [vmem:[%s4111_s24 + $0x290] sm:$0xff] %v2291_v1  ;;  %v5352_v1 = vld [vmem:[#allocation4_spill] sm:$0xff] }
 0x3c5   : > { %2402 = vst [vmem:[%s4111_s24 + $0x208] sm:$0xff] %v2274_v54  ;;  %v1914_v21 = vpop.f32.mrf.mxu0  ;;  %v5351_v54 = vld [vmem:[#allocation3_spill] sm:$0xff] }
 0x3c6   : > { %v1726_v20 = vpop.f32.mrf.mxu2  ;;  %v1915_v45 = vadd.f32 %v1914_v21, %v4591_v56  ;;  %v2003_v39 = vpop.f32.mrf.mxu1 }
 0x3c7   : > { %v1727_v6 = vadd.f32 %v1726_v20, %v4642_v3  ;;  %v1815_v9 = vpop.f32.mrf.mxu3 }
 0x3c8   : > { %v2004_v44 = vadd.f32 %v2003_v39, %v1915_v45 }
 0x3c9   : > { %v1816_v12 = vadd.f32 %v1815_v9, %v1727_v6 }
 0x3ca   : > { %v2295_v61 = vadd.f32 %v2004_v44, %v4516_v41  ;;  %v5348_v41 = vld [vmem:[#allocation41_spill] sm:$0xff] }
 0x3cb   : > { %v2278_v50 = vadd.f32 %v1816_v12, %v5346_v2  ;;  %2044 = vmatmul.bf16.gmra.mxu2 %v3516_v26  ;;  %2133 = vmatmul.bf16.gmra.mxu3 %v3518_v27  ;;  %v5353_v2 = vld [vmem:[#allocation29_spill] sm:$0xff] }
 0x3cc   : > { %2423 = vst [vmem:[%s4111_s24 + $0x2b0] sm:$0xff] %v2295_v61  ;;  %v5354_v61 = vld [vmem:[#allocation47_spill] sm:$0xff] }
 0x3cd   : > { %2406 = vst [vmem:[%s4111_s24 + $0x228] sm:$0xff] %v2278_v50  ;;  %v1917_v30 = vpop.f32.mrf.mxu0 }
 0x3ce   : > { %v1729_v38 = vpop.f32.mrf.mxu2  ;;  %v1918_v5 = vadd.f32 %v1917_v30, %v4591_v56  ;;  %v2006_v16 = vpop.f32.mrf.mxu1 }
 0x3cf   : > { %v1730_v23 = vadd.f32 %v1729_v38, %v4642_v3  ;;  %v1818_v29 = vpop.f32.mrf.mxu3 }
 0x3d0   : > { %v2007_v13 = vadd.f32 %v2006_v16, %v1918_v5 }
 0x3d1   : > { %v1819_v19 = vadd.f32 %v1818_v29, %v1730_v23 }
 0x3d2   : > { %v2299_v28 = vadd.f32 %v2007_v13, %v5348_v41 }
 0x3d3   : > { %v2282_v59 = vadd.f32 %v1819_v19, %v5347_v57 }
 0x3d4   : > { %2427 = vst [vmem:[%s4111_s24 + $0x2d0] sm:$0xff] %v2299_v28 }
 0x3d5   : > { %2410 = vst [vmem:[%s4111_s24 + $0x248] sm:$0xff] %v2282_v59  ;;  %v1919_v27 = vpop.f32.mrf.mxu0  ;;  %v5355_v59 = vld [vmem:[#allocation31_spill] sm:$0xff] }
 0x3d6   : > { %v1731_v26 = vpop.f32.mrf.mxu2  ;;  %v1920_v32 = vadd.f32 %v1919_v27, %v4591_v56  ;;  %v2008_v40 = vpop.f32.mrf.mxu1  ;;  %v5357_v27 = vld [vmem:[#allocation6_spill] sm:$0xff] }
 0x3d7   : > { %v1732_v63 = vadd.f32 %v1731_v26, %v4642_v3  ;;  %v1820_v42 = vpop.f32.mrf.mxu3  ;;  %v5356_v26 = vld [vmem:[#allocation5_spill] sm:$0xff] }
 0x3d8   : > { %v2009_v7 = vadd.f32 %v2008_v40, %v1920_v32 }
 0x3d9   : > { %v1821_v35 = vadd.f32 %v1820_v42, %v1732_v63 }
 0x3da   : > { %v2303_v53 = vadd.f32 %v2009_v7, %v5350_v48  ;;  %v5358_v48 = vld [vmem:[#allocation34_spill] sm:$0xff] }
 0x3db   : > { %v2286_v52 = vadd.f32 %v1821_v35, %v5349_v0  ;;  %2049 = vmatmul.bf16.gmra.mxu2 %v5351_v54  ;;  %2138 = vmatmul.bf16.gmra.mxu3 %v5352_v1 }
 0x3dc   : > { %2431 = vst [vmem:[%s4111_s24 + $0x2f0] sm:$0xff] %v2303_v53 }
 0x3dd   : > { %2414 = vst [vmem:[%s4111_s24 + $0x268] sm:$0xff] %v2286_v52  ;;  %v1922_v21 = vpop.f32.mrf.mxu0 }
 0x3de   : > { %v1734_v20 = vpop.f32.mrf.mxu2  ;;  %v1923_v45 = vadd.f32 %v1922_v21, %v4591_v56  ;;  %v2011_v39 = vpop.f32.mrf.mxu1 }
 0x3df   : > { %v1735_v6 = vadd.f32 %v1734_v20, %v4642_v3  ;;  %v1823_v9 = vpop.f32.mrf.mxu3 }
 0x3e0   : > { %v2012_v44 = vadd.f32 %v2011_v39, %v1923_v45 }
 0x3e1   : > { %v1824_v12 = vadd.f32 %v1823_v9, %v1735_v6 }
 0x3e2   : > { %v2307_v38 = vadd.f32 %v2012_v44, %v5354_v61 }
 0x3e3   : > { %v2290_v50 = vadd.f32 %v1824_v12, %v5353_v2  ;;  %v5359_v12 = vld [vmem:[#allocation37_spill] sm:$0xff] }
 0x3e4   : > { %2435 = vst [vmem:[%s4111_s24 + $0x310] sm:$0xff] %v2307_v38 }
 0x3e5   : > { %2418 = vst [vmem:[%s4111_s24 + $0x288] sm:$0xff] %v2290_v50  ;;  %v1924_v23 = vpop.f32.mrf.mxu0  ;;  %v5360_v50 = vld [vmem:[#allocation7_spill] sm:$0xff] }
 0x3e6   : > { %v1736_v30 = vpop.f32.mrf.mxu2  ;;  %v1925_v16 = vadd.f32 %v1924_v23, %v4591_v56  ;;  %v2013_v19 = vpop.f32.mrf.mxu1 }
 0x3e7   : > { %v1737_v29 = vadd.f32 %v1736_v30, %v4642_v3  ;;  %v1825_v5 = vpop.f32.mrf.mxu3 }
 0x3e8   : > { %v2014_v57 = vadd.f32 %v2013_v19, %v1925_v16 }
 0x3e9   : > { %v1826_v13 = vadd.f32 %v1825_v5, %v1737_v29 }
 0x3ea   : > { %v2311_v28 = vadd.f32 %v2014_v57, %v4564_v51 }
 0x3eb   : > { %v2294_v41 = vadd.f32 %v1826_v13, %v5355_v59  ;;  %2054 = vmatmul.bf16.gmra.mxu2 %v5356_v26  ;;  %2143 = vmatmul.bf16.gmra.mxu3 %v5357_v27  ;;  %v5362_v13 = vld [vmem:[#allocation40_spill] sm:$0xff] }
 0x3ec   : > { %2439 = vst [vmem:[%s4111_s24 + $0x330] sm:$0xff] %v2311_v28 }
 0x3ed   : > { %2422 = vst [vmem:[%s4111_s24 + $0x2a8] sm:$0xff] %v2294_v41  ;;  %v1927_v42 = vpop.f32.mrf.mxu0 }
 0x3ee   : > { %v1739_v63 = vpop.f32.mrf.mxu2  ;;  %v1928_v35 = vadd.f32 %v1927_v42, %v4591_v56  ;;  %v2016_v7 = vpop.f32.mrf.mxu1 }
 0x3ef   : > { %v1740_v32 = vadd.f32 %v1739_v63, %v4642_v3  ;;  %v1828_v40 = vpop.f32.mrf.mxu3 }
 0x3f0   : > { %v2017_v52 = vadd.f32 %v2016_v7, %v1928_v35 }
 0x3f1   : > { %v1829_v0 = vadd.f32 %v1828_v40, %v1740_v32  ;;  %v5363_v40 = vld [vmem:[#allocation43_spill] sm:$0xff] }
 0x3f2   : > { %v2315_v51 = vadd.f32 %v2017_v52, %v4573_v33  ;;  %v5361_v33 = vld [vmem:[#allocation8_spill] sm:$0xff] }
 0x3f3   : > { %v2298_v53 = vadd.f32 %v1829_v0, %v5358_v48 }
 0x3f4   : > { %2443 = vst [vmem:[%s4111_s24 + $0x350] sm:$0xff] %v2315_v51 }
 0x3f5   : > { %2426 = vst [vmem:[%s4111_s24 + $0x2c8] sm:$0xff] %v2298_v53  ;;  %v1929_v1 = vpop.f32.mrf.mxu0 }
 0x3f6   : > { %v1741_v54 = vpop.f32.mrf.mxu2  ;;  %v1930_v6 = vadd.f32 %v1929_v1, %v4591_v56  ;;  %v2018_v9 = vpop.f32.mrf.mxu1 }
 0x3f7   : > { %v1742_v20 = vadd.f32 %v1741_v54, %v4642_v3  ;;  %v1830_v21 = vpop.f32.mrf.mxu3 }
 0x3f8   : > { %v2019_v39 = vadd.f32 %v2018_v9, %v1930_v6 }
 0x3f9   : > { %v1831_v45 = vadd.f32 %v1830_v21, %v1742_v20  ;;  %v5365_v21 = vld [vmem:[#allocation46_spill] sm:$0xff] }
 0x3fa   : > { %v2319_v2 = vadd.f32 %v2019_v39, %v4582_v25 }
 0x3fb   : > { %v2302_v44 = vadd.f32 %v1831_v45, %v5359_v12  ;;  %2059 = vmatmul.bf16.gmra.mxu2 %v5360_v50  ;;  %2148 = vmatmul.bf16.gmra.mxu3 %v5361_v33  ;;  %v5366_v33 = vld [vmem:[#allocation49_spill] sm:$0xff] }
 0x3fc   : > { %2447 = vst [vmem:[%s4111_s24 + $0x370] sm:$0xff] %v2319_v2 }
 0x3fd   : > { %2430 = vst [vmem:[%s4111_s24 + $0x2e8] sm:$0xff] %v2302_v44  ;;  %v1932_v38 = vpop.f32.mrf.mxu0 }
 0x3fe   : > { %v1744_v61 = vpop.f32.mrf.mxu2  ;;  %v1933_v29 = vadd.f32 %v1932_v38, %v4591_v56  ;;  %v2021_v5 = vpop.f32.mrf.mxu1 }
 0x3ff   : > { %v1745_v30 = vadd.f32 %v1744_v61, %v4642_v3  ;;  %v1833_v23 = vpop.f32.mrf.mxu3 }
 0x400   : > { %v2022_v19 = vadd.f32 %v2021_v5, %v1933_v29 }
 0x401   : > { %v1834_v16 = vadd.f32 %v1833_v23, %v1745_v30  ;;  %v5367_v30 = vld [vmem:[#allocation11_spill] sm:$0xff] }
 0x402   : > { %v2323_v25 = vadd.f32 %v2022_v19, %v4600_v60  ;;  %v5364_v60 = vld [vmem:[#allocation10_spill] sm:$0xff] }
 0x403   : > { %v2306_v57 = vadd.f32 %v1834_v16, %v5362_v13 }
 0x404   : > { %2451 = vst [vmem:[%s4111_s24 + $0x390] sm:$0xff] %v2323_v25 }
 0x405   : > { %2434 = vst [vmem:[%s4111_s24 + $0x308] sm:$0xff] %v2306_v57  ;;  %v1934_v41 = vpop.f32.mrf.mxu0 }
 0x406   : > { %v1746_v59 = vpop.f32.mrf.mxu2  ;;  %v1935_v27 = vadd.f32 %v1934_v41, %v4591_v56  ;;  %v2023_v63 = vpop.f32.mrf.mxu1 }
 0x407   : > { %v1747_v28 = vadd.f32 %v1746_v59, %v4642_v3  ;;  %v1835_v26 = vpop.f32.mrf.mxu3  ;;  %v5370_v59 = vld [vmem:[#allocation52_spill] sm:$0xff] }
 0x408   : > { %v2024_v32 = vadd.f32 %v2023_v63, %v1935_v27 }
 0x409   : > { %v1836_v42 = vadd.f32 %v1835_v26, %v1747_v28 }
 0x40a   : > { %v2327_v7 = vadd.f32 %v2024_v32, %v4615_v43 }
 0x40b   : > { %v2310_v35 = vadd.f32 %v1836_v42, %v5363_v40  ;;  %2064 = vmatmul.bf16.gmra.mxu2 %v5309_v49  ;;  %2153 = vmatmul.bf16.gmra.mxu3 %v5364_v60  ;;  %v5371_v42 = vld [vmem:[#allocation53_spill] sm:$0xff] }
 0x40c   : > { %2455 = vst [vmem:[%s4111_s24 + $0x3b0] sm:$0xff] %v2327_v7 }
 0x40d   : > { %2438 = vst [vmem:[%s4111_s24 + $0x328] sm:$0xff] %v2310_v35  ;;  %v1937_v52 = vpop.f32.mrf.mxu0 }
 0x40e   : > { %v1749_v0 = vpop.f32.mrf.mxu2  ;;  %v1938_v51 = vadd.f32 %v1937_v52, %v4591_v56  ;;  %v2026_v54 = vpop.f32.mrf.mxu1  ;;  %v3296_v52 = vld [vmem:[%s5182_s2] sm:$0xf] }
 0x40f   : > { %v1750_v48 = vadd.f32 %v1749_v0, %v4642_v3  ;;  %v1838_v53 = vpop.f32.mrf.mxu3  ;;  %v5372_v0 = vld [vmem:[#allocation54_spill] sm:$0xff] }
 0x410   : > { %v2027_v20 = vadd.f32 %v2026_v54, %v1938_v51 }
 0x411   : > { %v1839_v1 = vadd.f32 %v1838_v53, %v1750_v48  ;;  %v4907_v48 = vperm.slane %v3296_v52, 3 }
 0x412   : > { %v2331_v43 = vadd.f32 %v2027_v20, %v4624_v22  ;;  %v5368_v22 = vld [vmem:[#allocation12_spill] sm:$0xff] }
 0x413   : > { %v2314_v6 = vadd.f32 %v1839_v1, %v5365_v21  ;;  %v5374_v1 = vld [vmem:[#allocation55_spill] sm:$0xff] }
 0x414   : > { %2459 = vst [vmem:[%s4111_s24 + $0x3d0] sm:$0xff] %v2331_v43 }
 0x415   : > { %2442 = vst [vmem:[%s4111_s24 + $0x348] sm:$0xff] %v2314_v6  ;;  %v1939_v9 = vpop.f32.mrf.mxu0 }
 0x416   : > { %v1751_v49 = vpop.f32.mrf.mxu2  ;;  %v1940_v12 = vadd.f32 %v1939_v9, %v4591_v56  ;;  %v2028_v44 = vpop.f32.mrf.mxu1  ;;  %v5369_v56 = vld [vmem:[#allocation51_spill] sm:$0xff] }
 0x417   : > { %v1752_v45 = vadd.f32 %v1751_v49, %v4642_v3  ;;  %v1840_v39 = vpop.f32.mrf.mxu3  ;;  %v5375_v49 = vld [vmem:[#allocation56_spill] sm:$0xff] }
 0x418   : > { %v2029_v50 = vadd.f32 %v2028_v44, %v1940_v12 }
 0x419   : > { %v1841_v2 = vadd.f32 %v1840_v39, %v1752_v45 }
 0x41a   : > { %v2335_v38 = vadd.f32 %v2029_v50, %v4633_v24 }
 0x41b   : > { %v2318_v61 = vadd.f32 %v1841_v2, %v5366_v33  ;;  %2069 = vmatmul.bf16.gmra.mxu2 %v5367_v30  ;;  %2158 = vmatmul.bf16.gmra.mxu3 %v5368_v22  ;;  %v5376_v2 = vld [vmem:[#allocation57_spill] sm:$0xff]  ;;  %v5377_v22 = vld [vmem:[#allocation58_spill] sm:$0xff] }
 0x41c   : > { %2463 = vst [vmem:[%s4111_s24 + $0x3f0] sm:$0xff] %v2335_v38 }
 0x41d   : > { %2446 = vst [vmem:[%s4111_s24 + $0x368] sm:$0xff] %v2318_v61 }
 0x41e   : > { %v1754_v23 = vpop.f32.mrf.mxu2 }
 0x41f   : > { %v1755_v29 = vadd.f32 %v1754_v23, %v4642_v3  ;;  %v1843_v5 = vpop.f32.mrf.mxu3 }
 0x421   : > { %v1844_v16 = vadd.f32 %v1843_v5, %v1755_v29 }
 0x423   : > { %v2322_v19 = vadd.f32 %v1844_v16, %v5369_v56  ;;  %v5378_v16 = vld [vmem:[#allocation59_spill] sm:$0xff] }
 0x425   : > { %2450 = vst [vmem:[%s4111_s24 + $0x388] sm:$0xff] %v2322_v19 }
 0x426   : > { %v1756_v13 = vpop.f32.mrf.mxu2 }
 0x427   : > { %v1757_v57 = vadd.f32 %v1756_v13, %v4642_v3  ;;  %v1845_v24 = vpop.f32.mrf.mxu3 }
 0x429   : > { %v1846_v25 = vadd.f32 %v1845_v24, %v1757_v57 }
 0x42b   : > { %v2326_v41 = vadd.f32 %v1846_v25, %v5370_v59  ;;  %2074 = vmatmul.bf16.gmra.mxu2 %v5321_v8  ;;  %2163 = vmatmul.bf16.gmra.mxu3 %v5322_v62  ;;  %v5373_v62 = vld [vmem:[#allocation15_spill] sm:$0xff]  ;;  %v5379_v25 = vld [vmem:[#allocation60_spill] sm:$0xff] }
 0x42d   : > { %2454 = vst [vmem:[%s4111_s24 + $0x3a8] sm:$0xff] %v2326_v41 }
 0x42e   : > { %v1759_v28 = vpop.f32.mrf.mxu2 }
 0x42f   : > { %v1760_v26 = vadd.f32 %v1759_v28, %v4642_v3  ;;  %v1848_v27 = vpop.f32.mrf.mxu3 }
 0x431   : > { %v1849_v63 = vadd.f32 %v1848_v27, %v1760_v26  ;;  %v5380_v26 = vld [vmem:[#allocation61_spill] sm:$0xff] }
 0x433   : > { %v2330_v32 = vadd.f32 %v1849_v63, %v5371_v42 }
 0x435   : > { %2458 = vst [vmem:[%s4111_s24 + $0x3c8] sm:$0xff] %v2330_v32 }
 0x436   : > { %v1761_v40 = vpop.f32.mrf.mxu2 }
 0x437   : > { %v1762_v35 = vadd.f32 %v1761_v40, %v4642_v3  ;;  %v1850_v7 = vpop.f32.mrf.mxu3 }
 0x439   : > { %v1851_v60 = vadd.f32 %v1850_v7, %v1762_v35  ;;  %v5381_v35 = vld [vmem:[#allocation62_spill] sm:$0xff] }
 0x43b   : > { %v2334_v8 = vadd.f32 %v1851_v60, %v5372_v0  ;;  %2079 = vmatmul.bf16.gmra.mxu2 %v3586_v4  ;;  %2168 = vmatmul.bf16.gmra.mxu3 %v5373_v62 }
 0x43d   : > { %2462 = vst [vmem:[%s4111_s24 + $0x3e8] sm:$0xff] %v2334_v8  ;;  %v5382_v8 = vld [vmem:[#allocation63_spill] sm:$0xff] }
 0x43e   : > { %v2040_v53 = vpop.f32.mrf.mxu2 }
 0x43f   : > { %v2041_v51 = vadd.f32 %v2040_v53, %v4907_v48  ;;  %v2129_v3 = vpop.f32.mrf.mxu3 }
 0x441   : > { %v2130_v54 = vadd.f32 %v2129_v3, %v2041_v51 }
 0x443   : > { %v2212_v20 = vadd.f32 %v2130_v54, %v5374_v1  ;;  %v5383_v54 = vld [vmem:[#allocation64_spill] sm:$0xff] }
 0x445   : > { %2340 = vst [vmem:[%s4111_s24 + $0x18] sm:$0xff] %v2212_v20 }
 0x446   : > { %v2042_v4 = vpop.f32.mrf.mxu2 }
 0x447   : > { %v2043_v21 = vadd.f32 %v2042_v4, %v4907_v48  ;;  %v2131_v6 = vpop.f32.mrf.mxu3 }
 0x449   : > { %v2132_v43 = vadd.f32 %v2131_v6, %v2043_v21  ;;  %v5384_v21 = vld [vmem:[#allocation65_spill] sm:$0xff] }
 0x44b   : > { %v2216_v9 = vadd.f32 %v2132_v43, %v5375_v49  ;;  %2084 = vmatmul.bf16.gmra.mxu2 %v3598_v17  ;;  %2173 = vmatmul.bf16.gmra.mxu3 %v3600_v18 }
 0x44d   : > { %2344 = vst [vmem:[%s4111_s24 + $0x38] sm:$0xff] %v2216_v9 }
 0x44e   : > { %v2045_v45 = vpop.f32.mrf.mxu2 }
 0x44f   : > { %v2046_v39 = vadd.f32 %v2045_v45, %v4907_v48  ;;  %v2134_v12 = vpop.f32.mrf.mxu3 }
 0x451   : > { %v2135_v44 = vadd.f32 %v2134_v12, %v2046_v39  ;;  %v5385_v39 = vld [vmem:[#allocation66_spill] sm:$0xff] }
 0x453   : > { %v2220_v50 = vadd.f32 %v2135_v44, %v5376_v2 }
 0x455   : > { %2348 = vst [vmem:[%s4111_s24 + $0x58] sm:$0xff] %v2220_v50  ;;  %v5386_v50 = vld [vmem:[#allocation67_spill] sm:$0xff] }
 0x456   : > { %v2047_v33 = vpop.f32.mrf.mxu2 }
 0x457   : > { %v2048_v61 = vadd.f32 %v2047_v33, %v4907_v48  ;;  %v2136_v38 = vpop.f32.mrf.mxu3 }
 0x459   : > { %v2137_v30 = vadd.f32 %v2136_v38, %v2048_v61 }
 0x45b   : > { %v2224_v17 = vadd.f32 %v2137_v30, %v5377_v22  ;;  %2089 = vmatmul.bf16.gmra.mxu2 %v3610_v36  ;;  %2178 = vmatmul.bf16.gmra.mxu3 %v3612_v37 }
 0x45d   : > { %2352 = vst [vmem:[%s4111_s24 + $0x78] sm:$0xff] %v2224_v17  ;;  %v5387_v17 = vld [vmem:[#allocation68_spill] sm:$0xff] }
 0x45e   : > { %v2050_v18 = vpop.f32.mrf.mxu2 }
 0x45f   : > { %v2051_v23 = vadd.f32 %v2050_v18, %v4907_v48  ;;  %v2139_v29 = vpop.f32.mrf.mxu3 }
 0x461   : > { %v2140_v5 = vadd.f32 %v2139_v29, %v2051_v23 }
 0x463   : > { %v2228_v56 = vadd.f32 %v2140_v5, %v5378_v16  ;;  %v5388_v5 = vld [vmem:[#allocation69_spill] sm:$0xff] }
 0x465   : > { %2356 = vst [vmem:[%s4111_s24 + $0x98] sm:$0xff] %v2228_v56 }
 0x466   : > { %v2052_v19 = vpop.f32.mrf.mxu2 }
 0x467   : > { %v2053_v13 = vadd.f32 %v2052_v19, %v4907_v48  ;;  %v2141_v57 = vpop.f32.mrf.mxu3 }
 0x469   : > { %v2142_v24 = vadd.f32 %v2141_v57, %v2053_v13 }
 0x46b   : > { %v2232_v36 = vadd.f32 %v2142_v24, %v5379_v25  ;;  %2094 = vmatmul.bf16.gmra.mxu2 %v3622_v55  ;;  %2183 = vmatmul.bf16.gmra.mxu3 %v3624_v58  ;;  %v5389_v24 = vld [vmem:[#allocation70_spill] sm:$0xff] }
 0x46d   : > { %2360 = vst [vmem:[%s4111_s24 + $0xb8] sm:$0xff] %v2232_v36 }
 0x46e   : > { %v2055_v37 = vpop.f32.mrf.mxu2 }
 0x46f   : > { %v2056_v59 = vadd.f32 %v2055_v37, %v4907_v48  ;;  %v2144_v41 = vpop.f32.mrf.mxu3 }
 0x471   : > { %v2145_v28 = vadd.f32 %v2144_v41, %v2056_v59  ;;  %v5390_v59 = vld [vmem:[#allocation71_spill] sm:$0xff] }
 0x473   : > { %v2236_v27 = vadd.f32 %v2145_v28, %v5380_v26 }
 0x475   : > { %2364 = vst [vmem:[%s4111_s24 + $0xd8] sm:$0xff] %v2236_v27 }
 0x476   : > { %v2057_v63 = vpop.f32.mrf.mxu2 }
 0x477   : > { %v2058_v42 = vadd.f32 %v2057_v63, %v4907_v48  ;;  %v2146_v32 = vpop.f32.mrf.mxu3 }
 0x479   : > { %v2147_v40 = vadd.f32 %v2146_v32, %v2058_v42  ;;  %v5391_v42 = vld [vmem:[#allocation72_spill] sm:$0xff] }
 0x47b   : > { %v2240_v55 = vadd.f32 %v2147_v40, %v5381_v35  ;;  %2099 = vmatmul.bf16.gmra.mxu2 %v3634_v10  ;;  %2188 = vmatmul.bf16.gmra.mxu3 %v3636_v11 }
 0x47d   : > { %2368 = vst [vmem:[%s4111_s24 + $0xf8] sm:$0xff] %v2240_v55 }
 0x47e   : > { %v2060_v58 = vpop.f32.mrf.mxu2 }
 0x47f   : > { %v2061_v7 = vadd.f32 %v2060_v58, %v4907_v48  ;;  %v2149_v60 = vpop.f32.mrf.mxu3 }
 0x481   : > { %v2150_v0 = vadd.f32 %v2149_v60, %v2061_v7  ;;  %v5392_v7 = vld [vmem:[#allocation73_spill] sm:$0xff] }
 0x483   : > { %v2244_v62 = vadd.f32 %v2150_v0, %v5382_v8 }
 0x485   : > { %2372 = vst [vmem:[%s4111_s24 + $0x118] sm:$0xff] %v2244_v62 }
 0x486   : > { %v2062_v52 = vpop.f32.mrf.mxu2 }
 0x487   : > { %v2063_v53 = vadd.f32 %v2062_v52, %v4907_v48  ;;  %v2151_v51 = vpop.f32.mrf.mxu3 }
 0x489   : > { %v2152_v3 = vadd.f32 %v2151_v51, %v2063_v53  ;;  %v5393_v53 = vld [vmem:[#allocation32_spill] sm:$0xff] }
 0x48b   : > { %v2248_v10 = vadd.f32 %v2152_v3, %v5383_v54  ;;  %2104 = vmatmul.bf16.gmra.mxu2 %v3646_v31  ;;  %2193 = vmatmul.bf16.gmra.mxu3 %v3648_v34 }
 0x48d   : > { %2376 = vst [vmem:[%s4111_s24 + $0x138] sm:$0xff] %v2248_v10 }
 0x48e   : > { %v2065_v11 = vpop.f32.mrf.mxu2 }
 0x48f   : > { %v2066_v1 = vadd.f32 %v2065_v11, %v4907_v48  ;;  %v2154_v20 = vpop.f32.mrf.mxu3 }
 0x491   : > { %v2155_v4 = vadd.f32 %v2154_v20, %v2066_v1  ;;  %v5394_v1 = vld [vmem:[#allocation35_spill] sm:$0xff] }
 0x493   : > { %v2252_v6 = vadd.f32 %v2155_v4, %v5384_v21 }
 0x495   : > { %2380 = vst [vmem:[%s4111_s24 + $0x158] sm:$0xff] %v2252_v6 }
 0x496   : > { %v2067_v43 = vpop.f32.mrf.mxu2 }
 0x497   : > { %v2068_v49 = vadd.f32 %v2067_v43, %v4907_v48  ;;  %v2156_v9 = vpop.f32.mrf.mxu3 }
 0x499   : > { %v2157_v45 = vadd.f32 %v2156_v9, %v2068_v49  ;;  %v5395_v49 = vld [vmem:[#allocation38_spill] sm:$0xff] }
 0x49b   : > { %v2256_v31 = vadd.f32 %v2157_v45, %v5385_v39  ;;  %2109 = vmatmul.bf16.gmra.mxu2 %v3682_v14  ;;  %2198 = vmatmul.bf16.gmra.mxu3 %v3684_v15 }
 0x49d   : > { %2384 = vst [vmem:[%s4111_s24 + $0x178] sm:$0xff] %v2256_v31 }
 0x49e   : > { %v2070_v34 = vpop.f32.mrf.mxu2 }
 0x49f   : > { %v2071_v12 = vadd.f32 %v2070_v34, %v4907_v48  ;;  %v2159_v44 = vpop.f32.mrf.mxu3 }
 0x4a1   : > { %v2160_v2 = vadd.f32 %v2159_v44, %v2071_v12  ;;  %v5396_v12 = vld [vmem:[#allocation74_spill] sm:$0xff] }
 0x4a3   : > { %v2260_v33 = vadd.f32 %v2160_v2, %v5386_v50 }
 0x4a5   : > { %2388 = vst [vmem:[%s4111_s24 + $0x198] sm:$0xff] %v2260_v33 }
 0x4a6   : > { %v2072_v61 = vpop.f32.mrf.mxu2 }
 0x4a7   : > { %v2073_v38 = vadd.f32 %v2072_v61, %v4907_v48  ;;  %v2161_v30 = vpop.f32.mrf.mxu3 }
 0x4a9   : > { %v2162_v22 = vadd.f32 %v2161_v30, %v2073_v38  ;;  %v5397_v38 = vld [vmem:[#allocation44_spill] sm:$0xff] }
 0x4ab   : > { %v2264_v14 = vadd.f32 %v2162_v22, %v5387_v17  ;;  %2114 = vmatmul.bf16.gmra.mxu2 %v3694_v46  ;;  %2203 = vmatmul.bf16.gmra.mxu3 %v3696_v47 }
 0x4ad   : > { %2392 = vst [vmem:[%s4111_s24 + $0x1b8] sm:$0xff] %v2264_v14 }
 0x4ae   : > { %v2075_v15 = vpop.f32.mrf.mxu2 }
 0x4af   : > { %v2076_v18 = vadd.f32 %v2075_v15, %v4907_v48  ;;  %v2164_v23 = vpop.f32.mrf.mxu3 }
 0x4b1   : > { %v2165_v29 = vadd.f32 %v2164_v23, %v2076_v18  ;;  %v5398_v18 = vld [vmem:[#allocation75_spill] sm:$0xff] }
 0x4b3   : > { %v2268_v16 = vadd.f32 %v2165_v29, %v5388_v5 }
 0x4b5   : > { %2396 = vst [vmem:[%s4111_s24 + $0x1d8] sm:$0xff] %v2268_v16 }
 0x4b6   : > { %v2077_v56 = vpop.f32.mrf.mxu2 }
 0x4b7   : > { %v2078_v19 = vadd.f32 %v2077_v56, %v4907_v48  ;;  %v2166_v13 = vpop.f32.mrf.mxu3 }
 0x4b9   : > { %v2167_v57 = vadd.f32 %v2166_v13, %v2078_v19  ;;  %v5399_v19 = vld [vmem:[#allocation76_spill] sm:$0xff] }
 0x4bb   : > { %v2272_v46 = vadd.f32 %v2167_v57, %v5389_v24 }
 0x4bd   : > { %2400 = vst [vmem:[%s4111_s24 + $0x1f8] sm:$0xff] %v2272_v46 }
 0x4be   : > { %v2080_v47 = vpop.f32.mrf.mxu2 }
 0x4bf   : > { %v2081_v25 = vadd.f32 %v2080_v47, %v4907_v48  ;;  %v2169_v36 = vpop.f32.mrf.mxu3 }
 0x4c1   : > { %v2170_v37 = vadd.f32 %v2169_v36, %v2081_v25  ;;  %v5400_v25 = vld [vmem:[#allocation77_spill] sm:$0xff] }
 0x4c3   : > { %v2276_v41 = vadd.f32 %v2170_v37, %v5390_v59 }
 0x4c5   : > { %2404 = vst [vmem:[%s4111_s24 + $0x218] sm:$0xff] %v2276_v41 }
 0x4c6   : > { %v2082_v28 = vpop.f32.mrf.mxu2 }
 0x4c7   : > { %v2083_v26 = vadd.f32 %v2082_v28, %v4907_v48  ;;  %v2171_v27 = vpop.f32.mrf.mxu3 }
 0x4c9   : > { %v2172_v63 = vadd.f32 %v2171_v27, %v2083_v26  ;;  %v5401_v26 = vld [vmem:[#allocation13_spill] sm:$0xff] }
 0x4cb   : > { %v2280_v32 = vadd.f32 %v2172_v63, %v5391_v42 }
 0x4cd   : > { %2408 = vst [vmem:[%s4111_s24 + $0x238] sm:$0xff] %v2280_v32 }
 0x4ce   : > { %v2085_v40 = vpop.f32.mrf.mxu2 }
 0x4cf   : > { %v2086_v35 = vadd.f32 %v2085_v40, %v4907_v48  ;;  %v2174_v55 = vpop.f32.mrf.mxu3 }
 0x4d1   : > { %v2175_v58 = vadd.f32 %v2174_v55, %v2086_v35  ;;  %v5402_v35 = vld [vmem:[#allocation14_spill] sm:$0xff] }
 0x4d3   : > { %v2284_v60 = vadd.f32 %v2175_v58, %v5392_v7 }
 0x4d5   : > { %2412 = vst [vmem:[%s4111_s24 + $0x258] sm:$0xff] %v2284_v60 }
 0x4d6   : > { %v2087_v0 = vpop.f32.mrf.mxu2 }
 0x4d7   : > { %v2088_v8 = vadd.f32 %v2087_v0, %v4907_v48  ;;  %v2176_v62 = vpop.f32.mrf.mxu3 }
 0x4d9   : > { %v2177_v52 = vadd.f32 %v2176_v62, %v2088_v8  ;;  %v5403_v8 = vld [vmem:[#allocation50_spill] sm:$0xff] }
 0x4db   : > { %v2288_v51 = vadd.f32 %v2177_v52, %v5393_v53 }
 0x4dd   : > { %2416 = vst [vmem:[%s4111_s24 + $0x278] sm:$0xff] %v2288_v51 }
 0x4de   : > { %v2090_v3 = vpop.f32.mrf.mxu2 }
 0x4df   : > { %v2091_v54 = vadd.f32 %v2090_v3, %v4907_v48  ;;  %v2179_v10 = vpop.f32.mrf.mxu3 }
 0x4e1   : > { %v2180_v11 = vadd.f32 %v2179_v10, %v2091_v54  ;;  %v5404_v54 = vld [vmem:[#allocation78_spill] sm:$0xff] }
 0x4e3   : > { %v2292_v20 = vadd.f32 %v2180_v11, %v5394_v1 }
 0x4e5   : > { %2420 = vst [vmem:[%s4111_s24 + $0x298] sm:$0xff] %v2292_v20 }
 0x4e6   : > { %v2092_v4 = vpop.f32.mrf.mxu2 }
 0x4e7   : > { %v2093_v21 = vadd.f32 %v2092_v4, %v4907_v48  ;;  %v2181_v6 = vpop.f32.mrf.mxu3 }
 0x4e9   : > { %v2182_v43 = vadd.f32 %v2181_v6, %v2093_v21  ;;  %v5405_v21 = vld [vmem:[#allocation79_spill] sm:$0xff] }
 0x4eb   : > { %v2296_v9 = vadd.f32 %v2182_v43, %v5395_v49 }
 0x4ed   : > { %2424 = vst [vmem:[%s4111_s24 + $0x2b8] sm:$0xff] %v2296_v9 }
 0x4ee   : > { %v2095_v45 = vpop.f32.mrf.mxu2 }
 0x4ef   : > { %v2096_v39 = vadd.f32 %v2095_v45, %v4907_v48  ;;  %v2184_v31 = vpop.f32.mrf.mxu3 }
 0x4f1   : > { %v2185_v34 = vadd.f32 %v2184_v31, %v2096_v39 }
 0x4f3   : > { %v2300_v44 = vadd.f32 %v2185_v34, %v5396_v12 }
 0x4f5   : > { %2428 = vst [vmem:[%s4111_s24 + $0x2d8] sm:$0xff] %v2300_v44 }
 0x4f6   : > { %v2097_v2 = vpop.f32.mrf.mxu2 }
 0x4f7   : > { %v2098_v50 = vadd.f32 %v2097_v2, %v4907_v48  ;;  %v2186_v33 = vpop.f32.mrf.mxu3 }
 0x4f9   : > { %v2187_v61 = vadd.f32 %v2186_v33, %v2098_v50 }
 0x4fb   : > { %v2304_v30 = vadd.f32 %v2187_v61, %v5397_v38 }
 0x4fd   : > { %2432 = vst [vmem:[%s4111_s24 + $0x2f8] sm:$0xff] %v2304_v30 }
 0x4fe   : > { %v2100_v22 = vpop.f32.mrf.mxu2 }
 0x4ff   : > { %v2101_v17 = vadd.f32 %v2100_v22, %v4907_v48  ;;  %v2189_v14 = vpop.f32.mrf.mxu3 }
 0x501   : > { %v2190_v15 = vadd.f32 %v2189_v14, %v2101_v17 }
 0x503   : > { %v2308_v23 = vadd.f32 %v2190_v15, %v5398_v18 }
 0x505   : > { %2436 = vst [vmem:[%s4111_s24 + $0x318] sm:$0xff] %v2308_v23 }
 0x506   : > { %v2102_v29 = vpop.f32.mrf.mxu2 }
 0x507   : > { %v2103_v5 = vadd.f32 %v2102_v29, %v4907_v48  ;;  %v2191_v16 = vpop.f32.mrf.mxu3 }
 0x509   : > { %v2192_v56 = vadd.f32 %v2191_v16, %v2103_v5 }
 0x50b   : > { %v2312_v13 = vadd.f32 %v2192_v56, %v5399_v19 }
 0x50d   : > { %2440 = vst [vmem:[%s4111_s24 + $0x338] sm:$0xff] %v2312_v13 }
 0x50e   : > { %v2105_v57 = vpop.f32.mrf.mxu2 }
 0x50f   : > { %v2106_v24 = vadd.f32 %v2105_v57, %v4907_v48  ;;  %v2194_v46 = vpop.f32.mrf.mxu3 }
 0x511   : > { %v2195_v47 = vadd.f32 %v2194_v46, %v2106_v24 }
 0x513   : > { %v2316_v36 = vadd.f32 %v2195_v47, %v5400_v25 }
 0x515   : > { %2444 = vst [vmem:[%s4111_s24 + $0x358] sm:$0xff] %v2316_v36 }
 0x516   : > { %v2107_v37 = vpop.f32.mrf.mxu2 }
 0x517   : > { %v2108_v59 = vadd.f32 %v2107_v37, %v4907_v48  ;;  %v2196_v41 = vpop.f32.mrf.mxu3 }
 0x519   : > { %v2197_v28 = vadd.f32 %v2196_v41, %v2108_v59 }
 0x51b   : > { %v2320_v27 = vadd.f32 %v2197_v28, %v5401_v26 }
 0x51d   : > { %2448 = vst [vmem:[%s4111_s24 + $0x378] sm:$0xff] %v2320_v27 }
 0x51e   : > { %v2110_v63 = vpop.f32.mrf.mxu2 }
 0x51f   : > { %v2111_v42 = vadd.f32 %v2110_v63, %v4907_v48  ;;  %v2199_v32 = vpop.f32.mrf.mxu3 }
 0x521   : > { %v2200_v40 = vadd.f32 %v2199_v32, %v2111_v42 }
 0x523   : > { %v2324_v55 = vadd.f32 %v2200_v40, %v5402_v35 }
 0x525   : > { %2452 = vst [vmem:[%s4111_s24 + $0x398] sm:$0xff] %v2324_v55 }
 0x526   : > { %v2112_v58 = vpop.f32.mrf.mxu2 }
 0x527   : > { %v2113_v7 = vadd.f32 %v2112_v58, %v4907_v48  ;;  %v2201_v60 = vpop.f32.mrf.mxu3 }
 0x529   : > { %v2202_v0 = vadd.f32 %v2201_v60, %v2113_v7 }
 0x52b   : > { %v2328_v62 = vadd.f32 %v2202_v0, %v5403_v8 }
 0x52d   : > { %2456 = vst [vmem:[%s4111_s24 + $0x3b8] sm:$0xff] %v2328_v62 }
 0x52e   : > { %v2115_v52 = vpop.f32.mrf.mxu2 }
 0x52f   : > { %v2116_v53 = vadd.f32 %v2115_v52, %v4907_v48  ;;  %v2204_v51 = vpop.f32.mrf.mxu3 }
 0x531   : > { %v2205_v3 = vadd.f32 %v2204_v51, %v2116_v53 }
 0x533   : > { %v2332_v10 = vadd.f32 %v2205_v3, %v5404_v54 }
 0x535   : > { %2460 = vst [vmem:[%s4111_s24 + $0x3d8] sm:$0xff] %v2332_v10 }
 0x536   : > { %v2117_v11 = vpop.f32.mrf.mxu2 }
 0x537   : > { %v2118_v1 = vadd.f32 %v2117_v11, %v4907_v48  ;;  %v2206_v20 = vpop.f32.mrf.mxu3 }
 0x539   : > { %v2207_v4 = vadd.f32 %v2206_v20, %v2118_v1  ;;  %2471 = sbr.rel (!%p3440_p4) target bundleno = 1406 (0x57e), region = 44 }
 0x53b   : > { %v2336_v6 = vadd.f32 %v2207_v4, %v5405_v21 }
 0x53d   : > { %2464 = vst [vmem:[%s4111_s24 + $0x3f8] sm:$0xff] %v2336_v6 }
 0x53e   : > { %s5417_s11 = smov (!%p2474_p8, %s2473_s11), 32 }
 0x53f   : > { %s3201_s20 = sshll.u32 %s5417_s11, 5 }
 0x540   : > { %p3104_p9 = scmp.eq.s32.totalorder %s3201_s20, 0 }
 0x541   : > { %s5033_s23 = sshrl.u32 (!%p3104_p9), %s5417_s11, 3 }
 0x542   : > { %2484 = sbr.rel (%p3104_p9) target bundleno = 1406 (0x57e), region = 48  ;;  %p3105_p10 = scmp.le.s32.totalorder (!%p3104_p9), %s5033_s23, 0 }
 0x547   : > { %2645 = sbr.rel (%p3105_p10) target bundleno = 1389 (0x56d), region = 96  ;;  %s5406_s21 = smov (!%p3105_p10), %s5027_s16 }
 0x548   : > { %s5407_s26 = smov (!%p3105_p10), %s4111_s24  ;;  %s5042_s14 = smov (!%p3105_p10), 0  }
 0x549   : > { %s5044_s18 = smov (!%p3105_p10), 0  }
 0x54c LB: >> { %v2497_v48 = vld [vmem:[%s3359_s26] sm:$0xff]  ;;  %s2561_s17 = sadd.s32 1, %s3363_s14  ;;  %v2513_v12 = vld [vmem:[%s3359_s26 + $0x8] sm:$0xff]  ;;  %v2529_v22 = vld [vmem:[%s3359_s26 + $0x10] sm:$0xff]  ;;  %s2491_s18 = sadd.s32 1, %s3367_s18   ;;  %s3367_s18 = sphi %s5044_s18, %s2491_s18   ;;  %s3363_s14 = sphi %s5042_s14, %s5410_s14   ;;  %s3359_s26 = sphi %s5407_s26, %s5409_s26   ;;  %s3355_s21 = sphi %s5406_s21, %s5408_s21  }
 0x54d   : >> { %v2499_v43 = vld [vmem:[%s3359_s26 + $0x20] sm:$0xff]  ;;  %2498 = vst [vmem:[%s3355_s21] sm:$0xff] %v2497_v48  ;;  %p2562_p11 = scmp.ge.s32.totalorder %s2561_s17, %s5033_s23  ;;  %v2515_v44 = vld [vmem:[%s3359_s26 + $0x28] sm:$0xff]  ;;  %v2531_v17 = vld [vmem:[%s3359_s26 + $0x30] sm:$0xff]  ;;  %p2490_p12 = scmp.ge.s32.totalorder %s2491_s18, %s5033_s23 }
 0x54e   : >> { %v2501_v49 = vld [vmem:[%s3359_s26 + $0x40] sm:$0xff]  ;;  %2500 = vst [vmem:[%s3355_s21 + $0x20] sm:$0xff] %v2499_v43  ;;  %v2517_v2 = vld [vmem:[%s3359_s26 + $0x48] sm:$0xff]  ;;  %v2533_v14 = vld [vmem:[%s3359_s26 + $0x50] sm:$0xff] }
 0x54f   : >> { %v2503_v9 = vld [vmem:[%s3359_s26 + $0x60] sm:$0xff]  ;;  %2502 = vst [vmem:[%s3355_s21 + $0x40] sm:$0xff] %v2501_v49  ;;  %s5419_s17 = smov (%p2562_p11, %s2561_s17), 0  ;;  %v2519_v50 = vld [vmem:[%s3359_s26 + $0x68] sm:$0xff]  ;;  %v2535_v15 = vld [vmem:[%s3359_s26 + $0x70] sm:$0xff] }
 0x550   : >> { %v2505_v45 = vld [vmem:[%s3359_s26 + $0x80] sm:$0xff]  ;;  %2504 = vst [vmem:[%s3355_s21 + $0x60] sm:$0xff] %v2503_v9  ;;  %s3106_s27 = sshll.u32 %s5419_s17, 8  ;;  %v2521_v33 = vld [vmem:[%s3359_s26 + $0x88] sm:$0xff]  ;;  %v2537_v18 = vld [vmem:[%s3359_s26 + $0x90] sm:$0xff]  ;;  %s5410_s14 = smov %s5419_s17 }
 0x551   : >> { %v2507_v39 = vld [vmem:[%s3359_s26 + $0xa0] sm:$0xff]  ;;  %2506 = vst [vmem:[%s3355_s21 + $0x80] sm:$0xff] %v2505_v45  ;;  %s5076_s28 = scalar_lea.vmem %s4111_s24, %s3106_s27 [#allocation2]   ;;  %s5079_s29 = scalar_lea.vmem %s5027_s16, %s3106_s27   ;;  %v2523_v61 = vld [vmem:[%s3359_s26 + $0xa8] sm:$0xff]  ;;  %v2539_v23 = vld [vmem:[%s3359_s26 + $0xb0] sm:$0xff] }
 0x552   : >> { %v2509_v31 = vld [vmem:[%s3359_s26 + $0xc0] sm:$0xff]  ;;  %2508 = vst [vmem:[%s3355_s21 + $0xa0] sm:$0xff] %v2507_v39  ;;  %v2525_v38 = vld [vmem:[%s3359_s26 + $0xc8] sm:$0xff]  ;;  %v2541_v29 = vld [vmem:[%s3359_s26 + $0xd0] sm:$0xff] }
 0x553   : >> { %v2511_v34 = vld [vmem:[%s3359_s26 + $0xe0] sm:$0xff]  ;;  %2510 = vst [vmem:[%s3355_s21 + $0xc0] sm:$0xff] %v2509_v31  ;;  %v2527_v30 = vld [vmem:[%s3359_s26 + $0xe8] sm:$0xff]  ;;  %v2543_v5 = vld [vmem:[%s3359_s26 + $0xf0] sm:$0xff] }
 0x554   : >> { %2512 = vst [vmem:[%s3355_s21 + $0xe0] sm:$0xff] %v2511_v34  ;;  %v2545_v16 = vld [vmem:[%s3359_s26 + $0x18] sm:$0xff] }
 0x555   : >> { %2514 = vst [vmem:[%s3355_s21 + $0x8] sm:$0xff] %v2513_v12  ;;  %v2547_v56 = vld [vmem:[%s3359_s26 + $0x38] sm:$0xff] }
 0x556   : >> { %2516 = vst [vmem:[%s3355_s21 + $0x28] sm:$0xff] %v2515_v44  ;;  %v2549_v19 = vld [vmem:[%s3359_s26 + $0x58] sm:$0xff] }
 0x557   : >> { %2518 = vst [vmem:[%s3355_s21 + $0x48] sm:$0xff] %v2517_v2  ;;  %v2551_v13 = vld [vmem:[%s3359_s26 + $0x78] sm:$0xff] }
 0x558   : >> { %2520 = vst [vmem:[%s3355_s21 + $0x68] sm:$0xff] %v2519_v50  ;;  %v2553_v57 = vld [vmem:[%s3359_s26 + $0x98] sm:$0xff] }
 0x559   : >> { %2522 = vst [vmem:[%s3355_s21 + $0x88] sm:$0xff] %v2521_v33  ;;  %v2555_v24 = vld [vmem:[%s3359_s26 + $0xb8] sm:$0xff] }
 0x55a   : >> { %2524 = vst [vmem:[%s3355_s21 + $0xa8] sm:$0xff] %v2523_v61  ;;  %v2557_v46 = vld [vmem:[%s3359_s26 + $0xd8] sm:$0xff] }
 0x55b   : >> { %2526 = vst [vmem:[%s3355_s21 + $0xc8] sm:$0xff] %v2525_v38  ;;  %v2559_v47 = vld [vmem:[%s3359_s26 + $0xf8] sm:$0xff]  ;;  %s5409_s26 = smov %s5076_s28 }
 0x55c   : >> { %2528 = vst [vmem:[%s3355_s21 + $0xe8] sm:$0xff] %v2527_v30 }
 0x55d   : >> { %2530 = vst [vmem:[%s3355_s21 + $0x10] sm:$0xff] %v2529_v22 }
 0x55e   : >> { %2532 = vst [vmem:[%s3355_s21 + $0x30] sm:$0xff] %v2531_v17 }
 0x55f   : >> { %2534 = vst [vmem:[%s3355_s21 + $0x50] sm:$0xff] %v2533_v14 }
 0x560   : >> { %2536 = vst [vmem:[%s3355_s21 + $0x70] sm:$0xff] %v2535_v15 }
 0x561   : >> { %2538 = vst [vmem:[%s3355_s21 + $0x90] sm:$0xff] %v2537_v18 }
 0x562   : >> { %2540 = vst [vmem:[%s3355_s21 + $0xb0] sm:$0xff] %v2539_v23 }
 0x563   : >> { %2542 = vst [vmem:[%s3355_s21 + $0xd0] sm:$0xff] %v2541_v29 }
 0x564   : >> { %2544 = vst [vmem:[%s3355_s21 + $0xf0] sm:$0xff] %v2543_v5 }
 0x565   : >> { %2546 = vst [vmem:[%s3355_s21 + $0x18] sm:$0xff] %v2545_v16 }
 0x566   : >> { %2548 = vst [vmem:[%s3355_s21 + $0x38] sm:$0xff] %v2547_v56 }
 0x567   : >> { %2550 = vst [vmem:[%s3355_s21 + $0x58] sm:$0xff] %v2549_v19 }
 0x568   : >> { %2552 = vst [vmem:[%s3355_s21 + $0x78] sm:$0xff] %v2551_v13  ;;  %2493 = sbr.rel (!%p2490_p12) target bundleno = 1356 (0x54c), region = 102 }
 0x569   : >> { %2554 = vst [vmem:[%s3355_s21 + $0x98] sm:$0xff] %v2553_v57 }
 0x56a   : >> { %2556 = vst [vmem:[%s3355_s21 + $0xb8] sm:$0xff] %v2555_v24 }
 0x56b   : >> { %2558 = vst [vmem:[%s3355_s21 + $0xd8] sm:$0xff] %v2557_v46 }
 0x56c   : >> { %2560 = vst [vmem:[%s3355_s21 + $0xf8] sm:$0xff] %v2559_v47  ;;  %s5408_s21 = smov %s5079_s29 }
 0x56d PF: > { %s5144_s30 = sand.u32 7, %s5417_s11   ;;  %s3204_s6 = sshll.u32 %s5033_s23, 8 }
 0x56e   : > { %s5148_s7 = scalar_lea.vmem %s4111_s24, %s3204_s6 [#allocation2]   ;;  %s5151_s8 = scalar_lea.vmem %s5027_s16, %s3204_s6  }
 0x56f   : > { %p3111_p13 = scmp.le.s32.totalorder %s5144_s30, 0 }
 0x570   : > { %s5411_s9 = smov (!%p3111_p13), %s5151_s8  ;;  %s5412_s10 = smov (!%p3111_p13), %s5148_s7 }
 0x571   : > { %2659 = sbr.rel (%p3111_p13) target bundleno = 1406 (0x57e), region = 107  ;;  %s3377_s12 = smov (!%p3111_p13), 0  }
 0x572   : > { %s3381_s13 = smov (!%p3111_p13), 0  }
 0x576 LB: >> { %v2584_v25 = vld [vmem:[%s3375_s10] sm:$0xff]  ;;  %v2586_v36 = vld [vmem:[%s3375_s10 + $0x8] sm:$0xff]  ;;  %v2588_v37 = vld [vmem:[%s3375_s10 + $0x10] sm:$0xff]  ;;  %s2592_s24 = sadd.s32 1, %s3379_s12  ;;  %s2578_s13 = sadd.s32 1, %s3383_s13   ;;  %s3383_s13 = sphi %s3381_s13, %s2578_s13   ;;  %s3379_s12 = sphi %s3377_s12, %s3378_s12   ;;  %s3375_s10 = sphi %s5412_s10, %s2597_s10   ;;  %s3371_s9 = sphi %s5411_s9, %s2598_s9  }
 0x577   : >> { %2585 = vst [vmem:[%s3371_s9] sm:$0xff] %v2584_v25  ;;  %v2590_v59 = vld [vmem:[%s3375_s10 + $0x18] sm:$0xff]  ;;  %p2593_p0 = scmp.ge.s32.totalorder %s2592_s24, %s5144_s30  ;;  %p2577_p1 = scmp.ge.s32.totalorder %s2578_s13, %s5144_s30 }
 0x578   : >> { %2587 = vst [vmem:[%s3371_s9 + $0x8] sm:$0xff] %v2586_v36 }
 0x579   : >> { %2589 = vst [vmem:[%s3371_s9 + $0x10] sm:$0xff] %v2588_v37  ;;  %s5421_s24 = smov (%p2593_p0, %s2592_s24), 0  ;;  %2580 = sbr.rel (!%p2577_p1) target bundleno = 1398 (0x576), region = 113 }
 0x57a   : >> { %2591 = vst [vmem:[%s3371_s9 + $0x18] sm:$0xff] %v2590_v59  ;;  %s3112_s11 = sshll.u32 %s5421_s24, 5  ;;  %s3378_s12 = smov %s5421_s24  }
 0x57b   : >> { %s2597_s10 = scalar_lea.vmem %s5148_s7, %s3112_s11 [#allocation2]   ;;  %s2598_s9 = scalar_lea.vmem %s5151_s8, %s3112_s11  }
 0x57e PF: > { %p12_p2 = scmp.ge.s32.totalorder %s3430_s22, 4   ;;  %s5413_s18 = smov %s3347_s19 }
 0x57f   : > { %s5414_s19 = smov %s3438_s25  ;;  %s5415_s20 = smov %s3430_s22 }
 0x580   :  { %14 = sbr.rel (!%p12_p2) target bundleno = 2 (0x2), region = 124 }

// kernel: distributed_lora_forward.1
= control target key start
LH: loop header
LB: loop body
LE: loop exit
PB: predicated region body
PF: predicated region fallthrough
CT: control target
= control target key end

     0   :  { %s3415_s18 = smov 0   ;;  %s3417_s19 = smov 0   ;;  %s5180_s0 = inlined_call_operand.vmem [shape: f32[500,256], index: 0, kind: input, shape index: {}]   ;;  %s5181_s1 = inlined_call_operand.vmem [shape: bf16[256,512], index: 1, kind: input, shape index: {}]   ;;  %s5182_s2 = inlined_call_operand.vmem [shape: f32[1,512], index: 2, kind: input, shape index: {}]   ;;  %s5183_s3 = inlined_call_operand.vmem [shape: bf16[256,16], index: 3, kind: input, shape index: {}]   ;;  %s5184_s4 = inlined_call_operand.vmem [shape: bf16[16,512], index: 4, kind: input, shape index: {}]   ;;  %s5185_s5 = inlined_call_operand.vmem [shape: f32[500,512], index: 5, kind: output, shape index: {}]  }
   0x1   :  { %s3419_s20 = smov 0  }
   0x2 LB: > { %s3428_s21 = sadd.s32 4294967295, %s3351_s20   ;;  %s3430_s22 = sadd.s32 1, %s3351_s20   ;;  %s3351_s20 = sphi %s3419_s20, %s5415_s20   ;;  %s3347_s19 = sphi %s3417_s19, %s5414_s19   ;;  %s3343_s18 = sphi %s3415_s18, %s5413_s18  }
   0x3   : > { %s129_s23 = ssub.s32 %s3351_s20, %s3430_s22  ;;  %s132_s24 = sadd.s32 1, %s3347_s19 }
   0x4   : > { %p130_p0 = scmp.eq.s32.totalorder %s129_s23, 0  ;;  %p142_p1 = scmp.ne.s32.totalorder %s3347_s19, %s3343_s18 }
   0x5   : > { %p143_p2 = scmp.eq.s32.totalorder %s3428_s21, 1  ;;  %p2692_p3 = scmp.ge.s32.totalorder %s3351_s20, 1 }
   0x6   : > { %s3438_s25 = scalar_select %p130_p0, %s3347_s19, %s132_s24  }
   0x7   : > { %p3440_p4 = por %p143_p2, %p142_p1  ;;  %p199_p5 = scmp.lt.s32.totalorder %s3351_s20, 3 }
   0x9   : > { %p200_p6 = pnand %p2692_p3, %p199_p5 }
   0xb   : > { %203 = sbr.rel (%p200_p6) target bundleno = 1406 (0x57e), region = 40 }
  0x10   : > { %v3188_v0 = vld [vmem:[%s5183_s3 + $0x38] sm:$0xff]  ;;  %v3187_v2 = vld [vmem:[%s5183_s3 + $0x30] sm:$0xff]  ;;  %v3186_v4 = vld [vmem:[%s5183_s3 + $0x28] sm:$0xff]  ;;  %s3463_s14 = sshll.u32 %s3428_s21, 5  ;;  %vm762_vm0 = vcmask 130048   ;;  %s3203_s12 = sshll.u32 (%p3440_p4), %s3428_s21, 10 }
  0x11   : > { %v3196_v1 = vld [vmem:[%s5183_s3 + $0x78] sm:$0xff]  ;;  %544 = vmatpush.bf16.msra.mxu0 %v3188_v0  ;;  %v3195_v3 = vld [vmem:[%s5183_s3 + $0x70] sm:$0xff]  ;;  %v3194_v5 = vld [vmem:[%s5183_s3 + $0x68] sm:$0xff]  ;;  %p238_p7 = scmp.lt.s32.totalorder %s3463_s14, 62  ;;  %s2473_s11 = ssub.s32 (%p3440_p4), 63, %s3463_s14 }
  0x12   : > { %633 = vmatpush.bf16.msra.mxu1 %v3196_v1  ;;  %v3185_v6 = vld [vmem:[%s5183_s3 + $0x20] sm:$0xff]  ;;  %v3184_v8 = vld [vmem:[%s5183_s3 + $0x18] sm:$0xff]  ;;  %v3183_v10 = vld [vmem:[%s5183_s3 + $0x10] sm:$0xff]  ;;  %p2474_p8 = scmp.lt.s32.totalorder (%p3440_p4), %s2473_s11, 32  ;;  %s5027_s16 = scalar_lea.vmem (%p3440_p4), %s5185_s5, %s3203_s12  }
  0x13   : > { %v3193_v7 = vld [vmem:[%s5183_s3 + $0x60] sm:$0xff]  ;;  %v3192_v9 = vld [vmem:[%s5183_s3 + $0x58] sm:$0xff]  ;;  %s239_s29 = scalar_select %p238_p7, %s3463_s14, 62  ;;  %v3191_v11 = vld [vmem:[%s5183_s3 + $0x50] sm:$0xff] }
  0x14   : > { %v3182_v12 = vld [vmem:[%s5183_s3 + $0x8] sm:$0xff]  ;;  %v3181_v14 = vld [vmem:[%s5183_s3] sm:$0xff] }
  0x15   : > { %545 = vmatpush.bf16.msra.mxu0 %v3187_v2  ;;  %s3116_s9 = sshll.u32 %s239_s29, 4  ;;  %v3190_v13 = vld [vmem:[%s5183_s3 + $0x48] sm:$0xff]  ;;  %v3189_v15 = vld [vmem:[%s5183_s3 + $0x40] sm:$0xff] }
  0x16   : > { %634 = vmatpush.bf16.msra.mxu1 %v3195_v3  ;;  %s3494_s17 = scalar_lea.vmem %s5180_s0, %s3116_s9  ;;  %s229_s9 = sand.u32 1, %s3343_s18  }
  0x17   : > { %v256_v16 = vld [vmem:[%s3494_s17] sm:$0xff]  ;;  %v258_v17 = vld [vmem:[%s3494_s17 + $0x10] sm:$0xff]  ;;  %v257_v18 = vld [vmem:[%s3494_s17 + $0x8] sm:$0xff]  ;;  %s2693_s18 = sshll.u32 %s229_s9, 10 }
  0x18   : > { %v259_v19 = vld [vmem:[%s3494_s17 + $0x18] sm:$0xff]  ;;  %v3506_v20 = vpack.c.bf16 %v258_v17, %v256_v16  ;;  %v260_v22 = vld [vmem:[%s3494_s17 + $0x20] sm:$0xff]  ;;  %v262_v23 = vld [vmem:[%s3494_s17 + $0x30] sm:$0xff]  ;;  %s4111_s24 = scalar_lea.vmem [#allocation2], %s2693_s18  }
  0x19   : > { %546 = vmatpush.bf16.msra.mxu0 %v3186_v4  ;;  %v3508_v21 = vpack.c.bf16 %v259_v19, %v257_v18  ;;  %v261_v24 = vld [vmem:[%s3494_s17 + $0x28] sm:$0xff]  ;;  %v263_v25 = vld [vmem:[%s3494_s17 + $0x38] sm:$0xff]  ;;  %v3516_v26 = vpack.c.bf16 %v262_v23, %v260_v22  ;;  %v264_v28 = vld [vmem:[%s3494_s17 + $0x40] sm:$0xff] }
  0x1a   : > { %635 = vmatpush.bf16.msra.mxu1 %v3194_v5  ;;  %v3518_v27 = vpack.c.bf16 %v263_v25, %v261_v24  ;;  %v266_v29 = vld [vmem:[%s3494_s17 + $0x50] sm:$0xff]  ;;  %v265_v30 = vld [vmem:[%s3494_s17 + $0x48] sm:$0xff]  ;;  %v267_v31 = vld [vmem:[%s3494_s17 + $0x58] sm:$0xff] }
  0x1b   : > { %v3526_v32 = vpack.c.bf16 %v266_v29, %v264_v28  ;;  %v3528_v33 = vpack.c.bf16 %v267_v31, %v265_v30  ;;  %v268_v34 = vld [vmem:[%s3494_s17 + $0x60] sm:$0xff]  ;;  %v270_v35 = vld [vmem:[%s3494_s17 + $0x70] sm:$0xff]  ;;  %v269_v36 = vld [vmem:[%s3494_s17 + $0x68] sm:$0xff] }
  0x1c   : > { %v271_v37 = vld [vmem:[%s3494_s17 + $0x78] sm:$0xff]  ;;  %v3536_v38 = vpack.c.bf16 %v270_v35, %v268_v34  ;;  %v272_v40 = vld [vmem:[%s3494_s17 + $0x80] sm:$0xff]  ;;  %v274_v41 = vld [vmem:[%s3494_s17 + $0x90] sm:$0xff] }
  0x1d   : > { %547 = vmatpush.bf16.msra.mxu0 %v3185_v6  ;;  %5223 = vst [vmem:[#allocation3_spill] sm:$0xff] %v3526_v32  ;;  %v3538_v39 = vpack.c.bf16 %v271_v37, %v269_v36  ;;  %v273_v42 = vld [vmem:[%s3494_s17 + $0x88] sm:$0xff]  ;;  %v275_v43 = vld [vmem:[%s3494_s17 + $0x98] sm:$0xff]  ;;  %v3546_v44 = vpack.c.bf16 %v274_v41, %v272_v40  ;;  %v276_v46 = vld [vmem:[%s3494_s17 + $0xa0] sm:$0xff] }
  0x1e   : > { %636 = vmatpush.bf16.msra.mxu1 %v3193_v7  ;;  %5224 = vst [vmem:[#allocation4_spill] sm:$0xff] %v3528_v33  ;;  %v3548_v45 = vpack.c.bf16 %v275_v43, %v273_v42  ;;  %v278_v47 = vld [vmem:[%s3494_s17 + $0xb0] sm:$0xff]  ;;  %v277_v48 = vld [vmem:[%s3494_s17 + $0xa8] sm:$0xff]  ;;  %v279_v49 = vld [vmem:[%s3494_s17 + $0xb8] sm:$0xff] }
  0x1f   : > { %5225 = vst [vmem:[#allocation5_spill] sm:$0xff] %v3536_v38  ;;  %v3556_v50 = vpack.c.bf16 %v278_v47, %v276_v46  ;;  %v3558_v51 = vpack.c.bf16 %v279_v49, %v277_v48  ;;  %v280_v52 = vld [vmem:[%s3494_s17 + $0xc0] sm:$0xff]  ;;  %v282_v53 = vld [vmem:[%s3494_s17 + $0xd0] sm:$0xff]  ;;  %v281_v54 = vld [vmem:[%s3494_s17 + $0xc8] sm:$0xff] }
  0x20   : > { %5226 = vst [vmem:[#allocation6_spill] sm:$0xff] %v3538_v39  ;;  %v283_v55 = vld [vmem:[%s3494_s17 + $0xd8] sm:$0xff]  ;;  %v3566_v56 = vpack.c.bf16 %v282_v53, %v280_v52  ;;  %v284_v58 = vld [vmem:[%s3494_s17 + $0xe0] sm:$0xff]  ;;  %v286_v59 = vld [vmem:[%s3494_s17 + $0xf0] sm:$0xff] }
  0x21   : > { %548 = vmatpush.bf16.msra.mxu0 %v3184_v8  ;;  %5227 = vst [vmem:[#allocation7_spill] sm:$0xff] %v3546_v44  ;;  %v3568_v57 = vpack.c.bf16 %v283_v55, %v281_v54  ;;  %v285_v60 = vld [vmem:[%s3494_s17 + $0xe8] sm:$0xff]  ;;  %v287_v61 = vld [vmem:[%s3494_s17 + $0xf8] sm:$0xff]  ;;  %v3576_v62 = vpack.c.bf16 %v286_v59, %v284_v58  ;;  %v288_v0 = vld [vmem:[%s3494_s17 + $0x100] sm:$0xff] }
  0x22   : > { %637 = vmatpush.bf16.msra.mxu1 %v3192_v9  ;;  %5228 = vst [vmem:[#allocation8_spill] sm:$0xff] %v3548_v45  ;;  %v3578_v63 = vpack.c.bf16 %v287_v61, %v285_v60  ;;  %v290_v1 = vld [vmem:[%s3494_s17 + $0x110] sm:$0xff]  ;;  %v289_v2 = vld [vmem:[%s3494_s17 + $0x108] sm:$0xff]  ;;  %v291_v3 = vld [vmem:[%s3494_s17 + $0x118] sm:$0xff] }
  0x23   : > { %5229 = vst [vmem:[#allocation9_spill] sm:$0xff] %v3556_v50  ;;  %v3586_v4 = vpack.c.bf16 %v290_v1, %v288_v0  ;;  %v3588_v5 = vpack.c.bf16 %v291_v3, %v289_v2  ;;  %v295_v16 = vld [vmem:[%s3494_s17 + $0x138] sm:$0xff]  ;;  %v296_v30 = vld [vmem:[%s3494_s17 + $0x140] sm:$0xff]  ;;  %v298_v31 = vld [vmem:[%s3494_s17 + $0x150] sm:$0xff] }
  0x24   : > { %5230 = vst [vmem:[#allocation10_spill] sm:$0xff] %v3558_v51  ;;  %v297_v34 = vld [vmem:[%s3494_s17 + $0x148] sm:$0xff]  ;;  %v299_v35 = vld [vmem:[%s3494_s17 + $0x158] sm:$0xff]  ;;  %v3610_v36 = vpack.c.bf16 %v298_v31, %v296_v30  ;;  %v300_v49 = vld [vmem:[%s3494_s17 + $0x160] sm:$0xff] }
  0x25   : > { %549 = vmatpush.bf16.msra.mxu0 %v3183_v10  ;;  %5231 = vst [vmem:[#allocation11_spill] sm:$0xff] %v3566_v56  ;;  %v3612_v37 = vpack.c.bf16 %v299_v35, %v297_v34  ;;  %v302_v52 = vld [vmem:[%s3494_s17 + $0x170] sm:$0xff]  ;;  %v301_v53 = vld [vmem:[%s3494_s17 + $0x168] sm:$0xff]  ;;  %v303_v54 = vld [vmem:[%s3494_s17 + $0x178] sm:$0xff] }
  0x26   : > { %638 = vmatpush.bf16.msra.mxu1 %v3191_v11  ;;  %5232 = vst [vmem:[#allocation12_spill] sm:$0xff] %v3568_v57  ;;  %v3622_v55 = vpack.c.bf16 %v302_v52, %v300_v49  ;;  %v3624_v58 = vpack.c.bf16 %v303_v54, %v301_v53  ;;  %v311_v30 = vld [vmem:[%s3494_s17 + $0x1b8] sm:$0xff]  ;;  %v2765_v53 = vld [vmem:[%s5184_s4 + $0x10] sm:$0xf0] }
  0x27   : > { %5233 = vst [vmem:[#allocation13_spill] sm:$0xff] %v3576_v62 }
  0x28   : > { %5234 = vst [vmem:[#allocation14_spill] sm:$0xff] %v3578_v63 }
  0x29   : > { %550 = vmatpush.bf16.msra.mxu0 %v3182_v12  ;;  %5235 = vst [vmem:[#allocation15_spill] sm:$0xff] %v3588_v5 }
  0x2a   : > { %639 = vmatpush.bf16.msra.mxu1 %v3190_v13  ;;  %v292_v13 = vld [vmem:[%s3494_s17 + $0x120] sm:$0xff] }
  0x2d   : > { %551 = vmatpush.bf16.msra.mxu0 %v3181_v14  ;;  %v294_v14 = vld [vmem:[%s3494_s17 + $0x130] sm:$0xff] }
  0x2e   : > { %640 = vmatpush.bf16.msra.mxu1 %v3189_v15  ;;  %v293_v15 = vld [vmem:[%s3494_s17 + $0x128] sm:$0xff]  ;;  %v3598_v17 = vpack.c.bf16 %v294_v14, %v292_v13 }
  0x2f   : > { %v3600_v18 = vpack.c.bf16 %v295_v16, %v293_v15 }
  0x30   : > { %552 = vmatmul.bf16.vlgmr.msra.gmra.mxu0 %v3506_v20 }
  0x31   : > { %641 = vmatmul.bf16.vlgmr.msra.gmra.mxu1 %v3508_v21 }
  0x40   : > { %557 = vmatmul.bf16.gmra.mxu0 %v3516_v26 }
  0x41   : > { %646 = vmatmul.bf16.gmra.mxu1 %v3518_v27 }
  0x50   : > { %562 = vmatmul.bf16.gmra.mxu0 %v3526_v32 }
  0x51   : > { %651 = vmatmul.bf16.gmra.mxu1 %v3528_v33 }
  0x60   : > { %567 = vmatmul.bf16.gmra.mxu0 %v3536_v38 }
  0x61   : > { %656 = vmatmul.bf16.gmra.mxu1 %v3538_v39 }
  0x70   : > { %572 = vmatmul.bf16.gmra.mxu0 %v3546_v44 }
  0x71   : > { %661 = vmatmul.bf16.gmra.mxu1 %v3548_v45 }
  0x80   : > { %577 = vmatmul.bf16.gmra.mxu0 %v3556_v50 }
  0x81   : > { %666 = vmatmul.bf16.gmra.mxu1 %v3558_v51 }
  0x90   : > { %582 = vmatmul.bf16.gmra.mxu0 %v3566_v56 }
  0x91   : > { %671 = vmatmul.bf16.gmra.mxu1 %v3568_v57 }
  0xa0   : > { %587 = vmatmul.bf16.gmra.mxu0 %v3576_v62 }
  0xa1   : > { %676 = vmatmul.bf16.gmra.mxu1 %v3578_v63 }
  0xad   : > { %v553_v6 = vpop.f32.mrf.mxu0 }
  0xae   : > { %v642_v7 = vpop.f32.mrf.mxu1 }
  0xaf   : > { %v643_v8 = vadd.f32 %v642_v7, %v553_v6  ;;  %v304_v6 = vld [vmem:[%s3494_s17 + $0x180] sm:$0xff]  ;;  %v306_v7 = vld [vmem:[%s3494_s17 + $0x190] sm:$0xff] }
  0xb0   : > { %592 = vmatmul.bf16.gmra.mxu0 %v3586_v4 }
  0xb1   : > { %681 = vmatmul.bf16.gmra.mxu1 %v3588_v5 }
  0xb5   : > { %v555_v9 = vpop.f32.mrf.mxu0 }
  0xb6   : > { %v644_v10 = vpop.f32.mrf.mxu1 }
  0xb7   : > { %v645_v11 = vadd.f32 %v644_v10, %v555_v9  ;;  %v307_v9 = vld [vmem:[%s3494_s17 + $0x198] sm:$0xff]  ;;  %v3634_v10 = vpack.c.bf16 %v306_v7, %v304_v6  ;;  %v2771_v6 = vld [vmem:[%s5184_s4 + $0x8] sm:$0xf] }
  0xb8   : > { %v3200_v7 = vld [vmem:[%s5184_s4 + $0x14] sm:$0xf0] }
  0xb9   : > { %v3592_v12 = vpack.c.bf16 %v645_v11, %v643_v8  ;;  %v305_v8 = vld [vmem:[%s3494_s17 + $0x188] sm:$0xff] }
  0xba   : > { %v3636_v11 = vpack.c.bf16 %v307_v9, %v305_v8  ;;  %v3198_v8 = vld [vmem:[%s5184_s4 + $0xc] sm:$0xf]  ;;  %v2772_v9 = vor.u32 %v3200_v7, %v2771_v6 }
  0xbd   : > { %v558_v19 = vpop.f32.mrf.mxu0 }
  0xbe   : > { %v647_v22 = vpop.f32.mrf.mxu1 }
  0xbf   : > { %v648_v23 = vadd.f32 %v647_v22, %v558_v19 }
  0xc0   : > { %597 = vmatmul.bf16.gmra.mxu0 %v3598_v17 }
  0xc1   : > { %686 = vmatmul.bf16.gmra.mxu1 %v3600_v18 }
  0xc5   : > { %v560_v24 = vpop.f32.mrf.mxu0 }
  0xc6   : > { %v649_v25 = vpop.f32.mrf.mxu1 }
  0xc7   : > { %v650_v28 = vadd.f32 %v649_v25, %v560_v24  ;;  %v308_v24 = vld [vmem:[%s3494_s17 + $0x1a0] sm:$0xff]  ;;  %v310_v25 = vld [vmem:[%s3494_s17 + $0x1b0] sm:$0xff] }
  0xc8   : > { %v3646_v31 = vpack.c.bf16 %v310_v25, %v308_v24 }
  0xc9   : > { %v3604_v29 = vpack.c.bf16 %v650_v28, %v648_v23  ;;  %v309_v28 = vld [vmem:[%s3494_s17 + $0x1a8] sm:$0xff] }
  0xca   : > { %v3648_v34 = vpack.c.bf16 %v311_v30, %v309_v28 }
  0xcd   : > { %v563_v40 = vpop.f32.mrf.mxu0 }
  0xce   : > { %v652_v41 = vpop.f32.mrf.mxu1 }
  0xcf   : > { %v653_v42 = vadd.f32 %v652_v41, %v563_v40 }
  0xd0   : > { %602 = vmatmul.bf16.gmra.mxu0 %v3610_v36 }
  0xd1   : > { %691 = vmatmul.bf16.gmra.mxu1 %v3612_v37 }
  0xd5   : > { %v565_v43 = vpop.f32.mrf.mxu0 }
  0xd6   : > { %v654_v46 = vpop.f32.mrf.mxu1 }
  0xd7   : > { %v655_v47 = vadd.f32 %v654_v46, %v565_v43  ;;  %v3199_v43 = vld [vmem:[%s5184_s4 + $0xc] sm:$0xf0]  ;;  %v3197_v46 = vld [vmem:[%s5184_s4 + $0x4] sm:$0xf] }
  0xd9   : > { %v3616_v48 = vpack.c.bf16 %v655_v47, %v653_v42  ;;  %v2763_v42 = vld [vmem:[%s5184_s4] sm:$0xf] }
  0xda   : > { %v2764_v52 = vor.u32 %v3199_v43, %v2763_v42  ;;  %v317_v42 = vld [vmem:[%s3494_s17 + $0x1e8] sm:$0xff]  ;;  %v319_v43 = vld [vmem:[%s3494_s17 + $0x1f8] sm:$0xff] }
  0xdc   : > { %3206 = vmatpush.bf16.msra.mxu2 %v2764_v52  ;;  %818 = vmatpush.bf16.msrb.mxu0 %v2764_v52 }
  0xdd   : > { %v568_v59 = vpop.f32.mrf.mxu0 }
  0xde   : > { %v657_v60 = vpop.f32.mrf.mxu1 }
  0xdf   : > { %v658_v61 = vadd.f32 %v657_v60, %v568_v59  ;;  %v2768_v59 = vor.u32 %v3197_v46, %v2765_v53 }
  0xe0   : > { %607 = vmatmul.bf16.gmra.mxu0 %v3622_v55  ;;  %996 = vmatpush.bf16.msrb.mxu2 %v2772_v9 }
  0xe1   : > { %696 = vmatmul.bf16.gmra.mxu1 %v3624_v58  ;;  %3207 = vmatpush.bf16.msra.mxu3 %v2768_v59 }
  0xe2   : > { %907 = vmatpush.bf16.msrb.mxu1 %v2768_v59 }
  0xe5   : > { %v570_v0 = vpop.f32.mrf.mxu0 }
  0xe6   : > { %v659_v1 = vpop.f32.mrf.mxu1 }
  0xe7   : > { %v660_v2 = vadd.f32 %v659_v1, %v570_v0  ;;  %v314_v0 = vld [vmem:[%s3494_s17 + $0x1d0] sm:$0xff]  ;;  %v313_v1 = vld [vmem:[%s3494_s17 + $0x1c8] sm:$0xff] }
  0xe9   : > { %v3628_v3 = vpack.c.bf16 %v660_v2, %v658_v61  ;;  %v312_v61 = vld [vmem:[%s3494_s17 + $0x1c0] sm:$0xff]  ;;  %v315_v2 = vld [vmem:[%s3494_s17 + $0x1d8] sm:$0xff] }
  0xed   : > { %v573_v13 = vpop.f32.mrf.mxu0 }
  0xee   : > { %v662_v14 = vpop.f32.mrf.mxu1 }
  0xef   : > { %v663_v15 = vadd.f32 %v662_v14, %v573_v13  ;;  %v2773_v13 = vld [vmem:[%s5184_s4 + $0x18] sm:$0xf0]  ;;  %v3682_v14 = vpack.c.bf16 %v314_v0, %v312_v61 }
  0xf0   : > { %612 = vmatmul.bf16.gmra.mxu0 %v3634_v10 }
  0xf1   : > { %701 = vmatmul.bf16.gmra.mxu1 %v3636_v11 }
  0xf5   : > { %v575_v16 = vpop.f32.mrf.mxu0 }
  0xf6   : > { %v664_v19 = vpop.f32.mrf.mxu1 }
  0xf7   : > { %v665_v22 = vadd.f32 %v664_v19, %v575_v16  ;;  %v2776_v16 = vor.u32 %v3198_v8, %v2773_v13 }
  0xf9   : > { %v3640_v23 = vpack.c.bf16 %v665_v22, %v663_v15  ;;  %v3684_v15 = vpack.c.bf16 %v315_v2, %v313_v1  ;;  %1085 = vmatpush.bf16.msrb.mxu3 %v2776_v16 }
  0xfd   : > { %v578_v35 = vpop.f32.mrf.mxu0 }
  0xfe   : > { %v667_v40 = vpop.f32.mrf.mxu1 }
  0xff   : > { %v668_v41 = vadd.f32 %v667_v40, %v578_v35  ;;  %v316_v40 = vld [vmem:[%s3494_s17 + $0x1e0] sm:$0xff] }
 0x100   : > { %617 = vmatmul.bf16.gmra.mxu0 %v3646_v31 }
 0x101   : > { %706 = vmatmul.bf16.gmra.mxu1 %v3648_v34 }
 0x105   : > { %v580_v47 = vpop.f32.mrf.mxu0 }
 0x106   : > { %v669_v49 = vpop.f32.mrf.mxu1 }
 0x107   : > { %v670_v54 = vadd.f32 %v669_v49, %v580_v47  ;;  %v3696_v47 = vpack.c.bf16 %v319_v43, %v317_v42 }
 0x109   : > { %v3664_v60 = vpack.c.bf16 %v670_v54, %v668_v41  ;;  %v318_v41 = vld [vmem:[%s3494_s17 + $0x1f0] sm:$0xff] }
 0x10a   : > { %v3694_v46 = vpack.c.bf16 %v318_v41, %v316_v40 }
 0x10d   : > { %v583_v19 = vpop.f32.mrf.mxu0 }
 0x10e   : > { %v672_v22 = vpop.f32.mrf.mxu1 }
 0x10f   : > { %v673_v24 = vadd.f32 %v672_v22, %v583_v19 }
 0x110   : > { %622 = vmatmul.bf16.gmra.mxu0 %v3682_v14 }
 0x111   : > { %711 = vmatmul.bf16.gmra.mxu1 %v3684_v15 }
 0x115   : > { %v585_v25 = vpop.f32.mrf.mxu0 }
 0x116   : > { %v674_v28 = vpop.f32.mrf.mxu1 }
 0x117   : > { %v675_v30 = vadd.f32 %v674_v28, %v585_v25 }
 0x119   : > { %v3688_v35 = vpack.c.bf16 %v675_v30, %v673_v24 }
 0x11d   : > { %v588_v49 = vpop.f32.mrf.mxu0 }
 0x11e   : > { %v677_v52 = vpop.f32.mrf.mxu1 }
 0x11f   : > { %v678_v59 = vadd.f32 %v677_v52, %v588_v49 }
 0x120   : > { %627 = vmatmul.bf16.gmra.mxu0 %v3694_v46 }
 0x121   : > { %716 = vmatmul.bf16.gmra.mxu1 %v3696_v47 }
 0x125   : > { %v590_v53 = vpop.f32.mrf.mxu0 }
 0x126   : > { %v679_v54 = vpop.f32.mrf.mxu1 }
 0x127   : > { %v680_v61 = vadd.f32 %v679_v54, %v590_v53 }
 0x129   : > { %v3700_v0 = vpack.c.bf16 %v680_v61, %v678_v59  ;;  %v2955_v61 = vld [vmem:[%s5181_s1 + $0xe0] sm:$0xf] }
 0x12b   : > { %2784 = vmatmul.msk.bf16.vlgmr.msra.gmra.mxu2 %vm762_vm0, %v3700_v0  ;;  %2800 = vmatmul.msk.bf16.vlgmr.msra.gmra.mxu3 %vm762_vm0, %v3700_v0 }
 0x12d   : > { %v593_v1 = vpop.f32.mrf.mxu0 }
 0x12e   : > { %v682_v2 = vpop.f32.mrf.mxu1 }
 0x12f   : > { %v683_v8 = vadd.f32 %v682_v2, %v593_v1  ;;  %v3147_v1 = vld [vmem:[%s5181_s1 + $0xec] sm:$0xf0] }
 0x130   : > { %2777 = vmatmul.msk.bf16.vlgmr.msrb.gmra.mxu0 %vm762_vm0, %v3592_v12  ;;  %v2956_v2 = vor.u32 %v3147_v1, %v2955_v61  ;;  %v3051_v1 = vld [vmem:[%s5181_s1 + $0x1a0] sm:$0xf] }
 0x131   : > { %2793 = vmatmul.msk.bf16.vlgmr.msrb.gmra.mxu1 %vm762_vm0, %v3592_v12 }
 0x132   : > { %1497 = vmatpush.bf16.msra.mxu0 %v2956_v2  ;;  %v2907_v2 = vld [vmem:[%s5181_s1 + $0x80] sm:$0xf] }
 0x135   : > { %v595_v6 = vpop.f32.mrf.mxu0 }
 0x136   : > { %v684_v7 = vpop.f32.mrf.mxu1 }
 0x137   : > { %v685_v9 = vadd.f32 %v684_v7, %v595_v6  ;;  %v3083_v6 = vld [vmem:[%s5181_s1 + $0x1e0] sm:$0xf]  ;;  %v3179_v7 = vld [vmem:[%s5181_s1 + $0x1ec] sm:$0xf0] }
 0x139   : > { %v3710_v13 = vpack.c.bf16 %v685_v9, %v683_v8  ;;  %v3084_v8 = vor.u32 %v3179_v7, %v3083_v6  ;;  %v2939_v9 = vld [vmem:[%s5181_s1 + $0xc0] sm:$0xf]  ;;  %v3135_v6 = vld [vmem:[%s5181_s1 + $0x8c] sm:$0xf0] }
 0x13a   : > { %v2908_v7 = vor.u32 %v3135_v6, %v2907_v2 }
 0x13b   : > { %2785 = vmatmul.msk.bf16.gmra.mxu2 %vm762_vm0, %v3710_v13  ;;  %2801 = vmatmul.msk.bf16.gmra.mxu3 %vm762_vm0, %v3710_v13 }
 0x13c   : > { %1586 = vmatpush.bf16.msra.mxu1 %v3084_v8  ;;  %v3035_v8 = vld [vmem:[%s5181_s1 + $0x180] sm:$0xf] }
 0x13d   : > { %v598_v16 = vpop.f32.mrf.mxu0 }
 0x13e   : > { %v687_v19 = vpop.f32.mrf.mxu1 }
 0x13f   : > { %v688_v25 = vadd.f32 %v687_v19, %v598_v16  ;;  %v3143_v16 = vld [vmem:[%s5181_s1 + $0xcc] sm:$0xf0] }
 0x140   : > { %2778 = vmatmul.msk.bf16.gmra.mxu0 %vm762_vm0, %v3604_v29  ;;  %v2940_v19 = vor.u32 %v3143_v16, %v2939_v9  ;;  %v3167_v9 = vld [vmem:[%s5181_s1 + $0x18c] sm:$0xf0] }
 0x141   : > { %2794 = vmatmul.msk.bf16.gmra.mxu1 %vm762_vm0, %v3604_v29 }
 0x142   : > { %1498 = vmatpush.bf16.msra.mxu0 %v2940_v19 }
 0x145   : > { %v600_v22 = vpop.f32.mrf.mxu0 }
 0x146   : > { %v689_v24 = vpop.f32.mrf.mxu1 }
 0x147   : > { %v690_v28 = vadd.f32 %v689_v24, %v600_v22  ;;  %v3067_v22 = vld [vmem:[%s5181_s1 + $0x1c0] sm:$0xf]  ;;  %v3175_v24 = vld [vmem:[%s5181_s1 + $0x1cc] sm:$0xf0] }
 0x149   : > { %v3720_v30 = vpack.c.bf16 %v690_v28, %v688_v25 }
 0x14b   : > { %2786 = vmatmul.msk.bf16.gmra.mxu2 %vm762_vm0, %v3720_v30  ;;  %2802 = vmatmul.msk.bf16.gmra.mxu3 %vm762_vm0, %v3720_v30 }
 0x14d   : > { %v603_v40 = vpop.f32.mrf.mxu0 }
 0x14e   : > { %v692_v41 = vpop.f32.mrf.mxu1 }
 0x14f   : > { %v693_v49 = vadd.f32 %v692_v41, %v603_v40  ;;  %v3068_v40 = vor.u32 %v3175_v24, %v3067_v22  ;;  %v3036_v22 = vor.u32 %v3167_v9, %v3035_v8  ;;  %v2891_v24 = vld [vmem:[%s5181_s1 + $0x60] sm:$0xf] }
 0x150   : > { %2779 = vmatmul.msk.bf16.gmra.mxu0 %vm762_vm0, %v3616_v48  ;;  %v2859_v9 = vld [vmem:[%s5181_s1 + $0x20] sm:$0xf] }
 0x151   : > { %2795 = vmatmul.msk.bf16.gmra.mxu1 %vm762_vm0, %v3616_v48 }
 0x152   : > { %1587 = vmatpush.bf16.msra.mxu1 %v3068_v40  ;;  %v3019_v40 = vld [vmem:[%s5181_s1 + $0x160] sm:$0xf] }
 0x155   : > { %v605_v42 = vpop.f32.mrf.mxu0 }
 0x156   : > { %v694_v43 = vpop.f32.mrf.mxu1 }
 0x157   : > { %v695_v52 = vadd.f32 %v694_v43, %v605_v42  ;;  %v2923_v43 = vld [vmem:[%s5181_s1 + $0xa0] sm:$0xf] }
 0x159   : > { %v3730_v53 = vpack.c.bf16 %v695_v52, %v693_v49  ;;  %v3139_v49 = vld [vmem:[%s5181_s1 + $0xac] sm:$0xf0] }
 0x15a   : > { %v2924_v52 = vor.u32 %v3139_v49, %v2923_v43  ;;  %v2875_v43 = vld [vmem:[%s5181_s1 + $0x40] sm:$0xf]  ;;  %v3127_v49 = vld [vmem:[%s5181_s1 + $0x4c] sm:$0xf0] }
 0x15b   : > { %2787 = vmatmul.msk.bf16.gmra.mxu2 %vm762_vm0, %v3730_v53  ;;  %2803 = vmatmul.msk.bf16.gmra.mxu3 %vm762_vm0, %v3730_v53 }
 0x15c   : > { %1499 = vmatpush.bf16.msra.mxu0 %v2924_v52  ;;  %v2876_v52 = vor.u32 %v3127_v49, %v2875_v43  ;;  %v2971_v43 = vld [vmem:[%s5181_s1 + $0x100] sm:$0xf]  ;;  %v3151_v49 = vld [vmem:[%s5181_s1 + $0x10c] sm:$0xf0] }
 0x15d   : > { %v608_v54 = vpop.f32.mrf.mxu0 }
 0x15e   : > { %v697_v59 = vpop.f32.mrf.mxu1 }
 0x15f   : > { %v698_v41 = vadd.f32 %v697_v59, %v608_v54  ;;  %v3171_v54 = vld [vmem:[%s5181_s1 + $0x1ac] sm:$0xf0] }
 0x160   : > { %2780 = vmatmul.msk.bf16.gmra.mxu0 %vm762_vm0, %v3628_v3  ;;  %v3052_v59 = vor.u32 %v3171_v54, %v3051_v1  ;;  %v3003_v1 = vld [vmem:[%s5181_s1 + $0x140] sm:$0xf]  ;;  %v3159_v54 = vld [vmem:[%s5181_s1 + $0x14c] sm:$0xf0] }
 0x161   : > { %2796 = vmatmul.msk.bf16.gmra.mxu1 %vm762_vm0, %v3628_v3  ;;  %1500 = vmatpush.bf16.msra.mxu0 %v2908_v7  ;;  %v3004_v6 = vor.u32 %v3159_v54, %v3003_v1  ;;  %v2972_v54 = vor.u32 %v3151_v49, %v2971_v43  ;;  %v3177_v43 = vld [vmem:[%s5181_s1 + $0x1e4] sm:$0xf] }
 0x162   : > { %1588 = vmatpush.bf16.msra.mxu1 %v3052_v59 }
 0x165   : > { %v610_v25 = vpop.f32.mrf.mxu0 }
 0x166   : > { %v699_v28 = vpop.f32.mrf.mxu1  ;;  %1589 = vmatpush.bf16.msra.mxu1 %v3036_v22  ;;  %v3123_v22 = vld [vmem:[%s5181_s1 + $0x2c] sm:$0xf0] }
 0x167   : > { %v700_v42 = vadd.f32 %v699_v28, %v610_v25  ;;  %v3131_v25 = vld [vmem:[%s5181_s1 + $0x6c] sm:$0xf0] }
 0x168   : > { %v2892_v28 = vor.u32 %v3131_v25, %v2891_v24  ;;  %v2860_v24 = vor.u32 %v3123_v22, %v2859_v9 }
 0x169   : > { %v3770_v61 = vpack.c.bf16 %v700_v42, %v698_v41  ;;  %v3163_v41 = vld [vmem:[%s5181_s1 + $0x16c] sm:$0xf0] }
 0x16a   : > { %1501 = vmatpush.bf16.msra.mxu0 %v2892_v28  ;;  %v3020_v42 = vor.u32 %v3163_v41, %v3019_v40  ;;  %v2987_v28 = vld [vmem:[%s5181_s1 + $0x120] sm:$0xf]  ;;  %v3119_v41 = vld [vmem:[%s5181_s1 + $0xc] sm:$0xf0] }
 0x16b   : > { %2788 = vmatmul.msk.bf16.gmra.mxu2 %vm762_vm0, %v3770_v61  ;;  %2804 = vmatmul.msk.bf16.gmra.mxu3 %vm762_vm0, %v3770_v61  ;;  %v2843_v40 = vld [vmem:[%s5181_s1] sm:$0xf] }
 0x16c   : > { %1590 = vmatpush.bf16.msra.mxu1 %v3020_v42  ;;  %v2844_v42 = vor.u32 %v3119_v41, %v2843_v40  ;;  %v3145_v41 = vld [vmem:[%s5181_s1 + $0xe4] sm:$0xf] }
 0x16d   : > { %v613_v16 = vpop.f32.mrf.mxu0 }
 0x16e   : > { %v702_v19 = vpop.f32.mrf.mxu1  ;;  %1502 = vmatpush.bf16.msra.mxu0 %v2876_v52 }
 0x16f   : > { %v703_v7 = vadd.f32 %v702_v19, %v613_v16  ;;  %v3155_v16 = vld [vmem:[%s5181_s1 + $0x12c] sm:$0xf0] }
 0x170   : > { %2781 = vmatmul.msk.bf16.gmra.mxu0 %vm762_vm0, %v3640_v23  ;;  %1591 = vmatpush.bf16.msra.mxu1 %v3004_v6  ;;  %v2988_v19 = vor.u32 %v3155_v16, %v2987_v28 }
 0x171   : > { %2797 = vmatmul.msk.bf16.gmra.mxu1 %vm762_vm0, %v3640_v23 }
 0x172   : > { %1503 = vmatpush.bf16.msra.mxu0 %v2860_v24 }
 0x174   : > { %1592 = vmatpush.bf16.msra.mxu1 %v2988_v19 }
 0x175   : > { %v615_v59 = vpop.f32.mrf.mxu0 }
 0x176   : > { %v704_v2 = vpop.f32.mrf.mxu1  ;;  %1504 = vmatpush.bf16.msra.mxu0 %v2844_v42  ;;  %v2957_v42 = vld [vmem:[%s5181_s1 + $0xf0] sm:$0xf0] }
 0x177   : > { %v705_v8 = vadd.f32 %v704_v2, %v615_v59  ;;  %v2960_v49 = vor.u32 %v3145_v41, %v2957_v42 }
 0x178   : > { %1593 = vmatpush.bf16.msra.mxu1 %v2972_v54 }
 0x179   : > { %v3828_v25 = vpack.c.bf16 %v705_v8, %v703_v7  ;;  %1675 = vmatpush.bf16.msra.mxu2 %v2960_v49 }
 0x17b   : > { %2789 = vmatmul.msk.bf16.gmra.mxu2 %vm762_vm0, %v3828_v25  ;;  %2805 = vmatmul.msk.bf16.gmra.mxu3 %vm762_vm0, %v3828_v25 }
 0x17d   : > { %v618_v52 = vpop.f32.mrf.mxu0 }
 0x17e   : > { %v707_v1 = vpop.f32.mrf.mxu1 }
 0x17f   : > { %v708_v6 = vadd.f32 %v707_v1, %v618_v52  ;;  %v3085_v52 = vld [vmem:[%s5181_s1 + $0x1f0] sm:$0xf0] }
 0x180   : > { %2782 = vmatmul.msk.bf16.gmra.mxu0 %vm762_vm0, %v3664_v60  ;;  %v3088_v1 = vor.u32 %v3177_v43, %v3085_v52  ;;  %v3141_v52 = vld [vmem:[%s5181_s1 + $0xc4] sm:$0xf] }
 0x181   : > { %2798 = vmatmul.msk.bf16.gmra.mxu1 %vm762_vm0, %v3664_v60 }
 0x182   : > { %1764 = vmatpush.bf16.msra.mxu3 %v3088_v1  ;;  %v2941_v1 = vld [vmem:[%s5181_s1 + $0xd0] sm:$0xf0] }
 0x185   : > { %v620_v59 = vpop.f32.mrf.mxu0 }
 0x186   : > { %v709_v2 = vpop.f32.mrf.mxu1 }
 0x187   : > { %v710_v7 = vadd.f32 %v709_v2, %v620_v59 }
 0x189   : > { %v3856_v8 = vpack.c.bf16 %v710_v7, %v708_v6 }
 0x18b   : > { %2790 = vmatmul.msk.bf16.gmra.mxu2 %vm762_vm0, %v3856_v8  ;;  %2806 = vmatmul.msk.bf16.gmra.mxu3 %vm762_vm0, %v3856_v8 }
 0x18d   : > { %v623_v9 = vpop.f32.mrf.mxu0 }
 0x18e   : > { %v712_v22 = vpop.f32.mrf.mxu1 }
 0x18f   : > { %v713_v16 = vadd.f32 %v712_v22, %v623_v9 }
 0x190   : > { %2783 = vmatmul.msk.bf16.gmra.mxu0 %vm762_vm0, %v3688_v35 }
 0x191   : > { %2799 = vmatmul.msk.bf16.gmra.mxu1 %vm762_vm0, %v3688_v35 }
 0x195   : > { %v625_v24 = vpop.f32.mrf.mxu0 }
 0x196   : > { %v714_v28 = vpop.f32.mrf.mxu1 }
 0x197   : > { %v715_v19 = vadd.f32 %v714_v28, %v625_v24 }
 0x199   : > { %v3866_v40 = vpack.c.bf16 %v715_v19, %v713_v16 }
 0x19b   : > { %2791 = vmatmul.msk.bf16.gmra.mxu2 %vm762_vm0, %v3866_v40  ;;  %2807 = vmatmul.msk.bf16.gmra.mxu3 %vm762_vm0, %v3866_v40 }
 0x19d   : > { %v628_v54 = vpop.f32.mrf.mxu0 }
 0x19e   : > { %v717_v59 = vpop.f32.mrf.mxu1 }
 0x19f   : > { %v718_v7 = vadd.f32 %v717_v59, %v628_v54  ;;  %v3173_v54 = vld [vmem:[%s5181_s1 + $0x1c4] sm:$0xf]  ;;  %v2944_v59 = vor.u32 %v3141_v52, %v2941_v1 }
 0x1a0   : > { %1505 = vmatmul.bf16.vlgmr.msra.gmra.mxu0 %v3506_v20 }
 0x1a1   : > { %1594 = vmatmul.bf16.vlgmr.msra.gmra.mxu1 %v3508_v21  ;;  %1676 = vmatpush.bf16.msra.mxu2 %v2944_v59 }
 0x1a5   : > { %v630_v2 = vpop.f32.mrf.mxu0 }
 0x1a6   : > { %v719_v6 = vpop.f32.mrf.mxu1 }
 0x1a7   : > { %v720_v9 = vadd.f32 %v719_v6, %v630_v2  ;;  %v3069_v2 = vld [vmem:[%s5181_s1 + $0x1d0] sm:$0xf0] }
 0x1a8   : > { %v3072_v6 = vor.u32 %v3173_v54, %v3069_v2 }
 0x1a9   : > { %v3886_v22 = vpack.c.bf16 %v720_v9, %v718_v7 }
 0x1aa   : > { %1765 = vmatpush.bf16.msra.mxu3 %v3072_v6 }
 0x1ab   : > { %2792 = vmatmul.msk.bf16.gmra.mxu2 %vm762_vm0, %v3886_v22  ;;  %2808 = vmatmul.msk.bf16.gmra.mxu3 %vm762_vm0, %v3886_v22 }
 0x1ad   : > { %v3892_v24 = vpop.f32.mrf.mxu0 }
 0x1ae   : > { %v3894_v28 = vpop.f32.mrf.mxu2  ;;  %v3896_v16 = vpop.f32.mrf.mxu1 }
 0x1af   : > { %5236 = vst [vmem:[#allocation16_spill] sm:$0xff] %v3896_v16  ;;  %v3898_v19 = vpop.f32.mrf.mxu3 }
 0x1b0   : > { %5237 = vst [vmem:[#allocation17_spill] sm:$0xff] %v3898_v19  ;;  %1510 = vmatmul.bf16.gmra.mxu0 %v3516_v26 }
 0x1b1   : > { %1599 = vmatmul.bf16.gmra.mxu1 %v3518_v27 }
 0x1b5   : > { %v3902_v41 = vpop.f32.mrf.mxu0 }
 0x1b6   : > { %v3904_v42 = vpop.f32.mrf.mxu2  ;;  %v3906_v43 = vpop.f32.mrf.mxu1 }
 0x1b7   : > { %5238 = vst [vmem:[#allocation18_spill] sm:$0xff] %v3906_v43  ;;  %v3908_v49 = vpop.f32.mrf.mxu3 }
 0x1b8   : > { %5239 = vst [vmem:[#allocation19_spill] sm:$0xff] %v3908_v49 }
 0x1bb   : > { %2809 = vmatmul.msk.bf16.vlgmr.msrb.gmra.mxu2 %vm762_vm0, %v3592_v12  ;;  %2825 = vmatmul.msk.bf16.vlgmr.msrb.gmra.mxu3 %vm762_vm0, %v3592_v12 }
 0x1bd   : > { %v3926_v7 = vpop.f32.mrf.mxu0 }
 0x1be   : > { %v3928_v12 = vpop.f32.mrf.mxu2  ;;  %v3930_v9 = vpop.f32.mrf.mxu1 }
 0x1bf   : > { %5240 = vst [vmem:[#allocation20_spill] sm:$0xff] %v3930_v9  ;;  %v3932_v49 = vpop.f32.mrf.mxu3 }
 0x1c0   : > { %5241 = vst [vmem:[#allocation21_spill] sm:$0xff] %v3932_v49  ;;  %1515 = vmatmul.bf16.gmra.mxu0 %v3526_v32 }
 0x1c1   : > { %1604 = vmatmul.bf16.gmra.mxu1 %v3528_v33 }
 0x1c5   : > { %v3936_v52 = vpop.f32.mrf.mxu0 }
 0x1c6   : > { %v3938_v1 = vpop.f32.mrf.mxu2  ;;  %v3940_v19 = vpop.f32.mrf.mxu1 }
 0x1c7   : > { %5242 = vst [vmem:[#allocation22_spill] sm:$0xff] %v3940_v19  ;;  %v3942_v54 = vpop.f32.mrf.mxu3 }
 0x1c8   : > { %5243 = vst [vmem:[#allocation23_spill] sm:$0xff] %v3942_v54 }
 0x1cb   : > { %2810 = vmatmul.msk.bf16.gmra.mxu2 %vm762_vm0, %v3604_v29  ;;  %2826 = vmatmul.msk.bf16.gmra.mxu3 %vm762_vm0, %v3604_v29  ;;  %v3137_v29 = vld [vmem:[%s5181_s1 + $0xa4] sm:$0xf] }
 0x1cd   : > { %v3948_v59 = vpop.f32.mrf.mxu0 }
 0x1ce   : > { %v3950_v2 = vpop.f32.mrf.mxu2  ;;  %v3952_v6 = vpop.f32.mrf.mxu1 }
 0x1cf   : > { %5244 = vst [vmem:[#allocation24_spill] sm:$0xff] %v3952_v6  ;;  %v3954_v49 = vpop.f32.mrf.mxu3 }
 0x1d0   : > { %5245 = vst [vmem:[#allocation25_spill] sm:$0xff] %v3954_v49  ;;  %1520 = vmatmul.bf16.gmra.mxu0 %v3536_v38  ;;  %v2925_v49 = vld [vmem:[%s5181_s1 + $0xb0] sm:$0xf0] }
 0x1d1   : > { %1609 = vmatmul.bf16.gmra.mxu1 %v3538_v39  ;;  %v2928_v6 = vor.u32 %v3137_v29, %v2925_v49 }
 0x1d3   : > { %1677 = vmatpush.bf16.msra.mxu2 %v2928_v6 }
 0x1d5   : > { %v3958_v19 = vpop.f32.mrf.mxu0 }
 0x1d6   : > { %v3960_v54 = vpop.f32.mrf.mxu2  ;;  %v3962_v9 = vpop.f32.mrf.mxu1 }
 0x1d7   : > { %5246 = vst [vmem:[#allocation26_spill] sm:$0xff] %v3962_v9  ;;  %v3964_v43 = vpop.f32.mrf.mxu3  ;;  %v3169_v9 = vld [vmem:[%s5181_s1 + $0x1a4] sm:$0xf] }
 0x1d8   : > { %5247 = vst [vmem:[#allocation27_spill] sm:$0xff] %v3964_v43  ;;  %v3053_v43 = vld [vmem:[%s5181_s1 + $0x1b0] sm:$0xf0] }
 0x1d9   : > { %v3056_v16 = vor.u32 %v3169_v9, %v3053_v43 }
 0x1db   : > { %2811 = vmatmul.msk.bf16.gmra.mxu2 %vm762_vm0, %v3616_v48  ;;  %2827 = vmatmul.msk.bf16.gmra.mxu3 %vm762_vm0, %v3616_v48 }
 0x1dc   : > { %1766 = vmatpush.bf16.msra.mxu3 %v3056_v16 }
 0x1dd   : > { %v3982_v39 = vpop.f32.mrf.mxu0 }
 0x1de   : > { %v3984_v48 = vpop.f32.mrf.mxu2  ;;  %v3986_v38 = vpop.f32.mrf.mxu1 }
 0x1df   : > { %5248 = vst [vmem:[#allocation28_spill] sm:$0xff] %v3986_v38  ;;  %v3988_v33 = vpop.f32.mrf.mxu3 }
 0x1e0   : > { %5249 = vst [vmem:[#allocation29_spill] sm:$0xff] %v3988_v33  ;;  %1525 = vmatmul.bf16.gmra.mxu0 %v3546_v44 }
 0x1e1   : > { %1614 = vmatmul.bf16.gmra.mxu1 %v3548_v45 }
 0x1e5   : > { %v3992_v49 = vpop.f32.mrf.mxu0 }
 0x1e6   : > { %v3994_v29 = vpop.f32.mrf.mxu2  ;;  %v3996_v32 = vpop.f32.mrf.mxu1 }
 0x1e7   : > { %5250 = vst [vmem:[#allocation30_spill] sm:$0xff] %v3996_v32  ;;  %v3998_v43 = vpop.f32.mrf.mxu3 }
 0x1e8   : > { %5251 = vst [vmem:[#allocation31_spill] sm:$0xff] %v3998_v43 }
 0x1eb   : > { %2812 = vmatmul.msk.bf16.gmra.mxu2 %vm762_vm0, %v3628_v3  ;;  %2828 = vmatmul.msk.bf16.gmra.mxu3 %vm762_vm0, %v3628_v3  ;;  %v3133_v3 = vld [vmem:[%s5181_s1 + $0x84] sm:$0xf] }
 0x1ed   : > { %v4004_v9 = vpop.f32.mrf.mxu0 }
 0x1ee   : > { %v4006_v16 = vpop.f32.mrf.mxu2  ;;  %v4008_v6 = vpop.f32.mrf.mxu1 }
 0x1ef   : > { %5252 = vst [vmem:[#allocation32_spill] sm:$0xff] %v4006_v16  ;;  %v4010_v33 = vpop.f32.mrf.mxu3 }
 0x1f0   : > { %5253 = vst [vmem:[#allocation33_spill] sm:$0xff] %v4008_v6  ;;  %1530 = vmatmul.bf16.gmra.mxu0 %v3556_v50 }
 0x1f1   : > { %5254 = vst [vmem:[#allocation34_spill] sm:$0xff] %v4010_v33  ;;  %1619 = vmatmul.bf16.gmra.mxu1 %v3558_v51  ;;  %v2909_v33 = vld [vmem:[%s5181_s1 + $0x90] sm:$0xf0] }
 0x1f2   : > { %v2912_v6 = vor.u32 %v3133_v3, %v2909_v33 }
 0x1f4   : > { %1678 = vmatpush.bf16.msra.mxu2 %v2912_v6 }
 0x1f5   : > { %v4014_v32 = vpop.f32.mrf.mxu0 }
 0x1f6   : > { %v4016_v43 = vpop.f32.mrf.mxu2  ;;  %v4018_v38 = vpop.f32.mrf.mxu1 }
 0x1f7   : > { %5255 = vst [vmem:[#allocation35_spill] sm:$0xff] %v4016_v43  ;;  %v4020_v45 = vpop.f32.mrf.mxu3 }
 0x1f8   : > { %5256 = vst [vmem:[#allocation36_spill] sm:$0xff] %v4018_v38  ;;  %v3165_v38 = vld [vmem:[%s5181_s1 + $0x184] sm:$0xf] }
 0x1f9   : > { %5257 = vst [vmem:[#allocation37_spill] sm:$0xff] %v4020_v45  ;;  %v3037_v45 = vld [vmem:[%s5181_s1 + $0x190] sm:$0xf0] }
 0x1fa   : > { %v3040_v51 = vor.u32 %v3165_v38, %v3037_v45 }
 0x1fb   : > { %2813 = vmatmul.msk.bf16.gmra.mxu2 %vm762_vm0, %v3640_v23  ;;  %2829 = vmatmul.msk.bf16.gmra.mxu3 %vm762_vm0, %v3640_v23 }
 0x1fc   : > { %1767 = vmatpush.bf16.msra.mxu3 %v3040_v51 }
 0x1fd   : > { %v4038_v50 = vpop.f32.mrf.mxu0 }
 0x1fe   : > { %v4040_v23 = vpop.f32.mrf.mxu2  ;;  %v4042_v44 = vpop.f32.mrf.mxu1 }
 0x1ff   : > { %5258 = vst [vmem:[#allocation38_spill] sm:$0xff] %v4040_v23  ;;  %v4044_v43 = vpop.f32.mrf.mxu3 }
 0x200   : > { %5259 = vst [vmem:[#allocation39_spill] sm:$0xff] %v4042_v44  ;;  %1535 = vmatmul.bf16.gmra.mxu0 %v3566_v56 }
 0x201   : > { %5260 = vst [vmem:[#allocation40_spill] sm:$0xff] %v4044_v43  ;;  %1624 = vmatmul.bf16.gmra.mxu1 %v3568_v57 }
 0x205   : > { %v4048_v33 = vpop.f32.mrf.mxu0 }
 0x206   : > { %v4050_v3 = vpop.f32.mrf.mxu2  ;;  %v4052_v16 = vpop.f32.mrf.mxu1 }
 0x207   : > { %5261 = vst [vmem:[#allocation41_spill] sm:$0xff] %v4050_v3  ;;  %v4054_v38 = vpop.f32.mrf.mxu3 }
 0x208   : > { %5262 = vst [vmem:[#allocation42_spill] sm:$0xff] %v4052_v16 }
 0x209   : > { %5263 = vst [vmem:[#allocation43_spill] sm:$0xff] %v4054_v38 }
 0x20b   : > { %2814 = vmatmul.msk.bf16.gmra.mxu2 %vm762_vm0, %v3664_v60  ;;  %2830 = vmatmul.msk.bf16.gmra.mxu3 %vm762_vm0, %v3664_v60  ;;  %v4081_v60 = vld [vmem:[%s5182_s2] sm:$0xf] }
 0x20c   : > { %5270 = vst [vmem:[#allocation50_spill] sm:$0xff] %v4081_v60 }
 0x20d   : > { %v4060_v45 = vpop.f32.mrf.mxu0 }
 0x20e   : > { %v4062_v51 = vpop.f32.mrf.mxu2  ;;  %v4064_v6 = vpop.f32.mrf.mxu1 }
 0x20f   : > { %5264 = vst [vmem:[#allocation44_spill] sm:$0xff] %v4062_v51  ;;  %v4066_v43 = vpop.f32.mrf.mxu3 }
 0x210   : > { %5265 = vst [vmem:[#allocation45_spill] sm:$0xff] %v4064_v6  ;;  %1540 = vmatmul.bf16.gmra.mxu0 %v3576_v62  ;;  %v3161_v6 = vld [vmem:[%s5181_s1 + $0x164] sm:$0xf] }
 0x211   : > { %5266 = vst [vmem:[#allocation46_spill] sm:$0xff] %v4066_v43  ;;  %1629 = vmatmul.bf16.gmra.mxu1 %v3578_v63  ;;  %v4088_v43 = vperm.slane %v4081_v60, 0  ;;  %v3021_v60 = vld [vmem:[%s5181_s1 + $0x170] sm:$0xf0] }
 0x212   : > { %v3024_v3 = vor.u32 %v3161_v6, %v3021_v60 }
 0x214   : > { %1768 = vmatpush.bf16.msra.mxu3 %v3024_v3 }
 0x215   : > { %v4070_v38 = vpop.f32.mrf.mxu0 }
 0x216   : > { %v4072_v16 = vpop.f32.mrf.mxu2  ;;  %v4074_v44 = vpop.f32.mrf.mxu1 }
 0x217   : > { %5267 = vst [vmem:[#allocation47_spill] sm:$0xff] %v4072_v16  ;;  %v4076_v57 = vpop.f32.mrf.mxu3 }
 0x218   : > { %5268 = vst [vmem:[#allocation48_spill] sm:$0xff] %v4074_v44  ;;  %v3129_v44 = vld [vmem:[%s5181_s1 + $0x64] sm:$0xf] }
 0x219   : > { %5269 = vst [vmem:[#allocation49_spill] sm:$0xff] %v4076_v57  ;;  %v2893_v57 = vld [vmem:[%s5181_s1 + $0x70] sm:$0xf0] }
 0x21b   : > { %2815 = vmatmul.msk.bf16.gmra.mxu2 %vm762_vm0, %v3688_v35  ;;  %2831 = vmatmul.msk.bf16.gmra.mxu3 %vm762_vm0, %v3688_v35  ;;  %v2896_v35 = vor.u32 %v3129_v44, %v2893_v57 }
 0x21d   : > { %v1506_v62 = vpop.f32.mrf.mxu0  ;;  %1679 = vmatpush.bf16.msra.mxu2 %v2896_v35 }
 0x21e   : > { %v4100_v63 = vpop.f32.mrf.mxu2  ;;  %v1507_v16 = vadd.f32 %v1506_v62, %v4088_v43  ;;  %v1595_v51 = vpop.f32.mrf.mxu1 }
 0x21f   : > { %v4105_v56 = vpop.f32.mrf.mxu3 }
 0x220   : > { %5271 = vst [vmem:[#allocation51_spill] sm:$0xff] %v4105_v56  ;;  %v1596_v23 = vadd.f32 %v1595_v51, %v1507_v16  ;;  %1545 = vmatmul.bf16.gmra.mxu0 %v3586_v4 }
 0x221   : > { %1634 = vmatmul.bf16.gmra.mxu1 %v3588_v5 }
 0x222   : > { %v2209_v44 = vadd.f32 %v1596_v23, %v3892_v24 }
 0x224   : > { %2337 = vst [vmem:[%s4111_s24] sm:$0xff] %v2209_v44 }
 0x225   : > { %v1508_v62 = vpop.f32.mrf.mxu0 }
 0x226   : > { %v4114_v57 = vpop.f32.mrf.mxu2  ;;  %v1509_v6 = vadd.f32 %v1508_v62, %v4088_v43  ;;  %v1597_v16 = vpop.f32.mrf.mxu1 }
 0x227   : > { %v4116_v56 = vpop.f32.mrf.mxu3 }
 0x228   : > { %5272 = vst [vmem:[#allocation52_spill] sm:$0xff] %v4116_v56  ;;  %v1598_v51 = vadd.f32 %v1597_v16, %v1509_v6 }
 0x22a   : > { %v2213_v60 = vadd.f32 %v1598_v51, %v3902_v41 }
 0x22b   : > { %2816 = vmatmul.msk.bf16.gmra.mxu2 %vm762_vm0, %v3700_v0  ;;  %2832 = vmatmul.msk.bf16.gmra.mxu3 %vm762_vm0, %v3700_v0 }
 0x22c   : > { %2341 = vst [vmem:[%s4111_s24 + $0x20] sm:$0xff] %v2213_v60 }
 0x22d   : > { %v1511_v23 = vpop.f32.mrf.mxu0 }
 0x22e   : > { %v4125_v24 = vpop.f32.mrf.mxu2  ;;  %v1512_v35 = vadd.f32 %v1511_v23, %v4088_v43  ;;  %v1600_v44 = vpop.f32.mrf.mxu1 }
 0x22f   : > { %v4127_v3 = vpop.f32.mrf.mxu3 }
 0x230   : > { %5273 = vst [vmem:[#allocation53_spill] sm:$0xff] %v4127_v3  ;;  %v1601_v62 = vadd.f32 %v1600_v44, %v1512_v35  ;;  %1550 = vmatmul.bf16.gmra.mxu0 %v3598_v17  ;;  %v2877_v35 = vld [vmem:[%s5181_s1 + $0x50] sm:$0xf0] }
 0x231   : > { %1639 = vmatmul.bf16.gmra.mxu1 %v3600_v18 }
 0x232   : > { %v2217_v41 = vadd.f32 %v1601_v62, %v3926_v7  ;;  %v3125_v7 = vld [vmem:[%s5181_s1 + $0x44] sm:$0xf] }
 0x234   : > { %2345 = vst [vmem:[%s4111_s24 + $0x40] sm:$0xff] %v2217_v41 }
 0x235   : > { %v1513_v0 = vpop.f32.mrf.mxu0 }
 0x236   : > { %v4134_v6 = vpop.f32.mrf.mxu2  ;;  %v1514_v51 = vadd.f32 %v1513_v0, %v4088_v43  ;;  %v1602_v60 = vpop.f32.mrf.mxu1 }
 0x237   : > { %v4136_v16 = vpop.f32.mrf.mxu3 }
 0x238   : > { %5274 = vst [vmem:[#allocation54_spill] sm:$0xff] %v4136_v16  ;;  %v1603_v3 = vadd.f32 %v1602_v60, %v1514_v51 }
 0x23a   : > { %v2221_v23 = vadd.f32 %v1603_v3, %v3936_v52  ;;  %v2880_v52 = vor.u32 %v3125_v7, %v2877_v35  ;;  %v3157_v3 = vld [vmem:[%s5181_s1 + $0x144] sm:$0xf] }
 0x23b   : > { %2817 = vmatmul.msk.bf16.gmra.mxu2 %vm762_vm0, %v3710_v13  ;;  %2833 = vmatmul.msk.bf16.gmra.mxu3 %vm762_vm0, %v3710_v13  ;;  %v3005_v13 = vld [vmem:[%s5181_s1 + $0x150] sm:$0xf0] }
 0x23c   : > { %2349 = vst [vmem:[%s4111_s24 + $0x60] sm:$0xff] %v2221_v23  ;;  %v3008_v60 = vor.u32 %v3157_v3, %v3005_v13  ;;  %1680 = vmatpush.bf16.msra.mxu2 %v2880_v52 }
 0x23d   : > { %v1516_v62 = vpop.f32.mrf.mxu0 }
 0x23e   : > { %v4151_v44 = vpop.f32.mrf.mxu2  ;;  %v1517_v0 = vadd.f32 %v1516_v62, %v4088_v43  ;;  %v1605_v51 = vpop.f32.mrf.mxu1  ;;  %1769 = vmatpush.bf16.msra.mxu3 %v3008_v60 }
 0x23f   : > { %v4159_v41 = vpop.f32.mrf.mxu3 }
 0x240   : > { %5275 = vst [vmem:[#allocation55_spill] sm:$0xff] %v4159_v41  ;;  %v1606_v23 = vadd.f32 %v1605_v51, %v1517_v0  ;;  %1555 = vmatmul.bf16.gmra.mxu0 %v3610_v36 }
 0x241   : > { %1644 = vmatmul.bf16.gmra.mxu1 %v3612_v37 }
 0x242   : > { %v2225_v7 = vadd.f32 %v1606_v23, %v3948_v59 }
 0x244   : > { %2353 = vst [vmem:[%s4111_s24 + $0x80] sm:$0xff] %v2225_v7 }
 0x245   : > { %v1518_v16 = vpop.f32.mrf.mxu0 }
 0x246   : > { %v4166_v35 = vpop.f32.mrf.mxu2  ;;  %v1519_v62 = vadd.f32 %v1518_v16, %v4088_v43  ;;  %v1607_v3 = vpop.f32.mrf.mxu1 }
 0x247   : > { %v4168_v56 = vpop.f32.mrf.mxu3 }
 0x248   : > { %5276 = vst [vmem:[#allocation56_spill] sm:$0xff] %v4168_v56  ;;  %v1608_v52 = vadd.f32 %v1607_v3, %v1519_v62 }
 0x24a   : > { %v2229_v13 = vadd.f32 %v1608_v52, %v3958_v19 }
 0x24b   : > { %2818 = vmatmul.msk.bf16.gmra.mxu2 %vm762_vm0, %v3720_v30  ;;  %2834 = vmatmul.msk.bf16.gmra.mxu3 %vm762_vm0, %v3720_v30 }
 0x24c   : > { %2357 = vst [vmem:[%s4111_s24 + $0xa0] sm:$0xff] %v2229_v13 }
 0x24d   : > { %v1521_v0 = vpop.f32.mrf.mxu0 }
 0x24e   : > { %v4177_v59 = vpop.f32.mrf.mxu2  ;;  %v1522_v60 = vadd.f32 %v1521_v0, %v4088_v43  ;;  %v1610_v16 = vpop.f32.mrf.mxu1 }
 0x24f   : > { %v4179_v51 = vpop.f32.mrf.mxu3 }
 0x250   : > { %5277 = vst [vmem:[#allocation57_spill] sm:$0xff] %v4179_v51  ;;  %v1611_v23 = vadd.f32 %v1610_v16, %v1522_v60  ;;  %1560 = vmatmul.bf16.gmra.mxu0 %v3622_v55  ;;  %v2861_v60 = vld [vmem:[%s5181_s1 + $0x30] sm:$0xf0]  ;;  %v5302_v51 = vld [vmem:[#allocation7_spill] sm:$0xff] }
 0x251   : > { %1649 = vmatmul.bf16.gmra.mxu1 %v3624_v58 }
 0x252   : > { %v2233_v19 = vadd.f32 %v1611_v23, %v3982_v39  ;;  %v3121_v39 = vld [vmem:[%s5181_s1 + $0x24] sm:$0xf] }
 0x254   : > { %2361 = vst [vmem:[%s4111_s24 + $0xc0] sm:$0xff] %v2233_v19  ;;  %v2864_v19 = vor.u32 %v3121_v39, %v2861_v60  ;;  %v3148_v39 = vld [vmem:[%s5181_s1 + $0xf4] sm:$0xf0] }
 0x255   : > { %v1523_v30 = vpop.f32.mrf.mxu0 }
 0x256   : > { %v4186_v7 = vpop.f32.mrf.mxu2  ;;  %v1524_v3 = vadd.f32 %v1523_v30, %v4088_v43  ;;  %v1612_v52 = vpop.f32.mrf.mxu1  ;;  %1681 = vmatpush.bf16.msra.mxu2 %v2864_v19  ;;  %v3180_v19 = vld [vmem:[%s5181_s1 + $0x1f4] sm:$0xf0] }
 0x257   : > { %v4188_v62 = vpop.f32.mrf.mxu3 }
 0x258   : > { %5278 = vst [vmem:[#allocation58_spill] sm:$0xff] %v4188_v62  ;;  %v1613_v13 = vadd.f32 %v1612_v52, %v1524_v3 }
 0x25a   : > { %v2237_v0 = vadd.f32 %v1613_v13, %v3992_v49  ;;  %v3153_v49 = vld [vmem:[%s5181_s1 + $0x124] sm:$0xf] }
 0x25b   : > { %2819 = vmatmul.msk.bf16.gmra.mxu2 %vm762_vm0, %v3730_v53  ;;  %2835 = vmatmul.msk.bf16.gmra.mxu3 %vm762_vm0, %v3730_v53  ;;  %v2989_v53 = vld [vmem:[%s5181_s1 + $0x130] sm:$0xf0] }
 0x25c   : > { %2365 = vst [vmem:[%s4111_s24 + $0xe0] sm:$0xff] %v2237_v0  ;;  %v2992_v13 = vor.u32 %v3153_v49, %v2989_v53  ;;  %v2963_v0 = vld [vmem:[%s5181_s1 + $0xe8] sm:$0xf] }
 0x25d   : > { %v1526_v23 = vpop.f32.mrf.mxu0 }
 0x25e   : > { %v4203_v16 = vpop.f32.mrf.mxu2  ;;  %v1527_v3 = vadd.f32 %v1526_v23, %v4088_v43  ;;  %v1615_v52 = vpop.f32.mrf.mxu1  ;;  %1770 = vmatpush.bf16.msra.mxu3 %v2992_v13  ;;  %v3091_v23 = vld [vmem:[%s5181_s1 + $0x1e8] sm:$0xf] }
 0x25f   : > { %v4211_v30 = vpop.f32.mrf.mxu3  ;;  %v3092_v53 = vor.u32 %v3180_v19, %v3091_v23 }
 0x260   : > { %5279 = vst [vmem:[#allocation59_spill] sm:$0xff] %v4211_v30  ;;  %v1616_v60 = vadd.f32 %v1615_v52, %v1527_v3  ;;  %1565 = vmatmul.bf16.gmra.mxu0 %v3634_v10  ;;  %v2964_v30 = vor.u32 %v3148_v39, %v2963_v0  ;;  %v2947_v3 = vld [vmem:[%s5181_s1 + $0xc8] sm:$0xf]  ;;  %v3144_v52 = vld [vmem:[%s5181_s1 + $0xd4] sm:$0xf0] }
 0x261   : > { %1654 = vmatmul.bf16.gmra.mxu1 %v3636_v11  ;;  %v2948_v13 = vor.u32 %v3144_v52, %v2947_v3  ;;  %v3140_v3 = vld [vmem:[%s5181_s1 + $0xb4] sm:$0xf0] }
 0x262   : > { %v2241_v49 = vadd.f32 %v1616_v60, %v4004_v9  ;;  %1853 = vmatpush.bf16.msrb.mxu0 %v2964_v30  ;;  %1942 = vmatpush.bf16.msrb.mxu1 %v3092_v53  ;;  %v3075_v9 = vld [vmem:[%s5181_s1 + $0x1c8] sm:$0xf]  ;;  %v3176_v30 = vld [vmem:[%s5181_s1 + $0x1d4] sm:$0xf0] }
 0x263   : > { %v2931_v53 = vld [vmem:[%s5181_s1 + $0xa8] sm:$0xf] }
 0x264   : > { %2369 = vst [vmem:[%s4111_s24 + $0x100] sm:$0xff] %v2241_v49  ;;  %v3076_v49 = vor.u32 %v3176_v30, %v3075_v9  ;;  %v2932_v62 = vor.u32 %v3140_v3, %v2931_v53  ;;  %v2915_v30 = vld [vmem:[%s5181_s1 + $0x88] sm:$0xf] }
 0x265   : > { %v1528_v39 = vpop.f32.mrf.mxu0 }
 0x266   : > { %v4236_v0 = vpop.f32.mrf.mxu2  ;;  %v1529_v23 = vadd.f32 %v1528_v39, %v4088_v43  ;;  %v1617_v19 = vpop.f32.mrf.mxu1  ;;  %1854 = vmatpush.bf16.msrb.mxu0 %v2948_v13  ;;  %1943 = vmatpush.bf16.msrb.mxu1 %v3076_v49  ;;  %v3172_v13 = vld [vmem:[%s5181_s1 + $0x1b4] sm:$0xf0] }
 0x267   : > { %v4244_v60 = vpop.f32.mrf.mxu3 }
 0x268   : > { %5280 = vst [vmem:[#allocation60_spill] sm:$0xff] %v4244_v60  ;;  %v1618_v52 = vadd.f32 %v1617_v19, %v1529_v23  ;;  %v3059_v60 = vld [vmem:[%s5181_s1 + $0x1a8] sm:$0xf]  ;;  %v3136_v23 = vld [vmem:[%s5181_s1 + $0x94] sm:$0xf0] }
 0x269   : > { %v3060_v9 = vor.u32 %v3172_v13, %v3059_v60  ;;  %v2916_v19 = vor.u32 %v3136_v23, %v2915_v30  ;;  %v2899_v13 = vld [vmem:[%s5181_s1 + $0x68] sm:$0xf] }
 0x26a   : > { %v2245_v39 = vadd.f32 %v1618_v52, %v4014_v32  ;;  %1855 = vmatpush.bf16.msrb.mxu0 %v2932_v62  ;;  %v3168_v62 = vld [vmem:[%s5181_s1 + $0x194] sm:$0xf0]  ;;  %v3027_v23 = vld [vmem:[%s5181_s1 + $0x168] sm:$0xf] }
 0x26b   : > { %2820 = vmatmul.msk.bf16.gmra.mxu2 %vm762_vm0, %v3770_v61  ;;  %2836 = vmatmul.msk.bf16.gmra.mxu3 %vm762_vm0, %v3770_v61  ;;  %v3043_v61 = vld [vmem:[%s5181_s1 + $0x188] sm:$0xf] }
 0x26c   : > { %2373 = vst [vmem:[%s4111_s24 + $0x120] sm:$0xff] %v2245_v39  ;;  %1944 = vmatpush.bf16.msrb.mxu1 %v3060_v9  ;;  %v3044_v52 = vor.u32 %v3168_v62, %v3043_v61  ;;  %v3132_v39 = vld [vmem:[%s5181_s1 + $0x74] sm:$0xf0]  ;;  %v2883_v62 = vld [vmem:[%s5181_s1 + $0x48] sm:$0xf] }
 0x26d   : > { %v1531_v49 = vpop.f32.mrf.mxu0  ;;  %v2900_v30 = vor.u32 %v3132_v39, %v2899_v13  ;;  %v3160_v39 = vld [vmem:[%s5181_s1 + $0x154] sm:$0xf0] }
 0x26e   : > { %v4271_v32 = vpop.f32.mrf.mxu2  ;;  %v1532_v53 = vadd.f32 %v1531_v49, %v4088_v43  ;;  %v1620_v3 = vpop.f32.mrf.mxu1  ;;  %1856 = vmatpush.bf16.msrb.mxu0 %v2916_v19  ;;  %v3164_v19 = vld [vmem:[%s5181_s1 + $0x174] sm:$0xf0] }
 0x26f   : > { %v4279_v60 = vpop.f32.mrf.mxu3  ;;  %v3028_v61 = vor.u32 %v3164_v19, %v3027_v23 }
 0x270   : > { %5281 = vst [vmem:[#allocation61_spill] sm:$0xff] %v4279_v60  ;;  %v1621_v9 = vadd.f32 %v1620_v3, %v1532_v53  ;;  %1570 = vmatmul.bf16.gmra.mxu0 %v3646_v31  ;;  %1945 = vmatpush.bf16.msrb.mxu1 %v3044_v52  ;;  %v3128_v53 = vld [vmem:[%s5181_s1 + $0x54] sm:$0xf0] }
 0x271   : > { %1659 = vmatmul.bf16.gmra.mxu1 %v3648_v34  ;;  %v2884_v3 = vor.u32 %v3128_v53, %v2883_v62 }
 0x272   : > { %v2249_v49 = vadd.f32 %v1621_v9, %v4038_v50  ;;  %1857 = vmatpush.bf16.msrb.mxu0 %v2900_v30  ;;  %v3011_v50 = vld [vmem:[%s5181_s1 + $0x148] sm:$0xf] }
 0x273   : > { %v3012_v19 = vor.u32 %v3160_v39, %v3011_v50  ;;  %v2851_v39 = vld [vmem:[%s5181_s1 + $0x8] sm:$0xf] }
 0x274   : > { %2377 = vst [vmem:[%s4111_s24 + $0x140] sm:$0xff] %v2249_v49  ;;  %1946 = vmatpush.bf16.msrb.mxu1 %v3028_v61  ;;  %v2867_v49 = vld [vmem:[%s5181_s1 + $0x28] sm:$0xf]  ;;  %v3124_v61 = vld [vmem:[%s5181_s1 + $0x34] sm:$0xf0] }
 0x275   : > { %v1533_v13 = vpop.f32.mrf.mxu0  ;;  %v2868_v53 = vor.u32 %v3124_v61, %v2867_v49  ;;  %v3149_v61 = vld [vmem:[%s5181_s1 + $0x104] sm:$0xf] }
 0x276   : > { %v4304_v52 = vpop.f32.mrf.mxu2  ;;  %v1534_v30 = vadd.f32 %v1533_v13, %v4088_v43  ;;  %v1622_v23 = vpop.f32.mrf.mxu1  ;;  %1858 = vmatpush.bf16.msrb.mxu0 %v2884_v3  ;;  %v3156_v13 = vld [vmem:[%s5181_s1 + $0x134] sm:$0xf0] }
 0x277   : > { %v4312_v9 = vpop.f32.mrf.mxu3 }
 0x278   : > { %5282 = vst [vmem:[#allocation62_spill] sm:$0xff] %v4312_v9  ;;  %v1623_v62 = vadd.f32 %v1622_v23, %v1534_v30  ;;  %1947 = vmatpush.bf16.msrb.mxu1 %v3012_v19  ;;  %v2995_v9 = vld [vmem:[%s5181_s1 + $0x128] sm:$0xf]  ;;  %v3120_v30 = vld [vmem:[%s5181_s1 + $0x14] sm:$0xf0] }
 0x279   : > { %v2996_v50 = vor.u32 %v3156_v13, %v2995_v9  ;;  %v2845_v23 = vld [vmem:[%s5181_s1 + $0x10] sm:$0xf0] }
 0x27a   : > { %v2253_v3 = vadd.f32 %v1623_v62, %v4048_v33  ;;  %1859 = vmatpush.bf16.msrb.mxu0 %v2868_v53  ;;  %v3117_v33 = vld [vmem:[%s5181_s1 + $0x4] sm:$0xf]  ;;  %v2973_v62 = vld [vmem:[%s5181_s1 + $0x110] sm:$0xf0]  ;;  %v2979_v53 = vld [vmem:[%s5181_s1 + $0x108] sm:$0xf] }
 0x27b   : > { %2821 = vmatmul.msk.bf16.gmra.mxu2 %vm762_vm0, %v3828_v25  ;;  %2837 = vmatmul.msk.bf16.gmra.mxu3 %vm762_vm0, %v3828_v25  ;;  %v2852_v25 = vor.u32 %v3120_v30, %v2851_v39  ;;  %v2848_v49 = vor.u32 %v3117_v33, %v2845_v23  ;;  %v2976_v30 = vor.u32 %v3149_v61, %v2973_v62 }
 0x27c   : > { %2381 = vst [vmem:[%s4111_s24 + $0x160] sm:$0xff] %v2253_v3  ;;  %1948 = vmatpush.bf16.msrb.mxu1 %v2996_v50  ;;  %v3152_v50 = vld [vmem:[%s5181_s1 + $0x114] sm:$0xf0] }
 0x27d   : > { %v1536_v19 = vpop.f32.mrf.mxu0  ;;  %1682 = vmatpush.bf16.msra.mxu2 %v2848_v49  ;;  %v2980_v33 = vor.u32 %v3152_v50, %v2979_v53  ;;  %1771 = vmatpush.bf16.msra.mxu3 %v2976_v30 }
 0x27e   : > { %v4345_v9 = vpop.f32.mrf.mxu2  ;;  %v1537_v3 = vadd.f32 %v1536_v19, %v4088_v43  ;;  %v1625_v39 = vpop.f32.mrf.mxu1  ;;  %1860 = vmatpush.bf16.msrb.mxu0 %v2852_v25 }
 0x27f   : > { %v4356_v13 = vpop.f32.mrf.mxu3 }
 0x280   : > { %5283 = vst [vmem:[#allocation63_spill] sm:$0xff] %v4356_v13  ;;  %v1626_v23 = vadd.f32 %v1625_v39, %v1537_v3  ;;  %1575 = vmatmul.bf16.gmra.mxu0 %v3682_v14  ;;  %1949 = vmatpush.bf16.msrb.mxu1 %v2980_v33 }
 0x281   : > { %1664 = vmatmul.bf16.gmra.mxu1 %v3684_v15 }
 0x282   : > { %v2257_v13 = vadd.f32 %v1626_v23, %v4060_v45 }
 0x284   : > { %2385 = vst [vmem:[%s4111_s24 + $0x180] sm:$0xff] %v2257_v13 }
 0x285   : > { %v1538_v61 = vpop.f32.mrf.mxu0 }
 0x286   : > { %v4366_v19 = vpop.f32.mrf.mxu2  ;;  %v1539_v49 = vadd.f32 %v1538_v61, %v4088_v43  ;;  %v1627_v25 = vpop.f32.mrf.mxu1 }
 0x287   : > { %v4368_v62 = vpop.f32.mrf.mxu3 }
 0x288   : > { %5284 = vst [vmem:[#allocation64_spill] sm:$0xff] %v4368_v62  ;;  %v1628_v53 = vadd.f32 %v1627_v25, %v1539_v49 }
 0x28a   : > { %v2261_v3 = vadd.f32 %v1628_v53, %v4070_v38 }
 0x28b   : > { %2822 = vmatmul.msk.bf16.gmra.mxu2 %vm762_vm0, %v3856_v8  ;;  %2838 = vmatmul.msk.bf16.gmra.mxu3 %vm762_vm0, %v3856_v8 }
 0x28c   : > { %2389 = vst [vmem:[%s4111_s24 + $0x1a0] sm:$0xff] %v2261_v3 }
 0x28d   : > { %v1541_v13 = vpop.f32.mrf.mxu0 }
 0x28e   : > { %v4377_v45 = vpop.f32.mrf.mxu2  ;;  %v1542_v30 = vadd.f32 %v1541_v13, %v4088_v43  ;;  %v1630_v50 = vpop.f32.mrf.mxu1  ;;  %v2965_v13 = vld [vmem:[%s5181_s1 + $0xf8] sm:$0xf0] }
 0x28f   : > { %v4379_v39 = vpop.f32.mrf.mxu3 }
 0x290   : > { %5285 = vst [vmem:[#allocation65_spill] sm:$0xff] %v4379_v39  ;;  %v1631_v33 = vadd.f32 %v1630_v50, %v1542_v30  ;;  %1580 = vmatmul.bf16.gmra.mxu0 %v3694_v46 }
 0x291   : > { %1669 = vmatmul.bf16.gmra.mxu1 %v3696_v47 }
 0x292   : > { %v2265_v38 = vadd.f32 %v1631_v33, %v3894_v28  ;;  %v3146_v28 = vld [vmem:[%s5181_s1 + $0xec] sm:$0xf] }
 0x293   : > { %v3178_v33 = vld [vmem:[%s5181_s1 + $0x1ec] sm:$0xf] }
 0x294   : > { %2393 = vst [vmem:[%s4111_s24 + $0x1c0] sm:$0xff] %v2265_v38 }
 0x295   : > { %v1543_v8 = vpop.f32.mrf.mxu0 }
 0x296   : > { %v4386_v23 = vpop.f32.mrf.mxu2  ;;  %v1544_v49 = vadd.f32 %v1543_v8, %v4088_v43  ;;  %v1632_v25 = vpop.f32.mrf.mxu1 }
 0x297   : > { %v4388_v61 = vpop.f32.mrf.mxu3 }
 0x298   : > { %5286 = vst [vmem:[#allocation66_spill] sm:$0xff] %v4388_v61  ;;  %v1633_v53 = vadd.f32 %v1632_v25, %v1544_v49 }
 0x29a   : > { %v2269_v3 = vadd.f32 %v1633_v53, %v3904_v42  ;;  %v2968_v42 = vor.u32 %v3146_v28, %v2965_v13 }
 0x29b   : > { %2823 = vmatmul.msk.bf16.gmra.mxu2 %vm762_vm0, %v3866_v40  ;;  %2839 = vmatmul.msk.bf16.gmra.mxu3 %vm762_vm0, %v3866_v40  ;;  %v3093_v40 = vld [vmem:[%s5181_s1 + $0x1f8] sm:$0xf0] }
 0x29c   : > { %2397 = vst [vmem:[%s4111_s24 + $0x1e0] sm:$0xff] %v2269_v3  ;;  %v3096_v25 = vor.u32 %v3178_v33, %v3093_v40  ;;  %2031 = vmatpush.bf16.msrb.mxu2 %v2968_v42 }
 0x29d   : > { %v1546_v50 = vpop.f32.mrf.mxu0 }
 0x29e   : > { %v4403_v30 = vpop.f32.mrf.mxu2  ;;  %v1547_v8 = vadd.f32 %v1546_v50, %v4088_v43  ;;  %v1635_v49 = vpop.f32.mrf.mxu1  ;;  %2120 = vmatpush.bf16.msrb.mxu3 %v3096_v25 }
 0x29f   : > { %v4411_v38 = vpop.f32.mrf.mxu3 }
 0x2a0   : > { %5287 = vst [vmem:[#allocation67_spill] sm:$0xff] %v4411_v38  ;;  %v1636_v53 = vadd.f32 %v1635_v49, %v1547_v8  ;;  %1861 = vmatmul.bf16.vlgmr.msrb.gmra.mxu0 %v3506_v20 }
 0x2a1   : > { %1950 = vmatmul.bf16.vlgmr.msrb.gmra.mxu1 %v3508_v21 }
 0x2a2   : > { %v2273_v3 = vadd.f32 %v1636_v53, %v3928_v12 }
 0x2a4   : > { %2401 = vst [vmem:[%s4111_s24 + $0x200] sm:$0xff] %v2273_v3 }
 0x2a5   : > { %v1548_v13 = vpop.f32.mrf.mxu0 }
 0x2a6   : > { %v4418_v28 = vpop.f32.mrf.mxu2  ;;  %v1549_v50 = vadd.f32 %v1548_v13, %v4088_v43  ;;  %v1637_v33 = vpop.f32.mrf.mxu1 }
 0x2a7   : > { %v4420_v61 = vpop.f32.mrf.mxu3 }
 0x2a8   : > { %5288 = vst [vmem:[#allocation68_spill] sm:$0xff] %v4420_v61  ;;  %v1638_v42 = vadd.f32 %v1637_v33, %v1549_v50 }
 0x2aa   : > { %v2277_v40 = vadd.f32 %v1638_v42, %v3938_v1 }
 0x2ab   : > { %2824 = vmatmul.msk.bf16.gmra.mxu2 %vm762_vm0, %v3886_v22  ;;  %2840 = vmatmul.msk.bf16.gmra.mxu3 %vm762_vm0, %v3886_v22 }
 0x2ac   : > { %2405 = vst [vmem:[%s4111_s24 + $0x220] sm:$0xff] %v2277_v40 }
 0x2ad   : > { %v1551_v8 = vpop.f32.mrf.mxu0 }
 0x2ae   : > { %v4429_v12 = vpop.f32.mrf.mxu2  ;;  %v1552_v25 = vadd.f32 %v1551_v8, %v4088_v43  ;;  %v1640_v53 = vpop.f32.mrf.mxu1 }
 0x2af   : > { %v4431_v49 = vpop.f32.mrf.mxu3 }
 0x2b0   : > { %5289 = vst [vmem:[#allocation69_spill] sm:$0xff] %v4431_v49  ;;  %v1641_v3 = vadd.f32 %v1640_v53, %v1552_v25  ;;  %1866 = vmatmul.bf16.gmra.mxu0 %v3516_v26  ;;  %v2949_v25 = vld [vmem:[%s5181_s1 + $0xd8] sm:$0xf0]  ;;  %v5292_v49 = vld [vmem:[#allocation3_spill] sm:$0xff] }
 0x2b1   : > { %1955 = vmatmul.bf16.gmra.mxu1 %v3518_v27 }
 0x2b2   : > { %v2281_v1 = vadd.f32 %v1641_v3, %v3950_v2  ;;  %v3142_v2 = vld [vmem:[%s5181_s1 + $0xcc] sm:$0xf] }
 0x2b4   : > { %2409 = vst [vmem:[%s4111_s24 + $0x240] sm:$0xff] %v2281_v1  ;;  %v2952_v1 = vor.u32 %v3142_v2, %v2949_v25  ;;  %v5293_v2 = vld [vmem:[#allocation4_spill] sm:$0xff] }
 0x2b5   : > { %v1553_v22 = vpop.f32.mrf.mxu0 }
 0x2b6   : > { %v4438_v13 = vpop.f32.mrf.mxu2  ;;  %v1554_v33 = vadd.f32 %v1553_v22, %v4088_v43  ;;  %v1642_v42 = vpop.f32.mrf.mxu1  ;;  %v3077_v22 = vld [vmem:[%s5181_s1 + $0x1d8] sm:$0xf0]  ;;  %2032 = vmatpush.bf16.msrb.mxu2 %v2952_v1 }
 0x2b7   : > { %v4440_v50 = vpop.f32.mrf.mxu3 }
 0x2b8   : > { %5290 = vst [vmem:[#allocation70_spill] sm:$0xff] %v4440_v50  ;;  %v1643_v40 = vadd.f32 %v1642_v42, %v1554_v33 }
 0x2ba   : > { %v2285_v8 = vadd.f32 %v1643_v40, %v3960_v54  ;;  %v3174_v54 = vld [vmem:[%s5181_s1 + $0x1cc] sm:$0xf] }
 0x2bb   : > { %1683 = vmatmul.bf16.vlgmr.msra.gmra.mxu2 %v3506_v20  ;;  %1772 = vmatmul.bf16.vlgmr.msra.gmra.mxu3 %v3508_v21 }
 0x2bc   : > { %2413 = vst [vmem:[%s4111_s24 + $0x260] sm:$0xff] %v2285_v8  ;;  %v3080_v8 = vor.u32 %v3174_v54, %v3077_v22 }
 0x2bd   : > { %v1556_v3 = vpop.f32.mrf.mxu0 }
 0x2be   : > { %v4453_v53 = vpop.f32.mrf.mxu2  ;;  %v1557_v42 = vadd.f32 %v1556_v3, %v4088_v43  ;;  %v1645_v40 = vpop.f32.mrf.mxu1  ;;  %2121 = vmatpush.bf16.msrb.mxu3 %v3080_v8 }
 0x2bf   : > { %v4461_v33 = vpop.f32.mrf.mxu3 }
 0x2c0   : > { %5291 = vst [vmem:[#allocation71_spill] sm:$0xff] %v4461_v33  ;;  %v1646_v50 = vadd.f32 %v1645_v40, %v1557_v42  ;;  %1871 = vmatmul.bf16.gmra.mxu0 %v5292_v49 }
 0x2c1   : > { %1960 = vmatmul.bf16.gmra.mxu1 %v5293_v2 }
 0x2c2   : > { %v2289_v25 = vadd.f32 %v1646_v50, %v3984_v48 }
 0x2c4   : > { %2417 = vst [vmem:[%s4111_s24 + $0x280] sm:$0xff] %v2289_v25  ;;  %v5296_v25 = vld [vmem:[#allocation5_spill] sm:$0xff] }
 0x2c5   : > { %v1558_v38 = vpop.f32.mrf.mxu0 }
 0x2c6   : > { %v4468_v61 = vpop.f32.mrf.mxu2  ;;  %v1559_v3 = vadd.f32 %v1558_v38, %v4088_v43  ;;  %v1647_v54 = vpop.f32.mrf.mxu1 }
 0x2c7   : > { %v4470_v39 = vpop.f32.mrf.mxu3 }
 0x2c8   : > { %5294 = vst [vmem:[#allocation72_spill] sm:$0xff] %v4470_v39  ;;  %v1648_v1 = vadd.f32 %v1647_v54, %v1559_v3  ;;  %v5297_v3 = vld [vmem:[#allocation6_spill] sm:$0xff] }
 0x2ca   : > { %v2293_v22 = vadd.f32 %v1648_v1, %v3994_v29  ;;  %v5298_v29 = vld [vmem:[#allocation32_spill] sm:$0xff] }
 0x2cb   : > { %1688 = vmatmul.bf16.gmra.mxu2 %v3516_v26  ;;  %1777 = vmatmul.bf16.gmra.mxu3 %v3518_v27 }
 0x2cc   : > { %2421 = vst [vmem:[%s4111_s24 + $0x2a0] sm:$0xff] %v2293_v22 }
 0x2cd   : > { %v1561_v48 = vpop.f32.mrf.mxu0 }
 0x2ce   : > { %v4477_v42 = vpop.f32.mrf.mxu2  ;;  %v1562_v40 = vadd.f32 %v1561_v48, %v4088_v43  ;;  %v1650_v8 = vpop.f32.mrf.mxu1  ;;  %v5300_v48 = vld [vmem:[#allocation35_spill] sm:$0xff] }
 0x2cf   : > { %v4479_v50 = vpop.f32.mrf.mxu3 }
 0x2d0   : > { %5295 = vst [vmem:[#allocation73_spill] sm:$0xff] %v4479_v50  ;;  %v1651_v38 = vadd.f32 %v1650_v8, %v1562_v40  ;;  %1876 = vmatmul.bf16.gmra.mxu0 %v5296_v25  ;;  %v3138_v40 = vld [vmem:[%s5181_s1 + $0xac] sm:$0xf]  ;;  %v2933_v8 = vld [vmem:[%s5181_s1 + $0xb8] sm:$0xf0] }
 0x2d1   : > { %1965 = vmatmul.bf16.gmra.mxu1 %v5297_v3 }
 0x2d2   : > { %v2297_v54 = vadd.f32 %v1651_v38, %v5298_v29 }
 0x2d4   : > { %2425 = vst [vmem:[%s4111_s24 + $0x2c0] sm:$0xff] %v2297_v54 }
 0x2d5   : > { %v1563_v22 = vpop.f32.mrf.mxu0 }
 0x2d6   : > { %v4486_v1 = vpop.f32.mrf.mxu2  ;;  %v1564_v33 = vadd.f32 %v1563_v22, %v4088_v43  ;;  %v1652_v50 = vpop.f32.mrf.mxu1 }
 0x2d7   : > { %v4488_v39 = vpop.f32.mrf.mxu3 }
 0x2d8   : > { %5299 = vst [vmem:[#allocation32_spill] sm:$0xff] %v4488_v39  ;;  %v1653_v62 = vadd.f32 %v1652_v50, %v1564_v33  ;;  %v2936_v33 = vor.u32 %v3138_v40, %v2933_v8  ;;  %v5303_v40 = vld [vmem:[#allocation8_spill] sm:$0xff]  ;;  %v5304_v8 = vld [vmem:[#allocation38_spill] sm:$0xff] }
 0x2da   : > { %v2301_v60 = vadd.f32 %v1653_v62, %v5300_v48  ;;  %v3170_v62 = vld [vmem:[%s5181_s1 + $0x1ac] sm:$0xf]  ;;  %2033 = vmatpush.bf16.msrb.mxu2 %v2936_v33 }
 0x2db   : > { %1693 = vmatmul.bf16.gmra.mxu2 %v5292_v49  ;;  %1782 = vmatmul.bf16.gmra.mxu3 %v5293_v2 }
 0x2dc   : > { %2429 = vst [vmem:[%s4111_s24 + $0x2e0] sm:$0xff] %v2301_v60  ;;  %v3061_v60 = vld [vmem:[%s5181_s1 + $0x1b8] sm:$0xf0] }
 0x2dd   : > { %v1566_v29 = vpop.f32.mrf.mxu0  ;;  %v3064_v48 = vor.u32 %v3170_v62, %v3061_v60  ;;  %v5306_v60 = vld [vmem:[#allocation41_spill] sm:$0xff] }
 0x2de   : > { %v4501_v38 = vpop.f32.mrf.mxu2  ;;  %v1567_v54 = vadd.f32 %v1566_v29, %v4088_v43  ;;  %v1655_v22 = vpop.f32.mrf.mxu1 }
 0x2df   : > { %v4509_v50 = vpop.f32.mrf.mxu3  ;;  %2122 = vmatpush.bf16.msrb.mxu3 %v3064_v48 }
 0x2e0   : > { %5301 = vst [vmem:[#allocation35_spill] sm:$0xff] %v4509_v50  ;;  %v1656_v39 = vadd.f32 %v1655_v22, %v1567_v54  ;;  %1881 = vmatmul.bf16.gmra.mxu0 %v5302_v51 }
 0x2e1   : > { %1970 = vmatmul.bf16.gmra.mxu1 %v5303_v40 }
 0x2e2   : > { %v2305_v56 = vadd.f32 %v1656_v39, %v5304_v8 }
 0x2e4   : > { %2433 = vst [vmem:[%s4111_s24 + $0x300] sm:$0xff] %v2305_v56 }
 0x2e5   : > { %v1568_v2 = vpop.f32.mrf.mxu0 }
 0x2e6   : > { %v4516_v41 = vpop.f32.mrf.mxu2  ;;  %v1569_v29 = vadd.f32 %v1568_v2, %v4088_v43  ;;  %v1657_v62 = vpop.f32.mrf.mxu1 }
 0x2e7   : > { %v4518_v49 = vpop.f32.mrf.mxu3 }
 0x2e8   : > { %5305 = vst [vmem:[#allocation38_spill] sm:$0xff] %v4518_v49  ;;  %v1658_v33 = vadd.f32 %v1657_v62, %v1569_v29  ;;  %v5309_v49 = vld [vmem:[#allocation9_spill] sm:$0xff]  ;;  %v5310_v29 = vld [vmem:[#allocation10_spill] sm:$0xff]  ;;  %v5311_v62 = vld [vmem:[#allocation44_spill] sm:$0xff] }
 0x2ea   : > { %v2309_v54 = vadd.f32 %v1658_v33, %v5306_v60 }
 0x2eb   : > { %1698 = vmatmul.bf16.gmra.mxu2 %v5296_v25  ;;  %1787 = vmatmul.bf16.gmra.mxu3 %v5297_v3 }
 0x2ec   : > { %2437 = vst [vmem:[%s4111_s24 + $0x320] sm:$0xff] %v2309_v54 }
 0x2ed   : > { %v1571_v56 = vpop.f32.mrf.mxu0 }
 0x2ee   : > { %v4525_v22 = vpop.f32.mrf.mxu2  ;;  %v1572_v48 = vadd.f32 %v1571_v56, %v4088_v43  ;;  %v1660_v8 = vpop.f32.mrf.mxu1  ;;  %v5314_v56 = vld [vmem:[#allocation47_spill] sm:$0xff] }
 0x2ef   : > { %5307 = vst [vmem:[#allocation41_spill] sm:$0xff] %v4525_v22  ;;  %v4527_v39 = vpop.f32.mrf.mxu3 }
 0x2f0   : > { %5308 = vst [vmem:[#allocation74_spill] sm:$0xff] %v4527_v39  ;;  %v1661_v2 = vadd.f32 %v1660_v8, %v1572_v48  ;;  %1886 = vmatmul.bf16.gmra.mxu0 %v5309_v49  ;;  %v3134_v48 = vld [vmem:[%s5181_s1 + $0x8c] sm:$0xf]  ;;  %v2917_v8 = vld [vmem:[%s5181_s1 + $0x98] sm:$0xf0] }
 0x2f1   : > { %1975 = vmatmul.bf16.gmra.mxu1 %v5310_v29 }
 0x2f2   : > { %v2313_v33 = vadd.f32 %v1661_v2, %v5311_v62 }
 0x2f4   : > { %2441 = vst [vmem:[%s4111_s24 + $0x340] sm:$0xff] %v2313_v33 }
 0x2f5   : > { %v1573_v54 = vpop.f32.mrf.mxu0 }
 0x2f6   : > { %v4534_v60 = vpop.f32.mrf.mxu2  ;;  %v1574_v3 = vadd.f32 %v1573_v54, %v4088_v43  ;;  %v1662_v39 = vpop.f32.mrf.mxu1 }
 0x2f7   : > { %5312 = vst [vmem:[#allocation9_spill] sm:$0xff] %v4534_v60  ;;  %v4536_v50 = vpop.f32.mrf.mxu3 }
 0x2f8   : > { %5313 = vst [vmem:[#allocation44_spill] sm:$0xff] %v4536_v50  ;;  %v1663_v25 = vadd.f32 %v1662_v39, %v1574_v3  ;;  %v2920_v3 = vor.u32 %v3134_v48, %v2917_v8  ;;  %v5318_v48 = vld [vmem:[#allocation12_spill] sm:$0xff] }
 0x2fa   : > { %v2317_v22 = vadd.f32 %v1663_v25, %v5314_v56  ;;  %v3166_v25 = vld [vmem:[%s5181_s1 + $0x18c] sm:$0xf]  ;;  %2034 = vmatpush.bf16.msrb.mxu2 %v2920_v3 }
 0x2fb   : > { %1703 = vmatmul.bf16.gmra.mxu2 %v5302_v51  ;;  %1792 = vmatmul.bf16.gmra.mxu3 %v5303_v40  ;;  %v5317_v40 = vld [vmem:[#allocation11_spill] sm:$0xff] }
 0x2fc   : > { %2445 = vst [vmem:[%s4111_s24 + $0x360] sm:$0xff] %v2317_v22  ;;  %v3045_v22 = vld [vmem:[%s5181_s1 + $0x198] sm:$0xf0] }
 0x2fd   : > { %v1576_v62 = vpop.f32.mrf.mxu0  ;;  %v3048_v56 = vor.u32 %v3166_v25, %v3045_v22 }
 0x2fe   : > { %v4549_v2 = vpop.f32.mrf.mxu2  ;;  %v1577_v33 = vadd.f32 %v1576_v62, %v4088_v43  ;;  %v1665_v54 = vpop.f32.mrf.mxu1 }
 0x2ff   : > { %5315 = vst [vmem:[#allocation47_spill] sm:$0xff] %v4549_v2  ;;  %v4557_v39 = vpop.f32.mrf.mxu3  ;;  %2123 = vmatpush.bf16.msrb.mxu3 %v3048_v56 }
 0x300   : > { %5316 = vst [vmem:[#allocation75_spill] sm:$0xff] %v4557_v39  ;;  %v1666_v50 = vadd.f32 %v1665_v54, %v1577_v33  ;;  %1891 = vmatmul.bf16.gmra.mxu0 %v5317_v40 }
 0x301   : > { %1980 = vmatmul.bf16.gmra.mxu1 %v5318_v48 }
 0x302   : > { %v2321_v8 = vadd.f32 %v1666_v50, %v4100_v63 }
 0x304   : > { %2449 = vst [vmem:[%s4111_s24 + $0x380] sm:$0xff] %v2321_v8  ;;  %v5321_v8 = vld [vmem:[#allocation13_spill] sm:$0xff] }
 0x305   : > { %v1578_v2 = vpop.f32.mrf.mxu0 }
 0x306   : > { %v4564_v51 = vpop.f32.mrf.mxu2  ;;  %v1579_v62 = vadd.f32 %v1578_v2, %v4088_v43  ;;  %v1667_v25 = vpop.f32.mrf.mxu1 }
 0x307   : > { %v4566_v60 = vpop.f32.mrf.mxu3 }
 0x308   : > { %5319 = vst [vmem:[#allocation76_spill] sm:$0xff] %v4566_v60  ;;  %v1668_v3 = vadd.f32 %v1667_v25, %v1579_v62  ;;  %v5322_v62 = vld [vmem:[#allocation14_spill] sm:$0xff] }
 0x30a   : > { %v2325_v22 = vadd.f32 %v1668_v3, %v4114_v57 }
 0x30b   : > { %1708 = vmatmul.bf16.gmra.mxu2 %v5309_v49  ;;  %1797 = vmatmul.bf16.gmra.mxu3 %v5310_v29 }
 0x30c   : > { %2453 = vst [vmem:[%s4111_s24 + $0x3a0] sm:$0xff] %v2325_v22 }
 0x30d   : > { %v1581_v63 = vpop.f32.mrf.mxu0 }
 0x30e   : > { %v4573_v33 = vpop.f32.mrf.mxu2  ;;  %v1582_v54 = vadd.f32 %v1581_v63, %v4088_v43  ;;  %v1670_v56 = vpop.f32.mrf.mxu1 }
 0x30f   : > { %v4575_v50 = vpop.f32.mrf.mxu3 }
 0x310   : > { %5320 = vst [vmem:[#allocation77_spill] sm:$0xff] %v4575_v50  ;;  %v1671_v2 = vadd.f32 %v1670_v56, %v1582_v54  ;;  %1896 = vmatmul.bf16.gmra.mxu0 %v5321_v8  ;;  %v5324_v54 = vld [vmem:[#allocation50_spill] sm:$0xff] }
 0x311   : > { %1985 = vmatmul.bf16.gmra.mxu1 %v5322_v62  ;;  %v4591_v56 = vperm.slane %v5324_v54, 2 }
 0x312   : > { %v2329_v57 = vadd.f32 %v1671_v2, %v4125_v24  ;;  %v3130_v24 = vld [vmem:[%s5181_s1 + $0x6c] sm:$0xf]  ;;  %v3029_v2 = vld [vmem:[%s5181_s1 + $0x178] sm:$0xf0] }
 0x314   : > { %2457 = vst [vmem:[%s4111_s24 + $0x3c0] sm:$0xff] %v2329_v57 }
 0x315   : > { %v1583_v3 = vpop.f32.mrf.mxu0 }
 0x316   : > { %v4582_v25 = vpop.f32.mrf.mxu2  ;;  %v1584_v60 = vadd.f32 %v1583_v3, %v4088_v43  ;;  %v1672_v50 = vpop.f32.mrf.mxu1  ;;  %v2901_v43 = vld [vmem:[%s5181_s1 + $0x78] sm:$0xf0] }
 0x317   : > { %v4584_v22 = vpop.f32.mrf.mxu3 }
 0x318   : > { %5323 = vst [vmem:[#allocation13_spill] sm:$0xff] %v4584_v22  ;;  %v1673_v39 = vadd.f32 %v1672_v50, %v1584_v60  ;;  %v3162_v50 = vld [vmem:[%s5181_s1 + $0x16c] sm:$0xf] }
 0x319   : > { %v3032_v22 = vor.u32 %v3162_v50, %v3029_v2 }
 0x31a   : > { %v2333_v63 = vadd.f32 %v1673_v39, %v4134_v6  ;;  %v2904_v39 = vor.u32 %v3130_v24, %v2901_v43 }
 0x31b   : > { %1713 = vmatmul.bf16.gmra.mxu2 %v5317_v40  ;;  %1802 = vmatmul.bf16.gmra.mxu3 %v5318_v48 }
 0x31c   : > { %2461 = vst [vmem:[%s4111_s24 + $0x3e0] sm:$0xff] %v2333_v63  ;;  %2035 = vmatpush.bf16.msrb.mxu2 %v2904_v39  ;;  %2124 = vmatpush.bf16.msrb.mxu3 %v3032_v22 }
 0x31d   : > { %v1862_v6 = vpop.f32.mrf.mxu0 }
 0x31e   : > { %v4600_v60 = vpop.f32.mrf.mxu2  ;;  %v1863_v3 = vadd.f32 %v1862_v6, %v4591_v56  ;;  %v1951_v63 = vpop.f32.mrf.mxu1 }
 0x31f   : > { %v4608_v57 = vpop.f32.mrf.mxu3 }
 0x320   : > { %5325 = vst [vmem:[#allocation14_spill] sm:$0xff] %v4608_v57  ;;  %v1952_v48 = vadd.f32 %v1951_v63, %v1863_v3  ;;  %1901 = vmatmul.bf16.gmra.mxu0 %v3586_v4 }
 0x321   : > { %1990 = vmatmul.bf16.gmra.mxu1 %v3588_v5 }
 0x322   : > { %v2211_v24 = vadd.f32 %v1952_v48, %v4151_v44 }
 0x324   : > { %2339 = vst [vmem:[%s4111_s24 + $0x10] sm:$0xff] %v2211_v24 }
 0x325   : > { %v1864_v40 = vpop.f32.mrf.mxu0 }
 0x326   : > { %v4615_v43 = vpop.f32.mrf.mxu2  ;;  %v1865_v6 = vadd.f32 %v1864_v40, %v4591_v56  ;;  %v1953_v50 = vpop.f32.mrf.mxu1 }
 0x327   : > { %v4617_v29 = vpop.f32.mrf.mxu3 }
 0x328   : > { %5326 = vst [vmem:[#allocation50_spill] sm:$0xff] %v4617_v29  ;;  %v1954_v39 = vadd.f32 %v1953_v50, %v1865_v6 }
 0x32a   : > { %v2215_v2 = vadd.f32 %v1954_v39, %v4166_v35 }
 0x32b   : > { %1718 = vmatmul.bf16.gmra.mxu2 %v5321_v8  ;;  %1807 = vmatmul.bf16.gmra.mxu3 %v5322_v62 }
 0x32c   : > { %2343 = vst [vmem:[%s4111_s24 + $0x30] sm:$0xff] %v2215_v2 }
 0x32d   : > { %v1867_v44 = vpop.f32.mrf.mxu0 }
 0x32e   : > { %v4624_v22 = vpop.f32.mrf.mxu2  ;;  %v1868_v3 = vadd.f32 %v1867_v44, %v4591_v56  ;;  %v1956_v63 = vpop.f32.mrf.mxu1 }
 0x32f   : > { %v4626_v48 = vpop.f32.mrf.mxu3 }
 0x330   : > { %5327 = vst [vmem:[#allocation78_spill] sm:$0xff] %v4626_v48  ;;  %v1957_v40 = vadd.f32 %v1956_v63, %v1868_v3  ;;  %1906 = vmatmul.bf16.gmra.mxu0 %v3598_v17  ;;  %v4642_v3 = vperm.slane %v5324_v54, 1 }
 0x331   : > { %1995 = vmatmul.bf16.gmra.mxu1 %v3600_v18 }
 0x332   : > { %v2219_v35 = vadd.f32 %v1957_v40, %v4177_v59  ;;  %v3126_v40 = vld [vmem:[%s5181_s1 + $0x4c] sm:$0xf] }
 0x334   : > { %2347 = vst [vmem:[%s4111_s24 + $0x50] sm:$0xff] %v2219_v35  ;;  %v2885_v35 = vld [vmem:[%s5181_s1 + $0x58] sm:$0xf0] }
 0x335   : > { %v1869_v6 = vpop.f32.mrf.mxu0 }
 0x336   : > { %v4633_v24 = vpop.f32.mrf.mxu2  ;;  %v1870_v39 = vadd.f32 %v1869_v6, %v4591_v56  ;;  %v1958_v2 = vpop.f32.mrf.mxu1 }
 0x337   : > { %v4635_v50 = vpop.f32.mrf.mxu3 }
 0x338   : > { %5328 = vst [vmem:[#allocation79_spill] sm:$0xff] %v4635_v50  ;;  %v1959_v48 = vadd.f32 %v1958_v2, %v1870_v39  ;;  %v2888_v2 = vor.u32 %v3126_v40, %v2885_v35 }
 0x33a   : > { %v2223_v44 = vadd.f32 %v1959_v48, %v4186_v7  ;;  %v3158_v7 = vld [vmem:[%s5181_s1 + $0x14c] sm:$0xf]  ;;  %2036 = vmatpush.bf16.msrb.mxu2 %v2888_v2  ;;  %v5330_v2 = vld [vmem:[#allocation18_spill] sm:$0xff] }
 0x33b   : > { %1723 = vmatmul.bf16.gmra.mxu2 %v3586_v4  ;;  %1812 = vmatmul.bf16.gmra.mxu3 %v3588_v5 }
 0x33c   : > { %2351 = vst [vmem:[%s4111_s24 + $0x70] sm:$0xff] %v2223_v44  ;;  %v3013_v44 = vld [vmem:[%s5181_s1 + $0x158] sm:$0xf0] }
 0x33d   : > { %v1872_v63 = vpop.f32.mrf.mxu0  ;;  %v3016_v50 = vor.u32 %v3158_v7, %v3013_v44 }
 0x33e   : > { %v1684_v59 = vpop.f32.mrf.mxu2  ;;  %v1873_v6 = vadd.f32 %v1872_v63, %v4591_v56  ;;  %v1961_v39 = vpop.f32.mrf.mxu1 }
 0x33f   : > { %v1685_v48 = vadd.f32 %v1684_v59, %v4642_v3  ;;  %v1773_v54 = vpop.f32.mrf.mxu3  ;;  %2125 = vmatpush.bf16.msrb.mxu3 %v3016_v50  ;;  %v5329_v59 = vld [vmem:[#allocation16_spill] sm:$0xff] }
 0x340   : > { %v1962_v57 = vadd.f32 %v1961_v39, %v1873_v6  ;;  %1911 = vmatmul.bf16.gmra.mxu0 %v3610_v36 }
 0x341   : > { %v1774_v29 = vadd.f32 %v1773_v54, %v1685_v48  ;;  %2000 = vmatmul.bf16.gmra.mxu1 %v3612_v37 }
 0x342   : > { %v2227_v63 = vadd.f32 %v1962_v57, %v4203_v16 }
 0x343   : > { %v2210_v5 = vadd.f32 %v1774_v29, %v5329_v59 }
 0x344   : > { %2355 = vst [vmem:[%s4111_s24 + $0x90] sm:$0xff] %v2227_v63 }
 0x345   : > { %2338 = vst [vmem:[%s4111_s24 + $0x8] sm:$0xff] %v2210_v5  ;;  %v1874_v35 = vpop.f32.mrf.mxu0 }
 0x346   : > { %v1686_v40 = vpop.f32.mrf.mxu2  ;;  %v1875_v54 = vadd.f32 %v1874_v35, %v4591_v56  ;;  %v1963_v6 = vpop.f32.mrf.mxu1 }
 0x347   : > { %v1687_v7 = vadd.f32 %v1686_v40, %v4642_v3  ;;  %v1775_v48 = vpop.f32.mrf.mxu3 }
 0x348   : > { %v1964_v44 = vadd.f32 %v1963_v6, %v1875_v54 }
 0x349   : > { %v1776_v39 = vadd.f32 %v1775_v48, %v1687_v7 }
 0x34a   : > { %v2231_v29 = vadd.f32 %v1964_v44, %v4236_v0  ;;  %v5331_v0 = vld [vmem:[#allocation20_spill] sm:$0xff] }
 0x34b   : > { %v2214_v50 = vadd.f32 %v1776_v39, %v5330_v2  ;;  %1728 = vmatmul.bf16.gmra.mxu2 %v3598_v17  ;;  %1817 = vmatmul.bf16.gmra.mxu3 %v3600_v18 }
 0x34c   : > { %2359 = vst [vmem:[%s4111_s24 + $0xb0] sm:$0xff] %v2231_v29 }
 0x34d   : > { %2342 = vst [vmem:[%s4111_s24 + $0x28] sm:$0xff] %v2214_v50  ;;  %v1877_v16 = vpop.f32.mrf.mxu0 }
 0x34e   : > { %v1689_v5 = vpop.f32.mrf.mxu2  ;;  %v1878_v63 = vadd.f32 %v1877_v16, %v4591_v56  ;;  %v1966_v40 = vpop.f32.mrf.mxu1 }
 0x34f   : > { %v1690_v57 = vadd.f32 %v1689_v5, %v4642_v3  ;;  %v1778_v59 = vpop.f32.mrf.mxu3 }
 0x350   : > { %v1967_v7 = vadd.f32 %v1966_v40, %v1878_v63  ;;  %1916 = vmatmul.bf16.gmra.mxu0 %v3622_v55 }
 0x351   : > { %v1779_v35 = vadd.f32 %v1778_v59, %v1690_v57  ;;  %2005 = vmatmul.bf16.gmra.mxu1 %v3624_v58  ;;  %v5332_v57 = vld [vmem:[#allocation22_spill] sm:$0xff] }
 0x352   : > { %v2235_v54 = vadd.f32 %v1967_v7, %v4271_v32  ;;  %v2869_v7 = vld [vmem:[%s5181_s1 + $0x38] sm:$0xf0] }
 0x353   : > { %v2218_v48 = vadd.f32 %v1779_v35, %v5331_v0  ;;  %v3122_v35 = vld [vmem:[%s5181_s1 + $0x2c] sm:$0xf] }
 0x354   : > { %2363 = vst [vmem:[%s4111_s24 + $0xd0] sm:$0xff] %v2235_v54 }
 0x355   : > { %2346 = vst [vmem:[%s4111_s24 + $0x48] sm:$0xff] %v2218_v48  ;;  %v1879_v39 = vpop.f32.mrf.mxu0 }
 0x356   : > { %v1691_v6 = vpop.f32.mrf.mxu2  ;;  %v1880_v50 = vadd.f32 %v1879_v39, %v4591_v56  ;;  %v1968_v29 = vpop.f32.mrf.mxu1  ;;  %v3154_v39 = vld [vmem:[%s5181_s1 + $0x12c] sm:$0xf] }
 0x357   : > { %v1692_v44 = vadd.f32 %v1691_v6, %v4642_v3  ;;  %v1780_v2 = vpop.f32.mrf.mxu3  ;;  %v2872_v6 = vor.u32 %v3122_v35, %v2869_v7 }
 0x358   : > { %v1969_v16 = vadd.f32 %v1968_v29, %v1880_v50 }
 0x359   : > { %v1781_v5 = vadd.f32 %v1780_v2, %v1692_v44  ;;  %v2997_v44 = vld [vmem:[%s5181_s1 + $0x138] sm:$0xf0]  ;;  %2037 = vmatpush.bf16.msrb.mxu2 %v2872_v6 }
 0x35a   : > { %v2239_v63 = vadd.f32 %v1969_v16, %v4304_v52  ;;  %v3000_v2 = vor.u32 %v3154_v39, %v2997_v44 }
 0x35b   : > { %v2222_v59 = vadd.f32 %v1781_v5, %v5332_v57  ;;  %1733 = vmatmul.bf16.gmra.mxu2 %v3610_v36  ;;  %1822 = vmatmul.bf16.gmra.mxu3 %v3612_v37  ;;  %v5333_v5 = vld [vmem:[#allocation24_spill] sm:$0xff] }
 0x35c   : > { %2367 = vst [vmem:[%s4111_s24 + $0xf0] sm:$0xff] %v2239_v63  ;;  %2126 = vmatpush.bf16.msrb.mxu3 %v3000_v2 }
 0x35d   : > { %2350 = vst [vmem:[%s4111_s24 + $0x68] sm:$0xff] %v2222_v59  ;;  %v1882_v40 = vpop.f32.mrf.mxu0 }
 0x35e   : > { %v1694_v32 = vpop.f32.mrf.mxu2  ;;  %v1883_v48 = vadd.f32 %v1882_v40, %v4591_v56  ;;  %v1971_v54 = vpop.f32.mrf.mxu1 }
 0x35f   : > { %v1695_v0 = vadd.f32 %v1694_v32, %v4642_v3  ;;  %v1783_v52 = vpop.f32.mrf.mxu3 }
 0x360   : > { %v1972_v29 = vadd.f32 %v1971_v54, %v1883_v48  ;;  %1921 = vmatmul.bf16.gmra.mxu0 %v3634_v10  ;;  %v5334_v48 = vld [vmem:[#allocation26_spill] sm:$0xff] }
 0x361   : > { %v1784_v50 = vadd.f32 %v1783_v52, %v1695_v0  ;;  %2010 = vmatmul.bf16.gmra.mxu1 %v3636_v11 }
 0x362   : > { %v2243_v57 = vadd.f32 %v1972_v29, %v4345_v9 }
 0x363   : > { %v2226_v16 = vadd.f32 %v1784_v50, %v5333_v5 }
 0x364   : > { %2371 = vst [vmem:[%s4111_s24 + $0x110] sm:$0xff] %v2243_v57 }
 0x365   : > { %2354 = vst [vmem:[%s4111_s24 + $0x88] sm:$0xff] %v2226_v16  ;;  %v1884_v63 = vpop.f32.mrf.mxu0 }
 0x366   : > { %v1696_v59 = vpop.f32.mrf.mxu2  ;;  %v1885_v35 = vadd.f32 %v1884_v63, %v4591_v56  ;;  %v1973_v7 = vpop.f32.mrf.mxu1 }
 0x367   : > { %v1697_v32 = vadd.f32 %v1696_v59, %v4642_v3  ;;  %v1785_v40 = vpop.f32.mrf.mxu3 }
 0x368   : > { %v1974_v52 = vadd.f32 %v1973_v7, %v1885_v35 }
 0x369   : > { %v1786_v0 = vadd.f32 %v1785_v40, %v1697_v32 }
 0x36a   : > { %v2247_v6 = vadd.f32 %v1974_v52, %v4366_v19  ;;  %v5335_v19 = vld [vmem:[#allocation28_spill] sm:$0xff] }
 0x36b   : > { %v2230_v54 = vadd.f32 %v1786_v0, %v5334_v48  ;;  %1738 = vmatmul.bf16.gmra.mxu2 %v3622_v55  ;;  %1827 = vmatmul.bf16.gmra.mxu3 %v3624_v58 }
 0x36c   : > { %2375 = vst [vmem:[%s4111_s24 + $0x130] sm:$0xff] %v2247_v6 }
 0x36d   : > { %2358 = vst [vmem:[%s4111_s24 + $0xa8] sm:$0xff] %v2230_v54  ;;  %v1887_v39 = vpop.f32.mrf.mxu0  ;;  %v5336_v54 = vld [vmem:[#allocation30_spill] sm:$0xff] }
 0x36e   : > { %v1699_v9 = vpop.f32.mrf.mxu2  ;;  %v1888_v50 = vadd.f32 %v1887_v39, %v4591_v56  ;;  %v1976_v29 = vpop.f32.mrf.mxu1 }
 0x36f   : > { %v1700_v44 = vadd.f32 %v1699_v9, %v4642_v3  ;;  %v1788_v2 = vpop.f32.mrf.mxu3 }
 0x370   : > { %v1977_v16 = vadd.f32 %v1976_v29, %v1888_v50  ;;  %1926 = vmatmul.bf16.gmra.mxu0 %v3646_v31 }
 0x371   : > { %v1789_v5 = vadd.f32 %v1788_v2, %v1700_v44  ;;  %2015 = vmatmul.bf16.gmra.mxu1 %v3648_v34  ;;  %v3118_v44 = vld [vmem:[%s5181_s1 + $0xc] sm:$0xf]  ;;  %v2853_v2 = vld [vmem:[%s5181_s1 + $0x18] sm:$0xf0] }
 0x372   : > { %v2251_v59 = vadd.f32 %v1977_v16, %v4377_v45  ;;  %v2856_v16 = vor.u32 %v3118_v44, %v2853_v2  ;;  %v5338_v44 = vld [vmem:[#allocation36_spill] sm:$0xff] }
 0x373   : > { %v2234_v57 = vadd.f32 %v1789_v5, %v5335_v19  ;;  %v3150_v19 = vld [vmem:[%s5181_s1 + $0x10c] sm:$0xf] }
 0x374   : > { %2379 = vst [vmem:[%s4111_s24 + $0x150] sm:$0xff] %v2251_v59  ;;  %2038 = vmatpush.bf16.msrb.mxu2 %v2856_v16 }
 0x375   : > { %2362 = vst [vmem:[%s4111_s24 + $0xc8] sm:$0xff] %v2234_v57  ;;  %v1889_v32 = vpop.f32.mrf.mxu0  ;;  %v2981_v57 = vld [vmem:[%s5181_s1 + $0x118] sm:$0xf0] }
 0x376   : > { %v1701_v63 = vpop.f32.mrf.mxu2  ;;  %v1890_v7 = vadd.f32 %v1889_v32, %v4591_v56  ;;  %v1978_v0 = vpop.f32.mrf.mxu1  ;;  %v2984_v59 = vor.u32 %v3150_v19, %v2981_v57 }
 0x377   : > { %v1702_v40 = vadd.f32 %v1701_v63, %v4642_v3  ;;  %v1790_v35 = vpop.f32.mrf.mxu3 }
 0x378   : > { %v1979_v48 = vadd.f32 %v1978_v0, %v1890_v7  ;;  %2127 = vmatpush.bf16.msrb.mxu3 %v2984_v59 }
 0x379   : > { %v1791_v52 = vadd.f32 %v1790_v35, %v1702_v40  ;;  %v5337_v40 = vld [vmem:[#allocation33_spill] sm:$0xff] }
 0x37a   : > { %v2255_v9 = vadd.f32 %v1979_v48, %v4386_v23 }
 0x37b   : > { %v2238_v6 = vadd.f32 %v1791_v52, %v5336_v54  ;;  %1743 = vmatmul.bf16.gmra.mxu2 %v3634_v10  ;;  %1832 = vmatmul.bf16.gmra.mxu3 %v3636_v11 }
 0x37c   : > { %2383 = vst [vmem:[%s4111_s24 + $0x170] sm:$0xff] %v2255_v9 }
 0x37d   : > { %2366 = vst [vmem:[%s4111_s24 + $0xe8] sm:$0xff] %v2238_v6  ;;  %v1892_v39 = vpop.f32.mrf.mxu0 }
 0x37e   : > { %v1704_v45 = vpop.f32.mrf.mxu2  ;;  %v1893_v29 = vadd.f32 %v1892_v39, %v4591_v56  ;;  %v1981_v5 = vpop.f32.mrf.mxu1 }
 0x37f   : > { %v1705_v50 = vadd.f32 %v1704_v45, %v4642_v3  ;;  %v1793_v23 = vpop.f32.mrf.mxu3 }
 0x380   : > { %v1982_v32 = vadd.f32 %v1981_v5, %v1893_v29  ;;  %1931 = vmatmul.bf16.gmra.mxu0 %v3682_v14 }
 0x381   : > { %v1794_v63 = vadd.f32 %v1793_v23, %v1705_v50  ;;  %2020 = vmatmul.bf16.gmra.mxu1 %v3684_v15 }
 0x382   : > { %v2259_v7 = vadd.f32 %v1982_v32, %v4403_v30 }
 0x383   : > { %v2242_v35 = vadd.f32 %v1794_v63, %v5337_v40 }
 0x384   : > { %2387 = vst [vmem:[%s4111_s24 + $0x190] sm:$0xff] %v2259_v7 }
 0x385   : > { %2370 = vst [vmem:[%s4111_s24 + $0x108] sm:$0xff] %v2242_v35  ;;  %v1894_v52 = vpop.f32.mrf.mxu0 }
 0x386   : > { %v1706_v0 = vpop.f32.mrf.mxu2  ;;  %v1895_v6 = vadd.f32 %v1894_v52, %v4591_v56  ;;  %v1983_v9 = vpop.f32.mrf.mxu1 }
 0x387   : > { %v1707_v48 = vadd.f32 %v1706_v0, %v4642_v3  ;;  %v1795_v54 = vpop.f32.mrf.mxu3 }
 0x388   : > { %v1984_v39 = vadd.f32 %v1983_v9, %v1895_v6  ;;  %v5340_v9 = vld [vmem:[#allocation42_spill] sm:$0xff] }
 0x389   : > { %v1796_v45 = vadd.f32 %v1795_v54, %v1707_v48 }
 0x38a   : > { %v2263_v50 = vadd.f32 %v1984_v39, %v4418_v28  ;;  %v5339_v28 = vld [vmem:[#allocation39_spill] sm:$0xff] }
 0x38b   : > { %v2246_v2 = vadd.f32 %v1796_v45, %v5338_v44  ;;  %1748 = vmatmul.bf16.gmra.mxu2 %v3646_v31  ;;  %1837 = vmatmul.bf16.gmra.mxu3 %v3648_v34 }
 0x38c   : > { %2391 = vst [vmem:[%s4111_s24 + $0x1b0] sm:$0xff] %v2263_v50 }
 0x38d   : > { %2374 = vst [vmem:[%s4111_s24 + $0x128] sm:$0xff] %v2246_v2  ;;  %v1897_v23 = vpop.f32.mrf.mxu0 }
 0x38e   : > { %v1709_v30 = vpop.f32.mrf.mxu2  ;;  %v1898_v16 = vadd.f32 %v1897_v23, %v4591_v56  ;;  %v1986_v19 = vpop.f32.mrf.mxu1 }
 0x38f   : > { %v1710_v29 = vadd.f32 %v1709_v30, %v4642_v3  ;;  %v1798_v5 = vpop.f32.mrf.mxu3 }
 0x390   : > { %v1987_v59 = vadd.f32 %v1986_v19, %v1898_v16  ;;  %1936 = vmatmul.bf16.gmra.mxu0 %v3694_v46  ;;  %v5341_v16 = vld [vmem:[#allocation45_spill] sm:$0xff] }
 0x391   : > { %v1799_v57 = vadd.f32 %v1798_v5, %v1710_v29  ;;  %2025 = vmatmul.bf16.gmra.mxu1 %v3696_v47 }
 0x392   : > { %v2267_v32 = vadd.f32 %v1987_v59, %v4429_v12 }
 0x393   : > { %v2250_v63 = vadd.f32 %v1799_v57, %v5339_v28 }
 0x394   : > { %2395 = vst [vmem:[%s4111_s24 + $0x1d0] sm:$0xff] %v2267_v32 }
 0x395   : > { %2378 = vst [vmem:[%s4111_s24 + $0x148] sm:$0xff] %v2250_v63  ;;  %v1899_v35 = vpop.f32.mrf.mxu0 }
 0x396   : > { %v1711_v40 = vpop.f32.mrf.mxu2  ;;  %v1900_v52 = vadd.f32 %v1899_v35, %v4591_v56  ;;  %v1988_v48 = vpop.f32.mrf.mxu1 }
 0x397   : > { %v1712_v7 = vadd.f32 %v1711_v40, %v4642_v3  ;;  %v1800_v0 = vpop.f32.mrf.mxu3 }
 0x398   : > { %v1989_v6 = vadd.f32 %v1988_v48, %v1900_v52 }
 0x399   : > { %v1801_v54 = vadd.f32 %v1800_v0, %v1712_v7  ;;  %v5342_v0 = vld [vmem:[#allocation48_spill] sm:$0xff] }
 0x39a   : > { %v2271_v39 = vadd.f32 %v1989_v6, %v4438_v13 }
 0x39b   : > { %v2254_v45 = vadd.f32 %v1801_v54, %v5340_v9  ;;  %1753 = vmatmul.bf16.gmra.mxu2 %v3682_v14  ;;  %1842 = vmatmul.bf16.gmra.mxu3 %v3684_v15 }
 0x39c   : > { %2399 = vst [vmem:[%s4111_s24 + $0x1f0] sm:$0xff] %v2271_v39 }
 0x39d   : > { %2382 = vst [vmem:[%s4111_s24 + $0x168] sm:$0xff] %v2254_v45  ;;  %v1902_v44 = vpop.f32.mrf.mxu0 }
 0x39e   : > { %v1714_v12 = vpop.f32.mrf.mxu2  ;;  %v1903_v30 = vadd.f32 %v1902_v44, %v4591_v56  ;;  %v1991_v23 = vpop.f32.mrf.mxu1 }
 0x39f   : > { %v1715_v2 = vadd.f32 %v1714_v12, %v4642_v3  ;;  %v1803_v50 = vpop.f32.mrf.mxu3 }
 0x3a0   : > { %v1992_v5 = vadd.f32 %v1991_v23, %v1903_v30 }
 0x3a1   : > { %v1804_v29 = vadd.f32 %v1803_v50, %v1715_v2  ;;  %v5343_v2 = vld [vmem:[#allocation17_spill] sm:$0xff] }
 0x3a2   : > { %v2275_v13 = vadd.f32 %v1992_v5, %v4453_v53 }
 0x3a3   : > { %v2258_v19 = vadd.f32 %v1804_v29, %v5341_v16 }
 0x3a4   : > { %2403 = vst [vmem:[%s4111_s24 + $0x210] sm:$0xff] %v2275_v13 }
 0x3a5   : > { %2386 = vst [vmem:[%s4111_s24 + $0x188] sm:$0xff] %v2258_v19  ;;  %v1904_v59 = vpop.f32.mrf.mxu0 }
 0x3a6   : > { %v1716_v57 = vpop.f32.mrf.mxu2  ;;  %v1905_v32 = vadd.f32 %v1904_v59, %v4591_v56  ;;  %v1993_v40 = vpop.f32.mrf.mxu1  ;;  %v5344_v59 = vld [vmem:[#allocation19_spill] sm:$0xff] }
 0x3a7   : > { %v1717_v28 = vadd.f32 %v1716_v57, %v4642_v3  ;;  %v1805_v63 = vpop.f32.mrf.mxu3 }
 0x3a8   : > { %v1994_v7 = vadd.f32 %v1993_v40, %v1905_v32 }
 0x3a9   : > { %v1806_v35 = vadd.f32 %v1805_v63, %v1717_v28 }
 0x3aa   : > { %v2279_v48 = vadd.f32 %v1994_v7, %v4468_v61 }
 0x3ab   : > { %v2262_v52 = vadd.f32 %v1806_v35, %v5342_v0  ;;  %1758 = vmatmul.bf16.gmra.mxu2 %v3694_v46  ;;  %1847 = vmatmul.bf16.gmra.mxu3 %v3696_v47 }
 0x3ac   : > { %2407 = vst [vmem:[%s4111_s24 + $0x230] sm:$0xff] %v2279_v48 }
 0x3ad   : > { %2390 = vst [vmem:[%s4111_s24 + $0x1a8] sm:$0xff] %v2262_v52  ;;  %v1907_v54 = vpop.f32.mrf.mxu0 }
 0x3ae   : > { %v1719_v53 = vpop.f32.mrf.mxu2  ;;  %v1908_v45 = vadd.f32 %v1907_v54, %v4591_v56  ;;  %v1996_v39 = vpop.f32.mrf.mxu1 }
 0x3af   : > { %v1720_v6 = vadd.f32 %v1719_v53, %v4642_v3  ;;  %v1808_v9 = vpop.f32.mrf.mxu3  ;;  %v5345_v53 = vld [vmem:[#allocation21_spill] sm:$0xff] }
 0x3b0   : > { %v1997_v44 = vadd.f32 %v1996_v39, %v1908_v45 }
 0x3b1   : > { %v1809_v12 = vadd.f32 %v1808_v9, %v1720_v6 }
 0x3b2   : > { %v2283_v61 = vadd.f32 %v1997_v44, %v4477_v42 }
 0x3b3   : > { %v2266_v50 = vadd.f32 %v1809_v12, %v5343_v2  ;;  %v5346_v2 = vld [vmem:[#allocation23_spill] sm:$0xff] }
 0x3b4   : > { %2411 = vst [vmem:[%s4111_s24 + $0x250] sm:$0xff] %v2283_v61 }
 0x3b5   : > { %2394 = vst [vmem:[%s4111_s24 + $0x1c8] sm:$0xff] %v2266_v50  ;;  %v1909_v23 = vpop.f32.mrf.mxu0 }
 0x3b6   : > { %v1721_v30 = vpop.f32.mrf.mxu2  ;;  %v1910_v16 = vadd.f32 %v1909_v23, %v4591_v56  ;;  %v1998_v19 = vpop.f32.mrf.mxu1 }
 0x3b7   : > { %v1722_v29 = vadd.f32 %v1721_v30, %v4642_v3  ;;  %v1810_v5 = vpop.f32.mrf.mxu3 }
 0x3b8   : > { %v1999_v57 = vadd.f32 %v1998_v19, %v1910_v16 }
 0x3b9   : > { %v1811_v13 = vadd.f32 %v1810_v5, %v1722_v29 }
 0x3ba   : > { %v2287_v63 = vadd.f32 %v1999_v57, %v4486_v1  ;;  %v5347_v57 = vld [vmem:[#allocation25_spill] sm:$0xff] }
 0x3bb   : > { %v2270_v28 = vadd.f32 %v1811_v13, %v5344_v59  ;;  %2039 = vmatmul.bf16.vlgmr.msrb.gmra.mxu2 %v3506_v20  ;;  %2128 = vmatmul.bf16.vlgmr.msrb.gmra.mxu3 %v3508_v21 }
 0x3bc   : > { %2415 = vst [vmem:[%s4111_s24 + $0x270] sm:$0xff] %v2287_v63 }
 0x3bd   : > { %2398 = vst [vmem:[%s4111_s24 + $0x1e8] sm:$0xff] %v2270_v28  ;;  %v1912_v32 = vpop.f32.mrf.mxu0 }
 0x3be   : > { %v1724_v42 = vpop.f32.mrf.mxu2  ;;  %v1913_v7 = vadd.f32 %v1912_v32, %v4591_v56  ;;  %v2001_v0 = vpop.f32.mrf.mxu1 }
 0x3bf   : > { %v1725_v40 = vadd.f32 %v1724_v42, %v4642_v3  ;;  %v1813_v35 = vpop.f32.mrf.mxu3 }
 0x3c0   : > { %v2002_v48 = vadd.f32 %v2001_v0, %v1913_v7  ;;  %v5349_v0 = vld [vmem:[#allocation27_spill] sm:$0xff] }
 0x3c1   : > { %v1814_v52 = vadd.f32 %v1813_v35, %v1725_v40 }
 0x3c2   : > { %v2291_v1 = vadd.f32 %v2002_v48, %v4501_v38  ;;  %v5350_v48 = vld [vmem:[#allocation9_spill] sm:$0xff] }
 0x3c3   : > { %v2274_v54 = vadd.f32 %v1814_v52, %v5345_v53 }
 0x3c4   : > { %2419 = vst [vmem:[%s4111_s24 + $0x290] sm:$0xff] %v2291_v1  ;;  %v5352_v1 = vld [vmem:[#allocation4_spill] sm:$0xff] }
 0x3c5   : > { %2402 = vst [vmem:[%s4111_s24 + $0x208] sm:$0xff] %v2274_v54  ;;  %v1914_v21 = vpop.f32.mrf.mxu0  ;;  %v5351_v54 = vld [vmem:[#allocation3_spill] sm:$0xff] }
 0x3c6   : > { %v1726_v20 = vpop.f32.mrf.mxu2  ;;  %v1915_v45 = vadd.f32 %v1914_v21, %v4591_v56  ;;  %v2003_v39 = vpop.f32.mrf.mxu1 }
 0x3c7   : > { %v1727_v6 = vadd.f32 %v1726_v20, %v4642_v3  ;;  %v1815_v9 = vpop.f32.mrf.mxu3 }
 0x3c8   : > { %v2004_v44 = vadd.f32 %v2003_v39, %v1915_v45 }
 0x3c9   : > { %v1816_v12 = vadd.f32 %v1815_v9, %v1727_v6 }
 0x3ca   : > { %v2295_v61 = vadd.f32 %v2004_v44, %v4516_v41  ;;  %v5348_v41 = vld [vmem:[#allocation41_spill] sm:$0xff] }
 0x3cb   : > { %v2278_v50 = vadd.f32 %v1816_v12, %v5346_v2  ;;  %2044 = vmatmul.bf16.gmra.mxu2 %v3516_v26  ;;  %2133 = vmatmul.bf16.gmra.mxu3 %v3518_v27  ;;  %v5353_v2 = vld [vmem:[#allocation29_spill] sm:$0xff] }
 0x3cc   : > { %2423 = vst [vmem:[%s4111_s24 + $0x2b0] sm:$0xff] %v2295_v61  ;;  %v5354_v61 = vld [vmem:[#allocation47_spill] sm:$0xff] }
 0x3cd   : > { %2406 = vst [vmem:[%s4111_s24 + $0x228] sm:$0xff] %v2278_v50  ;;  %v1917_v30 = vpop.f32.mrf.mxu0 }
 0x3ce   : > { %v1729_v38 = vpop.f32.mrf.mxu2  ;;  %v1918_v5 = vadd.f32 %v1917_v30, %v4591_v56  ;;  %v2006_v16 = vpop.f32.mrf.mxu1 }
 0x3cf   : > { %v1730_v23 = vadd.f32 %v1729_v38, %v4642_v3  ;;  %v1818_v29 = vpop.f32.mrf.mxu3 }
 0x3d0   : > { %v2007_v13 = vadd.f32 %v2006_v16, %v1918_v5 }
 0x3d1   : > { %v1819_v19 = vadd.f32 %v1818_v29, %v1730_v23 }
 0x3d2   : > { %v2299_v28 = vadd.f32 %v2007_v13, %v5348_v41 }
 0x3d3   : > { %v2282_v59 = vadd.f32 %v1819_v19, %v5347_v57 }
 0x3d4   : > { %2427 = vst [vmem:[%s4111_s24 + $0x2d0] sm:$0xff] %v2299_v28 }
 0x3d5   : > { %2410 = vst [vmem:[%s4111_s24 + $0x248] sm:$0xff] %v2282_v59  ;;  %v1919_v27 = vpop.f32.mrf.mxu0  ;;  %v5355_v59 = vld [vmem:[#allocation31_spill] sm:$0xff] }
 0x3d6   : > { %v1731_v26 = vpop.f32.mrf.mxu2  ;;  %v1920_v32 = vadd.f32 %v1919_v27, %v4591_v56  ;;  %v2008_v40 = vpop.f32.mrf.mxu1  ;;  %v5357_v27 = vld [vmem:[#allocation6_spill] sm:$0xff] }
 0x3d7   : > { %v1732_v63 = vadd.f32 %v1731_v26, %v4642_v3  ;;  %v1820_v42 = vpop.f32.mrf.mxu3  ;;  %v5356_v26 = vld [vmem:[#allocation5_spill] sm:$0xff] }
 0x3d8   : > { %v2009_v7 = vadd.f32 %v2008_v40, %v1920_v32 }
 0x3d9   : > { %v1821_v35 = vadd.f32 %v1820_v42, %v1732_v63 }
 0x3da   : > { %v2303_v53 = vadd.f32 %v2009_v7, %v5350_v48  ;;  %v5358_v48 = vld [vmem:[#allocation34_spill] sm:$0xff] }
 0x3db   : > { %v2286_v52 = vadd.f32 %v1821_v35, %v5349_v0  ;;  %2049 = vmatmul.bf16.gmra.mxu2 %v5351_v54  ;;  %2138 = vmatmul.bf16.gmra.mxu3 %v5352_v1 }
 0x3dc   : > { %2431 = vst [vmem:[%s4111_s24 + $0x2f0] sm:$0xff] %v2303_v53 }
 0x3dd   : > { %2414 = vst [vmem:[%s4111_s24 + $0x268] sm:$0xff] %v2286_v52  ;;  %v1922_v21 = vpop.f32.mrf.mxu0 }
 0x3de   : > { %v1734_v20 = vpop.f32.mrf.mxu2  ;;  %v1923_v45 = vadd.f32 %v1922_v21, %v4591_v56  ;;  %v2011_v39 = vpop.f32.mrf.mxu1 }
 0x3df   : > { %v1735_v6 = vadd.f32 %v1734_v20, %v4642_v3  ;;  %v1823_v9 = vpop.f32.mrf.mxu3 }
 0x3e0   : > { %v2012_v44 = vadd.f32 %v2011_v39, %v1923_v45 }
 0x3e1   : > { %v1824_v12 = vadd.f32 %v1823_v9, %v1735_v6 }
 0x3e2   : > { %v2307_v38 = vadd.f32 %v2012_v44, %v5354_v61 }
 0x3e3   : > { %v2290_v50 = vadd.f32 %v1824_v12, %v5353_v2  ;;  %v5359_v12 = vld [vmem:[#allocation37_spill] sm:$0xff] }
 0x3e4   : > { %2435 = vst [vmem:[%s4111_s24 + $0x310] sm:$0xff] %v2307_v38 }
 0x3e5   : > { %2418 = vst [vmem:[%s4111_s24 + $0x288] sm:$0xff] %v2290_v50  ;;  %v1924_v23 = vpop.f32.mrf.mxu0  ;;  %v5360_v50 = vld [vmem:[#allocation7_spill] sm:$0xff] }
 0x3e6   : > { %v1736_v30 = vpop.f32.mrf.mxu2  ;;  %v1925_v16 = vadd.f32 %v1924_v23, %v4591_v56  ;;  %v2013_v19 = vpop.f32.mrf.mxu1 }
 0x3e7   : > { %v1737_v29 = vadd.f32 %v1736_v30, %v4642_v3  ;;  %v1825_v5 = vpop.f32.mrf.mxu3 }
 0x3e8   : > { %v2014_v57 = vadd.f32 %v2013_v19, %v1925_v16 }
 0x3e9   : > { %v1826_v13 = vadd.f32 %v1825_v5, %v1737_v29 }
 0x3ea   : > { %v2311_v28 = vadd.f32 %v2014_v57, %v4564_v51 }
 0x3eb   : > { %v2294_v41 = vadd.f32 %v1826_v13, %v5355_v59  ;;  %2054 = vmatmul.bf16.gmra.mxu2 %v5356_v26  ;;  %2143 = vmatmul.bf16.gmra.mxu3 %v5357_v27  ;;  %v5362_v13 = vld [vmem:[#allocation40_spill] sm:$0xff] }
 0x3ec   : > { %2439 = vst [vmem:[%s4111_s24 + $0x330] sm:$0xff] %v2311_v28 }
 0x3ed   : > { %2422 = vst [vmem:[%s4111_s24 + $0x2a8] sm:$0xff] %v2294_v41  ;;  %v1927_v42 = vpop.f32.mrf.mxu0 }
 0x3ee   : > { %v1739_v63 = vpop.f32.mrf.mxu2  ;;  %v1928_v35 = vadd.f32 %v1927_v42, %v4591_v56  ;;  %v2016_v7 = vpop.f32.mrf.mxu1 }
 0x3ef   : > { %v1740_v32 = vadd.f32 %v1739_v63, %v4642_v3  ;;  %v1828_v40 = vpop.f32.mrf.mxu3 }
 0x3f0   : > { %v2017_v52 = vadd.f32 %v2016_v7, %v1928_v35 }
 0x3f1   : > { %v1829_v0 = vadd.f32 %v1828_v40, %v1740_v32  ;;  %v5363_v40 = vld [vmem:[#allocation43_spill] sm:$0xff] }
 0x3f2   : > { %v2315_v51 = vadd.f32 %v2017_v52, %v4573_v33  ;;  %v5361_v33 = vld [vmem:[#allocation8_spill] sm:$0xff] }
 0x3f3   : > { %v2298_v53 = vadd.f32 %v1829_v0, %v5358_v48 }
 0x3f4   : > { %2443 = vst [vmem:[%s4111_s24 + $0x350] sm:$0xff] %v2315_v51 }
 0x3f5   : > { %2426 = vst [vmem:[%s4111_s24 + $0x2c8] sm:$0xff] %v2298_v53  ;;  %v1929_v1 = vpop.f32.mrf.mxu0 }
 0x3f6   : > { %v1741_v54 = vpop.f32.mrf.mxu2  ;;  %v1930_v6 = vadd.f32 %v1929_v1, %v4591_v56  ;;  %v2018_v9 = vpop.f32.mrf.mxu1 }
 0x3f7   : > { %v1742_v20 = vadd.f32 %v1741_v54, %v4642_v3  ;;  %v1830_v21 = vpop.f32.mrf.mxu3 }
 0x3f8   : > { %v2019_v39 = vadd.f32 %v2018_v9, %v1930_v6 }
 0x3f9   : > { %v1831_v45 = vadd.f32 %v1830_v21, %v1742_v20  ;;  %v5365_v21 = vld [vmem:[#allocation46_spill] sm:$0xff] }
 0x3fa   : > { %v2319_v2 = vadd.f32 %v2019_v39, %v4582_v25 }
 0x3fb   : > { %v2302_v44 = vadd.f32 %v1831_v45, %v5359_v12  ;;  %2059 = vmatmul.bf16.gmra.mxu2 %v5360_v50  ;;  %2148 = vmatmul.bf16.gmra.mxu3 %v5361_v33  ;;  %v5366_v33 = vld [vmem:[#allocation49_spill] sm:$0xff] }
 0x3fc   : > { %2447 = vst [vmem:[%s4111_s24 + $0x370] sm:$0xff] %v2319_v2 }
 0x3fd   : > { %2430 = vst [vmem:[%s4111_s24 + $0x2e8] sm:$0xff] %v2302_v44  ;;  %v1932_v38 = vpop.f32.mrf.mxu0 }
 0x3fe   : > { %v1744_v61 = vpop.f32.mrf.mxu2  ;;  %v1933_v29 = vadd.f32 %v1932_v38, %v4591_v56  ;;  %v2021_v5 = vpop.f32.mrf.mxu1 }
 0x3ff   : > { %v1745_v30 = vadd.f32 %v1744_v61, %v4642_v3  ;;  %v1833_v23 = vpop.f32.mrf.mxu3 }
 0x400   : > { %v2022_v19 = vadd.f32 %v2021_v5, %v1933_v29 }
 0x401   : > { %v1834_v16 = vadd.f32 %v1833_v23, %v1745_v30  ;;  %v5367_v30 = vld [vmem:[#allocation11_spill] sm:$0xff] }
 0x402   : > { %v2323_v25 = vadd.f32 %v2022_v19, %v4600_v60  ;;  %v5364_v60 = vld [vmem:[#allocation10_spill] sm:$0xff] }
 0x403   : > { %v2306_v57 = vadd.f32 %v1834_v16, %v5362_v13 }
 0x404   : > { %2451 = vst [vmem:[%s4111_s24 + $0x390] sm:$0xff] %v2323_v25 }
 0x405   : > { %2434 = vst [vmem:[%s4111_s24 + $0x308] sm:$0xff] %v2306_v57  ;;  %v1934_v41 = vpop.f32.mrf.mxu0 }
 0x406   : > { %v1746_v59 = vpop.f32.mrf.mxu2  ;;  %v1935_v27 = vadd.f32 %v1934_v41, %v4591_v56  ;;  %v2023_v63 = vpop.f32.mrf.mxu1 }
 0x407   : > { %v1747_v28 = vadd.f32 %v1746_v59, %v4642_v3  ;;  %v1835_v26 = vpop.f32.mrf.mxu3  ;;  %v5370_v59 = vld [vmem:[#allocation52_spill] sm:$0xff] }
 0x408   : > { %v2024_v32 = vadd.f32 %v2023_v63, %v1935_v27 }
 0x409   : > { %v1836_v42 = vadd.f32 %v1835_v26, %v1747_v28 }
 0x40a   : > { %v2327_v7 = vadd.f32 %v2024_v32, %v4615_v43 }
 0x40b   : > { %v2310_v35 = vadd.f32 %v1836_v42, %v5363_v40  ;;  %2064 = vmatmul.bf16.gmra.mxu2 %v5309_v49  ;;  %2153 = vmatmul.bf16.gmra.mxu3 %v5364_v60  ;;  %v5371_v42 = vld [vmem:[#allocation53_spill] sm:$0xff] }
 0x40c   : > { %2455 = vst [vmem:[%s4111_s24 + $0x3b0] sm:$0xff] %v2327_v7 }
 0x40d   : > { %2438 = vst [vmem:[%s4111_s24 + $0x328] sm:$0xff] %v2310_v35  ;;  %v1937_v52 = vpop.f32.mrf.mxu0 }
 0x40e   : > { %v1749_v0 = vpop.f32.mrf.mxu2  ;;  %v1938_v51 = vadd.f32 %v1937_v52, %v4591_v56  ;;  %v2026_v54 = vpop.f32.mrf.mxu1  ;;  %v3296_v52 = vld [vmem:[%s5182_s2] sm:$0xf] }
 0x40f   : > { %v1750_v48 = vadd.f32 %v1749_v0, %v4642_v3  ;;  %v1838_v53 = vpop.f32.mrf.mxu3  ;;  %v5372_v0 = vld [vmem:[#allocation54_spill] sm:$0xff] }
 0x410   : > { %v2027_v20 = vadd.f32 %v2026_v54, %v1938_v51 }
 0x411   : > { %v1839_v1 = vadd.f32 %v1838_v53, %v1750_v48  ;;  %v4907_v48 = vperm.slane %v3296_v52, 3 }
 0x412   : > { %v2331_v43 = vadd.f32 %v2027_v20, %v4624_v22  ;;  %v5368_v22 = vld [vmem:[#allocation12_spill] sm:$0xff] }
 0x413   : > { %v2314_v6 = vadd.f32 %v1839_v1, %v5365_v21  ;;  %v5374_v1 = vld [vmem:[#allocation55_spill] sm:$0xff] }
 0x414   : > { %2459 = vst [vmem:[%s4111_s24 + $0x3d0] sm:$0xff] %v2331_v43 }
 0x415   : > { %2442 = vst [vmem:[%s4111_s24 + $0x348] sm:$0xff] %v2314_v6  ;;  %v1939_v9 = vpop.f32.mrf.mxu0 }
 0x416   : > { %v1751_v49 = vpop.f32.mrf.mxu2  ;;  %v1940_v12 = vadd.f32 %v1939_v9, %v4591_v56  ;;  %v2028_v44 = vpop.f32.mrf.mxu1  ;;  %v5369_v56 = vld [vmem:[#allocation51_spill] sm:$0xff] }
 0x417   : > { %v1752_v45 = vadd.f32 %v1751_v49, %v4642_v3  ;;  %v1840_v39 = vpop.f32.mrf.mxu3  ;;  %v5375_v49 = vld [vmem:[#allocation56_spill] sm:$0xff] }
 0x418   : > { %v2029_v50 = vadd.f32 %v2028_v44, %v1940_v12 }
 0x419   : > { %v1841_v2 = vadd.f32 %v1840_v39, %v1752_v45 }
 0x41a   : > { %v2335_v38 = vadd.f32 %v2029_v50, %v4633_v24 }
 0x41b   : > { %v2318_v61 = vadd.f32 %v1841_v2, %v5366_v33  ;;  %2069 = vmatmul.bf16.gmra.mxu2 %v5367_v30  ;;  %2158 = vmatmul.bf16.gmra.mxu3 %v5368_v22  ;;  %v5376_v2 = vld [vmem:[#allocation57_spill] sm:$0xff]  ;;  %v5377_v22 = vld [vmem:[#allocation58_spill] sm:$0xff] }
 0x41c   : > { %2463 = vst [vmem:[%s4111_s24 + $0x3f0] sm:$0xff] %v2335_v38 }
 0x41d   : > { %2446 = vst [vmem:[%s4111_s24 + $0x368] sm:$0xff] %v2318_v61 }
 0x41e   : > { %v1754_v23 = vpop.f32.mrf.mxu2 }
 0x41f   : > { %v1755_v29 = vadd.f32 %v1754_v23, %v4642_v3  ;;  %v1843_v5 = vpop.f32.mrf.mxu3 }
 0x421   : > { %v1844_v16 = vadd.f32 %v1843_v5, %v1755_v29 }
 0x423   : > { %v2322_v19 = vadd.f32 %v1844_v16, %v5369_v56  ;;  %v5378_v16 = vld [vmem:[#allocation59_spill] sm:$0xff] }
 0x425   : > { %2450 = vst [vmem:[%s4111_s24 + $0x388] sm:$0xff] %v2322_v19 }
 0x426   : > { %v1756_v13 = vpop.f32.mrf.mxu2 }
 0x427   : > { %v1757_v57 = vadd.f32 %v1756_v13, %v4642_v3  ;;  %v1845_v24 = vpop.f32.mrf.mxu3 }
 0x429   : > { %v1846_v25 = vadd.f32 %v1845_v24, %v1757_v57 }
 0x42b   : > { %v2326_v41 = vadd.f32 %v1846_v25, %v5370_v59  ;;  %2074 = vmatmul.bf16.gmra.mxu2 %v5321_v8  ;;  %2163 = vmatmul.bf16.gmra.mxu3 %v5322_v62  ;;  %v5373_v62 = vld [vmem:[#allocation15_spill] sm:$0xff]  ;;  %v5379_v25 = vld [vmem:[#allocation60_spill] sm:$0xff] }
 0x42d   : > { %2454 = vst [vmem:[%s4111_s24 + $0x3a8] sm:$0xff] %v2326_v41 }
 0x42e   : > { %v1759_v28 = vpop.f32.mrf.mxu2 }
 0x42f   : > { %v1760_v26 = vadd.f32 %v1759_v28, %v4642_v3  ;;  %v1848_v27 = vpop.f32.mrf.mxu3 }
 0x431   : > { %v1849_v63 = vadd.f32 %v1848_v27, %v1760_v26  ;;  %v5380_v26 = vld [vmem:[#allocation61_spill] sm:$0xff] }
 0x433   : > { %v2330_v32 = vadd.f32 %v1849_v63, %v5371_v42 }
 0x435   : > { %2458 = vst [vmem:[%s4111_s24 + $0x3c8] sm:$0xff] %v2330_v32 }
 0x436   : > { %v1761_v40 = vpop.f32.mrf.mxu2 }
 0x437   : > { %v1762_v35 = vadd.f32 %v1761_v40, %v4642_v3  ;;  %v1850_v7 = vpop.f32.mrf.mxu3 }
 0x439   : > { %v1851_v60 = vadd.f32 %v1850_v7, %v1762_v35  ;;  %v5381_v35 = vld [vmem:[#allocation62_spill] sm:$0xff] }
 0x43b   : > { %v2334_v8 = vadd.f32 %v1851_v60, %v5372_v0  ;;  %2079 = vmatmul.bf16.gmra.mxu2 %v3586_v4  ;;  %2168 = vmatmul.bf16.gmra.mxu3 %v5373_v62 }
 0x43d   : > { %2462 = vst [vmem:[%s4111_s24 + $0x3e8] sm:$0xff] %v2334_v8  ;;  %v5382_v8 = vld [vmem:[#allocation63_spill] sm:$0xff] }
 0x43e   : > { %v2040_v53 = vpop.f32.mrf.mxu2 }
 0x43f   : > { %v2041_v51 = vadd.f32 %v2040_v53, %v4907_v48  ;;  %v2129_v3 = vpop.f32.mrf.mxu3 }
 0x441   : > { %v2130_v54 = vadd.f32 %v2129_v3, %v2041_v51 }
 0x443   : > { %v2212_v20 = vadd.f32 %v2130_v54, %v5374_v1  ;;  %v5383_v54 = vld [vmem:[#allocation64_spill] sm:$0xff] }
 0x445   : > { %2340 = vst [vmem:[%s4111_s24 + $0x18] sm:$0xff] %v2212_v20 }
 0x446   : > { %v2042_v4 = vpop.f32.mrf.mxu2 }
 0x447   : > { %v2043_v21 = vadd.f32 %v2042_v4, %v4907_v48  ;;  %v2131_v6 = vpop.f32.mrf.mxu3 }
 0x449   : > { %v2132_v43 = vadd.f32 %v2131_v6, %v2043_v21  ;;  %v5384_v21 = vld [vmem:[#allocation65_spill] sm:$0xff] }
 0x44b   : > { %v2216_v9 = vadd.f32 %v2132_v43, %v5375_v49  ;;  %2084 = vmatmul.bf16.gmra.mxu2 %v3598_v17  ;;  %2173 = vmatmul.bf16.gmra.mxu3 %v3600_v18 }
 0x44d   : > { %2344 = vst [vmem:[%s4111_s24 + $0x38] sm:$0xff] %v2216_v9 }
 0x44e   : > { %v2045_v45 = vpop.f32.mrf.mxu2 }
 0x44f   : > { %v2046_v39 = vadd.f32 %v2045_v45, %v4907_v48  ;;  %v2134_v12 = vpop.f32.mrf.mxu3 }
 0x451   : > { %v2135_v44 = vadd.f32 %v2134_v12, %v2046_v39  ;;  %v5385_v39 = vld [vmem:[#allocation66_spill] sm:$0xff] }
 0x453   : > { %v2220_v50 = vadd.f32 %v2135_v44, %v5376_v2 }
 0x455   : > { %2348 = vst [vmem:[%s4111_s24 + $0x58] sm:$0xff] %v2220_v50  ;;  %v5386_v50 = vld [vmem:[#allocation67_spill] sm:$0xff] }
 0x456   : > { %v2047_v33 = vpop.f32.mrf.mxu2 }
 0x457   : > { %v2048_v61 = vadd.f32 %v2047_v33, %v4907_v48  ;;  %v2136_v38 = vpop.f32.mrf.mxu3 }
 0x459   : > { %v2137_v30 = vadd.f32 %v2136_v38, %v2048_v61 }
 0x45b   : > { %v2224_v17 = vadd.f32 %v2137_v30, %v5377_v22  ;;  %2089 = vmatmul.bf16.gmra.mxu2 %v3610_v36  ;;  %2178 = vmatmul.bf16.gmra.mxu3 %v3612_v37 }
 0x45d   : > { %2352 = vst [vmem:[%s4111_s24 + $0x78] sm:$0xff] %v2224_v17  ;;  %v5387_v17 = vld [vmem:[#allocation68_spill] sm:$0xff] }
 0x45e   : > { %v2050_v18 = vpop.f32.mrf.mxu2 }
 0x45f   : > { %v2051_v23 = vadd.f32 %v2050_v18, %v4907_v48  ;;  %v2139_v29 = vpop.f32.mrf.mxu3 }
 0x461   : > { %v2140_v5 = vadd.f32 %v2139_v29, %v2051_v23 }
 0x463   : > { %v2228_v56 = vadd.f32 %v2140_v5, %v5378_v16  ;;  %v5388_v5 = vld [vmem:[#allocation69_spill] sm:$0xff] }
 0x465   : > { %2356 = vst [vmem:[%s4111_s24 + $0x98] sm:$0xff] %v2228_v56 }
 0x466   : > { %v2052_v19 = vpop.f32.mrf.mxu2 }
 0x467   : > { %v2053_v13 = vadd.f32 %v2052_v19, %v4907_v48  ;;  %v2141_v57 = vpop.f32.mrf.mxu3 }
 0x469   : > { %v2142_v24 = vadd.f32 %v2141_v57, %v2053_v13 }
 0x46b   : > { %v2232_v36 = vadd.f32 %v2142_v24, %v5379_v25  ;;  %2094 = vmatmul.bf16.gmra.mxu2 %v3622_v55  ;;  %2183 = vmatmul.bf16.gmra.mxu3 %v3624_v58  ;;  %v5389_v24 = vld [vmem:[#allocation70_spill] sm:$0xff] }
 0x46d   : > { %2360 = vst [vmem:[%s4111_s24 + $0xb8] sm:$0xff] %v2232_v36 }
 0x46e   : > { %v2055_v37 = vpop.f32.mrf.mxu2 }
 0x46f   : > { %v2056_v59 = vadd.f32 %v2055_v37, %v4907_v48  ;;  %v2144_v41 = vpop.f32.mrf.mxu3 }
 0x471   : > { %v2145_v28 = vadd.f32 %v2144_v41, %v2056_v59  ;;  %v5390_v59 = vld [vmem:[#allocation71_spill] sm:$0xff] }
 0x473   : > { %v2236_v27 = vadd.f32 %v2145_v28, %v5380_v26 }
 0x475   : > { %2364 = vst [vmem:[%s4111_s24 + $0xd8] sm:$0xff] %v2236_v27 }
 0x476   : > { %v2057_v63 = vpop.f32.mrf.mxu2 }
 0x477   : > { %v2058_v42 = vadd.f32 %v2057_v63, %v4907_v48  ;;  %v2146_v32 = vpop.f32.mrf.mxu3 }
 0x479   : > { %v2147_v40 = vadd.f32 %v2146_v32, %v2058_v42  ;;  %v5391_v42 = vld [vmem:[#allocation72_spill] sm:$0xff] }
 0x47b   : > { %v2240_v55 = vadd.f32 %v2147_v40, %v5381_v35  ;;  %2099 = vmatmul.bf16.gmra.mxu2 %v3634_v10  ;;  %2188 = vmatmul.bf16.gmra.mxu3 %v3636_v11 }
 0x47d   : > { %2368 = vst [vmem:[%s4111_s24 + $0xf8] sm:$0xff] %v2240_v55 }
 0x47e   : > { %v2060_v58 = vpop.f32.mrf.mxu2 }
 0x47f   : > { %v2061_v7 = vadd.f32 %v2060_v58, %v4907_v48  ;;  %v2149_v60 = vpop.f32.mrf.mxu3 }
 0x481   : > { %v2150_v0 = vadd.f32 %v2149_v60, %v2061_v7  ;;  %v5392_v7 = vld [vmem:[#allocation73_spill] sm:$0xff] }
 0x483   : > { %v2244_v62 = vadd.f32 %v2150_v0, %v5382_v8 }
 0x485   : > { %2372 = vst [vmem:[%s4111_s24 + $0x118] sm:$0xff] %v2244_v62 }
 0x486   : > { %v2062_v52 = vpop.f32.mrf.mxu2 }
 0x487   : > { %v2063_v53 = vadd.f32 %v2062_v52, %v4907_v48  ;;  %v2151_v51 = vpop.f32.mrf.mxu3 }
 0x489   : > { %v2152_v3 = vadd.f32 %v2151_v51, %v2063_v53  ;;  %v5393_v53 = vld [vmem:[#allocation32_spill] sm:$0xff] }
 0x48b   : > { %v2248_v10 = vadd.f32 %v2152_v3, %v5383_v54  ;;  %2104 = vmatmul.bf16.gmra.mxu2 %v3646_v31  ;;  %2193 = vmatmul.bf16.gmra.mxu3 %v3648_v34 }
 0x48d   : > { %2376 = vst [vmem:[%s4111_s24 + $0x138] sm:$0xff] %v2248_v10 }
 0x48e   : > { %v2065_v11 = vpop.f32.mrf.mxu2 }
 0x48f   : > { %v2066_v1 = vadd.f32 %v2065_v11, %v4907_v48  ;;  %v2154_v20 = vpop.f32.mrf.mxu3 }
 0x491   : > { %v2155_v4 = vadd.f32 %v2154_v20, %v2066_v1  ;;  %v5394_v1 = vld [vmem:[#allocation35_spill] sm:$0xff] }
 0x493   : > { %v2252_v6 = vadd.f32 %v2155_v4, %v5384_v21 }
 0x495   : > { %2380 = vst [vmem:[%s4111_s24 + $0x158] sm:$0xff] %v2252_v6 }
 0x496   : > { %v2067_v43 = vpop.f32.mrf.mxu2 }
 0x497   : > { %v2068_v49 = vadd.f32 %v2067_v43, %v4907_v48  ;;  %v2156_v9 = vpop.f32.mrf.mxu3 }
 0x499   : > { %v2157_v45 = vadd.f32 %v2156_v9, %v2068_v49  ;;  %v5395_v49 = vld [vmem:[#allocation38_spill] sm:$0xff] }
 0x49b   : > { %v2256_v31 = vadd.f32 %v2157_v45, %v5385_v39  ;;  %2109 = vmatmul.bf16.gmra.mxu2 %v3682_v14  ;;  %2198 = vmatmul.bf16.gmra.mxu3 %v3684_v15 }
 0x49d   : > { %2384 = vst [vmem:[%s4111_s24 + $0x178] sm:$0xff] %v2256_v31 }
 0x49e   : > { %v2070_v34 = vpop.f32.mrf.mxu2 }
 0x49f   : > { %v2071_v12 = vadd.f32 %v2070_v34, %v4907_v48  ;;  %v2159_v44 = vpop.f32.mrf.mxu3 }
 0x4a1   : > { %v2160_v2 = vadd.f32 %v2159_v44, %v2071_v12  ;;  %v5396_v12 = vld [vmem:[#allocation74_spill] sm:$0xff] }
 0x4a3   : > { %v2260_v33 = vadd.f32 %v2160_v2, %v5386_v50 }
 0x4a5   : > { %2388 = vst [vmem:[%s4111_s24 + $0x198] sm:$0xff] %v2260_v33 }
 0x4a6   : > { %v2072_v61 = vpop.f32.mrf.mxu2 }
 0x4a7   : > { %v2073_v38 = vadd.f32 %v2072_v61, %v4907_v48  ;;  %v2161_v30 = vpop.f32.mrf.mxu3 }
 0x4a9   : > { %v2162_v22 = vadd.f32 %v2161_v30, %v2073_v38  ;;  %v5397_v38 = vld [vmem:[#allocation44_spill] sm:$0xff] }
 0x4ab   : > { %v2264_v14 = vadd.f32 %v2162_v22, %v5387_v17  ;;  %2114 = vmatmul.bf16.gmra.mxu2 %v3694_v46  ;;  %2203 = vmatmul.bf16.gmra.mxu3 %v3696_v47 }
 0x4ad   : > { %2392 = vst [vmem:[%s4111_s24 + $0x1b8] sm:$0xff] %v2264_v14 }
 0x4ae   : > { %v2075_v15 = vpop.f32.mrf.mxu2 }
 0x4af   : > { %v2076_v18 = vadd.f32 %v2075_v15, %v4907_v48  ;;  %v2164_v23 = vpop.f32.mrf.mxu3 }
 0x4b1   : > { %v2165_v29 = vadd.f32 %v2164_v23, %v2076_v18  ;;  %v5398_v18 = vld [vmem:[#allocation75_spill] sm:$0xff] }
 0x4b3   : > { %v2268_v16 = vadd.f32 %v2165_v29, %v5388_v5 }
 0x4b5   : > { %2396 = vst [vmem:[%s4111_s24 + $0x1d8] sm:$0xff] %v2268_v16 }
 0x4b6   : > { %v2077_v56 = vpop.f32.mrf.mxu2 }
 0x4b7   : > { %v2078_v19 = vadd.f32 %v2077_v56, %v4907_v48  ;;  %v2166_v13 = vpop.f32.mrf.mxu3 }
 0x4b9   : > { %v2167_v57 = vadd.f32 %v2166_v13, %v2078_v19  ;;  %v5399_v19 = vld [vmem:[#allocation76_spill] sm:$0xff] }
 0x4bb   : > { %v2272_v46 = vadd.f32 %v2167_v57, %v5389_v24 }
 0x4bd   : > { %2400 = vst [vmem:[%s4111_s24 + $0x1f8] sm:$0xff] %v2272_v46 }
 0x4be   : > { %v2080_v47 = vpop.f32.mrf.mxu2 }
 0x4bf   : > { %v2081_v25 = vadd.f32 %v2080_v47, %v4907_v48  ;;  %v2169_v36 = vpop.f32.mrf.mxu3 }
 0x4c1   : > { %v2170_v37 = vadd.f32 %v2169_v36, %v2081_v25  ;;  %v5400_v25 = vld [vmem:[#allocation77_spill] sm:$0xff] }
 0x4c3   : > { %v2276_v41 = vadd.f32 %v2170_v37, %v5390_v59 }
 0x4c5   : > { %2404 = vst [vmem:[%s4111_s24 + $0x218] sm:$0xff] %v2276_v41 }
 0x4c6   : > { %v2082_v28 = vpop.f32.mrf.mxu2 }
 0x4c7   : > { %v2083_v26 = vadd.f32 %v2082_v28, %v4907_v48  ;;  %v2171_v27 = vpop.f32.mrf.mxu3 }
 0x4c9   : > { %v2172_v63 = vadd.f32 %v2171_v27, %v2083_v26  ;;  %v5401_v26 = vld [vmem:[#allocation13_spill] sm:$0xff] }
 0x4cb   : > { %v2280_v32 = vadd.f32 %v2172_v63, %v5391_v42 }
 0x4cd   : > { %2408 = vst [vmem:[%s4111_s24 + $0x238] sm:$0xff] %v2280_v32 }
 0x4ce   : > { %v2085_v40 = vpop.f32.mrf.mxu2 }
 0x4cf   : > { %v2086_v35 = vadd.f32 %v2085_v40, %v4907_v48  ;;  %v2174_v55 = vpop.f32.mrf.mxu3 }
 0x4d1   : > { %v2175_v58 = vadd.f32 %v2174_v55, %v2086_v35  ;;  %v5402_v35 = vld [vmem:[#allocation14_spill] sm:$0xff] }
 0x4d3   : > { %v2284_v60 = vadd.f32 %v2175_v58, %v5392_v7 }
 0x4d5   : > { %2412 = vst [vmem:[%s4111_s24 + $0x258] sm:$0xff] %v2284_v60 }
 0x4d6   : > { %v2087_v0 = vpop.f32.mrf.mxu2 }
 0x4d7   : > { %v2088_v8 = vadd.f32 %v2087_v0, %v4907_v48  ;;  %v2176_v62 = vpop.f32.mrf.mxu3 }
 0x4d9   : > { %v2177_v52 = vadd.f32 %v2176_v62, %v2088_v8  ;;  %v5403_v8 = vld [vmem:[#allocation50_spill] sm:$0xff] }
 0x4db   : > { %v2288_v51 = vadd.f32 %v2177_v52, %v5393_v53 }
 0x4dd   : > { %2416 = vst [vmem:[%s4111_s24 + $0x278] sm:$0xff] %v2288_v51 }
 0x4de   : > { %v2090_v3 = vpop.f32.mrf.mxu2 }
 0x4df   : > { %v2091_v54 = vadd.f32 %v2090_v3, %v4907_v48  ;;  %v2179_v10 = vpop.f32.mrf.mxu3 }
 0x4e1   : > { %v2180_v11 = vadd.f32 %v2179_v10, %v2091_v54  ;;  %v5404_v54 = vld [vmem:[#allocation78_spill] sm:$0xff] }
 0x4e3   : > { %v2292_v20 = vadd.f32 %v2180_v11, %v5394_v1 }
 0x4e5   : > { %2420 = vst [vmem:[%s4111_s24 + $0x298] sm:$0xff] %v2292_v20 }
 0x4e6   : > { %v2092_v4 = vpop.f32.mrf.mxu2 }
 0x4e7   : > { %v2093_v21 = vadd.f32 %v2092_v4, %v4907_v48  ;;  %v2181_v6 = vpop.f32.mrf.mxu3 }
 0x4e9   : > { %v2182_v43 = vadd.f32 %v2181_v6, %v2093_v21  ;;  %v5405_v21 = vld [vmem:[#allocation79_spill] sm:$0xff] }
 0x4eb   : > { %v2296_v9 = vadd.f32 %v2182_v43, %v5395_v49 }
 0x4ed   : > { %2424 = vst [vmem:[%s4111_s24 + $0x2b8] sm:$0xff] %v2296_v9 }
 0x4ee   : > { %v2095_v45 = vpop.f32.mrf.mxu2 }
 0x4ef   : > { %v2096_v39 = vadd.f32 %v2095_v45, %v4907_v48  ;;  %v2184_v31 = vpop.f32.mrf.mxu3 }
 0x4f1   : > { %v2185_v34 = vadd.f32 %v2184_v31, %v2096_v39 }
 0x4f3   : > { %v2300_v44 = vadd.f32 %v2185_v34, %v5396_v12 }
 0x4f5   : > { %2428 = vst [vmem:[%s4111_s24 + $0x2d8] sm:$0xff] %v2300_v44 }
 0x4f6   : > { %v2097_v2 = vpop.f32.mrf.mxu2 }
 0x4f7   : > { %v2098_v50 = vadd.f32 %v2097_v2, %v4907_v48  ;;  %v2186_v33 = vpop.f32.mrf.mxu3 }
 0x4f9   : > { %v2187_v61 = vadd.f32 %v2186_v33, %v2098_v50 }
 0x4fb   : > { %v2304_v30 = vadd.f32 %v2187_v61, %v5397_v38 }
 0x4fd   : > { %2432 = vst [vmem:[%s4111_s24 + $0x2f8] sm:$0xff] %v2304_v30 }
 0x4fe   : > { %v2100_v22 = vpop.f32.mrf.mxu2 }
 0x4ff   : > { %v2101_v17 = vadd.f32 %v2100_v22, %v4907_v48  ;;  %v2189_v14 = vpop.f32.mrf.mxu3 }
 0x501   : > { %v2190_v15 = vadd.f32 %v2189_v14, %v2101_v17 }
 0x503   : > { %v2308_v23 = vadd.f32 %v2190_v15, %v5398_v18 }
 0x505   : > { %2436 = vst [vmem:[%s4111_s24 + $0x318] sm:$0xff] %v2308_v23 }
 0x506   : > { %v2102_v29 = vpop.f32.mrf.mxu2 }
 0x507   : > { %v2103_v5 = vadd.f32 %v2102_v29, %v4907_v48  ;;  %v2191_v16 = vpop.f32.mrf.mxu3 }
 0x509   : > { %v2192_v56 = vadd.f32 %v2191_v16, %v2103_v5 }
 0x50b   : > { %v2312_v13 = vadd.f32 %v2192_v56, %v5399_v19 }
 0x50d   : > { %2440 = vst [vmem:[%s4111_s24 + $0x338] sm:$0xff] %v2312_v13 }
 0x50e   : > { %v2105_v57 = vpop.f32.mrf.mxu2 }
 0x50f   : > { %v2106_v24 = vadd.f32 %v2105_v57, %v4907_v48  ;;  %v2194_v46 = vpop.f32.mrf.mxu3 }
 0x511   : > { %v2195_v47 = vadd.f32 %v2194_v46, %v2106_v24 }
 0x513   : > { %v2316_v36 = vadd.f32 %v2195_v47, %v5400_v25 }
 0x515   : > { %2444 = vst [vmem:[%s4111_s24 + $0x358] sm:$0xff] %v2316_v36 }
 0x516   : > { %v2107_v37 = vpop.f32.mrf.mxu2 }
 0x517   : > { %v2108_v59 = vadd.f32 %v2107_v37, %v4907_v48  ;;  %v2196_v41 = vpop.f32.mrf.mxu3 }
 0x519   : > { %v2197_v28 = vadd.f32 %v2196_v41, %v2108_v59 }
 0x51b   : > { %v2320_v27 = vadd.f32 %v2197_v28, %v5401_v26 }
 0x51d   : > { %2448 = vst [vmem:[%s4111_s24 + $0x378] sm:$0xff] %v2320_v27 }
 0x51e   : > { %v2110_v63 = vpop.f32.mrf.mxu2 }
 0x51f   : > { %v2111_v42 = vadd.f32 %v2110_v63, %v4907_v48  ;;  %v2199_v32 = vpop.f32.mrf.mxu3 }
 0x521   : > { %v2200_v40 = vadd.f32 %v2199_v32, %v2111_v42 }
 0x523   : > { %v2324_v55 = vadd.f32 %v2200_v40, %v5402_v35 }
 0x525   : > { %2452 = vst [vmem:[%s4111_s24 + $0x398] sm:$0xff] %v2324_v55 }
 0x526   : > { %v2112_v58 = vpop.f32.mrf.mxu2 }
 0x527   : > { %v2113_v7 = vadd.f32 %v2112_v58, %v4907_v48  ;;  %v2201_v60 = vpop.f32.mrf.mxu3 }
 0x529   : > { %v2202_v0 = vadd.f32 %v2201_v60, %v2113_v7 }
 0x52b   : > { %v2328_v62 = vadd.f32 %v2202_v0, %v5403_v8 }
 0x52d   : > { %2456 = vst [vmem:[%s4111_s24 + $0x3b8] sm:$0xff] %v2328_v62 }
 0x52e   : > { %v2115_v52 = vpop.f32.mrf.mxu2 }
 0x52f   : > { %v2116_v53 = vadd.f32 %v2115_v52, %v4907_v48  ;;  %v2204_v51 = vpop.f32.mrf.mxu3 }
 0x531   : > { %v2205_v3 = vadd.f32 %v2204_v51, %v2116_v53 }
 0x533   : > { %v2332_v10 = vadd.f32 %v2205_v3, %v5404_v54 }
 0x535   : > { %2460 = vst [vmem:[%s4111_s24 + $0x3d8] sm:$0xff] %v2332_v10 }
 0x536   : > { %v2117_v11 = vpop.f32.mrf.mxu2 }
 0x537   : > { %v2118_v1 = vadd.f32 %v2117_v11, %v4907_v48  ;;  %v2206_v20 = vpop.f32.mrf.mxu3 }
 0x539   : > { %v2207_v4 = vadd.f32 %v2206_v20, %v2118_v1  ;;  %2471 = sbr.rel (!%p3440_p4) target bundleno = 1406 (0x57e), region = 44 }
 0x53b   : > { %v2336_v6 = vadd.f32 %v2207_v4, %v5405_v21 }
 0x53d   : > { %2464 = vst [vmem:[%s4111_s24 + $0x3f8] sm:$0xff] %v2336_v6 }
 0x53e   : > { %s5417_s11 = smov (!%p2474_p8, %s2473_s11), 32 }
 0x53f   : > { %s3201_s20 = sshll.u32 %s5417_s11, 5 }
 0x540   : > { %p3104_p9 = scmp.eq.s32.totalorder %s3201_s20, 0 }
 0x541   : > { %s5033_s23 = sshrl.u32 (!%p3104_p9), %s5417_s11, 3 }
 0x542   : > { %2484 = sbr.rel (%p3104_p9) target bundleno = 1406 (0x57e), region = 48  ;;  %p3105_p10 = scmp.le.s32.totalorder (!%p3104_p9), %s5033_s23, 0 }
 0x547   : > { %2645 = sbr.rel (%p3105_p10) target bundleno = 1389 (0x56d), region = 96  ;;  %s5406_s21 = smov (!%p3105_p10), %s5027_s16 }
 0x548   : > { %s5407_s26 = smov (!%p3105_p10), %s4111_s24  ;;  %s5042_s14 = smov (!%p3105_p10), 0  }
 0x549   : > { %s5044_s18 = smov (!%p3105_p10), 0  }
 0x54c LB: >> { %v2497_v48 = vld [vmem:[%s3359_s26] sm:$0xff]  ;;  %s2561_s17 = sadd.s32 1, %s3363_s14  ;;  %v2513_v12 = vld [vmem:[%s3359_s26 + $0x8] sm:$0xff]  ;;  %v2529_v22 = vld [vmem:[%s3359_s26 + $0x10] sm:$0xff]  ;;  %s2491_s18 = sadd.s32 1, %s3367_s18   ;;  %s3367_s18 = sphi %s5044_s18, %s2491_s18   ;;  %s3363_s14 = sphi %s5042_s14, %s5410_s14   ;;  %s3359_s26 = sphi %s5407_s26, %s5409_s26   ;;  %s3355_s21 = sphi %s5406_s21, %s5408_s21  }
 0x54d   : >> { %v2499_v43 = vld [vmem:[%s3359_s26 + $0x20] sm:$0xff]  ;;  %2498 = vst [vmem:[%s3355_s21] sm:$0xff] %v2497_v48  ;;  %p2562_p11 = scmp.ge.s32.totalorder %s2561_s17, %s5033_s23  ;;  %v2515_v44 = vld [vmem:[%s3359_s26 + $0x28] sm:$0xff]  ;;  %v2531_v17 = vld [vmem:[%s3359_s26 + $0x30] sm:$0xff]  ;;  %p2490_p12 = scmp.ge.s32.totalorder %s2491_s18, %s5033_s23 }
 0x54e   : >> { %v2501_v49 = vld [vmem:[%s3359_s26 + $0x40] sm:$0xff]  ;;  %2500 = vst [vmem:[%s3355_s21 + $0x20] sm:$0xff] %v2499_v43  ;;  %v2517_v2 = vld [vmem:[%s3359_s26 + $0x48] sm:$0xff]  ;;  %v2533_v14 = vld [vmem:[%s3359_s26 + $0x50] sm:$0xff] }
 0x54f   : >> { %v2503_v9 = vld [vmem:[%s3359_s26 + $0x60] sm:$0xff]  ;;  %2502 = vst [vmem:[%s3355_s21 + $0x40] sm:$0xff] %v2501_v49  ;;  %s5419_s17 = smov (%p2562_p11, %s2561_s17), 0  ;;  %v2519_v50 = vld [vmem:[%s3359_s26 + $0x68] sm:$0xff]  ;;  %v2535_v15 = vld [vmem:[%s3359_s26 + $0x70] sm:$0xff] }
 0x550   : >> { %v2505_v45 = vld [vmem:[%s3359_s26 + $0x80] sm:$0xff]  ;;  %2504 = vst [vmem:[%s3355_s21 + $0x60] sm:$0xff] %v2503_v9  ;;  %s3106_s27 = sshll.u32 %s5419_s17, 8  ;;  %v2521_v33 = vld [vmem:[%s3359_s26 + $0x88] sm:$0xff]  ;;  %v2537_v18 = vld [vmem:[%s3359_s26 + $0x90] sm:$0xff]  ;;  %s5410_s14 = smov %s5419_s17 }
 0x551   : >> { %v2507_v39 = vld [vmem:[%s3359_s26 + $0xa0] sm:$0xff]  ;;  %2506 = vst [vmem:[%s3355_s21 + $0x80] sm:$0xff] %v2505_v45  ;;  %s5076_s28 = scalar_lea.vmem %s4111_s24, %s3106_s27 [#allocation2]   ;;  %s5079_s29 = scalar_lea.vmem %s5027_s16, %s3106_s27   ;;  %v2523_v61 = vld [vmem:[%s3359_s26 + $0xa8] sm:$0xff]  ;;  %v2539_v23 = vld [vmem:[%s3359_s26 + $0xb0] sm:$0xff] }
 0x552   : >> { %v2509_v31 = vld [vmem:[%s3359_s26 + $0xc0] sm:$0xff]  ;;  %2508 = vst [vmem:[%s3355_s21 + $0xa0] sm:$0xff] %v2507_v39  ;;  %v2525_v38 = vld [vmem:[%s3359_s26 + $0xc8] sm:$0xff]  ;;  %v2541_v29 = vld [vmem:[%s3359_s26 + $0xd0] sm:$0xff] }
 0x553   : >> { %v2511_v34 = vld [vmem:[%s3359_s26 + $0xe0] sm:$0xff]  ;;  %2510 = vst [vmem:[%s3355_s21 + $0xc0] sm:$0xff] %v2509_v31  ;;  %v2527_v30 = vld [vmem:[%s3359_s26 + $0xe8] sm:$0xff]  ;;  %v2543_v5 = vld [vmem:[%s3359_s26 + $0xf0] sm:$0xff] }
 0x554   : >> { %2512 = vst [vmem:[%s3355_s21 + $0xe0] sm:$0xff] %v2511_v34  ;;  %v2545_v16 = vld [vmem:[%s3359_s26 + $0x18] sm:$0xff] }
 0x555   : >> { %2514 = vst [vmem:[%s3355_s21 + $0x8] sm:$0xff] %v2513_v12  ;;  %v2547_v56 = vld [vmem:[%s3359_s26 + $0x38] sm:$0xff] }
 0x556   : >> { %2516 = vst [vmem:[%s3355_s21 + $0x28] sm:$0xff] %v2515_v44  ;;  %v2549_v19 = vld [vmem:[%s3359_s26 + $0x58] sm:$0xff] }
 0x557   : >> { %2518 = vst [vmem:[%s3355_s21 + $0x48] sm:$0xff] %v2517_v2  ;;  %v2551_v13 = vld [vmem:[%s3359_s26 + $0x78] sm:$0xff] }
 0x558   : >> { %2520 = vst [vmem:[%s3355_s21 + $0x68] sm:$0xff] %v2519_v50  ;;  %v2553_v57 = vld [vmem:[%s3359_s26 + $0x98] sm:$0xff] }
 0x559   : >> { %2522 = vst [vmem:[%s3355_s21 + $0x88] sm:$0xff] %v2521_v33  ;;  %v2555_v24 = vld [vmem:[%s3359_s26 + $0xb8] sm:$0xff] }
 0x55a   : >> { %2524 = vst [vmem:[%s3355_s21 + $0xa8] sm:$0xff] %v2523_v61  ;;  %v2557_v46 = vld [vmem:[%s3359_s26 + $0xd8] sm:$0xff] }
 0x55b   : >> { %2526 = vst [vmem:[%s3355_s21 + $0xc8] sm:$0xff] %v2525_v38  ;;  %v2559_v47 = vld [vmem:[%s3359_s26 + $0xf8] sm:$0xff]  ;;  %s5409_s26 = smov %s5076_s28 }
 0x55c   : >> { %2528 = vst [vmem:[%s3355_s21 + $0xe8] sm:$0xff] %v2527_v30 }
 0x55d   : >> { %2530 = vst [vmem:[%s3355_s21 + $0x10] sm:$0xff] %v2529_v22 }
 0x55e   : >> { %2532 = vst [vmem:[%s3355_s21 + $0x30] sm:$0xff] %v2531_v17 }
 0x55f   : >> { %2534 = vst [vmem:[%s3355_s21 + $0x50] sm:$0xff] %v2533_v14 }
 0x560   : >> { %2536 = vst [vmem:[%s3355_s21 + $0x70] sm:$0xff] %v2535_v15 }
 0x561   : >> { %2538 = vst [vmem:[%s3355_s21 + $0x90] sm:$0xff] %v2537_v18 }
 0x562   : >> { %2540 = vst [vmem:[%s3355_s21 + $0xb0] sm:$0xff] %v2539_v23 }
 0x563   : >> { %2542 = vst [vmem:[%s3355_s21 + $0xd0] sm:$0xff] %v2541_v29 }
 0x564   : >> { %2544 = vst [vmem:[%s3355_s21 + $0xf0] sm:$0xff] %v2543_v5 }
 0x565   : >> { %2546 = vst [vmem:[%s3355_s21 + $0x18] sm:$0xff] %v2545_v16 }
 0x566   : >> { %2548 = vst [vmem:[%s3355_s21 + $0x38] sm:$0xff] %v2547_v56 }
 0x567   : >> { %2550 = vst [vmem:[%s3355_s21 + $0x58] sm:$0xff] %v2549_v19 }
 0x568   : >> { %2552 = vst [vmem:[%s3355_s21 + $0x78] sm:$0xff] %v2551_v13  ;;  %2493 = sbr.rel (!%p2490_p12) target bundleno = 1356 (0x54c), region = 102 }
 0x569   : >> { %2554 = vst [vmem:[%s3355_s21 + $0x98] sm:$0xff] %v2553_v57 }
 0x56a   : >> { %2556 = vst [vmem:[%s3355_s21 + $0xb8] sm:$0xff] %v2555_v24 }
 0x56b   : >> { %2558 = vst [vmem:[%s3355_s21 + $0xd8] sm:$0xff] %v2557_v46 }
 0x56c   : >> { %2560 = vst [vmem:[%s3355_s21 + $0xf8] sm:$0xff] %v2559_v47  ;;  %s5408_s21 = smov %s5079_s29 }
 0x56d PF: > { %s5144_s30 = sand.u32 7, %s5417_s11   ;;  %s3204_s6 = sshll.u32 %s5033_s23, 8 }
 0x56e   : > { %s5148_s7 = scalar_lea.vmem %s4111_s24, %s3204_s6 [#allocation2]   ;;  %s5151_s8 = scalar_lea.vmem %s5027_s16, %s3204_s6  }
 0x56f   : > { %p3111_p13 = scmp.le.s32.totalorder %s5144_s30, 0 }
 0x570   : > { %s5411_s9 = smov (!%p3111_p13), %s5151_s8  ;;  %s5412_s10 = smov (!%p3111_p13), %s5148_s7 }
 0x571   : > { %2659 = sbr.rel (%p3111_p13) target bundleno = 1406 (0x57e), region = 107  ;;  %s3377_s12 = smov (!%p3111_p13), 0  }
 0x572   : > { %s3381_s13 = smov (!%p3111_p13), 0  }
 0x576 LB: >> { %v2584_v25 = vld [vmem:[%s3375_s10] sm:$0xff]  ;;  %v2586_v36 = vld [vmem:[%s3375_s10 + $0x8] sm:$0xff]  ;;  %v2588_v37 = vld [vmem:[%s3375_s10 + $0x10] sm:$0xff]  ;;  %s2592_s24 = sadd.s32 1, %s3379_s12  ;;  %s2578_s13 = sadd.s32 1, %s3383_s13   ;;  %s3383_s13 = sphi %s3381_s13, %s2578_s13   ;;  %s3379_s12 = sphi %s3377_s12, %s3378_s12   ;;  %s3375_s10 = sphi %s5412_s10, %s2597_s10   ;;  %s3371_s9 = sphi %s5411_s9, %s2598_s9  }
 0x577   : >> { %2585 = vst [vmem:[%s3371_s9] sm:$0xff] %v2584_v25  ;;  %v2590_v59 = vld [vmem:[%s3375_s10 + $0x18] sm:$0xff]  ;;  %p2593_p0 = scmp.ge.s32.totalorder %s2592_s24, %s5144_s30  ;;  %p2577_p1 = scmp.ge.s32.totalorder %s2578_s13, %s5144_s30 }
 0x578   : >> { %2587 = vst [vmem:[%s3371_s9 + $0x8] sm:$0xff] %v2586_v36 }
 0x579   : >> { %2589 = vst [vmem:[%s3371_s9 + $0x10] sm:$0xff] %v2588_v37  ;;  %s5421_s24 = smov (%p2593_p0, %s2592_s24), 0  ;;  %2580 = sbr.rel (!%p2577_p1) target bundleno = 1398 (0x576), region = 113 }
 0x57a   : >> { %2591 = vst [vmem:[%s3371_s9 + $0x18] sm:$0xff] %v2590_v59  ;;  %s3112_s11 = sshll.u32 %s5421_s24, 5  ;;  %s3378_s12 = smov %s5421_s24  }
 0x57b   : >> { %s2597_s10 = scalar_lea.vmem %s5148_s7, %s3112_s11 [#allocation2]   ;;  %s2598_s9 = scalar_lea.vmem %s5151_s8, %s3112_s11  }
 0x57e PF: > { %p12_p2 = scmp.ge.s32.totalorder %s3430_s22, 4   ;;  %s5413_s18 = smov %s3347_s19 }
 0x57f   : > { %s5414_s19 = smov %s3438_s25  ;;  %s5415_s20 = smov %s3430_s22 }
 0x580   :  { %14 = sbr.rel (!%p12_p2) target bundleno = 2 (0x2), region = 124 }

</bundles_post_ra>
